<compile_context>
chip_gen: v6e
topology: v6e:2x2x1
jax: 0.10.0
libtpu: 0.0.40
codegen_flags: <defaults>
</compile_context>

<pallas_src>
import jax
import jax.numpy as jnp
from jax.experimental import pallas as pl
from jax.experimental.pallas import tpu as pltpu


# ----------------------------------------------------------------------------
# Pallas kernels
# ----------------------------------------------------------------------------
def _matmul_bias_relu_kernel(x_ref, w_ref, b_ref, o_ref):
    """out = relu(x @ w + b); bf16 operands, f32 accumulate, bf16 out."""
    acc = jnp.dot(x_ref[...], w_ref[...], preferred_element_type=jnp.float32)
    o_ref[...] = jnp.maximum(acc + b_ref[...], 0.0).astype(o_ref.dtype)


def _head_kernel(x_ref, w4_ref, b4_ref, w5_ref, b5_ref, o_ref, acc_ref):
    """Fused conv4 (as matmul) + ReLU + final Linear, tiled over conv4's N.

    Per grid step j:
        h_j   = relu(x @ W4[:, jT:(j+1)T] + b4[jT:(j+1)T])      # (B, T)
        acc  += h_j @ W5[jT:(j+1)T, :]                           # (B, A)
    which sums exactly to relu(x @ W4 + b4) @ W5; b5 added once at the end.
    """
    j = pl.program_id(0)

    @pl.when(j == 0)
    def _():
        acc_ref[...] = jnp.zeros_like(acc_ref)

    h = jnp.dot(x_ref[...], w4_ref[...], preferred_element_type=jnp.float32)
    h = jnp.maximum(h + b4_ref[...], 0.0)
    acc_ref[...] += jnp.dot(h.astype(jnp.bfloat16), w5_ref[...],
                            preferred_element_type=jnp.float32)

    @pl.when(j == pl.num_programs(0) - 1)
    def _():
        o_ref[...] = (acc_ref[...] + b5_ref[...]).astype(o_ref.dtype)


# ----------------------------------------------------------------------------
# Layer wrappers
# ----------------------------------------------------------------------------
def _conv1_layer(x_nhwc, w_kn, b_1n, k, stride, *, m_tiles=4):
    """Conv2d(+ReLU) = patch extraction (XLA) + Pallas fused matmul/bias/relu.

    Patch feature order from conv_general_dilated_patches is channel-major
    ([c][kh][kw]); w_kn was packed once to match in prepare_params().
    The M dim is tiled with a 'parallel' grid so the patch DMA overlaps MXU
    work (and feeds both TCs on v7x).
    """
    p = jax.lax.conv_general_dilated_patches(
        x_nhwc, (k, k), (stride, stride), "VALID",
        dimension_numbers=("NHWC", "HWIO", "NHWC"))
    B, OH, OW, K = p.shape
    M = B * OH * OW
    N = w_kn.shape[1]
    tm = M // m_tiles

    out = pl.pallas_call(
        _matmul_bias_relu_kernel,
        out_shape=jax.ShapeDtypeStruct((M, N), jnp.bfloat16),
        grid=(m_tiles,),
        in_specs=[
            pl.BlockSpec((tm, K), lambda i: (i, 0)),
            pl.BlockSpec((K, N), lambda i: (0, 0)),
            pl.BlockSpec((1, N), lambda i: (0, 0)),
        ],
        out_specs=pl.BlockSpec((tm, N), lambda i: (i, 0)),
        compiler_params=pltpu.CompilerParams(
            dimension_semantics=("parallel",)),
    )(p.reshape(M, K), w_kn, b_1n)
    return out.reshape(B, OH, OW, N)


def _conv23_fused(h1_nhwc, w2_kn, b2_1n, w3_pkk, b3_1n):
    """Fused conv2 (4x4/s2) + ReLU + conv3 (3x3/s1) + ReLU in ONE pallas_call.

    conv2 is a single matmul on XLA-extracted patches.  Its output (row index
    r = b*81 + h*9 + w) is kept in a VMEM scratch; conv3 is then accumulated
    over its 9 taps as   acc[r] += h2[r + kh*9 + kw] @ W3[kh,kw]
    which is exact for the valid rows (h<7, w<7).  The valid 7x7 rows are
    extracted afterwards with cheap XLA slicing; conv2's activation never
    touches HBM.
    """
    B = h1_nhwc.shape[0]
    p2 = jax.lax.conv_general_dilated_patches(
        h1_nhwc, (4, 4), (2, 2), "VALID",
        dimension_numbers=("NHWC", "HWIO", "NHWC"))        # (B, 9, 9, 512)
    _, OH2, OW2, K2 = p2.shape
    M2 = B * OH2 * OW2                                     # 162
    C = w2_kn.shape[1]                                     # 64
    KH3 = KW3 = 3
    OH3, OW3 = OH2 - KH3 + 1, OW2 - KW3 + 1                # 7, 7
    max_shift = (KH3 - 1) * OW2 + (KW3 - 1)                # 20
    L = M2 - max_shift                                     # 142 (covers all valid rows)

    def kernel(p2_ref, w2_ref, b2_ref, w3_ref, b3_ref, o_ref, h2_ref):
        # conv2: (162,512) @ (512,64), bias + ReLU, kept in VMEM scratch (f32).
        h2 = jnp.dot(p2_ref[...], w2_ref[...], preferred_element_type=jnp.float32)
        h2_ref[...] = jnp.maximum(h2 + b2_ref[...], 0.0)
        # conv3: accumulate over the 9 taps via row-shifted loads.
        acc = jnp.zeros((L, C), jnp.float32)
        for kh in range(KH3):
            for kw in range(KW3):
                s = kh * OW2 + kw
                patch = h2_ref[pl.ds(s, L), :].astype(jnp.bfloat16)
                acc = acc + jnp.dot(patch, w3_ref[kh * KW3 + kw],
                                    preferred_element_type=jnp.float32)
        o_ref[...] = jnp.maximum(acc + b3_ref[...], 0.0).astype(o_ref.dtype)

    out = pl.pallas_call(
        kernel,
        out_shape=jax.ShapeDtypeStruct((L, C), jnp.bfloat16),
        grid=(1,),
        in_specs=[
            pl.BlockSpec((M2, K2), lambda i: (0, 0)),
            pl.BlockSpec((K2, C), lambda i: (0, 0)),
            pl.BlockSpec((1, C), lambda i: (0, 0)),
            pl.BlockSpec((KH3 * KW3, C, C), lambda i: (0, 0, 0)),
            pl.BlockSpec((1, C), lambda i: (0, 0)),
        ],
        out_specs=pl.BlockSpec((L, C), lambda i: (0, 0)),
        scratch_shapes=[pltpu.VMEM((M2, C), jnp.float32)],
        compiler_params=pltpu.CompilerParams(
            dimension_semantics=("arbitrary",)),
    )(p2.reshape(M2, K2), w2_kn, b2_1n, w3_pkk, b3_1n)

    # Extract the valid conv3 rows (h < 7, w < 7 within each batch's 9x9 grid)
    # with cheap XLA layout ops; garbage rows (r >= 142 or w >= 7) are dropped.
    out_p = jnp.pad(out, ((0, B * OH2 * OW2 - L), (0, 0)))      # back to 162 rows
    rows_per_b = OH3 * OW2                                       # 63
    per_b = [out_p[b * OH2 * OW2: b * OH2 * OW2 + rows_per_b]
             .reshape(OH3, OW2, C)[:, :OW3, :]
             for b in range(B)]
    x3 = jnp.stack(per_b)                                        # (B, 7, 7, 64)
    return x3.reshape(B, OH3 * OW3 * C)                          # (B, 3136)


def _head(xf, w4, b4, w5, b5, *, tn=512):
    """Fused conv4 (full 7x7 receptive field == plain matmul) + Linear.

    tn=512 keeps the double-buffered W4 stream (2 x 3.2 MB) under default
    scoped VMEM on v5e/v6e/v7x.  On v7x tn=1024 (single shot) also fits.
    """
    B, K = xf.shape              # (B, 3136)
    KN = w4.shape[1]             # 1024
    A = w5.shape[1]              # n_actions
    nt = KN // tn

    return pl.pallas_call(
        _head_kernel,
        out_shape=jax.ShapeDtypeStruct((B, A), jnp.float32),
        grid=(nt,),
        in_specs=[
            pl.BlockSpec((B, K), lambda j: (0, 0)),    # x, resident
            pl.BlockSpec((K, tn), lambda j: (0, j)),   # W4 tile, streamed
            pl.BlockSpec((1, tn), lambda j: (0, j)),   # b4 tile
            pl.BlockSpec((tn, A), lambda j: (j, 0)),   # W5 rows matching tile
            pl.BlockSpec((1, A), lambda j: (0, 0)),    # b5
        ],
        out_specs=pl.BlockSpec((B, A), lambda j: (0, 0)),
        scratch_shapes=[pltpu.VMEM((B, A), jnp.float32)],
        compiler_params=pltpu.CompilerParams(
            dimension_semantics=("arbitrary",)),
    )(xf, w4, b4, w5, b5)


# ----------------------------------------------------------------------------
# One-time parameter preparation (layout + bf16 cast); forward pass; reference
# ----------------------------------------------------------------------------
def prepare_params(params):
    """Fold all weight transposes/reshapes/casts into a one-time prep step."""
    def conv_w(w):  # (OC, IC, KH, KW) -> (IC*KH*KW, OC), channel-major K order
        OC, IC, KH, KW = w.shape
        return jnp.transpose(w, (1, 2, 3, 0)).reshape(IC * KH * KW, OC).astype(jnp.bfloat16)

    prep = {
        "w1": conv_w(params["w1"]),
        "w2": conv_w(params["w2"]),
        # conv3 is applied tap-by-tap inside the fused kernel: pack as
        # (KH*KW, IC, OC) indexed [kh*3+kw, ic, oc].
        "w3": jnp.transpose(params["w3"], (2, 3, 1, 0))
                 .reshape(9, params["w3"].shape[1], params["w3"].shape[0])
                 .astype(jnp.bfloat16),
        # conv4's 7x7 kernel covers conv3's whole 7x7 output, so it is a plain
        # matmul on the flattened NHWC activation: K order = (kh, kw, c).
        "w4": jnp.transpose(params["w4"], (2, 3, 1, 0))
                 .reshape(-1, params["w4"].shape[0]).astype(jnp.bfloat16),
        "w5": params["w5"].T.astype(jnp.bfloat16),     # (1024, n_actions)
    }
    for i in range(1, 6):
        prep[f"b{i}"] = params[f"b{i}"].reshape(1, -1).astype(jnp.float32)
    return prep


def dqn_forward(x_nchw, prep):
    x = jnp.transpose(x_nchw, (0, 2, 3, 1)).astype(jnp.bfloat16)   # NCHW -> NHWC
    x = _conv1_layer(x, prep["w1"], prep["b1"], 8, 4)              # (B,20,20,32)
    xf = _conv23_fused(x, prep["w2"], prep["b2"],
                       prep["w3"], prep["b3"])                     # (B, 3136)
    return _head(xf, prep["w4"], prep["b4"], prep["w5"], prep["b5"])


def dqn_reference(x_nchw, params):
    def conv(x, w, b, s):
        y = jax.lax.conv_general_dilated(
            x, w, (s, s), "VALID", dimension_numbers=("NCHW", "OIHW", "NCHW"))
        return jax.nn.relu(y + b[None, :, None, None])

    x = x_nchw
    x = conv(x, params["w1"], params["b1"], 4)
    x = conv(x, params["w2"], params["b2"], 2)
    x = conv(x, params["w3"], params["b3"], 1)
    x = conv(x, params["w4"], params["b4"], 1)
    x = x.reshape(x.shape[0], -1)
    return x @ params["w5"].T + params["b5"]


def init_params(key, n_actions):
    conv_shapes = [
        (32, 4, 8, 8),
        (64, 32, 4, 4),
        (64, 64, 3, 3),
        (1024, 64, 7, 7),
    ]
    keys = jax.random.split(key, 10)
    params = {}
    for idx, shape in enumerate(conv_shapes, start=1):
        fan_in = shape[1] * shape[2] * shape[3]
        params[f"w{idx}"] = (jax.random.normal(keys[2 * idx - 2], shape, jnp.float32)
                             / jnp.sqrt(fan_in))
        params[f"b{idx}"] = 0.01 * jax.random.normal(keys[2 * idx - 1], (shape[0],),
                                                     jnp.float32)
    params["w5"] = (jax.random.normal(keys[8], (n_actions, 1024), jnp.float32)
                    / jnp.sqrt(1024.0))
    params["b5"] = 0.01 * jax.random.normal(keys[9], (n_actions,), jnp.float32)
    return params


if __name__ == "__main__":
    key = jax.random.PRNGKey(0)
    k_in, k_p = jax.random.split(key)
    n_actions = 6

    # Smallest input consistent with forward(): Flatten->Linear(1024) forces 84x84.
    x = jax.random.normal(k_in, (2, 4, 84, 84), jnp.float32)
    params = init_params(k_p, n_actions)

    # One-time weight layout / bf16 cast (kept out of the per-call hot path).
    prep = jax.block_until_ready(prepare_params(params))

    fwd = jax.jit(dqn_forward)
    out = jax.block_until_ready(fwd(x, prep))
    assert out.shape == (2, n_actions)

    ref = dqn_reference(x, params)
    max_err = float(jnp.max(jnp.abs(out - ref)))
    assert max_err < 5e-2, f"mismatch vs reference: {max_err}"

    print("KERNEL_OK")
</pallas_src>

<mosaic_0001>
module attributes {stable_mosaic.version = 11 : i64} {
  func.func @_matmul_bias_relu_kernel(%arg0: i32, %arg1: memref<200x256xbf16, #tpu.memory_space<vmem>>, %arg2: memref<256x32xbf16, #tpu.memory_space<vmem>>, %arg3: memref<1x32xf32, #tpu.memory_space<vmem>>, %arg4: memref<200x32xbf16, #tpu.memory_space<vmem>>) attributes {dimension_semantics = [#tpu.dimension_semantics<parallel>], iteration_bounds = array<i64: 4>, scalar_prefetch = 0 : i64, scratch_operands = 0 : i64, tpu.core_type = #tpu.core_type<tc>, window_params = [{transform_indices = @transform_0, window_bounds = array<i64: 200, 256>}, {pipeline_mode = #tpu.pipeline_mode<synchronous>, transform_indices = @transform_1, window_bounds = array<i64: 256, 32>}, {pipeline_mode = #tpu.pipeline_mode<synchronous>, transform_indices = @transform_2, window_bounds = array<i64: 1, 32>}, {transform_indices = @transform_3, window_bounds = array<i64: 200, 32>}]} {
    %c0 = arith.constant 0 : index
    %c0_0 = arith.constant 0 : index
    %0 = vector.load %arg1[%c0, %c0_0] : memref<200x256xbf16, #tpu.memory_space<vmem>>, vector<200x256xbf16>
    %c0_1 = arith.constant 0 : index
    %c0_2 = arith.constant 0 : index
    %1 = vector.load %arg2[%c0_1, %c0_2] : memref<256x32xbf16, #tpu.memory_space<vmem>>, vector<256x32xbf16>
    %cst = arith.constant dense<0.000000e+00> : vector<200x32xf32>
    %2 = tpu.matmul %0, %1, %cst {dimension_numbers = #tpu.dot_dimension_numbers<[1], [0], [0], [1], [0, 0, 1, 1], [], []>} : vector<200x256xbf16>, vector<256x32xbf16>, vector<200x32xf32> -> vector<200x32xf32>
    %c0_3 = arith.constant 0 : index
    %c0_4 = arith.constant 0 : index
    %3 = vector.load %arg3[%c0_3, %c0_4] : memref<1x32xf32, #tpu.memory_space<vmem>>, vector<1x32xf32>
    %4 = vector.broadcast %3 : vector<1x32xf32> to vector<200x32xf32>
    %5 = arith.addf %2, %4 : vector<200x32xf32>
    %cst_5 = arith.constant 0.000000e+00 : f32
    %6 = vector.broadcast %cst_5 : f32 to vector<200x32xf32>
    %7 = arith.maximumf %5, %6 : vector<200x32xf32>
    %8 = arith.truncf %7 : vector<200x32xf32> to vector<200x32xbf16>
    %c0_6 = arith.constant 0 : index
    %c0_7 = arith.constant 0 : index
    %9 = vector.load %arg4[%c0_6, %c0_7] : memref<200x32xbf16, #tpu.memory_space<vmem>>, vector<200x32xbf16>
    tpu.vector_store %arg4[%c0_6, %c0_7], %8 {strides = array<i32>} : memref<200x32xbf16, #tpu.memory_space<vmem>>, vector<200x32xbf16>,
    return
  }
  func.func @transform_0(%arg0: i32) -> (i32, i32) {
    %c0_i32 = arith.constant 0 : i32
    %c0_i32_0 = arith.constant 0 : i32
    return %arg0, %c0_i32 : i32, i32
  }
  func.func @transform_1(%arg0: i32) -> (i32, i32) {
    %c0_i32 = arith.constant 0 : i32
    %c0_i32_0 = arith.constant 0 : i32
    %c0_i32_1 = arith.constant 0 : i32
    return %c0_i32, %c0_i32_0 : i32, i32
  }
  func.func @transform_2(%arg0: i32) -> (i32, i32) {
    %c0_i32 = arith.constant 0 : i32
    %c0_i32_0 = arith.constant 0 : i32
    %c0_i32_1 = arith.constant 0 : i32
    return %c0_i32, %c0_i32_0 : i32, i32
  }
  func.func @transform_3(%arg0: i32) -> (i32, i32) {
    %c0_i32 = arith.constant 0 : i32
    %c0_i32_0 = arith.constant 0 : i32
    return %arg0, %c0_i32 : i32, i32
  }
}

module attributes {stable_mosaic.version = 11 : i64} {
  func.func @kernel(%arg0: i32, %arg1: memref<162x512xbf16, #tpu.memory_space<vmem>>, %arg2: memref<512x64xbf16, #tpu.memory_space<vmem>>, %arg3: memref<1x64xf32, #tpu.memory_space<vmem>>, %arg4: memref<9x64x64xbf16, #tpu.memory_space<vmem>>, %arg5: memref<1x64xf32, #tpu.memory_space<vmem>>, %arg6: memref<142x64xbf16, #tpu.memory_space<vmem>>, %arg7: memref<162x64xf32, #tpu.memory_space<vmem>>) attributes {dimension_semantics = [#tpu.dimension_semantics<arbitrary>], iteration_bounds = array<i64: 1>, scalar_prefetch = 0 : i64, scratch_operands = 1 : i64, tpu.core_type = #tpu.core_type<tc>, window_params = [{pipeline_mode = #tpu.pipeline_mode<synchronous>, transform_indices = @transform_0, window_bounds = array<i64: 162, 512>}, {pipeline_mode = #tpu.pipeline_mode<synchronous>, transform_indices = @transform_1, window_bounds = array<i64: 512, 64>}, {pipeline_mode = #tpu.pipeline_mode<synchronous>, transform_indices = @transform_2, window_bounds = array<i64: 1, 64>}, {pipeline_mode = #tpu.pipeline_mode<synchronous>, transform_indices = @transform_3, window_bounds = array<i64: 9, 64, 64>}, {pipeline_mode = #tpu.pipeline_mode<synchronous>, transform_indices = @transform_4, window_bounds = array<i64: 1, 64>}, {pipeline_mode = #tpu.pipeline_mode<synchronous>, transform_indices = @transform_5, window_bounds = array<i64: 142, 64>}]} {
    %c0 = arith.constant 0 : index
    %c0_0 = arith.constant 0 : index
    %0 = vector.load %arg1[%c0, %c0_0] : memref<162x512xbf16, #tpu.memory_space<vmem>>, vector<162x512xbf16>
    %c0_1 = arith.constant 0 : index
    %c0_2 = arith.constant 0 : index
    %1 = vector.load %arg2[%c0_1, %c0_2] : memref<512x64xbf16, #tpu.memory_space<vmem>>, vector<512x64xbf16>
    %cst = arith.constant dense<0.000000e+00> : vector<162x64xf32>
    %2 = tpu.matmul %0, %1, %cst {dimension_numbers = #tpu.dot_dimension_numbers<[1], [0], [0], [1], [0, 0, 1, 1], [], []>} : vector<162x512xbf16>, vector<512x64xbf16>, vector<162x64xf32> -> vector<162x64xf32>
    %c0_3 = arith.constant 0 : index
    %c0_4 = arith.constant 0 : index
    %3 = vector.load %arg3[%c0_3, %c0_4] : memref<1x64xf32, #tpu.memory_space<vmem>>, vector<1x64xf32>
    %4 = vector.broadcast %3 : vector<1x64xf32> to vector<162x64xf32>
    %5 = arith.addf %2, %4 : vector<162x64xf32>
    %cst_5 = arith.constant 0.000000e+00 : f32
    %6 = vector.broadcast %cst_5 : f32 to vector<162x64xf32>
    %7 = arith.maximumf %5, %6 : vector<162x64xf32>
    %c0_6 = arith.constant 0 : index
    %c0_7 = arith.constant 0 : index
    %8 = vector.load %arg7[%c0_6, %c0_7] : memref<162x64xf32, #tpu.memory_space<vmem>>, vector<162x64xf32>
    tpu.vector_store %arg7[%c0_6, %c0_7], %7 {strides = array<i32>} : memref<162x64xf32, #tpu.memory_space<vmem>>, vector<162x64xf32>,
    %cst_8 = arith.constant 0.000000e+00 : f32
    %9 = vector.broadcast %cst_8 : f32 to vector<142x64xf32>
    %c0_9 = arith.constant 0 : index
    %c0_10 = arith.constant 0 : index
    %10 = vector.load %arg7[%c0_9, %c0_10] : memref<162x64xf32, #tpu.memory_space<vmem>>, vector<142x64xf32>
    %11 = arith.truncf %10 : vector<142x64xf32> to vector<142x64xbf16>
    %c0_11 = arith.constant 0 : index
    %c0_12 = arith.constant 0 : index
    %c0_13 = arith.constant 0 : index
    %12 = vector.load %arg4[%c0_11, %c0_12, %c0_13] : memref<9x64x64xbf16, #tpu.memory_space<vmem>>, vector<1x64x64xbf16>
    %13 = vector.shape_cast %12 : vector<1x64x64xbf16> to vector<64x64xbf16>
    %cst_14 = arith.constant dense<0.000000e+00> : vector<142x64xf32>
    %14 = tpu.matmul %11, %13, %cst_14 {dimension_numbers = #tpu.dot_dimension_numbers<[1], [0], [0], [1], [0, 0, 1, 1], [], []>} : vector<142x64xbf16>, vector<64x64xbf16>, vector<142x64xf32> -> vector<142x64xf32>
    %15 = arith.addf %9, %14 : vector<142x64xf32>
    %c1 = arith.constant 1 : index
    %c0_15 = arith.constant 0 : index
    %16 = vector.load %arg7[%c1, %c0_15] : memref<162x64xf32, #tpu.memory_space<vmem>>, vector<142x64xf32>
    %17 = arith.truncf %16 : vector<142x64xf32> to vector<142x64xbf16>
    %c1_16 = arith.constant 1 : index
    %c0_17 = arith.constant 0 : index
    %c0_18 = arith.constant 0 : index
    %18 = vector.load %arg4[%c1_16, %c0_17, %c0_18] : memref<9x64x64xbf16, #tpu.memory_space<vmem>>, vector<1x64x64xbf16>
    %19 = vector.shape_cast %18 : vector<1x64x64xbf16> to vector<64x64xbf16>
    %cst_19 = arith.constant dense<0.000000e+00> : vector<142x64xf32>
    %20 = tpu.matmul %17, %19, %cst_19 {dimension_numbers = #tpu.dot_dimension_numbers<[1], [0], [0], [1], [0, 0, 1, 1], [], []>} : vector<142x64xbf16>, vector<64x64xbf16>, vector<142x64xf32> -> vector<142x64xf32>
    %21 = arith.addf %15, %20 : vector<142x64xf32>
    %c2 = arith.constant 2 : index
    %c0_20 = arith.constant 0 : index
    %22 = vector.load %arg7[%c2, %c0_20] : memref<162x64xf32, #tpu.memory_space<vmem>>, vector<142x64xf32>
    %23 = arith.truncf %22 : vector<142x64xf32> to vector<142x64xbf16>
    %c2_21 = arith.constant 2 : index
    %c0_22 = arith.constant 0 : index
    %c0_23 = arith.constant 0 : index
    %24 = vector.load %arg4[%c2_21, %c0_22, %c0_23] : memref<9x64x64xbf16, #tpu.memory_space<vmem>>, vector<1x64x64xbf16>
    %25 = vector.shape_cast %24 : vector<1x64x64xbf16> to vector<64x64xbf16>
    %cst_24 = arith.constant dense<0.000000e+00> : vector<142x64xf32>
    %26 = tpu.matmul %23, %25, %cst_24 {dimension_numbers = #tpu.dot_dimension_numbers<[1], [0], [0], [1], [0, 0, 1, 1], [], []>} : vector<142x64xbf16>, vector<64x64xbf16>, vector<142x64xf32> -> vector<142x64xf32>
    %27 = arith.addf %21, %26 : vector<142x64xf32>
    %c9 = arith.constant 9 : index
    %c0_25 = arith.constant 0 : index
    %28 = vector.load %arg7[%c9, %c0_25] : memref<162x64xf32, #tpu.memory_space<vmem>>, vector<142x64xf32>
    %29 = arith.truncf %28 : vector<142x64xf32> to vector<142x64xbf16>
    %c3 = arith.constant 3 : index
    %c0_26 = arith.constant 0 : index
    %c0_27 = arith.constant 0 : index
    %30 = vector.load %arg4[%c3, %c0_26, %c0_27] : memref<9x64x64xbf16, #tpu.memory_space<vmem>>, vector<1x64x64xbf16>
    %31 = vector.shape_cast %30 : vector<1x64x64xbf16> to vector<64x64xbf16>
    %cst_28 = arith.constant dense<0.000000e+00> : vector<142x64xf32>
    %32 = tpu.matmul %29, %31, %cst_28 {dimension_numbers = #tpu.dot_dimension_numbers<[1], [0], [0], [1], [0, 0, 1, 1], [], []>} : vector<142x64xbf16>, vector<64x64xbf16>, vector<142x64xf32> -> vector<142x64xf32>
    %33 = arith.addf %27, %32 : vector<142x64xf32>
    %c10 = arith.constant 10 : index
    %c0_29 = arith.constant 0 : index
    %34 = vector.load %arg7[%c10, %c0_29] : memref<162x64xf32, #tpu.memory_space<vmem>>, vector<142x64xf32>
    %35 = arith.truncf %34 : vector<142x64xf32> to vector<142x64xbf16>
    %c4 = arith.constant 4 : index
    %c0_30 = arith.constant 0 : index
    %c0_31 = arith.constant 0 : index
    %36 = vector.load %arg4[%c4, %c0_30, %c0_31] : memref<9x64x64xbf16, #tpu.memory_space<vmem>>, vector<1x64x64xbf16>
    %37 = vector.shape_cast %36 : vector<1x64x64xbf16> to vector<64x64xbf16>
    %cst_32 = arith.constant dense<0.000000e+00> : vector<142x64xf32>
    %38 = tpu.matmul %35, %37, %cst_32 {dimension_numbers = #tpu.dot_dimension_numbers<[1], [0], [0], [1], [0, 0, 1, 1], [], []>} : vector<142x64xbf16>, vector<64x64xbf16>, vector<142x64xf32> -> vector<142x64xf32>
    %39 = arith.addf %33, %38 : vector<142x64xf32>
    %c11 = arith.constant 11 : index
    %c0_33 = arith.constant 0 : index
    %40 = vector.load %arg7[%c11, %c0_33] : memref<162x64xf32, #tpu.memory_space<vmem>>, vector<142x64xf32>
    %41 = arith.truncf %40 : vector<142x64xf32> to vector<142x64xbf16>
    %c5 = arith.constant 5 : index
    %c0_34 = arith.constant 0 : index
    %c0_35 = arith.constant 0 : index
    %42 = vector.load %arg4[%c5, %c0_34, %c0_35] : memref<9x64x64xbf16, #tpu.memory_space<vmem>>, vector<1x64x64xbf16>
    %43 = vector.shape_cast %42 : vector<1x64x64xbf16> to vector<64x64xbf16>
    %cst_36 = arith.constant dense<0.000000e+00> : vector<142x64xf32>
    %44 = tpu.matmul %41, %43, %cst_36 {dimension_numbers = #tpu.dot_dimension_numbers<[1], [0], [0], [1], [0, 0, 1, 1], [], []>} : vector<142x64xbf16>, vector<64x64xbf16>, vector<142x64xf32> -> vector<142x64xf32>
    %45 = arith.addf %39, %44 : vector<142x64xf32>
    %c18 = arith.constant 18 : index
    %c0_37 = arith.constant 0 : index
    %46 = vector.load %arg7[%c18, %c0_37] : memref<162x64xf32, #tpu.memory_space<vmem>>, vector<142x64xf32>
    %47 = arith.truncf %46 : vector<142x64xf32> to vector<142x64xbf16>
    %c6 = arith.constant 6 : index
    %c0_38 = arith.constant 0 : index
    %c0_39 = arith.constant 0 : index
    %48 = vector.load %arg4[%c6, %c0_38, %c0_39] : memref<9x64x64xbf16, #tpu.memory_space<vmem>>, vector<1x64x64xbf16>
    %49 = vector.shape_cast %48 : vector<1x64x64xbf16> to vector<64x64xbf16>
    %cst_40 = arith.constant dense<0.000000e+00> : vector<142x64xf32>
    %50 = tpu.matmul %47, %49, %cst_40 {dimension_numbers = #tpu.dot_dimension_numbers<[1], [0], [0], [1], [0, 0, 1, 1], [], []>} : vector<142x64xbf16>, vector<64x64xbf16>, vector<142x64xf32> -> vector<142x64xf32>
    %51 = arith.addf %45, %50 : vector<142x64xf32>
    %c19 = arith.constant 19 : index
    %c0_41 = arith.constant 0 : index
    %52 = vector.load %arg7[%c19, %c0_41] : memref<162x64xf32, #tpu.memory_space<vmem>>, vector<142x64xf32>
    %53 = arith.truncf %52 : vector<142x64xf32> to vector<142x64xbf16>
    %c7 = arith.constant 7 : index
    %c0_42 = arith.constant 0 : index
    %c0_43 = arith.constant 0 : index
    %54 = vector.load %arg4[%c7, %c0_42, %c0_43] : memref<9x64x64xbf16, #tpu.memory_space<vmem>>, vector<1x64x64xbf16>
    %55 = vector.shape_cast %54 : vector<1x64x64xbf16> to vector<64x64xbf16>
    %cst_44 = arith.constant dense<0.000000e+00> : vector<142x64xf32>
    %56 = tpu.matmul %53, %55, %cst_44 {dimension_numbers = #tpu.dot_dimension_numbers<[1], [0], [0], [1], [0, 0, 1, 1], [], []>} : vector<142x64xbf16>, vector<64x64xbf16>, vector<142x64xf32> -> vector<142x64xf32>
    %57 = arith.addf %51, %56 : vector<142x64xf32>
    %c20 = arith.constant 20 : index
    %c0_45 = arith.constant 0 : index
    %58 = vector.load %arg7[%c20, %c0_45] : memref<162x64xf32, #tpu.memory_space<vmem>>, vector<142x64xf32>
    %59 = arith.truncf %58 : vector<142x64xf32> to vector<142x64xbf16>
    %c8 = arith.constant 8 : index
    %c0_46 = arith.constant 0 : index
    %c0_47 = arith.constant 0 : index
    %60 = vector.load %arg4[%c8, %c0_46, %c0_47] : memref<9x64x64xbf16, #tpu.memory_space<vmem>>, vector<1x64x64xbf16>
    %61 = vector.shape_cast %60 : vector<1x64x64xbf16> to vector<64x64xbf16>
    %cst_48 = arith.constant dense<0.000000e+00> : vector<142x64xf32>
    %62 = tpu.matmul %59, %61, %cst_48 {dimension_numbers = #tpu.dot_dimension_numbers<[1], [0], [0], [1], [0, 0, 1, 1], [], []>} : vector<142x64xbf16>, vector<64x64xbf16>, vector<142x64xf32> -> vector<142x64xf32>
    %63 = arith.addf %57, %62 : vector<142x64xf32>
    %c0_49 = arith.constant 0 : index
    %c0_50 = arith.constant 0 : index
    %64 = vector.load %arg5[%c0_49, %c0_50] : memref<1x64xf32, #tpu.memory_space<vmem>>, vector<1x64xf32>
    %65 = vector.broadcast %64 : vector<1x64xf32> to vector<142x64xf32>
    %66 = arith.addf %63, %65 : vector<142x64xf32>
    %cst_51 = arith.constant 0.000000e+00 : f32
    %67 = vector.broadcast %cst_51 : f32 to vector<142x64xf32>
    %68 = arith.maximumf %66, %67 : vector<142x64xf32>
    %69 = arith.truncf %68 : vector<142x64xf32> to vector<142x64xbf16>
    %c0_52 = arith.constant 0 : index
    %c0_53 = arith.constant 0 : index
    %70 = vector.load %arg6[%c0_52, %c0_53] : memref<142x64xbf16, #tpu.memory_space<vmem>>, vector<142x64xbf16>
    tpu.vector_store %arg6[%c0_52, %c0_53], %69 {strides = array<i32>} : memref<142x64xbf16, #tpu.memory_space<vmem>>, vector<142x64xbf16>,
    return
  }
  func.func @transform_0(%arg0: i32) -> (i32, i32) {
    %c0_i32 = arith.constant 0 : i32
    %c0_i32_0 = arith.constant 0 : i32
    %c0_i32_1 = arith.constant 0 : i32
    return %c0_i32, %c0_i32_0 : i32, i32
  }
  func.func @transform_1(%arg0: i32) -> (i32, i32) {
    %c0_i32 = arith.constant 0 : i32
    %c0_i32_0 = arith.constant 0 : i32
    %c0_i32_1 = arith.constant 0 : i32
    return %c0_i32, %c0_i32_0 : i32, i32
  }
  func.func @transform_2(%arg0: i32) -> (i32, i32) {
    %c0_i32 = arith.constant 0 : i32
    %c0_i32_0 = arith.constant 0 : i32
    %c0_i32_1 = arith.constant 0 : i32
    return %c0_i32, %c0_i32_0 : i32, i32
  }
  func.func @transform_3(%arg0: i32) -> (i32, i32, i32) {
    %c0_i32 = arith.constant 0 : i32
    %c0_i32_0 = arith.constant 0 : i32
    %c0_i32_1 = arith.constant 0 : i32
    %c0_i32_2 = arith.constant 0 : i32
    return %c0_i32, %c0_i32_0, %c0_i32_1 : i32, i32, i32
  }
  func.func @transform_4(%arg0: i32) -> (i32, i32) {
    %c0_i32 = arith.constant 0 : i32
    %c0_i32_0 = arith.constant 0 : i32
    %c0_i32_1 = arith.constant 0 : i32
    return %c0_i32, %c0_i32_0 : i32, i32
  }
  func.func @transform_5(%arg0: i32) -> (i32, i32) {
    %c0_i32 = arith.constant 0 : i32
    %c0_i32_0 = arith.constant 0 : i32
    %c0_i32_1 = arith.constant 0 : i32
    return %c0_i32, %c0_i32_0 : i32, i32
  }
}

module attributes {stable_mosaic.version = 11 : i64} {
  func.func @_head_kernel(%arg0: i32, %arg1: memref<2x3136xbf16, #tpu.memory_space<vmem>>, %arg2: memref<3136x512xbf16, #tpu.memory_space<vmem>>, %arg3: memref<1x512xf32, #tpu.memory_space<vmem>>, %arg4: memref<512x6xbf16, #tpu.memory_space<vmem>>, %arg5: memref<1x6xf32, #tpu.memory_space<vmem>>, %arg6: memref<2x6xf32, #tpu.memory_space<vmem>>, %arg7: memref<2x6xf32, #tpu.memory_space<vmem>>) attributes {dimension_semantics = [#tpu.dimension_semantics<arbitrary>], iteration_bounds = array<i64: 2>, scalar_prefetch = 0 : i64, scratch_operands = 1 : i64, tpu.core_type = #tpu.core_type<tc>, window_params = [{pipeline_mode = #tpu.pipeline_mode<synchronous>, transform_indices = @transform_0, window_bounds = array<i64: 2, 3136>}, {transform_indices = @transform_1, window_bounds = array<i64: 3136, 512>}, {transform_indices = @transform_2, window_bounds = array<i64: 1, 512>}, {transform_indices = @transform_3, window_bounds = array<i64: 512, 6>}, {pipeline_mode = #tpu.pipeline_mode<synchronous>, transform_indices = @transform_4, window_bounds = array<i64: 1, 6>}, {pipeline_mode = #tpu.pipeline_mode<synchronous>, transform_indices = @transform_5, window_bounds = array<i64: 2, 6>}]} {
    %c0_i32 = arith.constant 0 : i32
    %0 = arith.cmpi eq, %arg0, %c0_i32 : i32
    %1 = arith.extui %0 : i1 to i32
    %c0_i32_0 = arith.constant 0 : i32
    %2 = arith.cmpi ne, %1, %c0_i32_0 : i32
    scf.if %2 {
      %cst_15 = arith.constant 0.000000e+00 : f32
      %20 = vector.broadcast %cst_15 : f32 to vector<2x6xf32>
      %c0_16 = arith.constant 0 : index
      %c0_17 = arith.constant 0 : index
      %21 = vector.load %arg7[%c0_16, %c0_17] : memref<2x6xf32, #tpu.memory_space<vmem>>, vector<2x6xf32>
      tpu.vector_store %arg7[%c0_16, %c0_17], %20 {strides = array<i32>} : memref<2x6xf32, #tpu.memory_space<vmem>>, vector<2x6xf32>,
    } else {
    }
    %c0 = arith.constant 0 : index
    %c0_1 = arith.constant 0 : index
    %3 = vector.load %arg1[%c0, %c0_1] : memref<2x3136xbf16, #tpu.memory_space<vmem>>, vector<2x3136xbf16>
    %c0_2 = arith.constant 0 : index
    %c0_3 = arith.constant 0 : index
    %4 = vector.load %arg2[%c0_2, %c0_3] : memref<3136x512xbf16, #tpu.memory_space<vmem>>, vector<3136x512xbf16>
    %cst = arith.constant dense<0.000000e+00> : vector<2x512xf32>
    %5 = tpu.matmul %3, %4, %cst {dimension_numbers = #tpu.dot_dimension_numbers<[1], [0], [0], [1], [0, 0, 1, 1], [], []>} : vector<2x3136xbf16>, vector<3136x512xbf16>, vector<2x512xf32> -> vector<2x512xf32>
    %c0_4 = arith.constant 0 : index
    %c0_5 = arith.constant 0 : index
    %6 = vector.load %arg3[%c0_4, %c0_5] : memref<1x512xf32, #tpu.memory_space<vmem>>, vector<1x512xf32>
    %7 = vector.broadcast %6 : vector<1x512xf32> to vector<2x512xf32>
    %8 = arith.addf %5, %7 : vector<2x512xf32>
    %cst_6 = arith.constant 0.000000e+00 : f32
    %9 = vector.broadcast %cst_6 : f32 to vector<2x512xf32>
    %10 = arith.maximumf %8, %9 : vector<2x512xf32>
    %c0_7 = arith.constant 0 : index
    %c0_8 = arith.constant 0 : index
    %11 = vector.load %arg7[%c0_7, %c0_8] : memref<2x6xf32, #tpu.memory_space<vmem>>, vector<2x6xf32>
    %12 = arith.truncf %10 : vector<2x512xf32> to vector<2x512xbf16>
    %c0_9 = arith.constant 0 : index
    %c0_10 = arith.constant 0 : index
    %13 = vector.load %arg4[%c0_9, %c0_10] : memref<512x6xbf16, #tpu.memory_space<vmem>>, vector<512x6xbf16>
    %cst_11 = arith.constant dense<0.000000e+00> : vector<2x6xf32>
    %14 = tpu.matmul %12, %13, %cst_11 {dimension_numbers = #tpu.dot_dimension_numbers<[1], [0], [0], [1], [0, 0, 1, 1], [], []>} : vector<2x512xbf16>, vector<512x6xbf16>, vector<2x6xf32> -> vector<2x6xf32>
    %15 = arith.addf %11, %14 : vector<2x6xf32>
    %c0_12 = arith.constant 0 : index
    %c0_13 = arith.constant 0 : index
    %16 = vector.load %arg7[%c0_12, %c0_13] : memref<2x6xf32, #tpu.memory_space<vmem>>, vector<2x6xf32>
    tpu.vector_store %arg7[%c0_12, %c0_13], %15 {strides = array<i32>} : memref<2x6xf32, #tpu.memory_space<vmem>>, vector<2x6xf32>,
    %c1_i32 = arith.constant 1 : i32
    %17 = arith.cmpi eq, %arg0, %c1_i32 : i32
    %18 = arith.extui %17 : i1 to i32
    %c0_i32_14 = arith.constant 0 : i32
    %19 = arith.cmpi ne, %18, %c0_i32_14 : i32
    scf.if %19 {
      %c0_15 = arith.constant 0 : index
      %c0_16 = arith.constant 0 : index
      %20 = vector.load %arg7[%c0_15, %c0_16] : memref<2x6xf32, #tpu.memory_space<vmem>>, vector<2x6xf32>
      %c0_17 = arith.constant 0 : index
      %c0_18 = arith.constant 0 : index
      %21 = vector.load %arg5[%c0_17, %c0_18] : memref<1x6xf32, #tpu.memory_space<vmem>>, vector<1x6xf32>
      %22 = vector.broadcast %21 : vector<1x6xf32> to vector<2x6xf32>
      %23 = arith.addf %20, %22 : vector<2x6xf32>
      %c0_19 = arith.constant 0 : index
      %c0_20 = arith.constant 0 : index
      %24 = vector.load %arg6[%c0_19, %c0_20] : memref<2x6xf32, #tpu.memory_space<vmem>>, vector<2x6xf32>
      tpu.vector_store %arg6[%c0_19, %c0_20], %23 {strides = array<i32>} : memref<2x6xf32, #tpu.memory_space<vmem>>, vector<2x6xf32>,
    } else {
    }
    return
  }
  func.func @transform_0(%arg0: i32) -> (i32, i32) {
    %c0_i32 = arith.constant 0 : i32
    %c0_i32_0 = arith.constant 0 : i32
    %c0_i32_1 = arith.constant 0 : i32
    return %c0_i32, %c0_i32_0 : i32, i32
  }
  func.func @transform_1(%arg0: i32) -> (i32, i32) {
    %c0_i32 = arith.constant 0 : i32
    %c0_i32_0 = arith.constant 0 : i32
    return %c0_i32, %arg0 : i32, i32
  }
  func.func @transform_2(%arg0: i32) -> (i32, i32) {
    %c0_i32 = arith.constant 0 : i32
    %c0_i32_0 = arith.constant 0 : i32
    return %c0_i32, %arg0 : i32, i32
  }
  func.func @transform_3(%arg0: i32) -> (i32, i32) {
    %c0_i32 = arith.constant 0 : i32
    %c0_i32_0 = arith.constant 0 : i32
    return %arg0, %c0_i32 : i32, i32
  }
  func.func @transform_4(%arg0: i32) -> (i32, i32) {
    %c0_i32 = arith.constant 0 : i32
    %c0_i32_0 = arith.constant 0 : i32
    %c0_i32_1 = arith.constant 0 : i32
    return %c0_i32, %c0_i32_0 : i32, i32
  }
  func.func @transform_5(%arg0: i32) -> (i32, i32) {
    %c0_i32 = arith.constant 0 : i32
    %c0_i32_0 = arith.constant 0 : i32
    %c0_i32_1 = arith.constant 0 : i32
    return %c0_i32, %c0_i32_0 : i32, i32
  }
}

</mosaic_0001>

<bundles_post_ra>
// kernel: dqn_forward.3
= control target key start
LH: loop header
LB: loop body
LE: loop exit
PB: predicated region body
PF: predicated region fallthrough
CT: control target
= control target key end

     0   :  { %s1113_s12 = smov 0   ;;  %s1291_s0 = inlined_call_operand.vmem [shape: bf16[800,256], index: 0, kind: input, shape index: {}]   ;;  %s1292_s1 = inlined_call_operand.vmem [shape: bf16[256,32], index: 1, kind: input, shape index: {}]   ;;  %s1293_s2 = inlined_call_operand.vmem [shape: f32[1,32], index: 2, kind: input, shape index: {}]   ;;  %s1294_s3 = inlined_call_operand.vmem [shape: bf16[800,32], index: 3, kind: output, shape index: {}]  }
   0x1 LB: > { %s809_s13 = sadd.s32 4294967295, %s1091_s12   ;;  %p813_p0 = scmp.ge.s32.totalorder %s1091_s12, 1  ;;  %s1091_s12 = sphi %s1113_s12, %s13_s12  }
   0x2   : > { %p139_p1 = scmp.lt.s32.totalorder %s1091_s12, 5 }
   0x4   : > { %p140_p2 = pnand %p813_p0, %p139_p1 }
   0x5   : > { %s164_s16 = smul.u32 (!%p140_p2), 25, %s809_s13 }
   0x6   : > { %143 = sbr.rel (%p140_p2) target bundleno = 300 (0x12c), region = 32 }
   0x7   : > { %p165_p3 = scmp.lt.s32.totalorder (!%p140_p2), %s164_s16, 99 }
   0xb   : > { %v1031_v0 = vld [vmem:[%s1292_s1 + $0x78] sm:$0xff]   ;;  %v1033_v2 = vld [vmem:[%s1292_s1 + $0x70] sm:$0xff]   ;;  %v1035_v4 = vld [vmem:[%s1292_s1 + $0x68] sm:$0xff]   ;;  %s1296_s16 = smov (!%p165_p3, %s164_s16), 99  ;;  %vm727_vm0 = vcmask 257024  }
   0xc   : > { %v1032_v1 = vld [vmem:[%s1292_s1 + $0x38] sm:$0xff]   ;;  %913 = vmatprep.subr.bf16.mxu0 %v1031_v0  ;;  %1007 = vmatprep.subr.bf16.mxu1 %v1031_v0  ;;  %v1034_v3 = vld [vmem:[%s1292_s1 + $0x30] sm:$0xff]   ;;  %v1036_v5 = vld [vmem:[%s1292_s1 + $0x28] sm:$0xff]   ;;  %s887_s4 = sshll.u32 %s1296_s16, 3  ;;  %s816_s28 = sshll.u32 %s1296_s16, 2 }
   0xd   : > { %914 = vmatpush3.bf16.msra.mxu0 %v1032_v1  ;;  %1015 = vmatpush3.bf16.msra.mxu1 %v1032_v1  ;;  %v1037_v6 = vld [vmem:[%s1292_s1 + $0x60] sm:$0xff]   ;;  %v1039_v8 = vld [vmem:[%s1292_s1 + $0x58] sm:$0xff]   ;;  %s1154_s9 = scalar_lea.vmem %s1291_s0, %s887_s4  ;;  %v1041_v10 = vld [vmem:[%s1292_s1 + $0x50] sm:$0xff]   ;;  %s1213_s4 = scalar_lea.vmem %s1294_s3, %s816_s28 }
   0xe   : > { %915 = vmatprep.subr.bf16.mxu0 %v1033_v2  ;;  %1008 = vmatprep.subr.bf16.mxu1 %v1033_v2  ;;  %v1038_v7 = vld [vmem:[%s1292_s1 + $0x20] sm:$0xff]   ;;  %v1040_v9 = vld [vmem:[%s1292_s1 + $0x18] sm:$0xff]   ;;  %v1042_v13 = vld [vmem:[%s1292_s1 + $0x10] sm:$0xff]  }
   0xf   : > { %v1049_v11 = vld [vmem:[%s1154_s9 + $0x4] ss:$8 sps:$4 sm:$0xff]   ;;  %v1052_v12 = vld [vmem:[%s1154_s9 + $0x74] ss:$8 sps:$4 sm:$0xff]   ;;  %v1047_v18 = vld [vmem:[%s1154_s9] ss:$8 sps:$4 sm:$0xff]  }
  0x10   : > { %v1043_v14 = vld [vmem:[%s1292_s1 + $0x48] sm:$0xff]   ;;  %497 = vmatprep.mubr.bf16.mxu0 %v1049_v11  ;;  %553 = vmatprep.mubr.bf16.mxu1 %v1052_v12  ;;  %v1045_v16 = vld [vmem:[%s1292_s1 + $0x40] sm:$0xff]   ;;  %v1050_v19 = vld [vmem:[%s1154_s9 + $0x70] ss:$8 sps:$4 sm:$0xff]  }
  0x11   : > { %916 = vmatpush3.bf16.msra.mxu0 %v1034_v3  ;;  %1016 = vmatpush3.bf16.msra.mxu1 %v1034_v3  ;;  %v1044_v15 = vld [vmem:[%s1292_s1 + $0x8] sm:$0xff]   ;;  %v1046_v17 = vld [vmem:[%s1292_s1] sm:$0xff]   ;;  %v1053_v20 = vld [vmem:[%s1154_s9 + $0x14] ss:$8 sps:$4 sm:$0xff]  }
  0x12   : > { %917 = vmatprep.subr.bf16.mxu0 %v1035_v4  ;;  %1009 = vmatprep.subr.bf16.mxu1 %v1035_v4  ;;  %v1056_v21 = vld [vmem:[%s1154_s9 + $0x84] ss:$8 sps:$4 sm:$0xff]   ;;  %v1055_v22 = vld [vmem:[%s1154_s9 + $0x10] ss:$8 sps:$4 sm:$0xff]   ;;  %v1058_v23 = vld [vmem:[%s1154_s9 + $0x80] ss:$8 sps:$4 sm:$0xff]  }
  0x13   : > { %v1059_v24 = vld [vmem:[%s1154_s9 + $0x24] ss:$8 sps:$4 sm:$0xff]   ;;  %v1062_v25 = vld [vmem:[%s1154_s9 + $0x94] ss:$8 sps:$4 sm:$0xff]   ;;  %v1061_v26 = vld [vmem:[%s1154_s9 + $0x20] ss:$8 sps:$4 sm:$0xff]  }
  0x14   : > { %v1064_v27 = vld [vmem:[%s1154_s9 + $0x90] ss:$8 sps:$4 sm:$0xff]   ;;  %v1065_v28 = vld [vmem:[%s1154_s9 + $0x34] ss:$8 sps:$4 sm:$0xff]   ;;  %v1068_v29 = vld [vmem:[%s1154_s9 + $0xa4] ss:$8 sps:$4 sm:$0xff]  }
  0x15   : > { %918 = vmatpush3.bf16.msra.mxu0 %v1036_v5  ;;  %1017 = vmatpush3.bf16.msra.mxu1 %v1036_v5  ;;  %v1067_v30 = vld [vmem:[%s1154_s9 + $0x30] ss:$8 sps:$4 sm:$0xff]   ;;  %v1070_v31 = vld [vmem:[%s1154_s9 + $0xa0] ss:$8 sps:$4 sm:$0xff]   ;;  %v1071_v32 = vld [vmem:[%s1154_s9 + $0x44] ss:$8 sps:$4 sm:$0xff]  }
  0x16   : > { %919 = vmatprep.subr.bf16.mxu0 %v1037_v6  ;;  %1010 = vmatprep.subr.bf16.mxu1 %v1037_v6  ;;  %v1074_v33 = vld [vmem:[%s1154_s9 + $0xb4] ss:$8 sps:$4 sm:$0xff]   ;;  %v202_v34 = vld [vmem:[%s1154_s9 + $0xc0] sm:$0xff]  ;;  %v1076_v36 = vld [vmem:[%s1154_s9 + $0xb0] ss:$8 sps:$4 sm:$0xff]  }
  0x17   : > { %v1073_v35 = vld [vmem:[%s1154_s9 + $0x40] ss:$8 sps:$4 sm:$0xff]   ;;  %v1077_v37 = vld [vmem:[%s1154_s9 + $0x54] ss:$8 sps:$4 sm:$0xff]   ;;  %v843_v38 = vcombine.high %v202_v34, %v202_v34  ;;  %v1079_v39 = vld [vmem:[%s1154_s9 + $0x50] ss:$8 sps:$4 sm:$0xff]   ;;  %v842_v40 = vcombine.low %v202_v34, %v202_v34 }
  0x18   : > { %v1082_v41 = vld [vmem:[%s1154_s9 + $0x64] ss:$8 sps:$4 sm:$0xff]   ;;  %v1084_v42 = vld [vmem:[%s1154_s9 + $0x60] ss:$8 sps:$4 sm:$0xff]  }
  0x19   : > { %920 = vmatpush3.bf16.msra.mxu0 %v1038_v7  ;;  %1018 = vmatpush3.bf16.msra.mxu1 %v1038_v7  ;;  %v1205_v45 = vld [vmem:[%s1293_s2] ss:$0 sm:$0xff] }
  0x1a   : > { %921 = vmatprep.subr.bf16.mxu0 %v1039_v8  ;;  %1011 = vmatprep.subr.bf16.mxu1 %v1039_v8 }
  0x1d   : > { %922 = vmatpush3.bf16.msra.mxu0 %v1040_v9  ;;  %1019 = vmatpush3.bf16.msra.mxu1 %v1040_v9 }
  0x1e   : > { %923 = vmatprep.subr.bf16.mxu0 %v1041_v10  ;;  %1012 = vmatprep.subr.bf16.mxu1 %v1041_v10 }
  0x21   : > { %924 = vmatpush3.bf16.msra.mxu0 %v1042_v13  ;;  %1020 = vmatpush3.bf16.msra.mxu1 %v1042_v13 }
  0x22   : > { %925 = vmatprep.subr.bf16.mxu0 %v1043_v14  ;;  %1013 = vmatprep.subr.bf16.mxu1 %v1043_v14 }
  0x25   : > { %926 = vmatpush3.bf16.msra.mxu0 %v1044_v15  ;;  %1021 = vmatpush3.bf16.msra.mxu1 %v1044_v15 }
  0x26   : > { %927 = vmatprep.subr.bf16.mxu0 %v1045_v16  ;;  %1014 = vmatprep.subr.bf16.mxu1 %v1045_v16 }
  0x29   : > { %928 = vmatpush3.bf16.msra.mxu0 %v1046_v17  ;;  %1022 = vmatpush3.bf16.msra.mxu1 %v1046_v17 }
  0x2c   : > { %498 = vmatmul.mubr.bf16.vlgmr.msra.gmra.mxu0 %v1047_v18  ;;  %554 = vmatmul.mubr.bf16.vlgmr.msra.gmra.mxu1 %v1050_v19 }
  0x2d   : > { %505 = vmatprep.mubr.bf16.mxu0 %v1053_v20  ;;  %561 = vmatprep.mubr.bf16.mxu1 %v1056_v21 }
  0x34   : > { %506 = vmatmul.mubr.bf16.gmra.mxu0 %v1055_v22  ;;  %562 = vmatmul.mubr.bf16.gmra.mxu1 %v1058_v23 }
  0x35   : > { %513 = vmatprep.mubr.bf16.mxu0 %v1059_v24  ;;  %569 = vmatprep.mubr.bf16.mxu1 %v1062_v25 }
  0x3c   : > { %514 = vmatmul.mubr.bf16.gmra.mxu0 %v1061_v26  ;;  %570 = vmatmul.mubr.bf16.gmra.mxu1 %v1064_v27 }
  0x3d   : > { %521 = vmatprep.mubr.bf16.mxu0 %v1065_v28  ;;  %577 = vmatprep.mubr.bf16.mxu1 %v1068_v29 }
  0x44   : > { %522 = vmatmul.mubr.bf16.gmra.mxu0 %v1067_v30  ;;  %578 = vmatmul.mubr.bf16.gmra.mxu1 %v1070_v31 }
  0x45   : > { %529 = vmatprep.mubr.bf16.mxu0 %v1071_v32  ;;  %585 = vmatprep.mubr.bf16.mxu1 %v1074_v33 }
  0x4c   : > { %530 = vmatmul.mubr.bf16.gmra.mxu0 %v1073_v35  ;;  %586 = vmatmul.mubr.bf16.gmra.mxu1 %v1076_v36 }
  0x4d   : > { %537 = vmatprep.mubr.bf16.mxu0 %v1077_v37  ;;  %593 = vmatprep.mubr.bf16.mxu1 %v843_v38 }
  0x54   : > { %538 = vmatmul.mubr.bf16.gmra.mxu0 %v1079_v39  ;;  %594 = vmatmul.mubr.bf16.gmra.mxu1 %v842_v40 }
  0x55   : > { %545 = vmatprep.mubr.bf16.mxu0 %v1082_v41 }
  0x5c   : > { %546 = vmatmul.mubr.bf16.gmra.mxu0 %v1084_v42 }
  0xec   : > { %v929_v43 = vpop.f32.mrf.mxu0  ;;  %v971_v44 = vpop.f32.mrf.mxu1 }
  0xee   : > { %v930_v46 = vpop.f32.mrf.mxu0  ;;  %v972_v47 = vpop.f32.mrf.mxu1 }
  0xef   : > { %v931_v48 = vadd.f32 %v930_v46, %v929_v43  ;;  %v973_v49 = vadd.f32 %v972_v47, %v971_v44 }
  0xf0   : > { %v932_v50 = vpop.f32.mrf.mxu0  ;;  %v974_v51 = vpop.f32.mrf.mxu1 }
  0xf1   : > { %v500_v52 = vadd.f32 %v931_v48, %v1205_v45  ;;  %v556_v53 = vadd.f32 %v973_v49, %v1205_v45 }
  0xf2   : > { %v933_v54 = vpop.f32.mrf.mxu0  ;;  %v975_v55 = vpop.f32.mrf.mxu1 }
  0xf3   : > { %v601_v56 = vmax.f32 %v500_v52, 0.0  ;;  %v934_v57 = vadd.f32 %v933_v54, %v932_v50  ;;  %v615_v58 = vmax.f32 %v556_v53, 0.0  ;;  %v976_v59 = vadd.f32 %v975_v55, %v974_v51 }
  0xf4   : > { %v935_v60 = vpop.f32.mrf.mxu0  ;;  %v977_v61 = vpop.f32.mrf.mxu1 }
  0xf5   : > { %v888_v62 = vpack.c.bf16 %v601_v56, %v601_v56  ;;  %v503_v63 = vadd.f32 %v934_v57, %v1205_v45  ;;  %v902_v0 = vpack.c.bf16 %v615_v58, %v615_v58  ;;  %v559_v1 = vadd.f32 %v976_v59, %v1205_v45 }
  0xf6   : > { %v936_v2 = vpop.f32.mrf.mxu0  ;;  %v978_v3 = vpop.f32.mrf.mxu1 }
  0xf7   : > { %728 = vst.msk [vmem:[%s1213_s4] sm:$0xf] %vm727_vm0, %v888_v62  ;;  %v602_v4 = vmax.f32 %v503_v63, 0.0  ;;  %742 = vst.msk [vmem:[%s1213_s4 + $0x38] sm:$0xf] %vm727_vm0, %v902_v0  ;;  %v937_v5 = vadd.f32 %v936_v2, %v935_v60  ;;  %v616_v6 = vmax.f32 %v559_v1, 0.0  ;;  %v979_v7 = vadd.f32 %v978_v3, %v977_v61 }
  0xf8   : > { %v938_v8 = vpop.f32.mrf.mxu0  ;;  %v980_v9 = vpop.f32.mrf.mxu1 }
  0xf9   : > { %v889_v10 = vpack.c.bf16 %v602_v4, %v602_v4  ;;  %v508_v11 = vadd.f32 %v937_v5, %v1205_v45  ;;  %v903_v12 = vpack.c.bf16 %v616_v6, %v616_v6  ;;  %v564_v13 = vadd.f32 %v979_v7, %v1205_v45 }
  0xfa   : > { %v939_v14 = vpop.f32.mrf.mxu0  ;;  %v981_v15 = vpop.f32.mrf.mxu1 }
  0xfb   : > { %729 = vst.msk [vmem:[%s1213_s4 + $0x4] sm:$0xf] %vm727_vm0, %v889_v10  ;;  %v603_v16 = vmax.f32 %v508_v11, 0.0  ;;  %743 = vst.msk [vmem:[%s1213_s4 + $0x3c] sm:$0xf] %vm727_vm0, %v903_v12  ;;  %v940_v17 = vadd.f32 %v939_v14, %v938_v8  ;;  %v617_v18 = vmax.f32 %v564_v13, 0.0  ;;  %v982_v19 = vadd.f32 %v981_v15, %v980_v9 }
  0xfc   : > { %v941_v20 = vpop.f32.mrf.mxu0  ;;  %v983_v21 = vpop.f32.mrf.mxu1 }
  0xfd   : > { %v890_v22 = vpack.c.bf16 %v603_v16, %v603_v16  ;;  %v511_v23 = vadd.f32 %v940_v17, %v1205_v45  ;;  %v904_v24 = vpack.c.bf16 %v617_v18, %v617_v18  ;;  %v567_v25 = vadd.f32 %v982_v19, %v1205_v45 }
  0xfe   : > { %v942_v26 = vpop.f32.mrf.mxu0  ;;  %v984_v27 = vpop.f32.mrf.mxu1 }
  0xff   : > { %730 = vst.msk [vmem:[%s1213_s4 + $0x8] sm:$0xf] %vm727_vm0, %v890_v22  ;;  %v604_v28 = vmax.f32 %v511_v23, 0.0  ;;  %744 = vst.msk [vmem:[%s1213_s4 + $0x40] sm:$0xf] %vm727_vm0, %v904_v24  ;;  %v943_v29 = vadd.f32 %v942_v26, %v941_v20  ;;  %v618_v30 = vmax.f32 %v567_v25, 0.0  ;;  %v985_v31 = vadd.f32 %v984_v27, %v983_v21 }
 0x100   : > { %v944_v32 = vpop.f32.mrf.mxu0  ;;  %v986_v33 = vpop.f32.mrf.mxu1 }
 0x101   : > { %v891_v34 = vpack.c.bf16 %v604_v28, %v604_v28  ;;  %v516_v35 = vadd.f32 %v943_v29, %v1205_v45  ;;  %v905_v36 = vpack.c.bf16 %v618_v30, %v618_v30  ;;  %v572_v37 = vadd.f32 %v985_v31, %v1205_v45 }
 0x102   : > { %v945_v38 = vpop.f32.mrf.mxu0  ;;  %v987_v39 = vpop.f32.mrf.mxu1 }
 0x103   : > { %731 = vst.msk [vmem:[%s1213_s4 + $0xc] sm:$0xf] %vm727_vm0, %v891_v34  ;;  %v605_v40 = vmax.f32 %v516_v35, 0.0  ;;  %745 = vst.msk [vmem:[%s1213_s4 + $0x44] sm:$0xf] %vm727_vm0, %v905_v36  ;;  %v946_v41 = vadd.f32 %v945_v38, %v944_v32  ;;  %v619_v42 = vmax.f32 %v572_v37, 0.0  ;;  %v988_v43 = vadd.f32 %v987_v39, %v986_v33 }
 0x104   : > { %v947_v44 = vpop.f32.mrf.mxu0  ;;  %v989_v46 = vpop.f32.mrf.mxu1 }
 0x105   : > { %v892_v47 = vpack.c.bf16 %v605_v40, %v605_v40  ;;  %v519_v48 = vadd.f32 %v946_v41, %v1205_v45  ;;  %v906_v49 = vpack.c.bf16 %v619_v42, %v619_v42  ;;  %v575_v50 = vadd.f32 %v988_v43, %v1205_v45 }
 0x106   : > { %v948_v51 = vpop.f32.mrf.mxu0  ;;  %v990_v52 = vpop.f32.mrf.mxu1 }
 0x107   : > { %732 = vst.msk [vmem:[%s1213_s4 + $0x10] sm:$0xf] %vm727_vm0, %v892_v47  ;;  %v606_v53 = vmax.f32 %v519_v48, 0.0  ;;  %746 = vst.msk [vmem:[%s1213_s4 + $0x48] sm:$0xf] %vm727_vm0, %v906_v49  ;;  %v949_v54 = vadd.f32 %v948_v51, %v947_v44  ;;  %v620_v55 = vmax.f32 %v575_v50, 0.0  ;;  %v991_v56 = vadd.f32 %v990_v52, %v989_v46 }
 0x108   : > { %v950_v57 = vpop.f32.mrf.mxu0  ;;  %v992_v58 = vpop.f32.mrf.mxu1 }
 0x109   : > { %v893_v59 = vpack.c.bf16 %v606_v53, %v606_v53  ;;  %v524_v60 = vadd.f32 %v949_v54, %v1205_v45  ;;  %v907_v61 = vpack.c.bf16 %v620_v55, %v620_v55  ;;  %v580_v62 = vadd.f32 %v991_v56, %v1205_v45 }
 0x10a   : > { %v951_v63 = vpop.f32.mrf.mxu0  ;;  %v993_v0 = vpop.f32.mrf.mxu1 }
 0x10b   : > { %733 = vst.msk [vmem:[%s1213_s4 + $0x14] sm:$0xf] %vm727_vm0, %v893_v59  ;;  %v607_v1 = vmax.f32 %v524_v60, 0.0  ;;  %747 = vst.msk [vmem:[%s1213_s4 + $0x4c] sm:$0xf] %vm727_vm0, %v907_v61  ;;  %v952_v2 = vadd.f32 %v951_v63, %v950_v57  ;;  %v621_v3 = vmax.f32 %v580_v62, 0.0  ;;  %v994_v4 = vadd.f32 %v993_v0, %v992_v58 }
 0x10c   : > { %v953_v5 = vpop.f32.mrf.mxu0  ;;  %v995_v6 = vpop.f32.mrf.mxu1 }
 0x10d   : > { %v894_v7 = vpack.c.bf16 %v607_v1, %v607_v1  ;;  %v527_v8 = vadd.f32 %v952_v2, %v1205_v45  ;;  %v908_v9 = vpack.c.bf16 %v621_v3, %v621_v3  ;;  %v583_v10 = vadd.f32 %v994_v4, %v1205_v45 }
 0x10e   : > { %v954_v11 = vpop.f32.mrf.mxu0  ;;  %v996_v12 = vpop.f32.mrf.mxu1 }
 0x10f   : > { %734 = vst.msk [vmem:[%s1213_s4 + $0x18] sm:$0xf] %vm727_vm0, %v894_v7  ;;  %v608_v13 = vmax.f32 %v527_v8, 0.0  ;;  %748 = vst.msk [vmem:[%s1213_s4 + $0x50] sm:$0xf] %vm727_vm0, %v908_v9  ;;  %v955_v14 = vadd.f32 %v954_v11, %v953_v5  ;;  %v622_v15 = vmax.f32 %v583_v10, 0.0  ;;  %v997_v16 = vadd.f32 %v996_v12, %v995_v6 }
 0x110   : > { %v956_v17 = vpop.f32.mrf.mxu0  ;;  %v998_v18 = vpop.f32.mrf.mxu1 }
 0x111   : > { %v895_v19 = vpack.c.bf16 %v608_v13, %v608_v13  ;;  %v532_v20 = vadd.f32 %v955_v14, %v1205_v45  ;;  %v909_v21 = vpack.c.bf16 %v622_v15, %v622_v15  ;;  %v588_v22 = vadd.f32 %v997_v16, %v1205_v45 }
 0x112   : > { %v957_v23 = vpop.f32.mrf.mxu0  ;;  %v999_v24 = vpop.f32.mrf.mxu1 }
 0x113   : > { %735 = vst.msk [vmem:[%s1213_s4 + $0x1c] sm:$0xf] %vm727_vm0, %v895_v19  ;;  %v609_v25 = vmax.f32 %v532_v20, 0.0  ;;  %749 = vst.msk [vmem:[%s1213_s4 + $0x54] sm:$0xf] %vm727_vm0, %v909_v21  ;;  %v958_v26 = vadd.f32 %v957_v23, %v956_v17  ;;  %v623_v27 = vmax.f32 %v588_v22, 0.0  ;;  %v1000_v28 = vadd.f32 %v999_v24, %v998_v18 }
 0x114   : > { %v959_v29 = vpop.f32.mrf.mxu0  ;;  %v1001_v30 = vpop.f32.mrf.mxu1 }
 0x115   : > { %v896_v31 = vpack.c.bf16 %v609_v25, %v609_v25  ;;  %v535_v32 = vadd.f32 %v958_v26, %v1205_v45  ;;  %v910_v33 = vpack.c.bf16 %v623_v27, %v623_v27  ;;  %v591_v34 = vadd.f32 %v1000_v28, %v1205_v45 }
 0x116   : > { %v960_v35 = vpop.f32.mrf.mxu0  ;;  %v1002_v36 = vpop.f32.mrf.mxu1 }
 0x117   : > { %736 = vst.msk [vmem:[%s1213_s4 + $0x20] sm:$0xf] %vm727_vm0, %v896_v31  ;;  %v610_v37 = vmax.f32 %v535_v32, 0.0  ;;  %750 = vst.msk [vmem:[%s1213_s4 + $0x58] sm:$0xf] %vm727_vm0, %v910_v33  ;;  %v961_v38 = vadd.f32 %v960_v35, %v959_v29  ;;  %v624_v39 = vmax.f32 %v591_v34, 0.0  ;;  %v1003_v40 = vadd.f32 %v1002_v36, %v1001_v30 }
 0x118   : > { %v962_v41 = vpop.f32.mrf.mxu0  ;;  %v1004_v42 = vpop.f32.mrf.mxu1 }
 0x119   : > { %v897_v43 = vpack.c.bf16 %v610_v37, %v610_v37  ;;  %v540_v44 = vadd.f32 %v961_v38, %v1205_v45  ;;  %v911_v46 = vpack.c.bf16 %v624_v39, %v624_v39  ;;  %v596_v47 = vadd.f32 %v1003_v40, %v1205_v45 }
 0x11a   : > { %v963_v48 = vpop.f32.mrf.mxu0  ;;  %v1005_v49 = vpop.f32.mrf.mxu1 }
 0x11b   : > { %737 = vst.msk [vmem:[%s1213_s4 + $0x24] sm:$0xf] %vm727_vm0, %v897_v43  ;;  %v611_v50 = vmax.f32 %v540_v44, 0.0  ;;  %751 = vst.msk [vmem:[%s1213_s4 + $0x5c] sm:$0xf] %vm727_vm0, %v911_v46  ;;  %v964_v51 = vadd.f32 %v963_v48, %v962_v41  ;;  %v625_v52 = vmax.f32 %v596_v47, 0.0 }
 0x11c   : > { %v965_v53 = vpop.f32.mrf.mxu0 }
 0x11d   : > { %v898_v54 = vpack.c.bf16 %v611_v50, %v611_v50  ;;  %v543_v55 = vadd.f32 %v964_v51, %v1205_v45  ;;  %v912_v56 = vpack.c.bf16 %v625_v52, %v625_v52 }
 0x11e   : > { %v966_v57 = vpop.f32.mrf.mxu0 }
 0x11f   : > { %738 = vst.msk [vmem:[%s1213_s4 + $0x28] sm:$0xf] %vm727_vm0, %v898_v54  ;;  %v612_v58 = vmax.f32 %v543_v55, 0.0  ;;  %752 = vst.msk [vmem:[%s1213_s4 + $0x60] sm:$0xf] %vm727_vm0, %v912_v56  ;;  %v967_v59 = vadd.f32 %v966_v57, %v965_v53 }
 0x120   : > { %v968_v60 = vpop.f32.mrf.mxu0 }
 0x121   : > { %v899_v61 = vpack.c.bf16 %v612_v58, %v612_v58  ;;  %v548_v62 = vadd.f32 %v967_v59, %v1205_v45 }
 0x122   : > { %v969_v63 = vpop.f32.mrf.mxu0 }
 0x123   : > { %739 = vst.msk [vmem:[%s1213_s4 + $0x2c] sm:$0xf] %vm727_vm0, %v899_v61  ;;  %v613_v0 = vmax.f32 %v548_v62, 0.0  ;;  %v970_v1 = vadd.f32 %v969_v63, %v968_v60 }
 0x125   : > { %v900_v2 = vpack.c.bf16 %v613_v0, %v613_v0  ;;  %v551_v3 = vadd.f32 %v970_v1, %v1205_v45 }
 0x127   : > { %740 = vst.msk [vmem:[%s1213_s4 + $0x30] sm:$0xf] %vm727_vm0, %v900_v2  ;;  %v614_v4 = vmax.f32 %v551_v3, 0.0 }
 0x129   : > { %v901_v5 = vpack.c.bf16 %v614_v4, %v614_v4 }
 0x12b   : > { %741 = vst.msk [vmem:[%s1213_s4 + $0x34] sm:$0xf] %vm727_vm0, %v901_v5 }
 0x12c PF: > { %s13_s12 = sadd.s32 1, %s1091_s12  }
 0x12d   : > { %p10_p4 = scmp.ge.s32.totalorder %s13_s12, 6  }
 0x12f   :  { %12 = sbr.rel (!%p10_p4) target bundleno = 1 (0x1), region = 62 }

// kernel: dqn_forward.4
= control target key start
LH: loop header
LB: loop body
LE: loop exit
PB: predicated region body
PF: predicated region fallthrough
CT: control target
= control target key end

     0   :  { %vm3939_vm0 = vmmov 0   ;;  %vm801_vm1 = vcmask 523264   ;;  %vm822_vm2 = vcmask 517120   ;;  %vm2792_vm3 = vcmask 519168   ;;  %s5262_s1 = inlined_call_operand.vmem [shape: bf16[512,64], index: 1, kind: input, shape index: {}]   ;;  %s5263_s0 = inlined_call_operand.vmem [shape: bf16[162,512], index: 0, kind: input, shape index: {}]   ;;  %s5264_s3 = inlined_call_operand.vmem [shape: bf16[9,64,64], index: 3, kind: input, shape index: {}]   ;;  %s5265_s2 = inlined_call_operand.vmem [shape: f32[1,64], index: 2, kind: input, shape index: {}]   ;;  %s5266_s4 = inlined_call_operand.vmem [shape: f32[1,64], index: 4, kind: input, shape index: {}]   ;;  %s5267_s5 = inlined_call_operand.vmem [shape: bf16[142,64], index: 5, kind: output, shape index: {}]  }
   0x1   :  { %v3806_v0 = vld [vmem:[%s5262_s1 + $0x78] sm:$0xff]   ;;  %v3808_v2 = vld [vmem:[%s5262_s1 + $0x70] sm:$0xff]   ;;  %v3810_v4 = vld [vmem:[%s5262_s1 + $0x68] sm:$0xff]   ;;  %vm2810_vm4 = vcmask 518144  }
   0x2   :  { %v3807_v1 = vld [vmem:[%s5262_s1 + $0x38] sm:$0xff]   ;;  %3788 = vmatprep.subr.bf16.mxu1 %v3806_v0  ;;  %3111 = vmatprep.subr.bf16.mxu0 %v3806_v0  ;;  %v3809_v3 = vld [vmem:[%s5262_s1 + $0x30] sm:$0xff]   ;;  %v3811_v5 = vld [vmem:[%s5262_s1 + $0x28] sm:$0xff]  }
   0x3   :  { %3796 = vmatpush3.bf16.msra.mxu1 %v3807_v1  ;;  %3112 = vmatpush3.bf16.msra.mxu0 %v3807_v1  ;;  %v3812_v6 = vld [vmem:[%s5262_s1 + $0x60] sm:$0xff]   ;;  %v3814_v8 = vld [vmem:[%s5262_s1 + $0x58] sm:$0xff]   ;;  %v3816_v10 = vld [vmem:[%s5262_s1 + $0x50] sm:$0xff]  }
   0x4   :  { %3789 = vmatprep.subr.bf16.mxu1 %v3808_v2  ;;  %3113 = vmatprep.subr.bf16.mxu0 %v3808_v2  ;;  %v3813_v7 = vld [vmem:[%s5262_s1 + $0x20] sm:$0xff]   ;;  %v3815_v9 = vld [vmem:[%s5262_s1 + $0x18] sm:$0xff]   ;;  %v3817_v12 = vld [vmem:[%s5262_s1 + $0x10] sm:$0xff]  }
   0x5   :  { %v3824_v11 = vld [vmem:[%s5263_s0 + $0xe4] ss:$16 sps:$4 sm:$0xff]   ;;  %v3818_v13 = vld [vmem:[%s5262_s1 + $0x48] sm:$0xff]   ;;  %v3825_v17 = vld [vmem:[%s5262_s1 + $0xf8] sm:$0xff]  }
   0x6   :  { %628 = vmatprep.mubr.bf16.mxu1 %v3824_v11  ;;  %v3819_v14 = vld [vmem:[%s5262_s1 + $0x8] sm:$0xff]   ;;  %v3820_v15 = vld [vmem:[%s5262_s1 + $0x40] sm:$0xff]   ;;  %v3826_v19 = vld [vmem:[%s5262_s1 + $0xb8] sm:$0xff]  }
   0x7   :  { %3797 = vmatpush3.bf16.msra.mxu1 %v3809_v3  ;;  %3114 = vmatpush3.bf16.msra.mxu0 %v3809_v3  ;;  %v3821_v16 = vld [vmem:[%s5262_s1] sm:$0xff]   ;;  %v3827_v21 = vld [vmem:[%s5262_s1 + $0xf0] sm:$0xff]   ;;  %v3832_v25 = vld [vmem:[%s5262_s1 + $0xe8] sm:$0xff]  }
   0x8   :  { %3790 = vmatprep.subr.bf16.mxu1 %v3810_v4  ;;  %3115 = vmatprep.subr.bf16.mxu0 %v3810_v4  ;;  %v3822_v18 = vld [vmem:[%s5263_s0 + $0xe0] ss:$16 sps:$4 sm:$0xff]   ;;  %v3829_v20 = vld [vmem:[%s5263_s0 + $0x104] ss:$16 sps:$4 sm:$0xff]   ;;  %v3833_v27 = vld [vmem:[%s5262_s1 + $0xa8] sm:$0xff]   ;;  %v3938_v4 = vmov 0.0  }
   0x9   :  { %v3844_v22 = vld [vmem:[%s5263_s0] ss:$16 sps:$4 sm:$0xff]   ;;  %v3846_v23 = vld [vmem:[%s5263_s0 + $0x4] ss:$16 sps:$4 sm:$0xff]   ;;  %v3839_v34 = vld [vmem:[%s5262_s1 + $0xd8] sm:$0xff]  }
   0xa   :  { %v3828_v24 = vld [vmem:[%s5262_s1 + $0xb0] sm:$0xff]   ;;  %572 = vmatprep.mubr.bf16.mxu0 %v3846_v23  ;;  %v3834_v30 = vld [vmem:[%s5262_s1 + $0xe0] sm:$0xff]   ;;  %v3840_v37 = vld [vmem:[%s5262_s1 + $0x98] sm:$0xff]  }
   0xb   :  { %3798 = vmatpush3.bf16.msra.mxu1 %v3811_v5  ;;  %3116 = vmatpush3.bf16.msra.mxu0 %v3811_v5  ;;  %v3831_v26 = vld [vmem:[%s5263_s0 + $0x100] ss:$16 sps:$4 sm:$0xff]   ;;  %v3836_v28 = vld [vmem:[%s5263_s0 + $0x124] ss:$16 sps:$4 sm:$0xff]   ;;  %v3848_v43 = vld [vmem:[%s5262_s1 + $0xc8] sm:$0xff]  }
   0xc   :  { %3791 = vmatprep.subr.bf16.mxu1 %v3812_v6  ;;  %3117 = vmatprep.subr.bf16.mxu0 %v3812_v6  ;;  %v3855_v29 = vld [vmem:[%s5263_s0 + $0x24] ss:$16 sps:$4 sm:$0xff]   ;;  %v3857_v31 = vld [vmem:[%s5263_s0 + $0x20] ss:$16 sps:$4 sm:$0xff]   ;;  %v3849_v45 = vld [vmem:[%s5262_s1 + $0x88] sm:$0xff]  }
   0xd   :  { %v3835_v32 = vld [vmem:[%s5262_s1 + $0xa0] sm:$0xff]   ;;  %v3841_v39 = vld [vmem:[%s5262_s1 + $0xd0] sm:$0xff]   ;;  %v3854_v46 = vld [vmem:[%s5263_s0 + $0xc] ss:$16 sps:$4 sm:$0xff]  }
   0xe   :  { %v3860_v33 = vld [vmem:[%s5263_s0 + $0x44] ss:$16 sps:$4 sm:$0xff]   ;;  %v3838_v36 = vld [vmem:[%s5263_s0 + $0x120] ss:$16 sps:$4 sm:$0xff]   ;;  %v3852_v51 = vld [vmem:[%s5263_s0 + $0x8] ss:$16 sps:$4 sm:$0xff]  }
   0xf   :  { %3799 = vmatpush3.bf16.msra.mxu1 %v3813_v7  ;;  %3118 = vmatpush3.bf16.msra.mxu0 %v3813_v7  ;;  %v61_v35 = vld [vmem:[%s5263_s0 + $0x140] sm:$0x11]  ;;  %v3842_v42 = vld [vmem:[%s5262_s1 + $0x90] sm:$0xff]   ;;  %v3858_v52 = vld [vmem:[%s5263_s0 + $0x2c] ss:$16 sps:$4 sm:$0xff]  }
  0x10   :  { %3792 = vmatprep.subr.bf16.mxu1 %v3814_v8  ;;  %3119 = vmatprep.subr.bf16.mxu0 %v3814_v8  ;;  %v2858_v38 = vcombine.high %v61_v35, %v61_v35  ;;  %v3863_v40 = vld [vmem:[%s5263_s0 + $0x40] ss:$16 sps:$4 sm:$0xff]   ;;  %v3866_v41 = vld [vmem:[%s5263_s0 + $0x64] ss:$16 sps:$4 sm:$0xff]   ;;  %v2857_v44 = vcombine.low %v61_v35, %v61_v35  ;;  %v3862_v55 = vld [vmem:[%s5263_s0 + $0x28] ss:$16 sps:$4 sm:$0xff]  }
  0x11   :  { %v3850_v47 = vld [vmem:[%s5262_s1 + $0xc0] sm:$0xff]   ;;  %v3864_v56 = vld [vmem:[%s5263_s0 + $0x4c] ss:$16 sps:$4 sm:$0xff]   ;;  %v3868_v59 = vld [vmem:[%s5263_s0 + $0x48] ss:$16 sps:$4 sm:$0xff]  }
  0x12   :  { %v3869_v48 = vld [vmem:[%s5263_s0 + $0x60] ss:$16 sps:$4 sm:$0xff]   ;;  %v3872_v49 = vld [vmem:[%s5263_s0 + $0x84] ss:$16 sps:$4 sm:$0xff]   ;;  %v3870_v60 = vld [vmem:[%s5263_s0 + $0x6c] ss:$16 sps:$4 sm:$0xff]  }
  0x13   :  { %3800 = vmatpush3.bf16.msra.mxu1 %v3815_v9  ;;  %3120 = vmatpush3.bf16.msra.mxu0 %v3815_v9  ;;  %v3851_v50 = vld [vmem:[%s5262_s1 + $0x80] sm:$0xff]   ;;  %v3874_v62 = vld [vmem:[%s5263_s0 + $0x68] ss:$16 sps:$4 sm:$0xff]   ;;  %v3876_v63 = vld [vmem:[%s5263_s0 + $0x8c] ss:$16 sps:$4 sm:$0xff]  }
  0x14   :  { %3793 = vmatprep.subr.bf16.mxu1 %v3816_v10  ;;  %3121 = vmatprep.subr.bf16.mxu0 %v3816_v10  ;;  %v3875_v53 = vld [vmem:[%s5263_s0 + $0x80] ss:$16 sps:$4 sm:$0xff]   ;;  %v3878_v54 = vld [vmem:[%s5263_s0 + $0xa4] ss:$16 sps:$4 sm:$0xff]   ;;  %v3880_v0 = vld [vmem:[%s5263_s0 + $0x88] ss:$16 sps:$4 sm:$0xff]  }
  0x15   :  { %v3881_v57 = vld [vmem:[%s5263_s0 + $0xa0] ss:$16 sps:$4 sm:$0xff]   ;;  %v3884_v58 = vld [vmem:[%s5263_s0 + $0xc4] ss:$16 sps:$4 sm:$0xff]   ;;  %v3882_v1 = vld [vmem:[%s5263_s0 + $0xac] ss:$16 sps:$4 sm:$0xff]  }
  0x16   :  { %v3887_v61 = vld [vmem:[%s5263_s0 + $0xc0] ss:$16 sps:$4 sm:$0xff]   ;;  %v3886_v2 = vld [vmem:[%s5263_s0 + $0xa8] ss:$16 sps:$4 sm:$0xff]   ;;  %v3888_v3 = vld [vmem:[%s5263_s0 + $0xcc] ss:$16 sps:$4 sm:$0xff]  }
  0x17   :  { %3801 = vmatpush3.bf16.msra.mxu1 %v3817_v12  ;;  %3122 = vmatpush3.bf16.msra.mxu0 %v3817_v12  ;;  %v3902_v5 = vld [vmem:[%s5264_s3 + $0x38] sm:$0xff]   ;;  %v3903_v10 = vld [vmem:[%s5264_s3 + $0x30] sm:$0xff]  }
  0x18   :  { %3794 = vmatprep.subr.bf16.mxu1 %v3818_v13  ;;  %3123 = vmatprep.subr.bf16.mxu0 %v3818_v13  ;;  %v3890_v6 = vld [vmem:[%s5263_s0 + $0xc8] ss:$16 sps:$4 sm:$0xff]   ;;  %v3891_v7 = vld [vmem:[%s5263_s0 + $0xec] ss:$16 sps:$4 sm:$0xff]  }
  0x19   :  { %v3893_v8 = vld [vmem:[%s5263_s0 + $0xe8] ss:$16 sps:$4 sm:$0xff]   ;;  %v3894_v9 = vld [vmem:[%s5263_s0 + $0x10c] ss:$16 sps:$4 sm:$0xff]  }
  0x1a   :  { %v3896_v11 = vld [vmem:[%s5263_s0 + $0x108] ss:$16 sps:$4 sm:$0xff]   ;;  %v3897_v12 = vld [vmem:[%s5263_s0 + $0x12c] ss:$16 sps:$4 sm:$0xff]  }
  0x1b   :  { %3802 = vmatpush3.bf16.msra.mxu1 %v3819_v14  ;;  %3124 = vmatpush3.bf16.msra.mxu0 %v3819_v14  ;;  %v3904_v13 = vld [vmem:[%s5264_s3 + $0x28] sm:$0xff]  }
  0x1c   :  { %3795 = vmatprep.subr.bf16.mxu1 %v3820_v15  ;;  %3125 = vmatprep.subr.bf16.mxu0 %v3820_v15  ;;  %v62_v14 = vld [vmem:[%s5263_s0 + $0x148] sm:$0x11] }
  0x1d   :  { %v3899_v15 = vld [vmem:[%s5263_s0 + $0x128] ss:$16 sps:$4 sm:$0xff]  }
  0x1f   :  { %3803 = vmatpush3.bf16.msra.mxu1 %v3821_v16  ;;  %3126 = vmatpush3.bf16.msra.mxu0 %v3821_v16  ;;  %v2860_v16 = vcombine.high %v62_v14, %v62_v14 }
  0x20   :  { %3193 = vmatprep.subr.bf16.mxu1 %v3825_v17  ;;  %3392 = vmatprep.subr.bf16.mxu0 %v3938_v4  ;;  %v3905_v17 = vld [vmem:[%s5264_s3 + $0x18] sm:$0xff]  }
  0x22   :  { %629 = vmatmul.mubr.bf16.vlgmr.msra.gmra.mxu1 %v3822_v18  ;;  %573 = vmatmul.mubr.bf16.vlgmr.msra.gmra.mxu0 %v3844_v22  ;;  %v3906_v18 = vld [vmem:[%s5264_s3 + $0x10] sm:$0xff]   ;;  %v3907_v22 = vld [vmem:[%s5264_s3 + $0x20] sm:$0xff]  }
  0x23   :  { %3194 = vmatpush3.bf16.msra.mxu1 %v3826_v19  ;;  %636 = vmatprep.mubr.bf16.mxu1 %v3829_v20  ;;  %v2859_v19 = vcombine.low %v62_v14, %v62_v14  ;;  %v3908_v20 = vld [vmem:[%s5264_s3 + $0x8] sm:$0xff]  }
  0x24   :  { %3195 = vmatprep.subr.bf16.mxu1 %v3827_v21  ;;  %580 = vmatprep.mubr.bf16.mxu0 %v3855_v29  ;;  %v3909_v21 = vld [vmem:[%s5264_s3] sm:$0xff]  }
  0x25   :  { %3393 = vmatpush3.bf16.msra.mxu0 %v3902_v5 }
  0x26   :  { %3394 = vmatprep.subr.bf16.mxu0 %v3938_v4 }
  0x27   :  { %3196 = vmatpush3.bf16.msra.mxu1 %v3828_v24 }
  0x28   :  { %3197 = vmatprep.subr.bf16.mxu1 %v3832_v25 }
  0x29   :  { %3395 = vmatpush3.bf16.msra.mxu0 %v3903_v10 }
  0x2a   :  { %637 = vmatmul.mubr.bf16.gmra.mxu1 %v3831_v26  ;;  %581 = vmatmul.mubr.bf16.gmra.mxu0 %v3857_v31 }
  0x2b   :  { %3198 = vmatpush3.bf16.msra.mxu1 %v3833_v27  ;;  %644 = vmatprep.mubr.bf16.mxu1 %v3836_v28 }
  0x2c   :  { %3199 = vmatprep.subr.bf16.mxu1 %v3834_v30  ;;  %588 = vmatprep.mubr.bf16.mxu0 %v3860_v33 }
  0x2d   :  { %3396 = vmatprep.subr.bf16.mxu0 %v3938_v4 }
  0x2e   :  { %3397 = vmatpush3.bf16.msra.mxu0 %v3904_v13 }
  0x2f   :  { %3200 = vmatpush3.bf16.msra.mxu1 %v3835_v32  ;;  %3398 = vmatprep.subr.bf16.mxu0 %v3938_v4 }
  0x30   :  { %3201 = vmatprep.subr.bf16.mxu1 %v3839_v34 }
  0x32   :  { %645 = vmatmul.mubr.bf16.gmra.mxu1 %v3838_v36  ;;  %589 = vmatmul.mubr.bf16.gmra.mxu0 %v3863_v40  ;;  %v4239_v36 = vld [vmem:[%s5265_s2] ss:$0 sm:$0xff] }
  0x33   :  { %3202 = vmatpush3.bf16.msra.mxu1 %v3840_v37  ;;  %652 = vmatprep.mubr.bf16.mxu1 %v2858_v38 }
  0x34   :  { %3203 = vmatprep.subr.bf16.mxu1 %v3841_v39  ;;  %596 = vmatprep.mubr.bf16.mxu0 %v3866_v41 }
  0x35   :  { %3399 = vmatpush3.bf16.msra.mxu0 %v3907_v22 }
  0x36   :  { %3480 = vmatprep.subr.bf16.mxu0 %v3938_v4 }
  0x37   :  { %3204 = vmatpush3.bf16.msra.mxu1 %v3842_v42 }
  0x38   :  { %3205 = vmatprep.subr.bf16.mxu1 %v3848_v43 }
  0x3a   :  { %653 = vmatmul.mubr.bf16.gmra.mxu1 %v2857_v44  ;;  %597 = vmatmul.mubr.bf16.gmra.mxu0 %v3869_v48 }
  0x3b   :  { %3206 = vmatpush3.bf16.msra.mxu1 %v3849_v45  ;;  %692 = vmatprep.mubr.bf16.mxu1 %v3854_v46 }
  0x3c   :  { %3207 = vmatprep.subr.bf16.mxu1 %v3850_v47  ;;  %604 = vmatprep.mubr.bf16.mxu0 %v3872_v49 }
  0x3f   :  { %3208 = vmatpush3.bf16.msra.mxu1 %v3851_v50 }
  0x40   :  { %3436 = vmatprep.subr.bf16.mxu1 %v3938_v4 }
  0x42   :  { %693 = vmatmul.mubr.bf16.vlgmr.msra.gmra.mxu1 %v3852_v51  ;;  %605 = vmatmul.mubr.bf16.gmra.mxu0 %v3875_v53 }
  0x43   :  { %700 = vmatprep.mubr.bf16.mxu1 %v3858_v52  ;;  %612 = vmatprep.mubr.bf16.mxu0 %v3878_v54 }
  0x44   :  { %3437 = vmatpush3.bf16.msra.mxu1 %v3905_v17 }
  0x45   :  { %3438 = vmatprep.subr.bf16.mxu1 %v3938_v4 }
  0x48   :  { %3439 = vmatpush3.bf16.msra.mxu1 %v3906_v18 }
  0x49   :  { %3440 = vmatprep.subr.bf16.mxu1 %v3938_v4 }
  0x4a   :  { %701 = vmatmul.mubr.bf16.gmra.mxu1 %v3862_v55  ;;  %613 = vmatmul.mubr.bf16.gmra.mxu0 %v3881_v57 }
  0x4b   :  { %708 = vmatprep.mubr.bf16.mxu1 %v3864_v56  ;;  %620 = vmatprep.mubr.bf16.mxu0 %v3884_v58 }
  0x4c   :  { %3441 = vmatpush3.bf16.msra.mxu1 %v3908_v20 }
  0x4d   :  { %3442 = vmatprep.subr.bf16.mxu1 %v3938_v4 }
  0x50   :  { %3443 = vmatpush3.bf16.msra.mxu1 %v3909_v21 }
  0x51   :  { %3524 = vmatprep.subr.bf16.mxu1 %v3938_v4 }
  0x52   :  { %709 = vmatmul.mubr.bf16.gmra.mxu1 %v3868_v59  ;;  %621 = vmatmul.mubr.bf16.gmra.mxu0 %v3887_v61 }
  0x53   :  { %716 = vmatprep.mubr.bf16.mxu1 %v3870_v60  ;;  %3400 = vmatprep.mubr.msk.bf16.mxu0 %vm3939_vm0, %v3938_v4 }
  0x5a   :  { %717 = vmatmul.mubr.bf16.gmra.mxu1 %v3874_v62 }
  0x5b   :  { %724 = vmatprep.mubr.bf16.mxu1 %v3876_v63 }
  0x62   :  { %725 = vmatmul.mubr.bf16.gmra.mxu1 %v3880_v0 }
  0x63   :  { %732 = vmatprep.mubr.bf16.mxu1 %v3882_v1 }
  0x6a   :  { %733 = vmatmul.mubr.bf16.gmra.mxu1 %v3886_v2 }
  0x6b   :  { %740 = vmatprep.mubr.bf16.mxu1 %v3888_v3 }
  0x72   :  { %741 = vmatmul.mubr.bf16.gmra.mxu1 %v3890_v6 }
  0x73   :  { %748 = vmatprep.mubr.bf16.mxu1 %v3891_v7 }
  0x7a   :  { %749 = vmatmul.mubr.bf16.gmra.mxu1 %v3893_v8 }
  0x7b   :  { %756 = vmatprep.mubr.bf16.mxu1 %v3894_v9 }
  0x82   :  { %757 = vmatmul.mubr.bf16.gmra.mxu1 %v3896_v11 }
  0x83   :  { %764 = vmatprep.mubr.bf16.mxu1 %v3897_v12 }
  0x8a   :  { %765 = vmatmul.mubr.bf16.gmra.mxu1 %v3899_v15 }
  0x8b   :  { %772 = vmatprep.mubr.bf16.mxu1 %v2860_v16 }
  0x92   :  { %773 = vmatmul.mubr.bf16.gmra.mxu1 %v2859_v19 }
  0x93   :  { %3444 = vmatprep.mubr.msk.bf16.mxu1 %vm3939_vm0, %v3938_v4 }
  0xe2   :  { %v3169_v23 = vpop.f32.mrf.mxu1  ;;  %v3127_v26 = vpop.f32.mrf.mxu0 }
  0xe4   :  { %v3170_v24 = vpop.f32.mrf.mxu1  ;;  %v3128_v28 = vpop.f32.mrf.mxu0 }
  0xe5   :  { %v4230_v25 = vadd.f32 %v3170_v24, %v3169_v23  ;;  %v3129_v1 = vadd.f32 %v3128_v28, %v3127_v26 }
  0xe6   :  { %v4232_v27 = vpop.f32.mrf.mxu1  ;;  %v3130_v30 = vpop.f32.mrf.mxu0 }
  0xe7   :  { %v575_v7 = vadd.f32 %v3129_v1, %v4239_v36 }
  0xe8   :  { %v4234_v29 = vpop.f32.mrf.mxu1  ;;  %v3131_v32 = vpop.f32.mrf.mxu0 }
  0xe9   :  { %v3132_v8 = vadd.f32 %v3131_v32, %v3130_v30 }
  0xea   :  { %v3175_v31 = vpop.f32.mrf.mxu1  ;;  %v3133_v35 = vpop.f32.mrf.mxu0 }
  0xeb   :  { %v578_v14 = vadd.f32 %v3132_v8, %v4239_v36 }
  0xec   :  { %v3176_v33 = vpop.f32.mrf.mxu1  ;;  %v3134_v39 = vpop.f32.mrf.mxu0 }
  0xed   :  { %v3177_v34 = vadd.f32 %v3176_v33, %v3175_v31  ;;  %v3135_v16 = vadd.f32 %v3134_v39, %v3133_v35 }
  0xee   :  { %v3178_v37 = vpop.f32.mrf.mxu1  ;;  %v3136_v42 = vpop.f32.mrf.mxu0 }
  0xef   :  { %v4242_v38 = vadd.f32 %v3177_v34, %v4239_v36  ;;  %v583_v22 = vadd.f32 %v3135_v16, %v4239_v36  ;;  %v3911_v16 = vld [vmem:[%s5264_s3 + $0x50] sm:$0xff]  }
  0xf0   :  { %v3179_v40 = vpop.f32.mrf.mxu1  ;;  %v3137_v45 = vpop.f32.mrf.mxu0 }
  0xf1   :  { %v3180_v41 = vadd.f32 %v3179_v40, %v3178_v37  ;;  %v3138_v24 = vadd.f32 %v3137_v45, %v3136_v42 }
  0xf2   :  { %v3181_v43 = vpop.f32.mrf.mxu1  ;;  %v3139_v48 = vpop.f32.mrf.mxu0 }
  0xf3   :  { %v4245_v44 = vadd.f32 %v3180_v41, %v4239_v36  ;;  %v586_v33 = vadd.f32 %v3138_v24, %v4239_v36 }
  0xf4   :  { %v3182_v46 = vpop.f32.mrf.mxu1  ;;  %v3140_v51 = vpop.f32.mrf.mxu0 }
  0xf5   :  { %v3183_v47 = vadd.f32 %v3182_v46, %v3181_v43  ;;  %v3141_v35 = vadd.f32 %v3140_v51, %v3139_v48  ;;  %v3913_v48 = vld [vmem:[%s5264_s3 + $0x78] sm:$0xff]  }
  0xf6   :  { %v3184_v49 = vpop.f32.mrf.mxu1  ;;  %v3142_v54 = vpop.f32.mrf.mxu0 }
  0xf7   :  { %v4248_v50 = vadd.f32 %v3183_v47, %v4239_v36  ;;  %v591_v43 = vadd.f32 %v3141_v35, %v4239_v36 }
  0xf8   :  { %v3185_v52 = vpop.f32.mrf.mxu1  ;;  %v3143_v57 = vpop.f32.mrf.mxu0 }
  0xf9   :  { %v3186_v53 = vadd.f32 %v3185_v52, %v3184_v49  ;;  %v3144_v46 = vadd.f32 %v3143_v57, %v3142_v54 }
  0xfa   :  { %v3187_v55 = vpop.f32.mrf.mxu1  ;;  %v3145_v60 = vpop.f32.mrf.mxu0 }
  0xfb   :  { %v4251_v56 = vadd.f32 %v3186_v53, %v4239_v36 }
  0xfc   :  { %v3188_v58 = vpop.f32.mrf.mxu1  ;;  %v3146_v63 = vpop.f32.mrf.mxu0 }
  0xfd   :  { %v3189_v59 = vadd.f32 %v3188_v58, %v3187_v55  ;;  %v3147_v1 = vadd.f32 %v3146_v63, %v3145_v60 }
  0xfe   :  { %v3190_v61 = vpop.f32.mrf.mxu1  ;;  %v4256_v2 = vpop.f32.mrf.mxu0 }
  0xff   :  { %v4254_v62 = vadd.f32 %v3189_v59, %v4239_v36  ;;  %v594_v61 = vadd.f32 %v3144_v46, %v4239_v36 }
 0x100   :  { %v3191_v0 = vpop.f32.mrf.mxu1  ;;  %v4258_v5 = vpop.f32.mrf.mxu0 }
 0x102   :  { %v3209_v3 = vpop.f32.mrf.mxu1  ;;  %v4261_v11 = vpop.f32.mrf.mxu0 }
 0x104   :  { %v3210_v6 = vpop.f32.mrf.mxu1  ;;  %v4264_v19 = vpop.f32.mrf.mxu0 }
 0x105   :  { %v3211_v9 = vadd.f32 %v3210_v6, %v3209_v3 }
 0x106   :  { %v3212_v10 = vpop.f32.mrf.mxu1  ;;  %v4268_v30 = vpop.f32.mrf.mxu0 }
 0x107   :  { %v695_v12 = vadd.f32 %v3211_v9, %v575_v7  ;;  %v3910_v7 = vld [vmem:[%s5264_s3 + $0x58] sm:$0xff]   ;;  %v3915_v9 = vld [vmem:[%s5264_s3 + $0x70] sm:$0xff]  }
 0x108   :  { %v3213_v13 = vpop.f32.mrf.mxu1  ;;  %v4272_v40 = vpop.f32.mrf.mxu0 }
 0x109   :  { %v780_v15 = vmax.f32 %v695_v12, 0.0  ;;  %v3214_v17 = vadd.f32 %v3213_v13, %v3212_v10  ;;  %v599_v12 = vadd.f32 %v3147_v1, %v4239_v36 }
 0x10a   :  { %v3215_v18 = vpop.f32.mrf.mxu1  ;;  %v4276_v55 = vpop.f32.mrf.mxu0 }
 0x10b   :  { %802 = vst.msk [vmem:[#allocation2] sm:$0xff] %vm801_vm1, %v780_v15  ;;  %v698_v20 = vadd.f32 %v3214_v17, %v578_v14  ;;  %v3150_v14 = vadd.f32 %v4258_v5, %v4256_v2 }
 0x10c   :  { %v3216_v21 = vpop.f32.mrf.mxu1  ;;  %v4291_v8 = vpop.f32.mrf.mxu0 }
 0x10d   :  { %v781_v23 = vmax.f32 %v698_v20, 0.0  ;;  %v3217_v26 = vadd.f32 %v3216_v21, %v3215_v18 }
 0x10e   :  { %v3218_v28 = vpop.f32.mrf.mxu1  ;;  %v4308_v21 = vpop.f32.mrf.mxu0 }
 0x10f   :  { %803 = vst.msk [vmem:[#allocation2 + $0x8] sm:$0xff] %vm801_vm1, %v781_v23  ;;  %v703_v31 = vadd.f32 %v3217_v26, %v583_v22  ;;  %v3916_v23 = vld [vmem:[%s5264_s3 + $0x68] sm:$0xff]  }
 0x110   :  { %v3219_v32 = vpop.f32.mrf.mxu1 }
 0x111   :  { %v782_v34 = vmax.f32 %v703_v31, 0.0  ;;  %v3220_v37 = vadd.f32 %v3219_v32, %v3218_v28  ;;  %v602_v31 = vadd.f32 %v3150_v14, %v4239_v36 }
 0x112   :  { %v3221_v39 = vpop.f32.mrf.mxu1  ;;  %v824_v52 = vld [vmem:[#allocation2] sm:$0xff] }
 0x113   :  { %804 = vst.msk [vmem:[#allocation2 + $0x10] sm:$0xff] %vm801_vm1, %v782_v34  ;;  %v706_v41 = vadd.f32 %v3220_v37, %v586_v33  ;;  %v3153_v33 = vadd.f32 %v4264_v19, %v4261_v11 }
 0x114   :  { %v3222_v42 = vpop.f32.mrf.mxu1 }
 0x115   :  { %v783_v45 = vmax.f32 %v706_v41, 0.0  ;;  %v3223_v47 = vadd.f32 %v3222_v42, %v3221_v39  ;;  %v3161_v41 = vpop.f32.mrf.mxu0  ;;  %v3912_v42 = vld [vmem:[%s5264_s3 + $0x48] sm:$0xff]  }
 0x116   :  { %v3224_v49 = vpop.f32.mrf.mxu1  ;;  %v825_v53 = vld [vmem:[#allocation2 + $0x8] sm:$0xff] }
 0x117   :  { %805 = vst.msk [vmem:[#allocation2 + $0x18] sm:$0xff] %vm801_vm1, %v783_v45  ;;  %v711_v51 = vadd.f32 %v3223_v47, %v591_v43  ;;  %v842_v58 = vpack.c.bf16 %v825_v53, %v824_v52  ;;  %v859_v3 = vld [vmem:[#allocation2 + $0x1] sm:$0xff]  ;;  %v607_v52 = vadd.f32 %v3153_v33, %v4239_v36  ;;  %v3163_v1 = vpop.f32.mrf.mxu0 }
 0x118   :  { %v3225_v59 = vpop.f32.mrf.mxu1  ;;  %v3917_v43 = vld [vmem:[%s5264_s3 + $0x60] sm:$0xff]  }
 0x119   :  { %v784_v0 = vmax.f32 %v711_v51, 0.0  ;;  %v3226_v54 = vadd.f32 %v3225_v59, %v3224_v49  ;;  %3445 = vmatmul.mubr.msk.bf16.vlgmr.msra.gmra.mxu1 %vm801_vm1, %v842_v58  ;;  %v3914_v58 = vld [vmem:[%s5264_s3 + $0x40] sm:$0xff]  }
 0x11a   :  { %v3227_v57 = vpop.f32.mrf.mxu1  ;;  %v4284_v6 = vld [vmem:[#allocation2 + $0x9] sm:$0xff]  ;;  %3448 = vmatprep.mubr.msk.bf16.mxu1 %vm3939_vm0, %v3938_v4  ;;  %3525 = vmatpush3.bf16.msra.mxu1 %v3913_v48  ;;  %v3156_v48 = vadd.f32 %v4272_v40, %v4268_v30 }
 0x11b   :  { %806 = vst.msk [vmem:[#allocation2 + $0x20] sm:$0xff] %vm801_vm1, %v784_v0  ;;  %v714_v60 = vadd.f32 %v3226_v54, %v594_v61  ;;  %v877_v63 = vpack.c.bf16 %v4284_v6, %v859_v3  ;;  %3526 = vmatprep.subr.bf16.mxu1 %v3938_v4  ;;  %v826_v18 = vld [vmem:[#allocation2 + $0x10] sm:$0xff] }
 0x11c   :  { %v3228_v10 = vpop.f32.mrf.mxu1  ;;  %v4317_v24 = vld [vmem:[#allocation2 + $0xa] sm:$0xff] }
 0x11d   :  { %v785_v13 = vmax.f32 %v714_v60, 0.0  ;;  %v3229_v15 = vadd.f32 %v3228_v10, %v3227_v57  ;;  %3401 = vmatmul.mubr.msk.bf16.vlgmr.msra.gmra.mxu0 %vm801_vm1, %v877_v63  ;;  %v610_v60 = vadd.f32 %v3156_v48, %v4239_v36 }
 0x11e   :  { %v3230_v17 = vpop.f32.mrf.mxu1  ;;  %3481 = vmatpush3.bf16.msra.mxu0 %v3910_v7  ;;  %v827_v20 = vld [vmem:[#allocation2 + $0x18] sm:$0xff]  ;;  %3404 = vmatprep.mubr.msk.bf16.mxu0 %vm3939_vm0, %v3938_v4 }
 0x11f   :  { %v4310_v22 = vld [vmem:[#allocation2 + $0x12] sm:$0xff]  ;;  %807 = vst.msk [vmem:[#allocation2 + $0x28] sm:$0xff] %vm801_vm1, %v785_v13  ;;  %v719_v2 = vadd.f32 %v3229_v15, %v599_v12  ;;  %v843_v5 = vpack.c.bf16 %v827_v20, %v826_v18  ;;  %3482 = vmatprep.subr.bf16.mxu0 %v3938_v4  ;;  %3527 = vmatpush3.bf16.msra.mxu1 %v3915_v9  ;;  %v3164_v13 = vpop.f32.mrf.mxu0 }
 0x120   :  { %v3231_v26 = vpop.f32.mrf.mxu1  ;;  %3528 = vmatprep.subr.bf16.mxu1 %v3938_v4  ;;  %v1645_v28 = vpack.c.bf16 %v4310_v22, %v4317_v24  ;;  %v4326_v37 = vld [vmem:[#allocation2 + $0x11] sm:$0xff]  ;;  %v3159_v9 = vadd.f32 %v4291_v8, %v4276_v55 }
 0x121   :  { %v786_v32 = vmax.f32 %v719_v2, 0.0  ;;  %v3232_v34 = vadd.f32 %v3231_v26, %v3230_v17  ;;  %3449 = vmatmul.mubr.msk.bf16.gmra.mxu1 %vm801_vm1, %v843_v5  ;;  %v4342_v45 = vld [vmem:[#allocation2 + $0x13] sm:$0xff]  ;;  %v3166_v33 = vpop.f32.mrf.mxu0 }
 0x122   :  { %v3233_v35 = vpop.f32.mrf.mxu1  ;;  %v4328_v39 = vld [vmem:[#allocation2 + $0x19] sm:$0xff]  ;;  %3452 = vmatprep.mubr.msk.bf16.mxu1 %vm3939_vm0, %v3938_v4  ;;  %3483 = vmatpush3.bf16.msra.mxu0 %v3911_v16  ;;  %v615_v2 = vadd.f32 %v3159_v9, %v4239_v36 }
 0x123   :  { %808 = vst.msk [vmem:[#allocation2 + $0x30] sm:$0xff] %vm801_vm1, %v786_v32  ;;  %v722_v11 = vadd.f32 %v3232_v34, %v602_v31  ;;  %v878_v19 = vpack.c.bf16 %v4328_v39, %v4326_v37  ;;  %3484 = vmatprep.subr.bf16.mxu0 %v3938_v4  ;;  %3529 = vmatpush3.bf16.msra.mxu1 %v3916_v23  ;;  %v4344_v46 = vld [vmem:[#allocation2 + $0x1b] sm:$0xff]  ;;  %v3167_v48 = vpop.f32.mrf.mxu0 }
 0x124   :  { %v3234_v47 = vpop.f32.mrf.mxu1  ;;  %3530 = vmatprep.subr.bf16.mxu1 %v3938_v4  ;;  %v828_v61 = vld [vmem:[#allocation2 + $0x20] sm:$0xff]  ;;  %v3162_v23 = vadd.f32 %v3161_v41, %v4308_v21  ;;  %v3168_v9 = vadd.f32 %v3167_v48, %v3166_v33 }
 0x125   :  { %v787_v53 = vmax.f32 %v722_v11, 0.0  ;;  %v3235_v51 = vadd.f32 %v3234_v47, %v3233_v35  ;;  %3405 = vmatmul.mubr.msk.bf16.gmra.mxu0 %vm801_vm1, %v878_v19  ;;  %v4362_v57 = vld [vmem:[#allocation2 + $0x1a] sm:$0xff] }
 0x126   :  { %v3236_v59 = vpop.f32.mrf.mxu1  ;;  %v829_v0 = vld [vmem:[#allocation2 + $0x28] sm:$0xff]  ;;  %3408 = vmatprep.mubr.msk.bf16.mxu0 %vm3939_vm0, %v3938_v4  ;;  %3485 = vmatpush3.bf16.msra.mxu0 %v3912_v42 }
 0x127   :  { %v4358_v54 = vld [vmem:[#allocation2 + $0x22] sm:$0xff]  ;;  %809 = vst.msk [vmem:[#allocation2 + $0x38] sm:$0xff] %vm801_vm1, %v787_v53  ;;  %v727_v30 = vadd.f32 %v3235_v51, %v607_v52  ;;  %v844_v40 = vpack.c.bf16 %v829_v0, %v828_v61  ;;  %3486 = vmatprep.subr.bf16.mxu0 %v3938_v4  ;;  %3531 = vmatpush3.bf16.msra.mxu1 %v3917_v43 }
 0x128   :  { %v3237_v3 = vpop.f32.mrf.mxu1  ;;  %3612 = vmatprep.subr.bf16.mxu1 %v3938_v4  ;;  %v1646_v7 = vpack.c.bf16 %v4358_v54, %v4362_v57  ;;  %v4371_v14 = vld [vmem:[#allocation2 + $0x21] sm:$0xff]  ;;  %v618_v43 = vadd.f32 %v3162_v23, %v4239_v36  ;;  %v3165_v52 = vadd.f32 %v3164_v13, %v3163_v1 }
 0x129   :  { %v788_v63 = vmax.f32 %v727_v30, 0.0  ;;  %v3238_v10 = vadd.f32 %v3237_v3, %v3236_v59  ;;  %3453 = vmatmul.mubr.msk.bf16.gmra.mxu1 %vm801_vm1, %v844_v40  ;;  %v4381_v55 = vld [vmem:[#allocation2 + $0x23] sm:$0xff] }
 0x12a   :  { %v3239_v12 = vpop.f32.mrf.mxu1  ;;  %v4373_v15 = vld [vmem:[#allocation2 + $0x29] sm:$0xff]  ;;  %3456 = vmatprep.mubr.msk.bf16.mxu1 %vm3939_vm0, %v3938_v4  ;;  %3487 = vmatpush3.bf16.msra.mxu0 %v3914_v58 }
 0x12b   :  { %810 = vst.msk [vmem:[#allocation2 + $0x40] sm:$0xff] %vm801_vm1, %v788_v63  ;;  %v730_v16 = vadd.f32 %v3238_v10, %v610_v60  ;;  %v879_v17 = vpack.c.bf16 %v4373_v15, %v4371_v14  ;;  %3568 = vmatprep.subr.bf16.mxu0 %v3938_v4  ;;  %v4383_v8 = vld [vmem:[#allocation2 + $0x2b] sm:$0xff]  ;;  %v623_v60 = vadd.f32 %v3165_v52, %v4239_v36 }
 0x12c   :  { %v3240_v18 = vpop.f32.mrf.mxu1  ;;  %v830_v31 = vld [vmem:[#allocation2 + $0x30] sm:$0xff] }
 0x12d   :  { %v789_v5 = vmax.f32 %v730_v16, 0.0  ;;  %v3241_v26 = vadd.f32 %v3240_v18, %v3239_v12  ;;  %3409 = vmatmul.mubr.msk.bf16.gmra.mxu0 %vm801_vm1, %v879_v17  ;;  %v4392_v35 = vld [vmem:[#allocation2 + $0x2a] sm:$0xff] }
 0x12e   :  { %v3242_v32 = vpop.f32.mrf.mxu1  ;;  %v831_v34 = vld [vmem:[#allocation2 + $0x38] sm:$0xff]  ;;  %3412 = vmatprep.mubr.msk.bf16.mxu0 %vm3939_vm0, %v3938_v4 }
 0x12f   :  { %v4394_v42 = vld [vmem:[#allocation2 + $0x32] sm:$0xff]  ;;  %811 = vst.msk [vmem:[#allocation2 + $0x48] sm:$0xff] %vm801_vm1, %v789_v5  ;;  %v735_v11 = vadd.f32 %v3241_v26, %v615_v2  ;;  %v845_v19 = vpack.c.bf16 %v831_v34, %v830_v31  ;;  %v626_v31 = vadd.f32 %v3168_v9, %v4239_v36 }
 0x130   :  { %v1647_v21 = vpack.c.bf16 %v4394_v42, %v4392_v35  ;;  %v3243_v41 = vpop.f32.mrf.mxu1  ;;  %v4401_v58 = vld [vmem:[#allocation2 + $0x31] sm:$0xff] }
 0x131   :  { %v790_v47 = vmax.f32 %v735_v11, 0.0  ;;  %v3244_v53 = vadd.f32 %v3243_v41, %v3242_v32  ;;  %3457 = vmatmul.mubr.msk.bf16.gmra.mxu1 %vm801_vm1, %v845_v19  ;;  %v4410_v30 = vld [vmem:[#allocation2 + $0x33] sm:$0xff] }
 0x132   :  { %v3245_v51 = vpop.f32.mrf.mxu1  ;;  %v4403_v59 = vld [vmem:[#allocation2 + $0x39] sm:$0xff]  ;;  %3460 = vmatprep.mubr.msk.bf16.mxu1 %vm3939_vm0, %v3938_v4 }
 0x133   :  { %812 = vst.msk [vmem:[#allocation2 + $0x50] sm:$0xff] %vm801_vm1, %v790_v47  ;;  %v738_v61 = vadd.f32 %v3244_v53, %v618_v43  ;;  %v880_v0 = vpack.c.bf16 %v4403_v59, %v4401_v58  ;;  %v4412_v1 = vld [vmem:[#allocation2 + $0x3b] sm:$0xff] }
 0x134   :  { %v3246_v40 = vpop.f32.mrf.mxu1  ;;  %v832_v12 = vld [vmem:[#allocation2 + $0x40] sm:$0xff] }
 0x135   :  { %v791_v63 = vmax.f32 %v738_v61, 0.0  ;;  %v3247_v10 = vadd.f32 %v3246_v40, %v3245_v51  ;;  %3413 = vmatmul.mubr.msk.bf16.gmra.mxu0 %vm801_vm1, %v880_v0  ;;  %v4420_v17 = vld [vmem:[#allocation2 + $0x3a] sm:$0xff]  ;;  %v631_v51 = vadd.f32 %v4230_v25, %v4239_v36  ;;  %v3174_v61 = vadd.f32 %v4234_v29, %v4232_v27 }
 0x136   :  { %v3248_v13 = vpop.f32.mrf.mxu1  ;;  %v833_v16 = vld [vmem:[#allocation2 + $0x48] sm:$0xff]  ;;  %3416 = vmatprep.mubr.msk.bf16.mxu0 %vm3939_vm0, %v3938_v4 }
 0x137   :  { %v4422_v18 = vld [vmem:[#allocation2 + $0x42] sm:$0xff]  ;;  %813 = vst.msk [vmem:[#allocation2 + $0x58] sm:$0xff] %vm801_vm1, %v791_v63  ;;  %v743_v2 = vadd.f32 %v3247_v10, %v623_v60  ;;  %v846_v5 = vpack.c.bf16 %v833_v16, %v832_v12  ;;  %v634_v16 = vadd.f32 %v3174_v61, %v4239_v36 }
 0x138   :  { %v1648_v23 = vpack.c.bf16 %v4422_v18, %v4420_v17  ;;  %v3249_v26 = vpop.f32.mrf.mxu1  ;;  %v4429_v11 = vld [vmem:[#allocation2 + $0x41] sm:$0xff] }
 0x139   :  { %v792_v32 = vmax.f32 %v743_v2, 0.0  ;;  %v3250_v33 = vadd.f32 %v3249_v26, %v3248_v13  ;;  %3461 = vmatmul.mubr.msk.bf16.gmra.mxu1 %vm801_vm1, %v846_v5  ;;  %v4438_v47 = vld [vmem:[#allocation2 + $0x43] sm:$0xff] }
 0x13a   :  { %v3251_v34 = vpop.f32.mrf.mxu1  ;;  %v4431_v19 = vld [vmem:[#allocation2 + $0x49] sm:$0xff]  ;;  %3464 = vmatprep.mubr.msk.bf16.mxu1 %vm3939_vm0, %v3938_v4 }
 0x13b   :  { %814 = vst.msk [vmem:[#allocation2 + $0x60] sm:$0xff] %vm801_vm1, %v792_v32  ;;  %v746_v41 = vadd.f32 %v3250_v33, %v626_v31  ;;  %v881_v43 = vpack.c.bf16 %v4431_v19, %v4429_v11  ;;  %v4440_v52 = vld [vmem:[#allocation2 + $0x4b] sm:$0xff] }
 0x13c   :  { %v3252_v53 = vpop.f32.mrf.mxu1  ;;  %v834_v60 = vld [vmem:[#allocation2 + $0x50] sm:$0xff] }
 0x13d   :  { %v793_v0 = vmax.f32 %v746_v41, 0.0  ;;  %v3253_v40 = vadd.f32 %v3252_v53, %v3251_v34  ;;  %3417 = vmatmul.mubr.msk.bf16.gmra.mxu0 %vm801_vm1, %v881_v43  ;;  %v4451_v10 = vld [vmem:[#allocation2 + $0x4a] sm:$0xff] }
 0x13e   :  { %v3254_v63 = vpop.f32.mrf.mxu1  ;;  %v835_v9 = vld [vmem:[#allocation2 + $0x58] sm:$0xff]  ;;  %3420 = vmatprep.mubr.msk.bf16.mxu0 %vm3939_vm0, %v3938_v4 }
 0x13f   :  { %v4453_v12 = vld [vmem:[#allocation2 + $0x52] sm:$0xff]  ;;  %815 = vst.msk [vmem:[#allocation2 + $0x68] sm:$0xff] %vm801_vm1, %v793_v0  ;;  %v751_v25 = vadd.f32 %v3253_v40, %v631_v51  ;;  %v847_v13 = vpack.c.bf16 %v835_v9, %v834_v60 }
 0x140   :  { %v1649_v27 = vpack.c.bf16 %v4453_v12, %v4451_v10  ;;  %v3255_v29 = vpop.f32.mrf.mxu1  ;;  %v4460_v31 = vld [vmem:[#allocation2 + $0x51] sm:$0xff] }
 0x141   :  { %v794_v2 = vmax.f32 %v751_v25, 0.0  ;;  %v3256_v5 = vadd.f32 %v3255_v29, %v3254_v63  ;;  %3465 = vmatmul.mubr.msk.bf16.gmra.mxu1 %vm801_vm1, %v847_v13  ;;  %v4469_v41 = vld [vmem:[#allocation2 + $0x53] sm:$0xff] }
 0x142   :  { %v3257_v26 = vpop.f32.mrf.mxu1  ;;  %v4462_v32 = vld [vmem:[#allocation2 + $0x59] sm:$0xff]  ;;  %3468 = vmatprep.mubr.msk.bf16.mxu1 %vm3939_vm0, %v3938_v4 }
 0x143   :  { %816 = vst.msk [vmem:[#allocation2 + $0x70] sm:$0xff] %vm801_vm1, %v794_v2  ;;  %v754_v33 = vadd.f32 %v3256_v5, %v634_v16  ;;  %v882_v34 = vpack.c.bf16 %v4462_v32, %v4460_v31  ;;  %v4471_v36 = vld [vmem:[#allocation2 + $0x5b] sm:$0xff] }
 0x144   :  { %v3258_v43 = vpop.f32.mrf.mxu1  ;;  %v836_v0 = vld [vmem:[#allocation2 + $0x60] sm:$0xff] }
 0x145   :  { %v795_v51 = vmax.f32 %v754_v33, 0.0  ;;  %v3259_v61 = vadd.f32 %v3258_v43, %v3257_v26  ;;  %3421 = vmatmul.mubr.msk.bf16.gmra.mxu0 %vm801_vm1, %v882_v34  ;;  %v4478_v63 = vld [vmem:[#allocation2 + $0x5a] sm:$0xff] }
 0x146   :  { %v3260_v40 = vpop.f32.mrf.mxu1  ;;  %v837_v60 = vld [vmem:[#allocation2 + $0x68] sm:$0xff]  ;;  %3424 = vmatprep.mubr.msk.bf16.mxu0 %vm3939_vm0, %v3938_v4 }
 0x147   :  { %v4480_v9 = vld [vmem:[#allocation2 + $0x62] sm:$0xff]  ;;  %817 = vst.msk [vmem:[#allocation2 + $0x78] sm:$0xff] %vm801_vm1, %v795_v51  ;;  %v759_v25 = vadd.f32 %v3259_v61, %v4242_v38  ;;  %v848_v13 = vpack.c.bf16 %v837_v60, %v836_v0 }
 0x148   :  { %v3261_v16 = vpop.f32.mrf.mxu1  ;;  %v4487_v33 = vld [vmem:[#allocation2 + $0x61] sm:$0xff] }
 0x149   :  { %v796_v2 = vmax.f32 %v759_v25, 0.0  ;;  %v3262_v5 = vadd.f32 %v3261_v16, %v3260_v40  ;;  %3469 = vmatmul.mubr.msk.bf16.gmra.mxu1 %vm801_vm1, %v848_v13  ;;  %v4497_v51 = vld [vmem:[#allocation2 + $0x63] sm:$0xff] }
 0x14a   :  { %v3263_v26 = vpop.f32.mrf.mxu1  ;;  %v4489_v34 = vld [vmem:[#allocation2 + $0x69] sm:$0xff]  ;;  %3472 = vmatprep.mubr.msk.bf16.mxu1 %vm3939_vm0, %v3938_v4 }
 0x14b   :  { %818 = vst.msk [vmem:[#allocation2 + $0x80] sm:$0xff] %vm801_vm1, %v796_v2  ;;  %v762_v38 = vadd.f32 %v3262_v5, %v4245_v44  ;;  %v883_v43 = vpack.c.bf16 %v4489_v34, %v4487_v33  ;;  %v4499_v61 = vld [vmem:[#allocation2 + $0x6b] sm:$0xff] }
 0x14c   :  { %v3264_v0 = vpop.f32.mrf.mxu1  ;;  %v838_v13 = vld [vmem:[#allocation2 + $0x70] sm:$0xff] }
 0x14d   :  { %v797_v60 = vmax.f32 %v762_v38, 0.0  ;;  %v3265_v25 = vadd.f32 %v3264_v0, %v3263_v26  ;;  %3425 = vmatmul.mubr.msk.bf16.gmra.mxu0 %vm801_vm1, %v883_v43  ;;  %v4506_v44 = vld [vmem:[#allocation2 + $0x6a] sm:$0xff] }
 0x14e   :  { %v3266_v16 = vpop.f32.mrf.mxu1  ;;  %v839_v2 = vld [vmem:[#allocation2 + $0x78] sm:$0xff]  ;;  %3428 = vmatprep.mubr.msk.bf16.mxu0 %vm3939_vm0, %v3938_v4 }
 0x14f   :  { %v4508_v5 = vld [vmem:[#allocation2 + $0x72] sm:$0xff]  ;;  %819 = vst.msk [vmem:[#allocation2 + $0x88] sm:$0xff] %vm801_vm1, %v797_v60  ;;  %v767_v53 = vadd.f32 %v3265_v25, %v4248_v50  ;;  %v849_v48 = vpack.c.bf16 %v839_v2, %v838_v13 }
 0x150   :  { %v3267_v38 = vpop.f32.mrf.mxu1  ;;  %v4515_v3 = vld [vmem:[#allocation2 + $0x71] sm:$0xff] }
 0x151   :  { %v798_v43 = vmax.f32 %v767_v53, 0.0  ;;  %v3268_v0 = vadd.f32 %v3267_v38, %v3266_v16  ;;  %3473 = vmatmul.mubr.msk.bf16.gmra.mxu1 %vm801_vm1, %v849_v48  ;;  %v4525_v25 = vld [vmem:[#allocation2 + $0x73] sm:$0xff] }
 0x152   :  { %v3269_v40 = vpop.f32.mrf.mxu1  ;;  %v4517_v20 = vld [vmem:[#allocation2 + $0x79] sm:$0xff]  ;;  %3476 = vmatprep.mubr.msk.bf16.mxu1 %vm3939_vm0, %v3938_v4 }
 0x153   :  { %820 = vst.msk [vmem:[#allocation2 + $0x90] sm:$0xff] %vm801_vm1, %v798_v43  ;;  %v770_v50 = vadd.f32 %v3268_v0, %v4251_v56  ;;  %v884_v60 = vpack.c.bf16 %v4517_v20, %v4515_v3  ;;  %v4527_v53 = vld [vmem:[#allocation2 + $0x7b] sm:$0xff] }
 0x154   :  { %v3270_v48 = vpop.f32.mrf.mxu1  ;;  %v840_v38 = vld [vmem:[#allocation2 + $0x80] sm:$0xff] }
 0x155   :  { %v799_v16 = vmax.f32 %v770_v50, 0.0  ;;  %v3271_v2 = vadd.f32 %v3270_v48, %v3269_v40  ;;  %3429 = vmatmul.mubr.msk.bf16.gmra.mxu0 %vm801_vm1, %v884_v60  ;;  %v4536_v26 = vld [vmem:[#allocation2 + $0x7a] sm:$0xff] }
 0x156   :  { %v841_v49 = vld [vmem:[#allocation2 + $0x88] sm:$0x3f]  ;;  %3432 = vmatprep.mubr.msk.bf16.mxu0 %vm3939_vm0, %v3938_v4  ;;  %v3272_v56 = vpop.f32.mrf.mxu1 }
 0x157   :  { %821 = vst.msk [vmem:[#allocation2 + $0x98] sm:$0xff] %vm801_vm1, %v799_v16  ;;  %v775_v43 = vadd.f32 %v3271_v2, %v4254_v62  ;;  %v850_v0 = vpack.c.bf16 %v841_v49, %v840_v38  ;;  %v4538_v29 = vld [vmem:[#allocation2 + $0x82] sm:$0xff] }
 0x158   :  { %v4540_v50 = vld [vmem:[#allocation2 + $0x81] sm:$0xff]  ;;  %v876_v40 = vld [vmem:[#allocation2 + $0x89] sm:$0x3f]  ;;  %v3273_v60 = vpop.f32.mrf.mxu1  ;;  %v1652_v48 = vpack.c.bf16 %v4538_v29, %v4536_v26 }
 0x159   :  { %v800_v13 = vmax.f32 %v775_v43, 0.0  ;;  %3477 = vmatmul.mubr.msk.bf16.gmra.mxu1 %vm801_vm1, %v850_v0  ;;  %v4547_v62 = vld [vmem:[#allocation2 + $0x83] sm:$0xff]  ;;  %v885_v16 = vpack.c.bf16 %v876_v40, %v4540_v50  ;;  %v3921_v43 = vld [vmem:[%s5264_s3 + $0xb8] sm:$0xff]  }
 0x15a   :  { %3532 = vmatprep.mubr.msk.bf16.mxu1 %vm3939_vm0, %v3938_v4  ;;  %v4549_v49 = vld [vmem:[#allocation2 + $0x8b] sm:$0xff]  ;;  %v1207_v0 = vld [vmem:[#allocation2 + $0x2] sm:$0xff]  ;;  %v3918_v40 = vld [vmem:[%s5264_s3 + $0x98] sm:$0xff]  }
 0x15b   :  { %823 = vst.msk [vmem:[#allocation2 + $0xa0] sm:$0x3] %vm822_vm2, %v800_v13  ;;  %v4552_v2 = vld [vmem:[#allocation2 + $0x8a] sm:$0xff]  ;;  %v2282_v38 = vpack.c.bf16 %v4549_v49, %v4547_v62  ;;  %v1435_v13 = vpack.c.bf16 %v4326_v37, %v4284_v6  ;;  %v1225_v60 = vpack.c.bf16 %v4317_v24, %v1207_v0  ;;  %v1436_v37 = vpack.c.bf16 %v4371_v14, %v4328_v39  ;;  %v3925_v14 = vld [vmem:[%s5264_s3 + $0xa0] sm:$0xff]  }
 0x15c   :  { %v2072_v56 = vpack.c.bf16 %v4552_v2, %v4538_v29  ;;  %v3919_v6 = vld [vmem:[%s5264_s3 + $0x90] sm:$0xff]   ;;  %v4598_v39 = vpack.c.bf16 %v4362_v57, %v4310_v22  ;;  %v3922_v0 = vld [vmem:[%s5264_s3 + $0x80] sm:$0xff]   ;;  %v3932_v22 = vld [vmem:[%s5264_s3 + $0xe8] sm:$0xff]   ;;  %v1859_v57 = vpack.c.bf16 %v4469_v41, %v4440_v52 }
 0x15d   :  { %3433 = vmatmul.mubr.msk.bf16.gmra.mxu0 %vm801_vm1, %v885_v16  ;;  %v3923_v16 = vld [vmem:[%s5264_s3 + $0xb0] sm:$0xff]   ;;  %v3928_v24 = vld [vmem:[%s5264_s3 + $0xc8] sm:$0xff]  }
 0x15e   :  { %3488 = vmatprep.mubr.msk.bf16.mxu0 %vm3939_vm0, %v3938_v4 }
 0x161   :  { %3533 = vmatmul.mubr.msk.bf16.vlgmr.msra.gmra.mxu1 %vm801_vm1, %v1435_v13  ;;  %v3920_v13 = vld [vmem:[%s5264_s3 + $0x88] sm:$0xff]  }
 0x162   :  { %3536 = vmatprep.mubr.msk.bf16.mxu1 %vm3939_vm0, %v3938_v4  ;;  %3613 = vmatpush3.bf16.msra.mxu1 %v3921_v43  ;;  %v3924_v43 = vld [vmem:[%s5264_s3 + $0xa8] sm:$0xff]  }
 0x163   :  { %3614 = vmatprep.subr.bf16.mxu1 %v3938_v4 }
 0x165   :  { %3489 = vmatmul.mubr.msk.bf16.vlgmr.msra.gmra.mxu0 %vm801_vm1, %v1225_v60  ;;  %v4621_v60 = vpack.c.bf16 %v4392_v35, %v4358_v54  ;;  %v1858_v54 = vpack.c.bf16 %v4438_v47, %v4412_v1  ;;  %v5268_v35 = vpack.c.bf16 %v4480_v9, %v4478_v63 }
 0x166   :  { %3569 = vmatpush3.bf16.msra.mxu0 %v3918_v40  ;;  %3492 = vmatprep.mubr.msk.bf16.mxu0 %vm3939_vm0, %v3938_v4  ;;  %v1437_v40 = vpack.c.bf16 %v4401_v58, %v4373_v15  ;;  %v1438_v15 = vpack.c.bf16 %v4429_v11, %v4403_v59  ;;  %v4635_v58 = vpack.c.bf16 %v4420_v17, %v4394_v42 }
 0x167   :  { %3570 = vmatprep.subr.bf16.mxu0 %v3938_v4  ;;  %3615 = vmatpush3.bf16.msra.mxu1 %v3923_v16  ;;  %v1439_v16 = vpack.c.bf16 %v4460_v31, %v4431_v19  ;;  %v4648_v59 = vpack.c.bf16 %v4451_v10, %v4422_v18  ;;  %v1440_v11 = vpack.c.bf16 %v4487_v33, %v4462_v32 }
 0x168   :  { %3616 = vmatprep.subr.bf16.mxu1 %v3938_v4  ;;  %v4661_v19 = vpack.c.bf16 %v4478_v63, %v4453_v12  ;;  %v1441_v31 = vpack.c.bf16 %v4515_v3, %v4489_v34  ;;  %v4674_v32 = vpack.c.bf16 %v4506_v44, %v4480_v9  ;;  %v1442_v33 = vpack.c.bf16 %v4540_v50, %v4517_v20  ;;  %v1433_v34 = vld [vmem:[#allocation2 + $0x89] sm:$0xff] }
 0x169   :  { %3537 = vmatmul.mubr.msk.bf16.gmra.mxu1 %vm801_vm1, %v1436_v37  ;;  %v4687_v3 = vpack.c.bf16 %v4536_v26, %v4508_v5  ;;  %v1837_v50 = vld [vmem:[#allocation2 + $0xb] sm:$0xff]  ;;  %v1861_v42 = vpack.c.bf16 %v4525_v25, %v4499_v61  ;;  %v5269_v10 = vpack.c.bf16 %v4508_v5, %v4506_v44  ;;  %v1862_v9 = vpack.c.bf16 %v4547_v62, %v4527_v53 }
 0x16a   :  { %3540 = vmatprep.mubr.msk.bf16.mxu1 %vm3939_vm0, %v3938_v4  ;;  %3571 = vmatpush3.bf16.msra.mxu0 %v3919_v6  ;;  %v1434_v6 = vld [vmem:[#allocation2 + $0x91] sm:$0x3f] }
 0x16b   :  { %3572 = vmatprep.subr.bf16.mxu0 %v3938_v4  ;;  %3617 = vmatpush3.bf16.msra.mxu1 %v3924_v43  ;;  %v1443_v37 = vpack.c.bf16 %v1434_v6, %v1433_v34  ;;  %v1224_v43 = vld [vmem:[#allocation2 + $0x8a] sm:$0x3f] }
 0x16c   :  { %3618 = vmatprep.subr.bf16.mxu1 %v3938_v4  ;;  %v1233_v20 = vpack.c.bf16 %v1224_v43, %v4538_v29 }
 0x16d   :  { %3493 = vmatmul.mubr.msk.bf16.gmra.mxu0 %vm801_vm1, %v4598_v39 }
 0x16e   :  { %3496 = vmatprep.mubr.msk.bf16.mxu0 %vm3939_vm0, %v3938_v4  ;;  %3573 = vmatpush3.bf16.msra.mxu0 %v3920_v13  ;;  %v3929_v13 = vld [vmem:[%s5264_s3 + $0xf8] sm:$0xff]  }
 0x16f   :  { %3574 = vmatprep.subr.bf16.mxu0 %v3938_v4  ;;  %3619 = vmatpush3.bf16.msra.mxu1 %v3925_v14  ;;  %v1855_v14 = vpack.c.bf16 %v4342_v45, %v1837_v50 }
 0x170   :  { %3700 = vmatprep.subr.bf16.mxu1 %v3938_v4 }
 0x171   :  { %3541 = vmatmul.mubr.msk.bf16.gmra.mxu1 %vm801_vm1, %v1437_v40  ;;  %v3931_v40 = vld [vmem:[%s5264_s3 + $0xf0] sm:$0xff]  }
 0x172   :  { %3544 = vmatprep.mubr.msk.bf16.mxu1 %vm3939_vm0, %v3938_v4  ;;  %3575 = vmatpush3.bf16.msra.mxu0 %v3922_v0  ;;  %v3926_v0 = vld [vmem:[%s5264_s3 + $0xd8] sm:$0xff]  }
 0x173   :  { %3656 = vmatprep.subr.bf16.mxu0 %v3938_v4 }
 0x175   :  { %3497 = vmatmul.mubr.msk.bf16.gmra.mxu0 %vm801_vm1, %v4621_v60 }
 0x176   :  { %3500 = vmatprep.mubr.msk.bf16.mxu0 %vm3939_vm0, %v3938_v4 }
 0x179   :  { %3545 = vmatmul.mubr.msk.bf16.gmra.mxu1 %vm801_vm1, %v1438_v15  ;;  %v3927_v15 = vld [vmem:[%s5264_s3 + $0xd0] sm:$0xff]  }
 0x17a   :  { %3548 = vmatprep.mubr.msk.bf16.mxu1 %vm3939_vm0, %v3938_v4 }
 0x17d   :  { %3501 = vmatmul.mubr.msk.bf16.gmra.mxu0 %vm801_vm1, %v4635_v58 }
 0x17e   :  { %3504 = vmatprep.mubr.msk.bf16.mxu0 %vm3939_vm0, %v3938_v4 }
 0x181   :  { %3549 = vmatmul.mubr.msk.bf16.gmra.mxu1 %vm801_vm1, %v1439_v16  ;;  %v1856_v16 = vpack.c.bf16 %v4381_v55, %v4344_v46 }
 0x182   :  { %3552 = vmatprep.mubr.msk.bf16.mxu1 %vm3939_vm0, %v3938_v4 }
 0x185   :  { %3505 = vmatmul.mubr.msk.bf16.gmra.mxu0 %vm801_vm1, %v4648_v59 }
 0x186   :  { %3508 = vmatprep.mubr.msk.bf16.mxu0 %vm3939_vm0, %v3938_v4 }
 0x189   :  { %3553 = vmatmul.mubr.msk.bf16.gmra.mxu1 %vm801_vm1, %v1440_v11  ;;  %v3930_v11 = vld [vmem:[%s5264_s3 + $0xc0] sm:$0xff]  }
 0x18a   :  { %3556 = vmatprep.mubr.msk.bf16.mxu1 %vm3939_vm0, %v3938_v4 }
 0x18d   :  { %3509 = vmatmul.mubr.msk.bf16.gmra.mxu0 %vm801_vm1, %v4661_v19 }
 0x18e   :  { %3512 = vmatprep.mubr.msk.bf16.mxu0 %vm3939_vm0, %v3938_v4 }
 0x191   :  { %3557 = vmatmul.mubr.msk.bf16.gmra.mxu1 %vm801_vm1, %v1441_v31  ;;  %v1857_v31 = vpack.c.bf16 %v4410_v30, %v4383_v8 }
 0x192   :  { %3560 = vmatprep.mubr.msk.bf16.mxu1 %vm3939_vm0, %v3938_v4 }
 0x195   :  { %3513 = vmatmul.mubr.msk.bf16.gmra.mxu0 %vm801_vm1, %v4674_v32 }
 0x196   :  { %3516 = vmatprep.mubr.msk.bf16.mxu0 %vm3939_vm0, %v3938_v4 }
 0x199   :  { %3561 = vmatmul.mubr.msk.bf16.gmra.mxu1 %vm801_vm1, %v1442_v33 }
 0x19a   :  { %3564 = vmatprep.mubr.msk.bf16.mxu1 %vm3939_vm0, %v3938_v4 }
 0x19d   :  { %3517 = vmatmul.mubr.msk.bf16.gmra.mxu0 %vm801_vm1, %v4687_v3 }
 0x19e   :  { %3520 = vmatprep.mubr.msk.bf16.mxu0 %vm3939_vm0, %v3938_v4 }
 0x1a1   :  { %3565 = vmatmul.mubr.msk.bf16.gmra.mxu1 %vm801_vm1, %v1443_v37  ;;  %v1854_v37 = vld [vmem:[#allocation2 + $0x93] sm:$0x3f] }
 0x1a2   :  { %3620 = vmatprep.mubr.msk.bf16.mxu1 %vm3939_vm0, %v3938_v4 }
 0x1a5   :  { %3521 = vmatmul.mubr.msk.bf16.gmra.mxu0 %vm801_vm1, %v1233_v20 }
 0x1a6   :  { %3576 = vmatprep.mubr.msk.bf16.mxu0 %vm3939_vm0, %v3938_v4 }
 0x1a9   :  { %3621 = vmatmul.mubr.msk.bf16.vlgmr.msra.gmra.mxu1 %vm801_vm1, %v1855_v14 }
 0x1aa   :  { %3624 = vmatprep.mubr.msk.bf16.mxu1 %vm3939_vm0, %v3938_v4  ;;  %3701 = vmatpush3.bf16.msra.mxu1 %v3929_v13 }
 0x1ab   :  { %3702 = vmatprep.subr.bf16.mxu1 %v3938_v4 }
 0x1ad   :  { %3577 = vmatmul.mubr.msk.bf16.vlgmr.msra.gmra.mxu0 %vm801_vm1, %v1645_v28  ;;  %v3933_v28 = vld [vmem:[%s5264_s3 + $0xe0] sm:$0xff]  }
 0x1ae   :  { %3657 = vmatpush3.bf16.msra.mxu0 %v3926_v0  ;;  %3580 = vmatprep.mubr.msk.bf16.mxu0 %vm3939_vm0, %v3938_v4  ;;  %v1863_v0 = vpack.c.bf16 %v1854_v37, %v4549_v49  ;;  %v2273_v49 = vld [vmem:[#allocation2 + $0x93] sm:$0xff] }
 0x1af   :  { %3658 = vmatprep.subr.bf16.mxu0 %v3938_v4  ;;  %3703 = vmatpush3.bf16.msra.mxu1 %v3931_v40  ;;  %v1644_v40 = vld [vmem:[#allocation2 + $0x92] sm:$0x3f] }
 0x1b0   :  { %3704 = vmatprep.subr.bf16.mxu1 %v3938_v4 }
 0x1b1   :  { %3625 = vmatmul.mubr.msk.bf16.gmra.mxu1 %vm801_vm1, %v1856_v16 }
 0x1b2   :  { %3628 = vmatprep.mubr.msk.bf16.mxu1 %vm3939_vm0, %v3938_v4  ;;  %3659 = vmatpush3.bf16.msra.mxu0 %v3927_v15 }
 0x1b3   :  { %3660 = vmatprep.subr.bf16.mxu0 %v3938_v4  ;;  %3705 = vmatpush3.bf16.msra.mxu1 %v3932_v22 }
 0x1b4   :  { %3706 = vmatprep.subr.bf16.mxu1 %v3938_v4 }
 0x1b5   :  { %3581 = vmatmul.mubr.msk.bf16.gmra.mxu0 %vm801_vm1, %v1646_v7  ;;  %v1860_v7 = vpack.c.bf16 %v4497_v51, %v4471_v36 }
 0x1b6   :  { %3584 = vmatprep.mubr.msk.bf16.mxu0 %vm3939_vm0, %v3938_v4  ;;  %3661 = vmatpush3.bf16.msra.mxu0 %v3928_v24  ;;  %v1653_v24 = vpack.c.bf16 %v1644_v40, %v4552_v2 }
 0x1b7   :  { %3662 = vmatprep.subr.bf16.mxu0 %v3938_v4  ;;  %3707 = vmatpush3.bf16.msra.mxu1 %v3933_v28 }
 0x1b9   :  { %3629 = vmatmul.mubr.msk.bf16.gmra.mxu1 %vm801_vm1, %v1857_v31 }
 0x1ba   :  { %3632 = vmatprep.mubr.msk.bf16.mxu1 %vm3939_vm0, %v3938_v4  ;;  %3663 = vmatpush3.bf16.msra.mxu0 %v3930_v11 }
 0x1bb   :  { %3744 = vmatprep.subr.bf16.mxu0 %v3938_v4 }
 0x1bd   :  { %3585 = vmatmul.mubr.msk.bf16.gmra.mxu0 %vm801_vm1, %v1647_v21 }
 0x1be   :  { %3588 = vmatprep.mubr.msk.bf16.mxu0 %vm3939_vm0, %v3938_v4 }
 0x1c1   :  { %3633 = vmatmul.mubr.msk.bf16.gmra.mxu1 %vm801_vm1, %v1858_v54 }
 0x1c2   :  { %3636 = vmatprep.mubr.msk.bf16.mxu1 %vm3939_vm0, %v3938_v4 }
 0x1c5   :  { %3589 = vmatmul.mubr.msk.bf16.gmra.mxu0 %vm801_vm1, %v1648_v23 }
 0x1c6   :  { %3592 = vmatprep.mubr.msk.bf16.mxu0 %vm3939_vm0, %v3938_v4 }
 0x1c9   :  { %3637 = vmatmul.mubr.msk.bf16.gmra.mxu1 %vm801_vm1, %v1859_v57 }
 0x1ca   :  { %3640 = vmatprep.mubr.msk.bf16.mxu1 %vm3939_vm0, %v3938_v4 }
 0x1cd   :  { %3593 = vmatmul.mubr.msk.bf16.gmra.mxu0 %vm801_vm1, %v1649_v27 }
 0x1ce   :  { %3596 = vmatprep.mubr.msk.bf16.mxu0 %vm3939_vm0, %v3938_v4 }
 0x1d1   :  { %3641 = vmatmul.mubr.msk.bf16.gmra.mxu1 %vm801_vm1, %v1860_v7 }
 0x1d2   :  { %3644 = vmatprep.mubr.msk.bf16.mxu1 %vm3939_vm0, %v3938_v4 }
 0x1d5   :  { %3597 = vmatmul.mubr.msk.bf16.gmra.mxu0 %vm801_vm1, %v5268_v35 }
 0x1d6   :  { %3600 = vmatprep.mubr.msk.bf16.mxu0 %vm3939_vm0, %v3938_v4 }
 0x1d9   :  { %v1136_v21 = vpop.f32.mrf.mxu1  ;;  %3645 = vmatmul.mubr.msk.bf16.gmra.mxu1 %vm801_vm1, %v1861_v42  ;;  %v5270_v42 = vpack.c.bf16 %v4344_v46, %v4342_v45  ;;  %v3935_v45 = vld [vmem:[%s5264_s3 + $0x110] sm:$0xff]  }
 0x1da   :  { %3648 = vmatprep.mubr.msk.bf16.mxu1 %vm3939_vm0, %v3938_v4 }
 0x1db   :  { %v3446_v17 = vpop.f32.mrf.mxu1 }
 0x1dc   :  { %v3934_v17 = vld [vmem:[%s5264_s3 + $0x118] sm:$0xff]  }
 0x1dd   :  { %v980_v18 = vpop.f32.mrf.mxu0  ;;  %v1139_v23 = vpop.f32.mrf.mxu1  ;;  %3601 = vmatmul.mubr.msk.bf16.gmra.mxu0 %vm801_vm1, %v5269_v10 }
 0x1de   :  { %v4805_v12 = vadd.f32 %v1136_v21, %v980_v18  ;;  %3604 = vmatprep.mubr.msk.bf16.mxu0 %vm3939_vm0, %v3938_v4 }
 0x1df   :  { %v3402_v27 = vpop.f32.mrf.mxu0  ;;  %v3447_v63 = vpop.f32.mrf.mxu1 }
 0x1e1   :  { %v983_v33 = vpop.f32.mrf.mxu0  ;;  %v1144_v34 = vpop.f32.mrf.mxu1  ;;  %3649 = vmatmul.mubr.msk.bf16.gmra.mxu1 %vm801_vm1, %v1862_v9 }
 0x1e2   :  { %v4812_v6 = vadd.f32 %v1139_v23, %v983_v33  ;;  %3652 = vmatprep.mubr.msk.bf16.mxu1 %vm3939_vm0, %v3938_v4 }
 0x1e3   :  { %v3403_v44 = vpop.f32.mrf.mxu0  ;;  %v3450_v5 = vpop.f32.mrf.mxu1 }
 0x1e4   :  { %v5271_v44 = vpack.c.bf16 %v4383_v8, %v4381_v55  ;;  %v3936_v5 = vld [vmem:[%s5264_s3 + $0x108] sm:$0xff]   ;;  %v3937_v8 = vld [vmem:[%s5264_s3 + $0x100] sm:$0xff]  }
 0x1e5   :  { %v988_v43 = vpop.f32.mrf.mxu0  ;;  %v1147_v20 = vpop.f32.mrf.mxu1  ;;  %3605 = vmatmul.mubr.msk.bf16.gmra.mxu0 %vm801_vm1, %v1652_v48 }
 0x1e6   :  { %v4820_v50 = vadd.f32 %v1144_v34, %v988_v43  ;;  %3608 = vmatprep.mubr.msk.bf16.mxu0 %vm3939_vm0, %v3938_v4 }
 0x1e7   :  { %v3406_v13 = vpop.f32.mrf.mxu0  ;;  %v3451_v14 = vpop.f32.mrf.mxu1 }
 0x1e9   :  { %v991_v15 = vpop.f32.mrf.mxu0  ;;  %v1152_v16 = vpop.f32.mrf.mxu1  ;;  %3653 = vmatmul.mubr.msk.bf16.gmra.mxu1 %vm801_vm1, %v1863_v0 }
 0x1ea   :  { %v4826_v22 = vadd.f32 %v1147_v20, %v991_v15  ;;  %3708 = vmatprep.mubr.msk.bf16.mxu1 %vm3939_vm0, %v3938_v4 }
 0x1eb   :  { %v3407_v26 = vpop.f32.mrf.mxu0  ;;  %v3454_v48 = vpop.f32.mrf.mxu1 }
 0x1ed   :  { %v996_v28 = vpop.f32.mrf.mxu0  ;;  %v1155_v11 = vpop.f32.mrf.mxu1  ;;  %3609 = vmatmul.mubr.msk.bf16.gmra.mxu0 %vm801_vm1, %v1653_v24 }
 0x1ee   :  { %v4832_v31 = vadd.f32 %v1152_v16, %v996_v28  ;;  %3664 = vmatprep.mubr.msk.bf16.mxu0 %vm3939_vm0, %v3938_v4  ;;  %v5272_v16 = vpack.c.bf16 %v4412_v1, %v4410_v30 }
 0x1ef   :  { %v3410_v54 = vpop.f32.mrf.mxu0  ;;  %v3455_v57 = vpop.f32.mrf.mxu1 }
 0x1f1   :  { %v999_v7 = vpop.f32.mrf.mxu0  ;;  %v1160_v35 = vpop.f32.mrf.mxu1  ;;  %3709 = vmatmul.mubr.msk.bf16.vlgmr.msra.gmra.mxu1 %vm801_vm1, %v5270_v42 }
 0x1f2   :  { %v4840_v21 = vadd.f32 %v1155_v11, %v999_v7  ;;  %3712 = vmatprep.mubr.msk.bf16.mxu1 %vm3939_vm0, %v3938_v4  ;;  %v5273_v7 = vpack.c.bf16 %v4440_v52, %v4438_v47 }
 0x1f3   :  { %v3411_v18 = vpop.f32.mrf.mxu0  ;;  %v3458_v23 = vpop.f32.mrf.mxu1 }
 0x1f5   :  { %v1004_v10 = vpop.f32.mrf.mxu0  ;;  %v1163_v27 = vpop.f32.mrf.mxu1  ;;  %3665 = vmatmul.mubr.msk.bf16.vlgmr.msra.gmra.mxu0 %vm801_vm1, %v4598_v39 }
 0x1f6   :  { %v4849_v63 = vadd.f32 %v1160_v35, %v1004_v10  ;;  %3745 = vmatpush3.bf16.msra.mxu0 %v3934_v17  ;;  %3668 = vmatprep.mubr.msk.bf16.mxu0 %vm3939_vm0, %v3938_v4 }
 0x1f7   :  { %v3414_v46 = vpop.f32.mrf.mxu0  ;;  %v3459_v9 = vpop.f32.mrf.mxu1  ;;  %3746 = vmatprep.subr.bf16.mxu0 %v3938_v4 }
 0x1f9   :  { %v1007_v33 = vpop.f32.mrf.mxu0  ;;  %v1168_v34 = vpop.f32.mrf.mxu1  ;;  %3713 = vmatmul.mubr.msk.bf16.gmra.mxu1 %vm801_vm1, %v5271_v44 }
 0x1fa   :  { %v4861_v39 = vadd.f32 %v1163_v27, %v1007_v33  ;;  %3716 = vmatprep.mubr.msk.bf16.mxu1 %vm3939_vm0, %v3938_v4  ;;  %3747 = vmatpush3.bf16.msra.mxu0 %v3935_v45  ;;  %v5274_v45 = vpack.c.bf16 %v4471_v36, %v4469_v41 }
 0x1fb   :  { %v3415_v37 = vpop.f32.mrf.mxu0  ;;  %v3462_v43 = vpop.f32.mrf.mxu1  ;;  %3748 = vmatprep.subr.bf16.mxu0 %v3938_v4 }
 0x1fc   :  { %v5275_v43 = vpack.c.bf16 %v4499_v61, %v4497_v51 }
 0x1fd   :  { %v1012_v20 = vpop.f32.mrf.mxu0  ;;  %v1171_v13 = vpop.f32.mrf.mxu1  ;;  %3669 = vmatmul.mubr.msk.bf16.gmra.mxu0 %vm801_vm1, %v4621_v60 }
 0x1fe   :  { %v4871_v55 = vadd.f32 %v1168_v34, %v1012_v20  ;;  %3672 = vmatprep.mubr.msk.bf16.mxu0 %vm3939_vm0, %v3938_v4  ;;  %3749 = vmatpush3.bf16.msra.mxu0 %v3936_v5 }
 0x1ff   :  { %v3418_v14 = vpop.f32.mrf.mxu0  ;;  %v3463_v0 = vpop.f32.mrf.mxu1  ;;  %3750 = vmatprep.subr.bf16.mxu0 %v3938_v4 }
 0x201   :  { %v1015_v40 = vpop.f32.mrf.mxu0  ;;  %v1176_v15 = vpop.f32.mrf.mxu1  ;;  %3717 = vmatmul.mubr.msk.bf16.gmra.mxu1 %vm801_vm1, %v5272_v16  ;;  %v5276_v16 = vpack.c.bf16 %v4527_v53, %v4525_v25 }
 0x202   :  { %v4883_v60 = vadd.f32 %v1171_v13, %v1015_v40  ;;  %3720 = vmatprep.mubr.msk.bf16.mxu1 %vm3939_vm0, %v3938_v4  ;;  %3751 = vmatpush3.bf16.msra.mxu0 %v3937_v8 }
 0x203   :  { %v3419_v26 = vpop.f32.mrf.mxu0  ;;  %v3466_v48 = vpop.f32.mrf.mxu1 }
 0x205   :  { %v1020_v24 = vpop.f32.mrf.mxu0  ;;  %v1179_v28 = vpop.f32.mrf.mxu1  ;;  %3673 = vmatmul.mubr.msk.bf16.gmra.mxu0 %vm801_vm1, %v4635_v58 }
 0x206   :  { %v4889_v11 = vadd.f32 %v1176_v15, %v1020_v24  ;;  %3676 = vmatprep.mubr.msk.bf16.mxu0 %vm3939_vm0, %v3938_v4 }
 0x207   :  { %v3422_v30 = vpop.f32.mrf.mxu0  ;;  %v3467_v1 = vpop.f32.mrf.mxu1 }
 0x209   :  { %v1023_v54 = vpop.f32.mrf.mxu0  ;;  %v1184_v57 = vpop.f32.mrf.mxu1  ;;  %3721 = vmatmul.mubr.msk.bf16.gmra.mxu1 %vm801_vm1, %v5273_v7 }
 0x20a   :  { %v4897_v35 = vadd.f32 %v1179_v28, %v1023_v54  ;;  %3724 = vmatprep.mubr.msk.bf16.mxu1 %vm3939_vm0, %v3938_v4 }
 0x20b   :  { %v3423_v58 = vpop.f32.mrf.mxu0  ;;  %v3470_v42 = vpop.f32.mrf.mxu1 }
 0x20c   :  { %v2274_v58 = vld [vmem:[#allocation2 + $0x9b] sm:$0x3f] }
 0x20d   :  { %v1028_v17 = vpop.f32.mrf.mxu0  ;;  %v1187_v18 = vpop.f32.mrf.mxu1  ;;  %3677 = vmatmul.mubr.msk.bf16.gmra.mxu0 %vm801_vm1, %v4648_v59 }
 0x20e   :  { %v4903_v23 = vadd.f32 %v1184_v57, %v1028_v17  ;;  %3680 = vmatprep.mubr.msk.bf16.mxu0 %vm3939_vm0, %v3938_v4 }
 0x20f   :  { %v3426_v47 = vpop.f32.mrf.mxu0  ;;  %v3471_v52 = vpop.f32.mrf.mxu1 }
 0x210   :  { %v2283_v47 = vpack.c.bf16 %v2274_v58, %v2273_v49  ;;  %v2063_v52 = vld [vmem:[#allocation2 + $0x92] sm:$0xff] }
 0x211   :  { %v1031_v10 = vpop.f32.mrf.mxu0  ;;  %v1192_v27 = vpop.f32.mrf.mxu1  ;;  %3725 = vmatmul.mubr.msk.bf16.gmra.mxu1 %vm801_vm1, %v5274_v45 }
 0x212   :  { %v4911_v46 = vadd.f32 %v1187_v18, %v1031_v10  ;;  %3728 = vmatprep.mubr.msk.bf16.mxu1 %vm3939_vm0, %v3938_v4  ;;  %v2064_v10 = vld [vmem:[#allocation2 + $0x9a] sm:$0x3f] }
 0x213   :  { %v3427_v59 = vpop.f32.mrf.mxu0  ;;  %v3474_v9 = vpop.f32.mrf.mxu1 }
 0x215   :  { %v1036_v33 = vpop.f32.mrf.mxu0  ;;  %v1195_v34 = vpop.f32.mrf.mxu1  ;;  %3681 = vmatmul.mubr.msk.bf16.gmra.mxu0 %vm801_vm1, %v4661_v19 }
 0x216   :  { %v4917_v44 = vadd.f32 %v1192_v27, %v1036_v33  ;;  %3684 = vmatprep.mubr.msk.bf16.mxu0 %vm3939_vm0, %v3938_v4 }
 0x217   :  { %v3430_v41 = vpop.f32.mrf.mxu0  ;;  %v3475_v36 = vpop.f32.mrf.mxu1 }
 0x219   :  { %v1039_v5 = vpop.f32.mrf.mxu0  ;;  %v1200_v37 = vpop.f32.mrf.mxu1  ;;  %3729 = vmatmul.mubr.msk.bf16.gmra.mxu1 %vm801_vm1, %v5275_v43 }
 0x21a   :  { %v4925_v20 = vadd.f32 %v1195_v34, %v1039_v5  ;;  %3732 = vmatprep.mubr.msk.bf16.mxu1 %vm3939_vm0, %v3938_v4 }
 0x21b   :  { %v3431_v19 = vpop.f32.mrf.mxu0  ;;  %v3478_v13 = vpop.f32.mrf.mxu1 }
 0x21d   :  { %v1044_v8 = vpop.f32.mrf.mxu0  ;;  %v1203_v14 = vpop.f32.mrf.mxu1  ;;  %3685 = vmatmul.mubr.msk.bf16.gmra.mxu0 %vm801_vm1, %v4674_v32 }
 0x21e   :  { %v4931_v0 = vadd.f32 %v1200_v37, %v1044_v8  ;;  %3688 = vmatprep.mubr.msk.bf16.mxu0 %vm3939_vm0, %v3938_v4  ;;  %v2468_v37 = vld [vmem:[#allocation2 + $0x1c] sm:$0xff]  ;;  %v2467_v8 = vld [vmem:[#allocation2 + $0x14] sm:$0xff] }
 0x21f   :  { %v3434_v51 = vpop.f32.mrf.mxu0  ;;  %v3479_v61 = vpop.f32.mrf.mxu1 }
 0x220   :  { %v2485_v61 = vpack.c.bf16 %v2468_v37, %v2467_v8 }
 0x221   :  { %v1047_v40 = vpop.f32.mrf.mxu0  ;;  %v1538_v15 = vpop.f32.mrf.mxu1  ;;  %3733 = vmatmul.mubr.msk.bf16.gmra.mxu1 %vm801_vm1, %v5276_v16 }
 0x222   :  { %v4939_v26 = vadd.f32 %v1203_v14, %v1047_v40  ;;  %3736 = vmatprep.mubr.msk.bf16.mxu1 %vm3939_vm0, %v3938_v4 }
 0x223   :  { %v3435_v32 = vpop.f32.mrf.mxu0  ;;  %v3534_v48 = vpop.f32.mrf.mxu1 }
 0x225   :  { %v1328_v24 = vpop.f32.mrf.mxu0  ;;  %v1541_v28 = vpop.f32.mrf.mxu1  ;;  %3689 = vmatmul.mubr.msk.bf16.gmra.mxu0 %vm801_vm1, %v4687_v3 }
 0x226   :  { %v1399_v30 = vadd.f32 %v1328_v24, %v4805_v12  ;;  %3692 = vmatprep.mubr.msk.bf16.mxu0 %vm3939_vm0, %v3938_v4  ;;  %v2470_v24 = vld [vmem:[#allocation2 + $0x2c] sm:$0xff] }
 0x227   :  { %v3490_v25 = vpop.f32.mrf.mxu0  ;;  %v3535_v53 = vpop.f32.mrf.mxu1 }
 0x228   :  { %v4948_v1 = vadd.f32 %v1538_v15, %v1399_v30  ;;  %v2469_v53 = vld [vmem:[#allocation2 + $0x24] sm:$0xff] }
 0x229   :  { %v1331_v54 = vpop.f32.mrf.mxu0  ;;  %v1546_v57 = vpop.f32.mrf.mxu1  ;;  %3737 = vmatmul.mubr.msk.bf16.gmra.mxu1 %vm801_vm1, %v2282_v38 }
 0x22a   :  { %v1400_v7 = vadd.f32 %v1331_v54, %v4812_v6  ;;  %3740 = vmatprep.mubr.msk.bf16.mxu1 %vm3939_vm0, %v3938_v4 }
 0x22b   :  { %v3491_v3 = vpop.f32.mrf.mxu0  ;;  %v3538_v12 = vpop.f32.mrf.mxu1 }
 0x22c   :  { %v4957_v42 = vadd.f32 %v1541_v28, %v1400_v7  ;;  %v2486_v7 = vpack.c.bf16 %v2470_v24, %v2469_v53 }
 0x22d   :  { %v1336_v17 = vpop.f32.mrf.mxu0  ;;  %v1549_v18 = vpop.f32.mrf.mxu1  ;;  %3693 = vmatmul.mubr.msk.bf16.gmra.mxu0 %vm801_vm1, %v2072_v56 }
 0x22e   :  { %v1401_v62 = vadd.f32 %v1336_v17, %v4820_v50  ;;  %3696 = vmatprep.mubr.msk.bf16.mxu0 %vm3939_vm0, %v3938_v4  ;;  %v2073_v50 = vpack.c.bf16 %v2064_v10, %v2063_v52 }
 0x22f   :  { %v3494_v38 = vpop.f32.mrf.mxu0  ;;  %v3539_v6 = vpop.f32.mrf.mxu1 }
 0x230   :  { %v4966_v27 = vadd.f32 %v1546_v57, %v1401_v62  ;;  %v2472_v62 = vld [vmem:[#allocation2 + $0x3c] sm:$0xff] }
 0x231   :  { %v1339_v45 = vpop.f32.mrf.mxu0  ;;  %v1554_v59 = vpop.f32.mrf.mxu1  ;;  %3741 = vmatmul.mubr.msk.bf16.gmra.mxu1 %vm801_vm1, %v2283_v47  ;;  %v2471_v47 = vld [vmem:[#allocation2 + $0x34] sm:$0xff] }
 0x232   :  { %v1402_v29 = vadd.f32 %v1339_v45, %v4826_v22  ;;  %v2487_v45 = vpack.c.bf16 %v2472_v62, %v2471_v47 }
 0x233   :  { %v3495_v2 = vpop.f32.mrf.mxu0  ;;  %v3542_v56 = vpop.f32.mrf.mxu1 }
 0x234   :  { %v4970_v9 = vadd.f32 %v1549_v18, %v1402_v29 }
 0x235   :  { %v1344_v33 = vpop.f32.mrf.mxu0  ;;  %v1557_v34 = vpop.f32.mrf.mxu1  ;;  %3697 = vmatmul.mubr.msk.bf16.gmra.mxu0 %vm801_vm1, %v2073_v50 }
 0x236   :  { %v1403_v41 = vadd.f32 %v1344_v33, %v4832_v31  ;;  %3752 = vmatprep.mubr.msk.bf16.mxu0 %vm3939_vm0, %v3938_v4  ;;  %v2474_v33 = vld [vmem:[#allocation2 + $0x4c] sm:$0xff] }
 0x237   :  { %v3498_v36 = vpop.f32.mrf.mxu0  ;;  %v3543_v5 = vpop.f32.mrf.mxu1 }
 0x238   :  { %v4976_v43 = vadd.f32 %v1554_v59, %v1403_v41  ;;  %v2473_v5 = vld [vmem:[#allocation2 + $0x44] sm:$0xff] }
 0x239   :  { %v1347_v22 = vpop.f32.mrf.mxu0  ;;  %v1562_v19 = vpop.f32.mrf.mxu1 }
 0x23a   :  { %v1404_v13 = vadd.f32 %v1347_v22, %v4840_v21 }
 0x23b   :  { %v3499_v14 = vpop.f32.mrf.mxu0  ;;  %v3546_v51 = vpop.f32.mrf.mxu1 }
 0x23c   :  { %v4979_v40 = vadd.f32 %v1557_v34, %v1404_v13 }
 0x23d   :  { %v1352_v15 = vpop.f32.mrf.mxu0  ;;  %v1565_v31 = vpop.f32.mrf.mxu1  ;;  %3753 = vmatmul.mubr.msk.bf16.vlgmr.msra.gmra.mxu0 %vm801_vm1, %v2485_v61 }
 0x23e   :  { %v1405_v16 = vadd.f32 %v1352_v15, %v4849_v63  ;;  %3756 = vmatprep.mubr.msk.bf16.mxu0 %vm3939_vm0, %v3938_v4  ;;  %v2476_v15 = vld [vmem:[#allocation2 + $0x5c] sm:$0xff] }
 0x23f   :  { %v3502_v32 = vpop.f32.mrf.mxu0  ;;  %v3547_v48 = vpop.f32.mrf.mxu1 }
 0x240   :  { %v4985_v28 = vadd.f32 %v1562_v19, %v1405_v16  ;;  %v2488_v19 = vpack.c.bf16 %v2474_v33, %v2473_v5  ;;  %v2475_v48 = vld [vmem:[#allocation2 + $0x54] sm:$0xff] }
 0x241   :  { %v1355_v21 = vpop.f32.mrf.mxu0  ;;  %v1570_v30 = vpop.f32.mrf.mxu1 }
 0x242   :  { %v1406_v25 = vadd.f32 %v1355_v21, %v4861_v39 }
 0x243   :  { %v3503_v54 = vpop.f32.mrf.mxu0  ;;  %v3550_v57 = vpop.f32.mrf.mxu1 }
 0x244   :  { %v4988_v3 = vadd.f32 %v1565_v31, %v1406_v25 }
 0x245   :  { %v1360_v12 = vpop.f32.mrf.mxu0  ;;  %v1573_v63 = vpop.f32.mrf.mxu1  ;;  %3757 = vmatmul.mubr.msk.bf16.gmra.mxu0 %vm801_vm1, %v2486_v7 }
 0x246   :  { %v1407_v58 = vadd.f32 %v1360_v12, %v4871_v55  ;;  %3760 = vmatprep.mubr.msk.bf16.mxu0 %vm3939_vm0, %v3938_v4  ;;  %v2478_v12 = vld [vmem:[#allocation2 + $0x6c] sm:$0xff] }
 0x247   :  { %v3506_v17 = vpop.f32.mrf.mxu0  ;;  %v3551_v18 = vpop.f32.mrf.mxu1 }
 0x248   :  { %v4994_v49 = vadd.f32 %v1570_v30, %v1407_v58  ;;  %v2489_v30 = vpack.c.bf16 %v2476_v15, %v2475_v48  ;;  %v2477_v18 = vld [vmem:[#allocation2 + $0x64] sm:$0xff] }
 0x249   :  { %v1363_v39 = vpop.f32.mrf.mxu0  ;;  %v1578_v38 = vpop.f32.mrf.mxu1 }
 0x24a   :  { %v1408_v6 = vadd.f32 %v1363_v39, %v4883_v60 }
 0x24b   :  { %v3507_v52 = vpop.f32.mrf.mxu0  ;;  %v3554_v10 = vpop.f32.mrf.mxu1 }
 0x24c   :  { %v4997_v59 = vadd.f32 %v1573_v63, %v1408_v6 }
 0x24d   :  { %v1368_v29 = vpop.f32.mrf.mxu0  ;;  %v1581_v55 = vpop.f32.mrf.mxu1  ;;  %3761 = vmatmul.mubr.msk.bf16.gmra.mxu0 %vm801_vm1, %v2487_v45 }
 0x24e   :  { %v1409_v2 = vadd.f32 %v1368_v29, %v4889_v11  ;;  %3764 = vmatprep.mubr.msk.bf16.mxu0 %vm3939_vm0, %v3938_v4  ;;  %v2480_v29 = vld [vmem:[#allocation2 + $0x7c] sm:$0xff] }
 0x24f   :  { %v3510_v56 = vpop.f32.mrf.mxu0  ;;  %v3555_v50 = vpop.f32.mrf.mxu1 }
 0x250   :  { %v5003_v34 = vadd.f32 %v1578_v38, %v1409_v2  ;;  %v2490_v38 = vpack.c.bf16 %v2478_v12, %v2477_v18  ;;  %v2479_v50 = vld [vmem:[#allocation2 + $0x74] sm:$0xff] }
 0x251   :  { %v1371_v60 = vpop.f32.mrf.mxu0  ;;  %v1586_v41 = vpop.f32.mrf.mxu1 }
 0x252   :  { %v1410_v36 = vadd.f32 %v1371_v60, %v4897_v35 }
 0x253   :  { %v3511_v37 = vpop.f32.mrf.mxu0  ;;  %v3558_v22 = vpop.f32.mrf.mxu1 }
 0x254   :  { %v5006_v13 = vadd.f32 %v1581_v55, %v1410_v36 }
 0x255   :  { %v1376_v8 = vpop.f32.mrf.mxu0  ;;  %v1589_v11 = vpop.f32.mrf.mxu1  ;;  %3765 = vmatmul.mubr.msk.bf16.gmra.mxu0 %vm801_vm1, %v2488_v19 }
 0x256   :  { %v1411_v14 = vadd.f32 %v1376_v8, %v4903_v23  ;;  %3768 = vmatprep.mubr.msk.bf16.mxu0 %vm3939_vm0, %v3938_v4  ;;  %v2482_v8 = vld [vmem:[#allocation2 + $0x8c] sm:$0xff] }
 0x257   :  { %v3514_v51 = vpop.f32.mrf.mxu0  ;;  %v3559_v61 = vpop.f32.mrf.mxu1 }
 0x258   :  { %v5012_v31 = vadd.f32 %v1586_v41, %v1411_v14  ;;  %v2491_v41 = vpack.c.bf16 %v2480_v29, %v2479_v50  ;;  %v2481_v61 = vld [vmem:[#allocation2 + $0x84] sm:$0xff] }
 0x259   :  { %v1379_v35 = vpop.f32.mrf.mxu0  ;;  %v1594_v16 = vpop.f32.mrf.mxu1 }
 0x25a   :  { %v1412_v32 = vadd.f32 %v1379_v35, %v4911_v46 }
 0x25b   :  { %v3515_v24 = vpop.f32.mrf.mxu0  ;;  %v3562_v21 = vpop.f32.mrf.mxu1 }
 0x25c   :  { %v5015_v25 = vadd.f32 %v1589_v11, %v1412_v32 }
 0x25d   :  { %v1384_v53 = vpop.f32.mrf.mxu0  ;;  %v1597_v23 = vpop.f32.mrf.mxu1  ;;  %3769 = vmatmul.mubr.msk.bf16.gmra.mxu0 %vm801_vm1, %v2489_v30 }
 0x25e   :  { %v1413_v54 = vadd.f32 %v1384_v53, %v4917_v44  ;;  %3772 = vmatprep.mubr.msk.bf16.mxu0 %vm3939_vm0, %v3938_v4  ;;  %v2484_v53 = vld [vmem:[#allocation2 + $0x9c] sm:$0x3f] }
 0x25f   :  { %v3518_v57 = vpop.f32.mrf.mxu0  ;;  %v3563_v7 = vpop.f32.mrf.mxu1 }
 0x260   :  { %v5021_v63 = vadd.f32 %v1594_v16, %v1413_v54  ;;  %v2492_v16 = vpack.c.bf16 %v2482_v8, %v2481_v61  ;;  %v2483_v7 = vld [vmem:[#allocation2 + $0x94] sm:$0xff] }
 0x261   :  { %v1387_v46 = vpop.f32.mrf.mxu0  ;;  %v1602_v58 = vpop.f32.mrf.mxu1 }
 0x262   :  { %v1414_v17 = vadd.f32 %v1387_v46, %v4925_v20 }
 0x263   :  { %v3519_v62 = vpop.f32.mrf.mxu0  ;;  %v3566_v39 = vpop.f32.mrf.mxu1 }
 0x264   :  { %v5024_v6 = vadd.f32 %v1597_v23, %v1414_v17 }
 0x265   :  { %v1392_v47 = vpop.f32.mrf.mxu0  ;;  %v1605_v44 = vpop.f32.mrf.mxu1  ;;  %3773 = vmatmul.mubr.msk.bf16.gmra.mxu0 %vm801_vm1, %v2490_v38 }
 0x266   :  { %v1415_v52 = vadd.f32 %v1392_v47, %v4931_v0  ;;  %3776 = vmatprep.mubr.msk.bf16.mxu0 %vm3939_vm0, %v3938_v4 }
 0x267   :  { %v3522_v10 = vpop.f32.mrf.mxu0  ;;  %v3567_v45 = vpop.f32.mrf.mxu1 }
 0x268   :  { %v5030_v55 = vadd.f32 %v1602_v58, %v1415_v52  ;;  %v2493_v58 = vpack.c.bf16 %v2484_v53, %v2483_v7 }
 0x269   :  { %v1395_v20 = vpop.f32.mrf.mxu0  ;;  %v1958_v2 = vpop.f32.mrf.mxu1 }
 0x26a   :  { %v1416_v56 = vadd.f32 %v1395_v20, %v4939_v26 }
 0x26b   :  { %v3523_v33 = vpop.f32.mrf.mxu0  ;;  %v3622_v60 = vpop.f32.mrf.mxu1 }
 0x26c   :  { %v5033_v36 = vadd.f32 %v1605_v44, %v1416_v56 }
 0x26d   :  { %v1748_v5 = vpop.f32.mrf.mxu0  ;;  %v1961_v0 = vpop.f32.mrf.mxu1  ;;  %3777 = vmatmul.mubr.msk.bf16.gmra.mxu0 %vm801_vm1, %v2491_v41 }
 0x26e   :  { %v1819_v37 = vadd.f32 %v1748_v5, %v4948_v1  ;;  %3780 = vmatprep.mubr.msk.bf16.mxu0 %vm3939_vm0, %v3938_v4 }
 0x26f   :  { %v3578_v22 = vpop.f32.mrf.mxu0  ;;  %v3623_v19 = vpop.f32.mrf.mxu1 }
 0x270   :  { %v5039_v11 = vadd.f32 %v1958_v2, %v1819_v37 }
 0x271   :  { %v1751_v26 = vpop.f32.mrf.mxu0  ;;  %v1966_v14 = vpop.f32.mrf.mxu1 }
 0x272   :  { %v1820_v51 = vadd.f32 %v1751_v26, %v4957_v42 }
 0x273   :  { %v3579_v15 = vpop.f32.mrf.mxu0  ;;  %v3626_v35 = vpop.f32.mrf.mxu1 }
 0x274   :  { %v5042_v32 = vadd.f32 %v1961_v0, %v1820_v51 }
 0x275   :  { %v1756_v48 = vpop.f32.mrf.mxu0  ;;  %v1969_v1 = vpop.f32.mrf.mxu1  ;;  %3781 = vmatmul.mubr.msk.bf16.gmra.mxu0 %vm801_vm1, %v2492_v16 }
 0x276   :  { %v1821_v24 = vadd.f32 %v1756_v48, %v4966_v27  ;;  %3784 = vmatprep.mubr.msk.bf16.mxu0 %vm3939_vm0, %v3938_v4 }
 0x277   :  { %v3582_v21 = vpop.f32.mrf.mxu0  ;;  %v3627_v30 = vpop.f32.mrf.mxu1 }
 0x278   :  { %v5048_v23 = vadd.f32 %v1966_v14, %v1821_v24 }
 0x279   :  { %v1759_v42 = vpop.f32.mrf.mxu0  ;;  %v1974_v54 = vpop.f32.mrf.mxu1 }
 0x27a   :  { %v1822_v57 = vadd.f32 %v1759_v42, %v4970_v9 }
 0x27b   :  { %v3583_v12 = vpop.f32.mrf.mxu0  ;;  %v3630_v46 = vpop.f32.mrf.mxu1 }
 0x27c   :  { %v5051_v17 = vadd.f32 %v1969_v1, %v1822_v57 }
 0x27d   :  { %v1764_v18 = vpop.f32.mrf.mxu0  ;;  %v1977_v27 = vpop.f32.mrf.mxu1  ;;  %3785 = vmatmul.mubr.msk.bf16.gmra.mxu0 %vm801_vm1, %v2493_v58 }
 0x27e   :  { %v1823_v4 = vadd.f32 %v1764_v18, %v4976_v43 }
 0x27f   :  { %v3586_v62 = vpop.f32.mrf.mxu0  ;;  %v3631_v39 = vpop.f32.mrf.mxu1 }
 0x280   :  { %v5055_v38 = vadd.f32 %v1974_v54, %v1823_v4 }
 0x281   :  { %v1767_v47 = vpop.f32.mrf.mxu0  ;;  %v1982_v44 = vpop.f32.mrf.mxu1 }
 0x282   :  { %v1824_v9 = vadd.f32 %v1767_v47, %v4979_v40 }
 0x283   :  { %v3587_v52 = vpop.f32.mrf.mxu0  ;;  %v3634_v10 = vpop.f32.mrf.mxu1 }
 0x284   :  { %v5058_v45 = vadd.f32 %v1977_v27, %v1824_v9 }
 0x285   :  { %v1772_v29 = vpop.f32.mrf.mxu0  ;;  %v1985_v20 = vpop.f32.mrf.mxu1 }
 0x286   :  { %v1825_v2 = vadd.f32 %v1772_v29, %v4985_v28 }
 0x287   :  { %v3590_v56 = vpop.f32.mrf.mxu0  ;;  %v3635_v50 = vpop.f32.mrf.mxu1 }
 0x288   :  { %v5061_v33 = vadd.f32 %v1982_v44, %v1825_v2 }
 0x289   :  { %v1775_v43 = vpop.f32.mrf.mxu0  ;;  %v1990_v60 = vpop.f32.mrf.mxu1 }
 0x28a   :  { %v1826_v41 = vadd.f32 %v1775_v43, %v4988_v3 }
 0x28b   :  { %v3591_v5 = vpop.f32.mrf.mxu0  ;;  %v3638_v0 = vpop.f32.mrf.mxu1 }
 0x28c   :  { %v5064_v37 = vadd.f32 %v1985_v20, %v1826_v41 }
 0x28d   :  { %v1780_v40 = vpop.f32.mrf.mxu0  ;;  %v1993_v22 = vpop.f32.mrf.mxu1 }
 0x28e   :  { %v1827_v19 = vadd.f32 %v1780_v40, %v4994_v49 }
 0x28f   :  { %v3594_v8 = vpop.f32.mrf.mxu0  ;;  %v3639_v26 = vpop.f32.mrf.mxu1 }
 0x290   :  { %v5067_v14 = vadd.f32 %v1990_v60, %v1827_v19 }
 0x291   :  { %v1783_v28 = vpop.f32.mrf.mxu0  ;;  %v1998_v51 = vpop.f32.mrf.mxu1 }
 0x292   :  { %v1828_v61 = vadd.f32 %v1783_v28, %v4997_v59 }
 0x293   :  { %v3595_v15 = vpop.f32.mrf.mxu0  ;;  %v3642_v35 = vpop.f32.mrf.mxu1 }
 0x294   :  { %v5070_v16 = vadd.f32 %v1993_v22, %v1828_v61 }
 0x295   :  { %v1788_v3 = vpop.f32.mrf.mxu0  ;;  %v2001_v48 = vpop.f32.mrf.mxu1 }
 0x296   :  { %v1829_v1 = vadd.f32 %v1788_v3, %v5003_v34 }
 0x297   :  { %v3598_v24 = vpop.f32.mrf.mxu0  ;;  %v3643_v21 = vpop.f32.mrf.mxu1 }
 0x298   :  { %v5073_v30 = vadd.f32 %v1998_v51, %v1829_v1 }
 0x299   :  { %v1791_v49 = vpop.f32.mrf.mxu0  ;;  %v2006_v53 = vpop.f32.mrf.mxu1 }
 0x29a   :  { %v1830_v42 = vadd.f32 %v1791_v49, %v5006_v13 }
 0x29b   :  { %v3599_v54 = vpop.f32.mrf.mxu0  ;;  %v3646_v57 = vpop.f32.mrf.mxu1 }
 0x29c   :  { %v5076_v7 = vadd.f32 %v2001_v48, %v1830_v42 }
 0x29d   :  { %v1796_v59 = vpop.f32.mrf.mxu0  ;;  %v2009_v12 = vpop.f32.mrf.mxu1 }
 0x29e   :  { %v1831_v46 = vadd.f32 %v1796_v59, %v5012_v31 }
 0x29f   :  { %v3602_v58 = vpop.f32.mrf.mxu0  ;;  %v3647_v18 = vpop.f32.mrf.mxu1 }
 0x2a0   :  { %v5079_v27 = vadd.f32 %v2006_v53, %v1831_v46 }
 0x2a1   :  { %v1799_v34 = vpop.f32.mrf.mxu0  ;;  %v2014_v4 = vpop.f32.mrf.mxu1 }
 0x2a2   :  { %v1832_v62 = vadd.f32 %v1799_v34, %v5015_v25 }
 0x2a3   :  { %v3603_v39 = vpop.f32.mrf.mxu0  ;;  %v3650_v47 = vpop.f32.mrf.mxu1 }
 0x2a4   :  { %v5082_v44 = vadd.f32 %v2009_v12, %v1832_v62 }
 0x2a5   :  { %v1804_v13 = vpop.f32.mrf.mxu0  ;;  %v2017_v9 = vpop.f32.mrf.mxu1 }
 0x2a6   :  { %v1833_v52 = vadd.f32 %v1804_v13, %v5021_v63 }
 0x2a7   :  { %v3606_v10 = vpop.f32.mrf.mxu0  ;;  %v3651_v29 = vpop.f32.mrf.mxu1 }
 0x2a8   :  { %v5085_v20 = vadd.f32 %v2014_v4, %v1833_v52 }
 0x2a9   :  { %v1807_v31 = vpop.f32.mrf.mxu0  ;;  %v2022_v2 = vpop.f32.mrf.mxu1 }
 0x2aa   :  { %v1834_v56 = vadd.f32 %v1807_v31, %v5024_v6 }
 0x2ab   :  { %v3607_v50 = vpop.f32.mrf.mxu0  ;;  %v3654_v43 = vpop.f32.mrf.mxu1 }
 0x2ac   :  { %v5088_v60 = vadd.f32 %v2017_v9, %v1834_v56 }
 0x2ad   :  { %v1812_v25 = vpop.f32.mrf.mxu0  ;;  %v2025_v41 = vpop.f32.mrf.mxu1 }
 0x2ae   :  { %v1835_v5 = vadd.f32 %v1812_v25, %v5030_v55 }
 0x2af   :  { %v3610_v0 = vpop.f32.mrf.mxu0  ;;  %v3655_v40 = vpop.f32.mrf.mxu1 }
 0x2b0   :  { %v5091_v22 = vadd.f32 %v2022_v2, %v1835_v5 }
 0x2b1   :  { %v1815_v63 = vpop.f32.mrf.mxu0  ;;  %v2378_v19 = vpop.f32.mrf.mxu1 }
 0x2b2   :  { %v1836_v8 = vadd.f32 %v1815_v63, %v5033_v36 }
 0x2b3   :  { %v3611_v26 = vpop.f32.mrf.mxu0  ;;  %v3710_v28 = vpop.f32.mrf.mxu1 }
 0x2b4   :  { %v5094_v51 = vadd.f32 %v2025_v41, %v1836_v8 }
 0x2b5   :  { %v2168_v6 = vpop.f32.mrf.mxu0  ;;  %v2381_v61 = vpop.f32.mrf.mxu1 }
 0x2b6   :  { %v2239_v15 = vadd.f32 %v2168_v6, %v5039_v11 }
 0x2b7   :  { %v3666_v35 = vpop.f32.mrf.mxu0  ;;  %v3711_v3 = vpop.f32.mrf.mxu1 }
 0x2b8   :  { %v5097_v48 = vadd.f32 %v2378_v19, %v2239_v15 }
 0x2b9   :  { %v2171_v55 = vpop.f32.mrf.mxu0  ;;  %v2386_v1 = vpop.f32.mrf.mxu1 }
 0x2ba   :  { %v2240_v24 = vadd.f32 %v2171_v55, %v5042_v32 }
 0x2bb   :  { %v3667_v21 = vpop.f32.mrf.mxu0  ;;  %v3714_v49 = vpop.f32.mrf.mxu1 }
 0x2bc   :  { %v5100_v53 = vadd.f32 %v2381_v61, %v2240_v24 }
 0x2bd   :  { %v2176_v36 = vpop.f32.mrf.mxu0  ;;  %v2389_v42 = vpop.f32.mrf.mxu1 }
 0x2be   :  { %v2241_v54 = vadd.f32 %v2176_v36, %v5048_v23 }
 0x2bf   :  { %v3670_v57 = vpop.f32.mrf.mxu0  ;;  %v3715_v59 = vpop.f32.mrf.mxu1 }
 0x2c0   :  { %v5103_v12 = vadd.f32 %v2386_v1, %v2241_v54 }
 0x2c1   :  { %v2179_v11 = vpop.f32.mrf.mxu0  ;;  %v2394_v46 = vpop.f32.mrf.mxu1 }
 0x2c2   :  { %v2242_v58 = vadd.f32 %v2179_v11, %v5051_v17 }
 0x2c3   :  { %v3671_v18 = vpop.f32.mrf.mxu0  ;;  %v3718_v34 = vpop.f32.mrf.mxu1 }
 0x2c4   :  { %v5106_v4 = vadd.f32 %v2389_v42, %v2242_v58 }
 0x2c5   :  { %v2184_v32 = vpop.f32.mrf.mxu0  ;;  %v2397_v62 = vpop.f32.mrf.mxu1 }
 0x2c6   :  { %v2243_v39 = vadd.f32 %v2184_v32, %v5055_v38 }
 0x2c7   :  { %v3674_v47 = vpop.f32.mrf.mxu0  ;;  %v3719_v13 = vpop.f32.mrf.mxu1 }
 0x2c8   :  { %v5109_v9 = vadd.f32 %v2394_v46, %v2243_v39 }
 0x2c9   :  { %v2187_v23 = vpop.f32.mrf.mxu0  ;;  %v2402_v52 = vpop.f32.mrf.mxu1 }
 0x2ca   :  { %v2244_v10 = vadd.f32 %v2187_v23, %v5058_v45 }
 0x2cb   :  { %v3675_v29 = vpop.f32.mrf.mxu0  ;;  %v3722_v31 = vpop.f32.mrf.mxu1 }
 0x2cc   :  { %v5112_v2 = vadd.f32 %v2397_v62, %v2244_v10 }
 0x2cd   :  { %v2192_v17 = vpop.f32.mrf.mxu0  ;;  %v2405_v56 = vpop.f32.mrf.mxu1 }
 0x2ce   :  { %v2245_v50 = vadd.f32 %v2192_v17, %v5061_v33 }
 0x2cf   :  { %v3678_v43 = vpop.f32.mrf.mxu0  ;;  %v3723_v25 = vpop.f32.mrf.mxu1 }
 0x2d0   :  { %v5115_v41 = vadd.f32 %v2402_v52, %v2245_v50 }
 0x2d1   :  { %v2195_v38 = vpop.f32.mrf.mxu0  ;;  %v2410_v5 = vpop.f32.mrf.mxu1 }
 0x2d2   :  { %v2246_v0 = vadd.f32 %v2195_v38, %v5064_v37 }
 0x2d3   :  { %v3679_v40 = vpop.f32.mrf.mxu0  ;;  %v3726_v63 = vpop.f32.mrf.mxu1 }
 0x2d4   :  { %v5118_v19 = vadd.f32 %v2405_v56, %v2246_v0 }
 0x2d5   :  { %v2200_v45 = vpop.f32.mrf.mxu0  ;;  %v2413_v8 = vpop.f32.mrf.mxu1 }
 0x2d6   :  { %v2247_v26 = vadd.f32 %v2200_v45, %v5067_v14 }
 0x2d7   :  { %v3682_v28 = vpop.f32.mrf.mxu0  ;;  %v3727_v6 = vpop.f32.mrf.mxu1 }
 0x2d8   :  { %v5121_v61 = vadd.f32 %v2410_v5, %v2247_v26 }
 0x2d9   :  { %v2203_v33 = vpop.f32.mrf.mxu0  ;;  %v2418_v15 = vpop.f32.mrf.mxu1 }
 0x2da   :  { %v2248_v35 = vadd.f32 %v2203_v33, %v5070_v16 }
 0x2db   :  { %v3683_v3 = vpop.f32.mrf.mxu0  ;;  %v3730_v55 = vpop.f32.mrf.mxu1 }
 0x2dc   :  { %v5124_v1 = vadd.f32 %v2413_v8, %v2248_v35 }
 0x2dd   :  { %v2208_v37 = vpop.f32.mrf.mxu0  ;;  %v2421_v24 = vpop.f32.mrf.mxu1 }
 0x2de   :  { %v2249_v21 = vadd.f32 %v2208_v37, %v5073_v30 }
 0x2df   :  { %v3686_v49 = vpop.f32.mrf.mxu0  ;;  %v3731_v36 = vpop.f32.mrf.mxu1 }
 0x2e0   :  { %v5127_v42 = vadd.f32 %v2418_v15, %v2249_v21 }
 0x2e1   :  { %v2211_v14 = vpop.f32.mrf.mxu0  ;;  %v2426_v54 = vpop.f32.mrf.mxu1 }
 0x2e2   :  { %v2250_v57 = vadd.f32 %v2211_v14, %v5076_v7 }
 0x2e3   :  { %v3687_v59 = vpop.f32.mrf.mxu0  ;;  %v3734_v11 = vpop.f32.mrf.mxu1 }
 0x2e4   :  { %v5130_v46 = vadd.f32 %v2421_v24, %v2250_v57 }
 0x2e5   :  { %v2216_v16 = vpop.f32.mrf.mxu0  ;;  %v2429_v58 = vpop.f32.mrf.mxu1 }
 0x2e6   :  { %v2251_v18 = vadd.f32 %v2216_v16, %v5079_v27 }
 0x2e7   :  { %v3690_v34 = vpop.f32.mrf.mxu0  ;;  %v3735_v32 = vpop.f32.mrf.mxu1 }
 0x2e8   :  { %v5133_v62 = vadd.f32 %v2426_v54, %v2251_v18 }
 0x2e9   :  { %v2219_v30 = vpop.f32.mrf.mxu0  ;;  %v2434_v39 = vpop.f32.mrf.mxu1 }
 0x2ea   :  { %v2252_v47 = vadd.f32 %v2219_v30, %v5082_v44 }
 0x2eb   :  { %v3691_v13 = vpop.f32.mrf.mxu0  ;;  %v3738_v23 = vpop.f32.mrf.mxu1 }
 0x2ec   :  { %v5136_v52 = vadd.f32 %v2429_v58, %v2252_v47 }
 0x2ed   :  { %v2224_v7 = vpop.f32.mrf.mxu0  ;;  %v2437_v10 = vpop.f32.mrf.mxu1 }
 0x2ee   :  { %v2253_v29 = vadd.f32 %v2224_v7, %v5085_v20 }
 0x2ef   :  { %v3694_v31 = vpop.f32.mrf.mxu0  ;;  %v3739_v17 = vpop.f32.mrf.mxu1 }
 0x2f0   :  { %v5139_v56 = vadd.f32 %v2434_v39, %v2253_v29 }
 0x2f1   :  { %v2227_v27 = vpop.f32.mrf.mxu0  ;;  %v2442_v50 = vpop.f32.mrf.mxu1 }
 0x2f2   :  { %v2254_v43 = vadd.f32 %v2227_v27, %v5088_v60  ;;  %v5153_v60 = vld [vmem:[%s5266_s4] ss:$0 sm:$0xff] }
 0x2f3   :  { %v3695_v25 = vpop.f32.mrf.mxu0  ;;  %v3742_v38 = vpop.f32.mrf.mxu1 }
 0x2f4   :  { %v5142_v5 = vadd.f32 %v2437_v10, %v2254_v43 }
 0x2f5   :  { %v2232_v44 = vpop.f32.mrf.mxu0  ;;  %v2445_v0 = vpop.f32.mrf.mxu1 }
 0x2f6   :  { %v2255_v40 = vadd.f32 %v2232_v44, %v5091_v22 }
 0x2f7   :  { %v3698_v63 = vpop.f32.mrf.mxu0  ;;  %v3743_v45 = vpop.f32.mrf.mxu1 }
 0x2f8   :  { %v5145_v8 = vadd.f32 %v2442_v50, %v2255_v40 }
 0x2f9   :  { %v2235_v20 = vpop.f32.mrf.mxu0 }
 0x2fa   :  { %v2256_v26 = vadd.f32 %v2235_v20, %v5094_v51 }
 0x2fb   :  { %v3699_v28 = vpop.f32.mrf.mxu0 }
 0x2fc   :  { %v5148_v6 = vadd.f32 %v2445_v0, %v2256_v26 }
 0x2fd   :  { %v2588_v33 = vpop.f32.mrf.mxu0 }
 0x2fe   :  { %v2659_v15 = vadd.f32 %v2588_v33, %v5097_v48 }
 0x2ff   :  { %v3754_v35 = vpop.f32.mrf.mxu0 }
 0x300   :  { %v2684_v22 = vadd.f32 %v5153_v60, %v2659_v15 }
 0x301   :  { %v2591_v3 = vpop.f32.mrf.mxu0 }
 0x302   :  { %v2702_v55 = vmax.f32 %v2684_v22, 0.0  ;;  %v2660_v37 = vadd.f32 %v2591_v3, %v5100_v53 }
 0x303   :  { %v3755_v51 = vpop.f32.mrf.mxu0 }
 0x304   :  { %v3093_v24 = vpack.c.bf16 %v2702_v55, %v2702_v55  ;;  %v2685_v21 = vadd.f32 %v5153_v60, %v2660_v37 }
 0x305   :  { %v2596_v49 = vpop.f32.mrf.mxu0 }
 0x306   :  { %2793 = vst.msk [vmem:[%s5267_s5] sm:$0xf] %vm2792_vm3, %v3093_v24  ;;  %v2703_v36 = vmax.f32 %v2685_v21, 0.0  ;;  %v2661_v48 = vadd.f32 %v2596_v49, %v5103_v12 }
 0x307   :  { %v3758_v14 = vpop.f32.mrf.mxu0 }
 0x308   :  { %v3094_v54 = vpack.c.bf16 %v2703_v36, %v2703_v36  ;;  %v2686_v57 = vadd.f32 %v5153_v60, %v2661_v48 }
 0x309   :  { %v2599_v59 = vpop.f32.mrf.mxu0 }
 0x30a   :  { %2794 = vst.msk [vmem:[%s5267_s5 + $0x4] sm:$0xf] %vm2792_vm3, %v3094_v54  ;;  %v2704_v53 = vmax.f32 %v2686_v57, 0.0  ;;  %v2662_v11 = vadd.f32 %v2599_v59, %v5106_v4 }
 0x30b   :  { %v3759_v16 = vpop.f32.mrf.mxu0 }
 0x30c   :  { %v3095_v58 = vpack.c.bf16 %v2704_v53, %v2704_v53  ;;  %v2687_v18 = vadd.f32 %v5153_v60, %v2662_v11 }
 0x30d   :  { %v2604_v34 = vpop.f32.mrf.mxu0 }
 0x30e   :  { %2795 = vst.msk [vmem:[%s5267_s5 + $0x8] sm:$0xf] %vm2792_vm3, %v3095_v58  ;;  %v2705_v12 = vmax.f32 %v2687_v18, 0.0  ;;  %v2663_v32 = vadd.f32 %v2604_v34, %v5109_v9 }
 0x30f   :  { %v3762_v30 = vpop.f32.mrf.mxu0 }
 0x310   :  { %v3096_v39 = vpack.c.bf16 %v2705_v12, %v2705_v12  ;;  %v2688_v47 = vadd.f32 %v5153_v60, %v2663_v32 }
 0x311   :  { %v2607_v13 = vpop.f32.mrf.mxu0 }
 0x312   :  { %2796 = vst.msk [vmem:[%s5267_s5 + $0xc] sm:$0xf] %vm2792_vm3, %v3096_v39  ;;  %v2706_v4 = vmax.f32 %v2688_v47, 0.0  ;;  %v2664_v23 = vadd.f32 %v2607_v13, %v5112_v2 }
 0x313   :  { %v3763_v7 = vpop.f32.mrf.mxu0 }
 0x314   :  { %v3097_v10 = vpack.c.bf16 %v2706_v4, %v2706_v4  ;;  %v2689_v29 = vadd.f32 %v5153_v60, %v2664_v23 }
 0x315   :  { %v2612_v31 = vpop.f32.mrf.mxu0 }
 0x316   :  { %2797 = vst.msk [vmem:[%s5267_s5 + $0x10] sm:$0xf] %vm2792_vm3, %v3097_v10  ;;  %v2707_v9 = vmax.f32 %v2689_v29, 0.0  ;;  %v2665_v17 = vadd.f32 %v2612_v31, %v5115_v41 }
 0x317   :  { %v3766_v27 = vpop.f32.mrf.mxu0 }
 0x318   :  { %v3098_v50 = vpack.c.bf16 %v2707_v9, %v2707_v9  ;;  %v2690_v43 = vadd.f32 %v5153_v60, %v2665_v17 }
 0x319   :  { %v2615_v25 = vpop.f32.mrf.mxu0 }
 0x31a   :  { %2798 = vst.msk [vmem:[%s5267_s5 + $0x14] sm:$0xf] %vm2792_vm3, %v3098_v50  ;;  %v2708_v2 = vmax.f32 %v2690_v43, 0.0  ;;  %v2666_v38 = vadd.f32 %v2615_v25, %v5118_v19 }
 0x31b   :  { %v3767_v44 = vpop.f32.mrf.mxu0 }
 0x31c   :  { %v3099_v0 = vpack.c.bf16 %v2708_v2, %v2708_v2  ;;  %v2691_v40 = vadd.f32 %v5153_v60, %v2666_v38 }
 0x31d   :  { %v2620_v63 = vpop.f32.mrf.mxu0 }
 0x31e   :  { %2799 = vst.msk [vmem:[%s5267_s5 + $0x18] sm:$0xf] %vm2792_vm3, %v3099_v0  ;;  %v2709_v41 = vmax.f32 %v2691_v40, 0.0  ;;  %v2667_v45 = vadd.f32 %v2620_v63, %v5121_v61 }
 0x31f   :  { %v3770_v20 = vpop.f32.mrf.mxu0 }
 0x320   :  { %v3100_v26 = vpack.c.bf16 %v2709_v41, %v2709_v41  ;;  %v2692_v28 = vadd.f32 %v5153_v60, %v2667_v45 }
 0x321   :  { %v2623_v33 = vpop.f32.mrf.mxu0 }
 0x322   :  { %2800 = vst.msk [vmem:[%s5267_s5 + $0x1c] sm:$0xf] %vm2792_vm3, %v3100_v26  ;;  %v2710_v19 = vmax.f32 %v2692_v28, 0.0  ;;  %v2668_v15 = vadd.f32 %v2623_v33, %v5124_v1 }
 0x323   :  { %v3771_v35 = vpop.f32.mrf.mxu0 }
 0x324   :  { %v3101_v22 = vpack.c.bf16 %v2710_v19, %v2710_v19  ;;  %v2693_v3 = vadd.f32 %v5153_v60, %v2668_v15 }
 0x325   :  { %v2628_v55 = vpop.f32.mrf.mxu0 }
 0x326   :  { %2801 = vst.msk [vmem:[%s5267_s5 + $0x20] sm:$0xf] %vm2792_vm3, %v3101_v22  ;;  %v2711_v61 = vmax.f32 %v2693_v3, 0.0  ;;  %v2669_v37 = vadd.f32 %v2628_v55, %v5127_v42 }
 0x327   :  { %v3774_v51 = vpop.f32.mrf.mxu0 }
 0x328   :  { %v3102_v24 = vpack.c.bf16 %v2711_v61, %v2711_v61  ;;  %v2694_v21 = vadd.f32 %v5153_v60, %v2669_v37 }
 0x329   :  { %v2631_v49 = vpop.f32.mrf.mxu0 }
 0x32a   :  { %2802 = vst.msk [vmem:[%s5267_s5 + $0x24] sm:$0xf] %vm2792_vm3, %v3102_v24  ;;  %v2712_v1 = vmax.f32 %v2694_v21, 0.0  ;;  %v2670_v36 = vadd.f32 %v2631_v49, %v5130_v46 }
 0x32b   :  { %v3775_v48 = vpop.f32.mrf.mxu0 }
 0x32c   :  { %v3103_v14 = vpack.c.bf16 %v2712_v1, %v2712_v1  ;;  %v2695_v54 = vadd.f32 %v5153_v60, %v2670_v36 }
 0x32d   :  { %v2636_v57 = vpop.f32.mrf.mxu0 }
 0x32e   :  { %2803 = vst.msk [vmem:[%s5267_s5 + $0x28] sm:$0xf] %vm2792_vm3, %v3103_v14  ;;  %v2713_v42 = vmax.f32 %v2695_v54, 0.0  ;;  %v2671_v59 = vadd.f32 %v2636_v57, %v5133_v62 }
 0x32f   :  { %v3778_v53 = vpop.f32.mrf.mxu0 }
 0x330   :  { %v3104_v11 = vpack.c.bf16 %v2713_v42, %v2713_v42  ;;  %v2696_v16 = vadd.f32 %v5153_v60, %v2671_v59 }
 0x331   :  { %v2639_v58 = vpop.f32.mrf.mxu0 }
 0x332   :  { %2804 = vst.msk [vmem:[%s5267_s5 + $0x2c] sm:$0xf] %vm2792_vm3, %v3104_v11  ;;  %v2714_v46 = vmax.f32 %v2696_v16, 0.0  ;;  %v2672_v18 = vadd.f32 %v2639_v58, %v5136_v52 }
 0x333   :  { %v3779_v34 = vpop.f32.mrf.mxu0 }
 0x334   :  { %v3105_v12 = vpack.c.bf16 %v2714_v46, %v2714_v46  ;;  %v2697_v32 = vadd.f32 %v5153_v60, %v2672_v18 }
 0x335   :  { %v2644_v30 = vpop.f32.mrf.mxu0 }
 0x336   :  { %2805 = vst.msk [vmem:[%s5267_s5 + $0x30] sm:$0xf] %vm2792_vm3, %v3105_v12  ;;  %v2715_v62 = vmax.f32 %v2697_v32, 0.0  ;;  %v2673_v39 = vadd.f32 %v2644_v30, %v5139_v56 }
 0x337   :  { %v3782_v47 = vpop.f32.mrf.mxu0 }
 0x338   :  { %v3106_v13 = vpack.c.bf16 %v2715_v62, %v2715_v62  ;;  %v2698_v4 = vadd.f32 %v5153_v60, %v2673_v39 }
 0x339   :  { %v2647_v23 = vpop.f32.mrf.mxu0 }
 0x33a   :  { %2806 = vst.msk [vmem:[%s5267_s5 + $0x34] sm:$0xf] %vm2792_vm3, %v3106_v13  ;;  %v2716_v52 = vmax.f32 %v2698_v4, 0.0  ;;  %v2674_v7 = vadd.f32 %v2647_v23, %v5142_v5 }
 0x33b   :  { %v3783_v10 = vpop.f32.mrf.mxu0 }
 0x33c   :  { %v3107_v29 = vpack.c.bf16 %v2716_v52, %v2716_v52  ;;  %v2699_v31 = vadd.f32 %v5153_v60, %v2674_v7 }
 0x33d   :  { %v2652_v9 = vpop.f32.mrf.mxu0 }
 0x33e   :  { %2807 = vst.msk [vmem:[%s5267_s5 + $0x38] sm:$0xf] %vm2792_vm3, %v3107_v29  ;;  %v2717_v56 = vmax.f32 %v2699_v31, 0.0  ;;  %v2675_v17 = vadd.f32 %v2652_v9, %v5145_v8 }
 0x33f   :  { %v3786_v27 = vpop.f32.mrf.mxu0 }
 0x340   :  { %v3108_v50 = vpack.c.bf16 %v2717_v56, %v2717_v56  ;;  %v2700_v43 = vadd.f32 %v5153_v60, %v2675_v17 }
 0x341   :  { %v2655_v25 = vpop.f32.mrf.mxu0 }
 0x342   :  { %2808 = vst.msk [vmem:[%s5267_s5 + $0x3c] sm:$0xf] %vm2792_vm3, %v3108_v50  ;;  %v2718_v5 = vmax.f32 %v2700_v43, 0.0  ;;  %v2676_v2 = vadd.f32 %v2655_v25, %v5148_v6 }
 0x343   :  { %v3787_v38 = vpop.f32.mrf.mxu0 }
 0x344   :  { %v3109_v44 = vpack.c.bf16 %v2718_v5, %v2718_v5  ;;  %v2701_v0 = vadd.f32 %v5153_v60, %v2676_v2 }
 0x346   :  { %2809 = vst.msk [vmem:[%s5267_s5 + $0x40] sm:$0xf] %vm2792_vm3, %v3109_v44  ;;  %v2719_v8 = vmax.f32 %v2701_v0, 0.0 }
 0x348   :  { %v3110_v40 = vpack.c.bf16 %v2719_v8, %v2719_v8 }
 0x34a   :  { %2811 = vst.msk [vmem:[%s5267_s5 + $0x44] sm:$0x7] %vm2810_vm4, %v3110_v40 }

// kernel: dqn_forward.5
= control target key start
LH: loop header
LB: loop body
LE: loop exit
PB: predicated region body
PF: predicated region fallthrough
CT: control target
= control target key end

     0   :  { %10 = vsyncpa [#allocation5], 0  ;;  %s10484_s18 = smov 0   ;;  %s10486_s19 = smov 0   ;;  %s13205_s0 = inlined_call_operand.vmem [shape: bf16[2,3136], index: 0, kind: input, shape index: {}]   ;;  %s13206_s1 = inlined_call_operand.vmem [shape: bf16[3136,1024], index: 1, kind: input, shape index: {}]   ;;  %s13207_s2 = inlined_call_operand.vmem [shape: f32[1,1024], index: 2, kind: input, shape index: {}]   ;;  %s13208_s3 = inlined_call_operand.vmem [shape: bf16[1024,6], index: 3, kind: input, shape index: {}]   ;;  %s13209_s4 = inlined_call_operand.vmem [shape: f32[1,6], index: 4, kind: input, shape index: {}]   ;;  %s13210_s5 = inlined_call_operand.hbm [shape: f32[2,6], index: 5, kind: output, shape index: {}]  }
   0x1   :  { %s10488_s20 = smov 0  }
   0x2 LB: > { %s10500_s21 = sadd.s32 4294967295, %s10448_s20   ;;  %s10503_s22 = sadd.s32 1, %s10448_s20   ;;  %s10448_s20 = sphi %s10488_s20, %s13213_s20   ;;  %s10444_s19 = sphi %s10486_s19, %s13212_s19   ;;  %s10440_s18 = sphi %s10484_s18, %s13211_s18  }
   0x3   : > { %s41_s23 = ssub.s32 %s10448_s20, %s10503_s22  ;;  %s44_s24 = sadd.s32 1, %s10444_s19 }
   0x4   : > { %p42_p0 = scmp.eq.s32.totalorder %s41_s23, 0  ;;  %p51_p1 = scmp.ne.s32.totalorder %s10444_s19, %s10440_s18 }
   0x5   : > { %p52_p2 = scmp.eq.s32.totalorder %s10448_s20, 0  ;;  %p8272_p4 = scmp.ge.s32.totalorder %s10448_s20, 2 }
   0x6   : > { %s10512_s25 = scalar_select %p42_p0, %s10444_s19, %s44_s24  }
   0x7   : > { %p53_p3 = por %p52_p2, %p51_p1  ;;  %177 = sbr.rel (%p8272_p4) target bundleno = 408 (0x198), region = 24 }
   0xc   : > { %180 = sbr.rel (!%p53_p3) target bundleno = 408 (0x198), region = 28  ;;  %s182_s26 = sand.u32 (%p53_p3), 1, %s10444_s19  }
   0xd   : > { %s9105_s27 = sshll.u32 (%p53_p3), %s10448_s20, 4  ;;  %s9150_s28 = smul.u32 (%p53_p3), 6272, %s182_s26 }
   0xe   : > { %s10520_s6 = scalar_lea.vmem (%p53_p3), %s13206_s1, %s9105_s27 }
   0xf   : > { %v200_v0 = vld [vmem:[%s10520_s6] sm:$0xff] (%p53_p3)  ;;  %v202_v1 = vld [vmem:[%s10520_s6 + $0x8] sm:$0xff] (%p53_p3)  ;;  %s10528_s7 = scalar_lea.vmem (%p53_p3), [#allocation3], %s9150_s28 }
  0x10   : > { %v204_v2 = vld [vmem:[%s10520_s6 + $0x20] sm:$0xff] (%p53_p3)  ;;  %v206_v3 = vld [vmem:[%s10520_s6 + $0x28] sm:$0xff] (%p53_p3)  ;;  %201 = vst [vmem:[%s10528_s7] sm:$0xff] (%p53_p3), %v200_v0  ;;  %203 = vst [vmem:[%s10528_s7 + $0x8] sm:$0xff] (%p53_p3), %v202_v1 }
  0x11   : > { %v208_v4 = vld [vmem:[%s10520_s6 + $0x40] sm:$0xff]  ;;  %v210_v5 = vld [vmem:[%s10520_s6 + $0x48] sm:$0xff]  ;;  %205 = vst [vmem:[%s10528_s7 + $0x10] sm:$0xff] %v204_v2  ;;  %207 = vst [vmem:[%s10528_s7 + $0x18] sm:$0xff] %v206_v3 }
  0x12   : > { %209 = vst [vmem:[%s10528_s7 + $0x20] sm:$0xff] %v208_v4  ;;  %211 = vst [vmem:[%s10528_s7 + $0x28] sm:$0xff] %v210_v5  ;;  %v212_v6 = vld [vmem:[%s10520_s6 + $0x60] sm:$0xff]  ;;  %v214_v7 = vld [vmem:[%s10520_s6 + $0x68] sm:$0xff] }
  0x13   : > { %v216_v8 = vld [vmem:[%s10520_s6 + $0x80] sm:$0xff]  ;;  %213 = vst [vmem:[%s10528_s7 + $0x30] sm:$0xff] %v212_v6  ;;  %215 = vst [vmem:[%s10528_s7 + $0x38] sm:$0xff] %v214_v7  ;;  %v218_v9 = vld [vmem:[%s10520_s6 + $0x88] sm:$0xff] }
  0x14   : > { %217 = vst [vmem:[%s10528_s7 + $0x40] sm:$0xff] %v216_v8  ;;  %v220_v10 = vld [vmem:[%s10520_s6 + $0xa0] sm:$0xff]  ;;  %v222_v11 = vld [vmem:[%s10520_s6 + $0xa8] sm:$0xff]  ;;  %219 = vst [vmem:[%s10528_s7 + $0x48] sm:$0xff] %v218_v9 }
  0x15   : > { %221 = vst [vmem:[%s10528_s7 + $0x50] sm:$0xff] %v220_v10  ;;  %223 = vst [vmem:[%s10528_s7 + $0x58] sm:$0xff] %v222_v11  ;;  %v224_v12 = vld [vmem:[%s10520_s6 + $0xc0] sm:$0xff]  ;;  %v226_v13 = vld [vmem:[%s10520_s6 + $0xc8] sm:$0xff] }
  0x16   : > { %v228_v14 = vld [vmem:[%s10520_s6 + $0xe0] sm:$0xff]  ;;  %225 = vst [vmem:[%s10528_s7 + $0x60] sm:$0xff] %v224_v12  ;;  %227 = vst [vmem:[%s10528_s7 + $0x68] sm:$0xff] %v226_v13  ;;  %v230_v15 = vld [vmem:[%s10520_s6 + $0xe8] sm:$0xff] }
  0x17   : > { %229 = vst [vmem:[%s10528_s7 + $0x70] sm:$0xff] %v228_v14  ;;  %v232_v16 = vld [vmem:[%s10520_s6 + $0x100] sm:$0xff]  ;;  %v234_v17 = vld [vmem:[%s10520_s6 + $0x108] sm:$0xff]  ;;  %231 = vst [vmem:[%s10528_s7 + $0x78] sm:$0xff] %v230_v15 }
  0x18   : > { %233 = vst [vmem:[%s10528_s7 + $0x80] sm:$0xff] %v232_v16  ;;  %235 = vst [vmem:[%s10528_s7 + $0x88] sm:$0xff] %v234_v17  ;;  %v236_v18 = vld [vmem:[%s10520_s6 + $0x120] sm:$0xff]  ;;  %v238_v19 = vld [vmem:[%s10520_s6 + $0x128] sm:$0xff] }
  0x19   : > { %v240_v20 = vld [vmem:[%s10520_s6 + $0x140] sm:$0xff]  ;;  %237 = vst [vmem:[%s10528_s7 + $0x90] sm:$0xff] %v236_v18  ;;  %239 = vst [vmem:[%s10528_s7 + $0x98] sm:$0xff] %v238_v19  ;;  %v242_v21 = vld [vmem:[%s10520_s6 + $0x148] sm:$0xff] }
  0x1a   : > { %241 = vst [vmem:[%s10528_s7 + $0xa0] sm:$0xff] %v240_v20  ;;  %v244_v22 = vld [vmem:[%s10520_s6 + $0x160] sm:$0xff]  ;;  %v246_v23 = vld [vmem:[%s10520_s6 + $0x168] sm:$0xff]  ;;  %243 = vst [vmem:[%s10528_s7 + $0xa8] sm:$0xff] %v242_v21 }
  0x1b   : > { %245 = vst [vmem:[%s10528_s7 + $0xb0] sm:$0xff] %v244_v22  ;;  %247 = vst [vmem:[%s10528_s7 + $0xb8] sm:$0xff] %v246_v23  ;;  %v248_v24 = vld [vmem:[%s10520_s6 + $0x180] sm:$0xff]  ;;  %v250_v25 = vld [vmem:[%s10520_s6 + $0x188] sm:$0xff] }
  0x1c   : > { %v252_v26 = vld [vmem:[%s10520_s6 + $0x1a0] sm:$0xff]  ;;  %249 = vst [vmem:[%s10528_s7 + $0xc0] sm:$0xff] %v248_v24  ;;  %251 = vst [vmem:[%s10528_s7 + $0xc8] sm:$0xff] %v250_v25  ;;  %v254_v27 = vld [vmem:[%s10520_s6 + $0x1a8] sm:$0xff] }
  0x1d   : > { %253 = vst [vmem:[%s10528_s7 + $0xd0] sm:$0xff] %v252_v26  ;;  %v256_v28 = vld [vmem:[%s10520_s6 + $0x1c0] sm:$0xff]  ;;  %v258_v29 = vld [vmem:[%s10520_s6 + $0x1c8] sm:$0xff]  ;;  %255 = vst [vmem:[%s10528_s7 + $0xd8] sm:$0xff] %v254_v27 }
  0x1e   : > { %257 = vst [vmem:[%s10528_s7 + $0xe0] sm:$0xff] %v256_v28  ;;  %259 = vst [vmem:[%s10528_s7 + $0xe8] sm:$0xff] %v258_v29  ;;  %v260_v30 = vld [vmem:[%s10520_s6 + $0x1e0] sm:$0xff]  ;;  %v262_v31 = vld [vmem:[%s10520_s6 + $0x1e8] sm:$0xff] }
  0x1f   : > { %v264_v32 = vld [vmem:[%s10520_s6 + $0x200] sm:$0xff]  ;;  %261 = vst [vmem:[%s10528_s7 + $0xf0] sm:$0xff] %v260_v30  ;;  %263 = vst [vmem:[%s10528_s7 + $0xf8] sm:$0xff] %v262_v31  ;;  %v266_v33 = vld [vmem:[%s10520_s6 + $0x208] sm:$0xff] }
  0x20   : > { %265 = vst [vmem:[%s10528_s7 + $0x100] sm:$0xff] %v264_v32  ;;  %v268_v34 = vld [vmem:[%s10520_s6 + $0x220] sm:$0xff]  ;;  %v270_v35 = vld [vmem:[%s10520_s6 + $0x228] sm:$0xff]  ;;  %267 = vst [vmem:[%s10528_s7 + $0x108] sm:$0xff] %v266_v33 }
  0x21   : > { %269 = vst [vmem:[%s10528_s7 + $0x110] sm:$0xff] %v268_v34  ;;  %271 = vst [vmem:[%s10528_s7 + $0x118] sm:$0xff] %v270_v35  ;;  %v272_v36 = vld [vmem:[%s10520_s6 + $0x240] sm:$0xff]  ;;  %v274_v37 = vld [vmem:[%s10520_s6 + $0x248] sm:$0xff] }
  0x22   : > { %v276_v38 = vld [vmem:[%s10520_s6 + $0x260] sm:$0xff]  ;;  %273 = vst [vmem:[%s10528_s7 + $0x120] sm:$0xff] %v272_v36  ;;  %275 = vst [vmem:[%s10528_s7 + $0x128] sm:$0xff] %v274_v37  ;;  %v278_v39 = vld [vmem:[%s10520_s6 + $0x268] sm:$0xff] }
  0x23   : > { %277 = vst [vmem:[%s10528_s7 + $0x130] sm:$0xff] %v276_v38  ;;  %v280_v40 = vld [vmem:[%s10520_s6 + $0x280] sm:$0xff]  ;;  %v282_v41 = vld [vmem:[%s10520_s6 + $0x288] sm:$0xff]  ;;  %279 = vst [vmem:[%s10528_s7 + $0x138] sm:$0xff] %v278_v39 }
  0x24   : > { %281 = vst [vmem:[%s10528_s7 + $0x140] sm:$0xff] %v280_v40  ;;  %283 = vst [vmem:[%s10528_s7 + $0x148] sm:$0xff] %v282_v41  ;;  %v284_v42 = vld [vmem:[%s10520_s6 + $0x2a0] sm:$0xff]  ;;  %v286_v43 = vld [vmem:[%s10520_s6 + $0x2a8] sm:$0xff] }
  0x25   : > { %v288_v44 = vld [vmem:[%s10520_s6 + $0x2c0] sm:$0xff]  ;;  %285 = vst [vmem:[%s10528_s7 + $0x150] sm:$0xff] %v284_v42  ;;  %287 = vst [vmem:[%s10528_s7 + $0x158] sm:$0xff] %v286_v43  ;;  %v290_v45 = vld [vmem:[%s10520_s6 + $0x2c8] sm:$0xff] }
  0x26   : > { %289 = vst [vmem:[%s10528_s7 + $0x160] sm:$0xff] %v288_v44  ;;  %v292_v46 = vld [vmem:[%s10520_s6 + $0x2e0] sm:$0xff]  ;;  %v294_v47 = vld [vmem:[%s10520_s6 + $0x2e8] sm:$0xff]  ;;  %291 = vst [vmem:[%s10528_s7 + $0x168] sm:$0xff] %v290_v45 }
  0x27   : > { %293 = vst [vmem:[%s10528_s7 + $0x170] sm:$0xff] %v292_v46  ;;  %295 = vst [vmem:[%s10528_s7 + $0x178] sm:$0xff] %v294_v47  ;;  %v296_v48 = vld [vmem:[%s10520_s6 + $0x300] sm:$0xff]  ;;  %v298_v49 = vld [vmem:[%s10520_s6 + $0x308] sm:$0xff] }
  0x28   : > { %v300_v50 = vld [vmem:[%s10520_s6 + $0x320] sm:$0xff]  ;;  %297 = vst [vmem:[%s10528_s7 + $0x180] sm:$0xff] %v296_v48  ;;  %299 = vst [vmem:[%s10528_s7 + $0x188] sm:$0xff] %v298_v49  ;;  %v302_v51 = vld [vmem:[%s10520_s6 + $0x328] sm:$0xff] }
  0x29   : > { %301 = vst [vmem:[%s10528_s7 + $0x190] sm:$0xff] %v300_v50  ;;  %v304_v52 = vld [vmem:[%s10520_s6 + $0x340] sm:$0xff]  ;;  %v306_v53 = vld [vmem:[%s10520_s6 + $0x348] sm:$0xff]  ;;  %303 = vst [vmem:[%s10528_s7 + $0x198] sm:$0xff] %v302_v51 }
  0x2a   : > { %305 = vst [vmem:[%s10528_s7 + $0x1a0] sm:$0xff] %v304_v52  ;;  %307 = vst [vmem:[%s10528_s7 + $0x1a8] sm:$0xff] %v306_v53  ;;  %v308_v54 = vld [vmem:[%s10520_s6 + $0x360] sm:$0xff]  ;;  %v310_v55 = vld [vmem:[%s10520_s6 + $0x368] sm:$0xff] }
  0x2b   : > { %v312_v56 = vld [vmem:[%s10520_s6 + $0x380] sm:$0xff]  ;;  %309 = vst [vmem:[%s10528_s7 + $0x1b0] sm:$0xff] %v308_v54  ;;  %311 = vst [vmem:[%s10528_s7 + $0x1b8] sm:$0xff] %v310_v55  ;;  %v314_v57 = vld [vmem:[%s10520_s6 + $0x388] sm:$0xff] }
  0x2c   : > { %313 = vst [vmem:[%s10528_s7 + $0x1c0] sm:$0xff] %v312_v56  ;;  %v316_v58 = vld [vmem:[%s10520_s6 + $0x3a0] sm:$0xff]  ;;  %v318_v59 = vld [vmem:[%s10520_s6 + $0x3a8] sm:$0xff]  ;;  %315 = vst [vmem:[%s10528_s7 + $0x1c8] sm:$0xff] %v314_v57 }
  0x2d   : > { %317 = vst [vmem:[%s10528_s7 + $0x1d0] sm:$0xff] %v316_v58  ;;  %319 = vst [vmem:[%s10528_s7 + $0x1d8] sm:$0xff] %v318_v59  ;;  %v320_v60 = vld [vmem:[%s10520_s6 + $0x3c0] sm:$0xff]  ;;  %v322_v61 = vld [vmem:[%s10520_s6 + $0x3c8] sm:$0xff] }
  0x2e   : > { %v324_v62 = vld [vmem:[%s10520_s6 + $0x3e0] sm:$0xff]  ;;  %321 = vst [vmem:[%s10528_s7 + $0x1e0] sm:$0xff] %v320_v60  ;;  %323 = vst [vmem:[%s10528_s7 + $0x1e8] sm:$0xff] %v322_v61  ;;  %v326_v63 = vld [vmem:[%s10520_s6 + $0x3e8] sm:$0xff] }
  0x2f   : > { %325 = vst [vmem:[%s10528_s7 + $0x1f0] sm:$0xff] %v324_v62  ;;  %v328_v0 = vld [vmem:[%s10520_s6 + $0x400] sm:$0xff]  ;;  %v330_v1 = vld [vmem:[%s10520_s6 + $0x408] sm:$0xff]  ;;  %327 = vst [vmem:[%s10528_s7 + $0x1f8] sm:$0xff] %v326_v63 }
  0x30   : > { %329 = vst [vmem:[%s10528_s7 + $0x200] sm:$0xff] %v328_v0  ;;  %331 = vst [vmem:[%s10528_s7 + $0x208] sm:$0xff] %v330_v1  ;;  %v332_v2 = vld [vmem:[%s10520_s6 + $0x420] sm:$0xff]  ;;  %v334_v3 = vld [vmem:[%s10520_s6 + $0x428] sm:$0xff] }
  0x31   : > { %v336_v4 = vld [vmem:[%s10520_s6 + $0x440] sm:$0xff]  ;;  %333 = vst [vmem:[%s10528_s7 + $0x210] sm:$0xff] %v332_v2  ;;  %335 = vst [vmem:[%s10528_s7 + $0x218] sm:$0xff] %v334_v3  ;;  %v338_v5 = vld [vmem:[%s10520_s6 + $0x448] sm:$0xff] }
  0x32   : > { %337 = vst [vmem:[%s10528_s7 + $0x220] sm:$0xff] %v336_v4  ;;  %v340_v6 = vld [vmem:[%s10520_s6 + $0x460] sm:$0xff]  ;;  %v342_v7 = vld [vmem:[%s10520_s6 + $0x468] sm:$0xff]  ;;  %339 = vst [vmem:[%s10528_s7 + $0x228] sm:$0xff] %v338_v5 }
  0x33   : > { %341 = vst [vmem:[%s10528_s7 + $0x230] sm:$0xff] %v340_v6  ;;  %343 = vst [vmem:[%s10528_s7 + $0x238] sm:$0xff] %v342_v7  ;;  %v344_v8 = vld [vmem:[%s10520_s6 + $0x480] sm:$0xff]  ;;  %v346_v9 = vld [vmem:[%s10520_s6 + $0x488] sm:$0xff] }
  0x34   : > { %v348_v10 = vld [vmem:[%s10520_s6 + $0x4a0] sm:$0xff]  ;;  %345 = vst [vmem:[%s10528_s7 + $0x240] sm:$0xff] %v344_v8  ;;  %347 = vst [vmem:[%s10528_s7 + $0x248] sm:$0xff] %v346_v9  ;;  %v350_v11 = vld [vmem:[%s10520_s6 + $0x4a8] sm:$0xff] }
  0x35   : > { %349 = vst [vmem:[%s10528_s7 + $0x250] sm:$0xff] %v348_v10  ;;  %v352_v12 = vld [vmem:[%s10520_s6 + $0x4c0] sm:$0xff]  ;;  %v354_v13 = vld [vmem:[%s10520_s6 + $0x4c8] sm:$0xff]  ;;  %351 = vst [vmem:[%s10528_s7 + $0x258] sm:$0xff] %v350_v11 }
  0x36   : > { %353 = vst [vmem:[%s10528_s7 + $0x260] sm:$0xff] %v352_v12  ;;  %355 = vst [vmem:[%s10528_s7 + $0x268] sm:$0xff] %v354_v13  ;;  %v356_v14 = vld [vmem:[%s10520_s6 + $0x4e0] sm:$0xff]  ;;  %v358_v15 = vld [vmem:[%s10520_s6 + $0x4e8] sm:$0xff] }
  0x37   : > { %v360_v16 = vld [vmem:[%s10520_s6 + $0x500] sm:$0xff]  ;;  %357 = vst [vmem:[%s10528_s7 + $0x270] sm:$0xff] %v356_v14  ;;  %359 = vst [vmem:[%s10528_s7 + $0x278] sm:$0xff] %v358_v15  ;;  %v362_v17 = vld [vmem:[%s10520_s6 + $0x508] sm:$0xff] }
  0x38   : > { %361 = vst [vmem:[%s10528_s7 + $0x280] sm:$0xff] %v360_v16  ;;  %v364_v18 = vld [vmem:[%s10520_s6 + $0x520] sm:$0xff]  ;;  %v366_v19 = vld [vmem:[%s10520_s6 + $0x528] sm:$0xff]  ;;  %363 = vst [vmem:[%s10528_s7 + $0x288] sm:$0xff] %v362_v17 }
  0x39   : > { %365 = vst [vmem:[%s10528_s7 + $0x290] sm:$0xff] %v364_v18  ;;  %367 = vst [vmem:[%s10528_s7 + $0x298] sm:$0xff] %v366_v19  ;;  %v368_v20 = vld [vmem:[%s10520_s6 + $0x540] sm:$0xff]  ;;  %v370_v21 = vld [vmem:[%s10520_s6 + $0x548] sm:$0xff] }
  0x3a   : > { %v372_v22 = vld [vmem:[%s10520_s6 + $0x560] sm:$0xff]  ;;  %369 = vst [vmem:[%s10528_s7 + $0x2a0] sm:$0xff] %v368_v20  ;;  %371 = vst [vmem:[%s10528_s7 + $0x2a8] sm:$0xff] %v370_v21  ;;  %v374_v23 = vld [vmem:[%s10520_s6 + $0x568] sm:$0xff] }
  0x3b   : > { %373 = vst [vmem:[%s10528_s7 + $0x2b0] sm:$0xff] %v372_v22  ;;  %v376_v24 = vld [vmem:[%s10520_s6 + $0x580] sm:$0xff]  ;;  %v378_v25 = vld [vmem:[%s10520_s6 + $0x588] sm:$0xff]  ;;  %375 = vst [vmem:[%s10528_s7 + $0x2b8] sm:$0xff] %v374_v23 }
  0x3c   : > { %377 = vst [vmem:[%s10528_s7 + $0x2c0] sm:$0xff] %v376_v24  ;;  %379 = vst [vmem:[%s10528_s7 + $0x2c8] sm:$0xff] %v378_v25  ;;  %v380_v26 = vld [vmem:[%s10520_s6 + $0x5a0] sm:$0xff]  ;;  %v382_v27 = vld [vmem:[%s10520_s6 + $0x5a8] sm:$0xff] }
  0x3d   : > { %v384_v28 = vld [vmem:[%s10520_s6 + $0x5c0] sm:$0xff]  ;;  %381 = vst [vmem:[%s10528_s7 + $0x2d0] sm:$0xff] %v380_v26  ;;  %383 = vst [vmem:[%s10528_s7 + $0x2d8] sm:$0xff] %v382_v27  ;;  %v386_v29 = vld [vmem:[%s10520_s6 + $0x5c8] sm:$0xff] }
  0x3e   : > { %385 = vst [vmem:[%s10528_s7 + $0x2e0] sm:$0xff] %v384_v28  ;;  %v388_v30 = vld [vmem:[%s10520_s6 + $0x5e0] sm:$0xff]  ;;  %v390_v31 = vld [vmem:[%s10520_s6 + $0x5e8] sm:$0xff]  ;;  %387 = vst [vmem:[%s10528_s7 + $0x2e8] sm:$0xff] %v386_v29 }
  0x3f   : > { %389 = vst [vmem:[%s10528_s7 + $0x2f0] sm:$0xff] %v388_v30  ;;  %391 = vst [vmem:[%s10528_s7 + $0x2f8] sm:$0xff] %v390_v31  ;;  %v392_v32 = vld [vmem:[%s10520_s6 + $0x600] sm:$0xff]  ;;  %v394_v33 = vld [vmem:[%s10520_s6 + $0x608] sm:$0xff] }
  0x40   : > { %v396_v34 = vld [vmem:[%s10520_s6 + $0x620] sm:$0xff]  ;;  %393 = vst [vmem:[%s10528_s7 + $0x300] sm:$0xff] %v392_v32  ;;  %395 = vst [vmem:[%s10528_s7 + $0x308] sm:$0xff] %v394_v33  ;;  %v398_v35 = vld [vmem:[%s10520_s6 + $0x628] sm:$0xff] }
  0x41   : > { %397 = vst [vmem:[%s10528_s7 + $0x310] sm:$0xff] %v396_v34  ;;  %v400_v36 = vld [vmem:[%s10520_s6 + $0x640] sm:$0xff]  ;;  %v402_v37 = vld [vmem:[%s10520_s6 + $0x648] sm:$0xff]  ;;  %399 = vst [vmem:[%s10528_s7 + $0x318] sm:$0xff] %v398_v35 }
  0x42   : > { %401 = vst [vmem:[%s10528_s7 + $0x320] sm:$0xff] %v400_v36  ;;  %403 = vst [vmem:[%s10528_s7 + $0x328] sm:$0xff] %v402_v37  ;;  %v404_v38 = vld [vmem:[%s10520_s6 + $0x660] sm:$0xff]  ;;  %v406_v39 = vld [vmem:[%s10520_s6 + $0x668] sm:$0xff] }
  0x43   : > { %v408_v40 = vld [vmem:[%s10520_s6 + $0x680] sm:$0xff]  ;;  %405 = vst [vmem:[%s10528_s7 + $0x330] sm:$0xff] %v404_v38  ;;  %407 = vst [vmem:[%s10528_s7 + $0x338] sm:$0xff] %v406_v39  ;;  %v410_v41 = vld [vmem:[%s10520_s6 + $0x688] sm:$0xff] }
  0x44   : > { %409 = vst [vmem:[%s10528_s7 + $0x340] sm:$0xff] %v408_v40  ;;  %v412_v42 = vld [vmem:[%s10520_s6 + $0x6a0] sm:$0xff]  ;;  %v414_v43 = vld [vmem:[%s10520_s6 + $0x6a8] sm:$0xff]  ;;  %411 = vst [vmem:[%s10528_s7 + $0x348] sm:$0xff] %v410_v41 }
  0x45   : > { %413 = vst [vmem:[%s10528_s7 + $0x350] sm:$0xff] %v412_v42  ;;  %415 = vst [vmem:[%s10528_s7 + $0x358] sm:$0xff] %v414_v43  ;;  %v416_v44 = vld [vmem:[%s10520_s6 + $0x6c0] sm:$0xff]  ;;  %v418_v45 = vld [vmem:[%s10520_s6 + $0x6c8] sm:$0xff] }
  0x46   : > { %v420_v46 = vld [vmem:[%s10520_s6 + $0x6e0] sm:$0xff]  ;;  %417 = vst [vmem:[%s10528_s7 + $0x360] sm:$0xff] %v416_v44  ;;  %419 = vst [vmem:[%s10528_s7 + $0x368] sm:$0xff] %v418_v45  ;;  %v422_v47 = vld [vmem:[%s10520_s6 + $0x6e8] sm:$0xff] }
  0x47   : > { %421 = vst [vmem:[%s10528_s7 + $0x370] sm:$0xff] %v420_v46  ;;  %v424_v48 = vld [vmem:[%s10520_s6 + $0x700] sm:$0xff]  ;;  %v426_v49 = vld [vmem:[%s10520_s6 + $0x708] sm:$0xff]  ;;  %423 = vst [vmem:[%s10528_s7 + $0x378] sm:$0xff] %v422_v47 }
  0x48   : > { %425 = vst [vmem:[%s10528_s7 + $0x380] sm:$0xff] %v424_v48  ;;  %427 = vst [vmem:[%s10528_s7 + $0x388] sm:$0xff] %v426_v49  ;;  %v428_v50 = vld [vmem:[%s10520_s6 + $0x720] sm:$0xff]  ;;  %v430_v51 = vld [vmem:[%s10520_s6 + $0x728] sm:$0xff] }
  0x49   : > { %v432_v52 = vld [vmem:[%s10520_s6 + $0x740] sm:$0xff]  ;;  %429 = vst [vmem:[%s10528_s7 + $0x390] sm:$0xff] %v428_v50  ;;  %431 = vst [vmem:[%s10528_s7 + $0x398] sm:$0xff] %v430_v51  ;;  %v434_v53 = vld [vmem:[%s10520_s6 + $0x748] sm:$0xff] }
  0x4a   : > { %433 = vst [vmem:[%s10528_s7 + $0x3a0] sm:$0xff] %v432_v52  ;;  %v436_v54 = vld [vmem:[%s10520_s6 + $0x760] sm:$0xff]  ;;  %v438_v55 = vld [vmem:[%s10520_s6 + $0x768] sm:$0xff]  ;;  %435 = vst [vmem:[%s10528_s7 + $0x3a8] sm:$0xff] %v434_v53 }
  0x4b   : > { %437 = vst [vmem:[%s10528_s7 + $0x3b0] sm:$0xff] %v436_v54  ;;  %439 = vst [vmem:[%s10528_s7 + $0x3b8] sm:$0xff] %v438_v55  ;;  %v440_v56 = vld [vmem:[%s10520_s6 + $0x780] sm:$0xff]  ;;  %v442_v57 = vld [vmem:[%s10520_s6 + $0x788] sm:$0xff] }
  0x4c   : > { %v444_v58 = vld [vmem:[%s10520_s6 + $0x7a0] sm:$0xff]  ;;  %441 = vst [vmem:[%s10528_s7 + $0x3c0] sm:$0xff] %v440_v56  ;;  %443 = vst [vmem:[%s10528_s7 + $0x3c8] sm:$0xff] %v442_v57  ;;  %v446_v59 = vld [vmem:[%s10520_s6 + $0x7a8] sm:$0xff] }
  0x4d   : > { %445 = vst [vmem:[%s10528_s7 + $0x3d0] sm:$0xff] %v444_v58  ;;  %v448_v60 = vld [vmem:[%s10520_s6 + $0x7c0] sm:$0xff]  ;;  %v450_v61 = vld [vmem:[%s10520_s6 + $0x7c8] sm:$0xff]  ;;  %447 = vst [vmem:[%s10528_s7 + $0x3d8] sm:$0xff] %v446_v59 }
  0x4e   : > { %449 = vst [vmem:[%s10528_s7 + $0x3e0] sm:$0xff] %v448_v60  ;;  %451 = vst [vmem:[%s10528_s7 + $0x3e8] sm:$0xff] %v450_v61  ;;  %v452_v62 = vld [vmem:[%s10520_s6 + $0x7e0] sm:$0xff]  ;;  %v454_v63 = vld [vmem:[%s10520_s6 + $0x7e8] sm:$0xff] }
  0x4f   : > { %v456_v0 = vld [vmem:[%s10520_s6 + $0x800] sm:$0xff]  ;;  %453 = vst [vmem:[%s10528_s7 + $0x3f0] sm:$0xff] %v452_v62  ;;  %455 = vst [vmem:[%s10528_s7 + $0x3f8] sm:$0xff] %v454_v63  ;;  %v458_v1 = vld [vmem:[%s10520_s6 + $0x808] sm:$0xff] }
  0x50   : > { %457 = vst [vmem:[%s10528_s7 + $0x400] sm:$0xff] %v456_v0  ;;  %v460_v2 = vld [vmem:[%s10520_s6 + $0x820] sm:$0xff]  ;;  %v462_v3 = vld [vmem:[%s10520_s6 + $0x828] sm:$0xff]  ;;  %459 = vst [vmem:[%s10528_s7 + $0x408] sm:$0xff] %v458_v1 }
  0x51   : > { %461 = vst [vmem:[%s10528_s7 + $0x410] sm:$0xff] %v460_v2  ;;  %463 = vst [vmem:[%s10528_s7 + $0x418] sm:$0xff] %v462_v3  ;;  %v464_v4 = vld [vmem:[%s10520_s6 + $0x840] sm:$0xff]  ;;  %v466_v5 = vld [vmem:[%s10520_s6 + $0x848] sm:$0xff] }
  0x52   : > { %v468_v6 = vld [vmem:[%s10520_s6 + $0x860] sm:$0xff]  ;;  %465 = vst [vmem:[%s10528_s7 + $0x420] sm:$0xff] %v464_v4  ;;  %467 = vst [vmem:[%s10528_s7 + $0x428] sm:$0xff] %v466_v5  ;;  %v470_v7 = vld [vmem:[%s10520_s6 + $0x868] sm:$0xff] }
  0x53   : > { %469 = vst [vmem:[%s10528_s7 + $0x430] sm:$0xff] %v468_v6  ;;  %v472_v8 = vld [vmem:[%s10520_s6 + $0x880] sm:$0xff]  ;;  %v474_v9 = vld [vmem:[%s10520_s6 + $0x888] sm:$0xff]  ;;  %471 = vst [vmem:[%s10528_s7 + $0x438] sm:$0xff] %v470_v7 }
  0x54   : > { %473 = vst [vmem:[%s10528_s7 + $0x440] sm:$0xff] %v472_v8  ;;  %475 = vst [vmem:[%s10528_s7 + $0x448] sm:$0xff] %v474_v9  ;;  %v476_v10 = vld [vmem:[%s10520_s6 + $0x8a0] sm:$0xff]  ;;  %v478_v11 = vld [vmem:[%s10520_s6 + $0x8a8] sm:$0xff] }
  0x55   : > { %v480_v12 = vld [vmem:[%s10520_s6 + $0x8c0] sm:$0xff]  ;;  %477 = vst [vmem:[%s10528_s7 + $0x450] sm:$0xff] %v476_v10  ;;  %479 = vst [vmem:[%s10528_s7 + $0x458] sm:$0xff] %v478_v11  ;;  %v482_v13 = vld [vmem:[%s10520_s6 + $0x8c8] sm:$0xff] }
  0x56   : > { %481 = vst [vmem:[%s10528_s7 + $0x460] sm:$0xff] %v480_v12  ;;  %v484_v14 = vld [vmem:[%s10520_s6 + $0x8e0] sm:$0xff]  ;;  %v486_v15 = vld [vmem:[%s10520_s6 + $0x8e8] sm:$0xff]  ;;  %483 = vst [vmem:[%s10528_s7 + $0x468] sm:$0xff] %v482_v13 }
  0x57   : > { %485 = vst [vmem:[%s10528_s7 + $0x470] sm:$0xff] %v484_v14  ;;  %487 = vst [vmem:[%s10528_s7 + $0x478] sm:$0xff] %v486_v15  ;;  %v488_v16 = vld [vmem:[%s10520_s6 + $0x900] sm:$0xff]  ;;  %v490_v17 = vld [vmem:[%s10520_s6 + $0x908] sm:$0xff] }
  0x58   : > { %v492_v18 = vld [vmem:[%s10520_s6 + $0x920] sm:$0xff]  ;;  %489 = vst [vmem:[%s10528_s7 + $0x480] sm:$0xff] %v488_v16  ;;  %491 = vst [vmem:[%s10528_s7 + $0x488] sm:$0xff] %v490_v17  ;;  %v494_v19 = vld [vmem:[%s10520_s6 + $0x928] sm:$0xff] }
  0x59   : > { %493 = vst [vmem:[%s10528_s7 + $0x490] sm:$0xff] %v492_v18  ;;  %v496_v20 = vld [vmem:[%s10520_s6 + $0x940] sm:$0xff]  ;;  %v498_v21 = vld [vmem:[%s10520_s6 + $0x948] sm:$0xff]  ;;  %495 = vst [vmem:[%s10528_s7 + $0x498] sm:$0xff] %v494_v19 }
  0x5a   : > { %497 = vst [vmem:[%s10528_s7 + $0x4a0] sm:$0xff] %v496_v20  ;;  %499 = vst [vmem:[%s10528_s7 + $0x4a8] sm:$0xff] %v498_v21  ;;  %v500_v22 = vld [vmem:[%s10520_s6 + $0x960] sm:$0xff]  ;;  %v502_v23 = vld [vmem:[%s10520_s6 + $0x968] sm:$0xff] }
  0x5b   : > { %v504_v24 = vld [vmem:[%s10520_s6 + $0x980] sm:$0xff]  ;;  %501 = vst [vmem:[%s10528_s7 + $0x4b0] sm:$0xff] %v500_v22  ;;  %503 = vst [vmem:[%s10528_s7 + $0x4b8] sm:$0xff] %v502_v23  ;;  %v506_v25 = vld [vmem:[%s10520_s6 + $0x988] sm:$0xff] }
  0x5c   : > { %505 = vst [vmem:[%s10528_s7 + $0x4c0] sm:$0xff] %v504_v24  ;;  %v508_v26 = vld [vmem:[%s10520_s6 + $0x9a0] sm:$0xff]  ;;  %v510_v27 = vld [vmem:[%s10520_s6 + $0x9a8] sm:$0xff]  ;;  %507 = vst [vmem:[%s10528_s7 + $0x4c8] sm:$0xff] %v506_v25 }
  0x5d   : > { %509 = vst [vmem:[%s10528_s7 + $0x4d0] sm:$0xff] %v508_v26  ;;  %511 = vst [vmem:[%s10528_s7 + $0x4d8] sm:$0xff] %v510_v27  ;;  %v512_v28 = vld [vmem:[%s10520_s6 + $0x9c0] sm:$0xff]  ;;  %v514_v29 = vld [vmem:[%s10520_s6 + $0x9c8] sm:$0xff] }
  0x5e   : > { %v516_v30 = vld [vmem:[%s10520_s6 + $0x9e0] sm:$0xff]  ;;  %513 = vst [vmem:[%s10528_s7 + $0x4e0] sm:$0xff] %v512_v28  ;;  %515 = vst [vmem:[%s10528_s7 + $0x4e8] sm:$0xff] %v514_v29  ;;  %v518_v31 = vld [vmem:[%s10520_s6 + $0x9e8] sm:$0xff] }
  0x5f   : > { %517 = vst [vmem:[%s10528_s7 + $0x4f0] sm:$0xff] %v516_v30  ;;  %v520_v32 = vld [vmem:[%s10520_s6 + $0xa00] sm:$0xff]  ;;  %v522_v33 = vld [vmem:[%s10520_s6 + $0xa08] sm:$0xff]  ;;  %519 = vst [vmem:[%s10528_s7 + $0x4f8] sm:$0xff] %v518_v31 }
  0x60   : > { %521 = vst [vmem:[%s10528_s7 + $0x500] sm:$0xff] %v520_v32  ;;  %523 = vst [vmem:[%s10528_s7 + $0x508] sm:$0xff] %v522_v33  ;;  %v524_v34 = vld [vmem:[%s10520_s6 + $0xa20] sm:$0xff]  ;;  %v526_v35 = vld [vmem:[%s10520_s6 + $0xa28] sm:$0xff] }
  0x61   : > { %v528_v36 = vld [vmem:[%s10520_s6 + $0xa40] sm:$0xff]  ;;  %525 = vst [vmem:[%s10528_s7 + $0x510] sm:$0xff] %v524_v34  ;;  %527 = vst [vmem:[%s10528_s7 + $0x518] sm:$0xff] %v526_v35  ;;  %v530_v37 = vld [vmem:[%s10520_s6 + $0xa48] sm:$0xff] }
  0x62   : > { %529 = vst [vmem:[%s10528_s7 + $0x520] sm:$0xff] %v528_v36  ;;  %v532_v38 = vld [vmem:[%s10520_s6 + $0xa60] sm:$0xff]  ;;  %v534_v39 = vld [vmem:[%s10520_s6 + $0xa68] sm:$0xff]  ;;  %531 = vst [vmem:[%s10528_s7 + $0x528] sm:$0xff] %v530_v37 }
  0x63   : > { %533 = vst [vmem:[%s10528_s7 + $0x530] sm:$0xff] %v532_v38  ;;  %535 = vst [vmem:[%s10528_s7 + $0x538] sm:$0xff] %v534_v39  ;;  %v536_v40 = vld [vmem:[%s10520_s6 + $0xa80] sm:$0xff]  ;;  %v538_v41 = vld [vmem:[%s10520_s6 + $0xa88] sm:$0xff] }
  0x64   : > { %v540_v42 = vld [vmem:[%s10520_s6 + $0xaa0] sm:$0xff]  ;;  %537 = vst [vmem:[%s10528_s7 + $0x540] sm:$0xff] %v536_v40  ;;  %539 = vst [vmem:[%s10528_s7 + $0x548] sm:$0xff] %v538_v41  ;;  %v542_v43 = vld [vmem:[%s10520_s6 + $0xaa8] sm:$0xff] }
  0x65   : > { %541 = vst [vmem:[%s10528_s7 + $0x550] sm:$0xff] %v540_v42  ;;  %v544_v44 = vld [vmem:[%s10520_s6 + $0xac0] sm:$0xff]  ;;  %v546_v45 = vld [vmem:[%s10520_s6 + $0xac8] sm:$0xff]  ;;  %543 = vst [vmem:[%s10528_s7 + $0x558] sm:$0xff] %v542_v43 }
  0x66   : > { %545 = vst [vmem:[%s10528_s7 + $0x560] sm:$0xff] %v544_v44  ;;  %547 = vst [vmem:[%s10528_s7 + $0x568] sm:$0xff] %v546_v45  ;;  %v548_v46 = vld [vmem:[%s10520_s6 + $0xae0] sm:$0xff]  ;;  %v550_v47 = vld [vmem:[%s10520_s6 + $0xae8] sm:$0xff] }
  0x67   : > { %v552_v48 = vld [vmem:[%s10520_s6 + $0xb00] sm:$0xff]  ;;  %549 = vst [vmem:[%s10528_s7 + $0x570] sm:$0xff] %v548_v46  ;;  %551 = vst [vmem:[%s10528_s7 + $0x578] sm:$0xff] %v550_v47  ;;  %v554_v49 = vld [vmem:[%s10520_s6 + $0xb08] sm:$0xff] }
  0x68   : > { %553 = vst [vmem:[%s10528_s7 + $0x580] sm:$0xff] %v552_v48  ;;  %v556_v50 = vld [vmem:[%s10520_s6 + $0xb20] sm:$0xff]  ;;  %v558_v51 = vld [vmem:[%s10520_s6 + $0xb28] sm:$0xff]  ;;  %555 = vst [vmem:[%s10528_s7 + $0x588] sm:$0xff] %v554_v49 }
  0x69   : > { %557 = vst [vmem:[%s10528_s7 + $0x590] sm:$0xff] %v556_v50  ;;  %559 = vst [vmem:[%s10528_s7 + $0x598] sm:$0xff] %v558_v51  ;;  %v560_v52 = vld [vmem:[%s10520_s6 + $0xb40] sm:$0xff]  ;;  %v562_v53 = vld [vmem:[%s10520_s6 + $0xb48] sm:$0xff] }
  0x6a   : > { %v564_v54 = vld [vmem:[%s10520_s6 + $0xb60] sm:$0xff]  ;;  %561 = vst [vmem:[%s10528_s7 + $0x5a0] sm:$0xff] %v560_v52  ;;  %563 = vst [vmem:[%s10528_s7 + $0x5a8] sm:$0xff] %v562_v53  ;;  %v566_v55 = vld [vmem:[%s10520_s6 + $0xb68] sm:$0xff] }
  0x6b   : > { %565 = vst [vmem:[%s10528_s7 + $0x5b0] sm:$0xff] %v564_v54  ;;  %v568_v56 = vld [vmem:[%s10520_s6 + $0xb80] sm:$0xff]  ;;  %v570_v57 = vld [vmem:[%s10520_s6 + $0xb88] sm:$0xff]  ;;  %567 = vst [vmem:[%s10528_s7 + $0x5b8] sm:$0xff] %v566_v55 }
  0x6c   : > { %569 = vst [vmem:[%s10528_s7 + $0x5c0] sm:$0xff] %v568_v56  ;;  %571 = vst [vmem:[%s10528_s7 + $0x5c8] sm:$0xff] %v570_v57  ;;  %v572_v58 = vld [vmem:[%s10520_s6 + $0xba0] sm:$0xff]  ;;  %v574_v59 = vld [vmem:[%s10520_s6 + $0xba8] sm:$0xff] }
  0x6d   : > { %v576_v60 = vld [vmem:[%s10520_s6 + $0xbc0] sm:$0xff]  ;;  %573 = vst [vmem:[%s10528_s7 + $0x5d0] sm:$0xff] %v572_v58  ;;  %575 = vst [vmem:[%s10528_s7 + $0x5d8] sm:$0xff] %v574_v59  ;;  %v578_v61 = vld [vmem:[%s10520_s6 + $0xbc8] sm:$0xff] }
  0x6e   : > { %577 = vst [vmem:[%s10528_s7 + $0x5e0] sm:$0xff] %v576_v60  ;;  %v580_v62 = vld [vmem:[%s10520_s6 + $0xbe0] sm:$0xff]  ;;  %v582_v63 = vld [vmem:[%s10520_s6 + $0xbe8] sm:$0xff]  ;;  %579 = vst [vmem:[%s10528_s7 + $0x5e8] sm:$0xff] %v578_v61 }
  0x6f   : > { %581 = vst [vmem:[%s10528_s7 + $0x5f0] sm:$0xff] %v580_v62  ;;  %583 = vst [vmem:[%s10528_s7 + $0x5f8] sm:$0xff] %v582_v63  ;;  %v584_v0 = vld [vmem:[%s10520_s6 + $0xc00] sm:$0xff]  ;;  %v586_v1 = vld [vmem:[%s10520_s6 + $0xc08] sm:$0xff] }
  0x70   : > { %v588_v2 = vld [vmem:[%s10520_s6 + $0xc20] sm:$0xff]  ;;  %585 = vst [vmem:[%s10528_s7 + $0x600] sm:$0xff] %v584_v0  ;;  %587 = vst [vmem:[%s10528_s7 + $0x608] sm:$0xff] %v586_v1  ;;  %v590_v3 = vld [vmem:[%s10520_s6 + $0xc28] sm:$0xff] }
  0x71   : > { %589 = vst [vmem:[%s10528_s7 + $0x610] sm:$0xff] %v588_v2  ;;  %v592_v4 = vld [vmem:[%s10520_s6 + $0xc40] sm:$0xff]  ;;  %v594_v5 = vld [vmem:[%s10520_s6 + $0xc48] sm:$0xff]  ;;  %591 = vst [vmem:[%s10528_s7 + $0x618] sm:$0xff] %v590_v3 }
  0x72   : > { %593 = vst [vmem:[%s10528_s7 + $0x620] sm:$0xff] %v592_v4  ;;  %595 = vst [vmem:[%s10528_s7 + $0x628] sm:$0xff] %v594_v5  ;;  %v596_v6 = vld [vmem:[%s10520_s6 + $0xc60] sm:$0xff]  ;;  %v598_v7 = vld [vmem:[%s10520_s6 + $0xc68] sm:$0xff] }
  0x73   : > { %v600_v8 = vld [vmem:[%s10520_s6 + $0xc80] sm:$0xff]  ;;  %597 = vst [vmem:[%s10528_s7 + $0x630] sm:$0xff] %v596_v6  ;;  %599 = vst [vmem:[%s10528_s7 + $0x638] sm:$0xff] %v598_v7  ;;  %v602_v9 = vld [vmem:[%s10520_s6 + $0xc88] sm:$0xff] }
  0x74   : > { %601 = vst [vmem:[%s10528_s7 + $0x640] sm:$0xff] %v600_v8  ;;  %v604_v10 = vld [vmem:[%s10520_s6 + $0xca0] sm:$0xff]  ;;  %v606_v11 = vld [vmem:[%s10520_s6 + $0xca8] sm:$0xff]  ;;  %603 = vst [vmem:[%s10528_s7 + $0x648] sm:$0xff] %v602_v9 }
  0x75   : > { %605 = vst [vmem:[%s10528_s7 + $0x650] sm:$0xff] %v604_v10  ;;  %607 = vst [vmem:[%s10528_s7 + $0x658] sm:$0xff] %v606_v11  ;;  %v608_v12 = vld [vmem:[%s10520_s6 + $0xcc0] sm:$0xff]  ;;  %v610_v13 = vld [vmem:[%s10520_s6 + $0xcc8] sm:$0xff] }
  0x76   : > { %v612_v14 = vld [vmem:[%s10520_s6 + $0xce0] sm:$0xff]  ;;  %609 = vst [vmem:[%s10528_s7 + $0x660] sm:$0xff] %v608_v12  ;;  %611 = vst [vmem:[%s10528_s7 + $0x668] sm:$0xff] %v610_v13  ;;  %v614_v15 = vld [vmem:[%s10520_s6 + $0xce8] sm:$0xff] }
  0x77   : > { %613 = vst [vmem:[%s10528_s7 + $0x670] sm:$0xff] %v612_v14  ;;  %v616_v16 = vld [vmem:[%s10520_s6 + $0xd00] sm:$0xff]  ;;  %v618_v17 = vld [vmem:[%s10520_s6 + $0xd08] sm:$0xff]  ;;  %615 = vst [vmem:[%s10528_s7 + $0x678] sm:$0xff] %v614_v15 }
  0x78   : > { %617 = vst [vmem:[%s10528_s7 + $0x680] sm:$0xff] %v616_v16  ;;  %619 = vst [vmem:[%s10528_s7 + $0x688] sm:$0xff] %v618_v17  ;;  %v620_v18 = vld [vmem:[%s10520_s6 + $0xd20] sm:$0xff]  ;;  %v622_v19 = vld [vmem:[%s10520_s6 + $0xd28] sm:$0xff] }
  0x79   : > { %v624_v20 = vld [vmem:[%s10520_s6 + $0xd40] sm:$0xff]  ;;  %621 = vst [vmem:[%s10528_s7 + $0x690] sm:$0xff] %v620_v18  ;;  %623 = vst [vmem:[%s10528_s7 + $0x698] sm:$0xff] %v622_v19  ;;  %v626_v21 = vld [vmem:[%s10520_s6 + $0xd48] sm:$0xff] }
  0x7a   : > { %625 = vst [vmem:[%s10528_s7 + $0x6a0] sm:$0xff] %v624_v20  ;;  %v628_v22 = vld [vmem:[%s10520_s6 + $0xd60] sm:$0xff]  ;;  %v630_v23 = vld [vmem:[%s10520_s6 + $0xd68] sm:$0xff]  ;;  %627 = vst [vmem:[%s10528_s7 + $0x6a8] sm:$0xff] %v626_v21 }
  0x7b   : > { %629 = vst [vmem:[%s10528_s7 + $0x6b0] sm:$0xff] %v628_v22  ;;  %631 = vst [vmem:[%s10528_s7 + $0x6b8] sm:$0xff] %v630_v23  ;;  %v632_v24 = vld [vmem:[%s10520_s6 + $0xd80] sm:$0xff]  ;;  %v634_v25 = vld [vmem:[%s10520_s6 + $0xd88] sm:$0xff] }
  0x7c   : > { %v636_v26 = vld [vmem:[%s10520_s6 + $0xda0] sm:$0xff]  ;;  %633 = vst [vmem:[%s10528_s7 + $0x6c0] sm:$0xff] %v632_v24  ;;  %635 = vst [vmem:[%s10528_s7 + $0x6c8] sm:$0xff] %v634_v25  ;;  %v638_v27 = vld [vmem:[%s10520_s6 + $0xda8] sm:$0xff] }
  0x7d   : > { %637 = vst [vmem:[%s10528_s7 + $0x6d0] sm:$0xff] %v636_v26  ;;  %v640_v28 = vld [vmem:[%s10520_s6 + $0xdc0] sm:$0xff]  ;;  %v642_v29 = vld [vmem:[%s10520_s6 + $0xdc8] sm:$0xff]  ;;  %639 = vst [vmem:[%s10528_s7 + $0x6d8] sm:$0xff] %v638_v27 }
  0x7e   : > { %641 = vst [vmem:[%s10528_s7 + $0x6e0] sm:$0xff] %v640_v28  ;;  %643 = vst [vmem:[%s10528_s7 + $0x6e8] sm:$0xff] %v642_v29  ;;  %v644_v30 = vld [vmem:[%s10520_s6 + $0xde0] sm:$0xff]  ;;  %v646_v31 = vld [vmem:[%s10520_s6 + $0xde8] sm:$0xff] }
  0x7f   : > { %v648_v32 = vld [vmem:[%s10520_s6 + $0xe00] sm:$0xff]  ;;  %645 = vst [vmem:[%s10528_s7 + $0x6f0] sm:$0xff] %v644_v30  ;;  %647 = vst [vmem:[%s10528_s7 + $0x6f8] sm:$0xff] %v646_v31  ;;  %v650_v33 = vld [vmem:[%s10520_s6 + $0xe08] sm:$0xff] }
  0x80   : > { %649 = vst [vmem:[%s10528_s7 + $0x700] sm:$0xff] %v648_v32  ;;  %v652_v34 = vld [vmem:[%s10520_s6 + $0xe20] sm:$0xff]  ;;  %v654_v35 = vld [vmem:[%s10520_s6 + $0xe28] sm:$0xff]  ;;  %651 = vst [vmem:[%s10528_s7 + $0x708] sm:$0xff] %v650_v33 }
  0x81   : > { %653 = vst [vmem:[%s10528_s7 + $0x710] sm:$0xff] %v652_v34  ;;  %655 = vst [vmem:[%s10528_s7 + $0x718] sm:$0xff] %v654_v35  ;;  %v656_v36 = vld [vmem:[%s10520_s6 + $0xe40] sm:$0xff]  ;;  %v658_v37 = vld [vmem:[%s10520_s6 + $0xe48] sm:$0xff] }
  0x82   : > { %v660_v38 = vld [vmem:[%s10520_s6 + $0xe60] sm:$0xff]  ;;  %657 = vst [vmem:[%s10528_s7 + $0x720] sm:$0xff] %v656_v36  ;;  %659 = vst [vmem:[%s10528_s7 + $0x728] sm:$0xff] %v658_v37  ;;  %v662_v39 = vld [vmem:[%s10520_s6 + $0xe68] sm:$0xff] }
  0x83   : > { %661 = vst [vmem:[%s10528_s7 + $0x730] sm:$0xff] %v660_v38  ;;  %v664_v40 = vld [vmem:[%s10520_s6 + $0xe80] sm:$0xff]  ;;  %v666_v41 = vld [vmem:[%s10520_s6 + $0xe88] sm:$0xff]  ;;  %663 = vst [vmem:[%s10528_s7 + $0x738] sm:$0xff] %v662_v39 }
  0x84   : > { %665 = vst [vmem:[%s10528_s7 + $0x740] sm:$0xff] %v664_v40  ;;  %667 = vst [vmem:[%s10528_s7 + $0x748] sm:$0xff] %v666_v41  ;;  %v668_v42 = vld [vmem:[%s10520_s6 + $0xea0] sm:$0xff]  ;;  %v670_v43 = vld [vmem:[%s10520_s6 + $0xea8] sm:$0xff] }
  0x85   : > { %v672_v44 = vld [vmem:[%s10520_s6 + $0xec0] sm:$0xff]  ;;  %669 = vst [vmem:[%s10528_s7 + $0x750] sm:$0xff] %v668_v42  ;;  %671 = vst [vmem:[%s10528_s7 + $0x758] sm:$0xff] %v670_v43  ;;  %v674_v45 = vld [vmem:[%s10520_s6 + $0xec8] sm:$0xff] }
  0x86   : > { %673 = vst [vmem:[%s10528_s7 + $0x760] sm:$0xff] %v672_v44  ;;  %v676_v46 = vld [vmem:[%s10520_s6 + $0xee0] sm:$0xff]  ;;  %v678_v47 = vld [vmem:[%s10520_s6 + $0xee8] sm:$0xff]  ;;  %675 = vst [vmem:[%s10528_s7 + $0x768] sm:$0xff] %v674_v45 }
  0x87   : > { %677 = vst [vmem:[%s10528_s7 + $0x770] sm:$0xff] %v676_v46  ;;  %679 = vst [vmem:[%s10528_s7 + $0x778] sm:$0xff] %v678_v47  ;;  %v680_v48 = vld [vmem:[%s10520_s6 + $0xf00] sm:$0xff]  ;;  %v682_v49 = vld [vmem:[%s10520_s6 + $0xf08] sm:$0xff] }
  0x88   : > { %v684_v50 = vld [vmem:[%s10520_s6 + $0xf20] sm:$0xff]  ;;  %681 = vst [vmem:[%s10528_s7 + $0x780] sm:$0xff] %v680_v48  ;;  %683 = vst [vmem:[%s10528_s7 + $0x788] sm:$0xff] %v682_v49  ;;  %v686_v51 = vld [vmem:[%s10520_s6 + $0xf28] sm:$0xff] }
  0x89   : > { %685 = vst [vmem:[%s10528_s7 + $0x790] sm:$0xff] %v684_v50  ;;  %v688_v52 = vld [vmem:[%s10520_s6 + $0xf40] sm:$0xff]  ;;  %v690_v53 = vld [vmem:[%s10520_s6 + $0xf48] sm:$0xff]  ;;  %687 = vst [vmem:[%s10528_s7 + $0x798] sm:$0xff] %v686_v51 }
  0x8a   : > { %689 = vst [vmem:[%s10528_s7 + $0x7a0] sm:$0xff] %v688_v52  ;;  %691 = vst [vmem:[%s10528_s7 + $0x7a8] sm:$0xff] %v690_v53  ;;  %v692_v54 = vld [vmem:[%s10520_s6 + $0xf60] sm:$0xff]  ;;  %v694_v55 = vld [vmem:[%s10520_s6 + $0xf68] sm:$0xff] }
  0x8b   : > { %v696_v56 = vld [vmem:[%s10520_s6 + $0xf80] sm:$0xff]  ;;  %693 = vst [vmem:[%s10528_s7 + $0x7b0] sm:$0xff] %v692_v54  ;;  %695 = vst [vmem:[%s10528_s7 + $0x7b8] sm:$0xff] %v694_v55  ;;  %v698_v57 = vld [vmem:[%s10520_s6 + $0xf88] sm:$0xff] }
  0x8c   : > { %697 = vst [vmem:[%s10528_s7 + $0x7c0] sm:$0xff] %v696_v56  ;;  %v700_v58 = vld [vmem:[%s10520_s6 + $0xfa0] sm:$0xff]  ;;  %v702_v59 = vld [vmem:[%s10520_s6 + $0xfa8] sm:$0xff]  ;;  %699 = vst [vmem:[%s10528_s7 + $0x7c8] sm:$0xff] %v698_v57 }
  0x8d   : > { %701 = vst [vmem:[%s10528_s7 + $0x7d0] sm:$0xff] %v700_v58  ;;  %703 = vst [vmem:[%s10528_s7 + $0x7d8] sm:$0xff] %v702_v59  ;;  %v704_v60 = vld [vmem:[%s10520_s6 + $0xfc0] sm:$0xff]  ;;  %v706_v61 = vld [vmem:[%s10520_s6 + $0xfc8] sm:$0xff] }
  0x8e   : > { %v708_v62 = vld [vmem:[%s10520_s6 + $0xfe0] sm:$0xff]  ;;  %705 = vst [vmem:[%s10528_s7 + $0x7e0] sm:$0xff] %v704_v60  ;;  %707 = vst [vmem:[%s10528_s7 + $0x7e8] sm:$0xff] %v706_v61  ;;  %v710_v63 = vld [vmem:[%s10520_s6 + $0xfe8] sm:$0xff] }
  0x8f   : > { %709 = vst [vmem:[%s10528_s7 + $0x7f0] sm:$0xff] %v708_v62  ;;  %v712_v0 = vld [vmem:[%s10520_s6 + $0x1000] sm:$0xff]  ;;  %v714_v1 = vld [vmem:[%s10520_s6 + $0x1008] sm:$0xff]  ;;  %711 = vst [vmem:[%s10528_s7 + $0x7f8] sm:$0xff] %v710_v63 }
  0x90   : > { %713 = vst [vmem:[%s10528_s7 + $0x800] sm:$0xff] %v712_v0  ;;  %715 = vst [vmem:[%s10528_s7 + $0x808] sm:$0xff] %v714_v1  ;;  %v716_v2 = vld [vmem:[%s10520_s6 + $0x1020] sm:$0xff]  ;;  %v718_v3 = vld [vmem:[%s10520_s6 + $0x1028] sm:$0xff] }
  0x91   : > { %v720_v4 = vld [vmem:[%s10520_s6 + $0x1040] sm:$0xff]  ;;  %717 = vst [vmem:[%s10528_s7 + $0x810] sm:$0xff] %v716_v2  ;;  %719 = vst [vmem:[%s10528_s7 + $0x818] sm:$0xff] %v718_v3  ;;  %v722_v5 = vld [vmem:[%s10520_s6 + $0x1048] sm:$0xff] }
  0x92   : > { %721 = vst [vmem:[%s10528_s7 + $0x820] sm:$0xff] %v720_v4  ;;  %v724_v6 = vld [vmem:[%s10520_s6 + $0x1060] sm:$0xff]  ;;  %v726_v7 = vld [vmem:[%s10520_s6 + $0x1068] sm:$0xff]  ;;  %723 = vst [vmem:[%s10528_s7 + $0x828] sm:$0xff] %v722_v5 }
  0x93   : > { %725 = vst [vmem:[%s10528_s7 + $0x830] sm:$0xff] %v724_v6  ;;  %727 = vst [vmem:[%s10528_s7 + $0x838] sm:$0xff] %v726_v7  ;;  %v728_v8 = vld [vmem:[%s10520_s6 + $0x1080] sm:$0xff]  ;;  %v730_v9 = vld [vmem:[%s10520_s6 + $0x1088] sm:$0xff] }
  0x94   : > { %v732_v10 = vld [vmem:[%s10520_s6 + $0x10a0] sm:$0xff]  ;;  %729 = vst [vmem:[%s10528_s7 + $0x840] sm:$0xff] %v728_v8  ;;  %731 = vst [vmem:[%s10528_s7 + $0x848] sm:$0xff] %v730_v9  ;;  %v734_v11 = vld [vmem:[%s10520_s6 + $0x10a8] sm:$0xff] }
  0x95   : > { %733 = vst [vmem:[%s10528_s7 + $0x850] sm:$0xff] %v732_v10  ;;  %v736_v12 = vld [vmem:[%s10520_s6 + $0x10c0] sm:$0xff]  ;;  %v738_v13 = vld [vmem:[%s10520_s6 + $0x10c8] sm:$0xff]  ;;  %735 = vst [vmem:[%s10528_s7 + $0x858] sm:$0xff] %v734_v11 }
  0x96   : > { %737 = vst [vmem:[%s10528_s7 + $0x860] sm:$0xff] %v736_v12  ;;  %739 = vst [vmem:[%s10528_s7 + $0x868] sm:$0xff] %v738_v13  ;;  %v740_v14 = vld [vmem:[%s10520_s6 + $0x10e0] sm:$0xff]  ;;  %v742_v15 = vld [vmem:[%s10520_s6 + $0x10e8] sm:$0xff] }
  0x97   : > { %v744_v16 = vld [vmem:[%s10520_s6 + $0x1100] sm:$0xff]  ;;  %741 = vst [vmem:[%s10528_s7 + $0x870] sm:$0xff] %v740_v14  ;;  %743 = vst [vmem:[%s10528_s7 + $0x878] sm:$0xff] %v742_v15  ;;  %v746_v17 = vld [vmem:[%s10520_s6 + $0x1108] sm:$0xff] }
  0x98   : > { %745 = vst [vmem:[%s10528_s7 + $0x880] sm:$0xff] %v744_v16  ;;  %v748_v18 = vld [vmem:[%s10520_s6 + $0x1120] sm:$0xff]  ;;  %v750_v19 = vld [vmem:[%s10520_s6 + $0x1128] sm:$0xff]  ;;  %747 = vst [vmem:[%s10528_s7 + $0x888] sm:$0xff] %v746_v17 }
  0x99   : > { %749 = vst [vmem:[%s10528_s7 + $0x890] sm:$0xff] %v748_v18  ;;  %751 = vst [vmem:[%s10528_s7 + $0x898] sm:$0xff] %v750_v19  ;;  %v752_v20 = vld [vmem:[%s10520_s6 + $0x1140] sm:$0xff]  ;;  %v754_v21 = vld [vmem:[%s10520_s6 + $0x1148] sm:$0xff] }
  0x9a   : > { %v756_v22 = vld [vmem:[%s10520_s6 + $0x1160] sm:$0xff]  ;;  %753 = vst [vmem:[%s10528_s7 + $0x8a0] sm:$0xff] %v752_v20  ;;  %755 = vst [vmem:[%s10528_s7 + $0x8a8] sm:$0xff] %v754_v21  ;;  %v758_v23 = vld [vmem:[%s10520_s6 + $0x1168] sm:$0xff] }
  0x9b   : > { %757 = vst [vmem:[%s10528_s7 + $0x8b0] sm:$0xff] %v756_v22  ;;  %v760_v24 = vld [vmem:[%s10520_s6 + $0x1180] sm:$0xff]  ;;  %v762_v25 = vld [vmem:[%s10520_s6 + $0x1188] sm:$0xff]  ;;  %759 = vst [vmem:[%s10528_s7 + $0x8b8] sm:$0xff] %v758_v23 }
  0x9c   : > { %761 = vst [vmem:[%s10528_s7 + $0x8c0] sm:$0xff] %v760_v24  ;;  %763 = vst [vmem:[%s10528_s7 + $0x8c8] sm:$0xff] %v762_v25  ;;  %v764_v26 = vld [vmem:[%s10520_s6 + $0x11a0] sm:$0xff]  ;;  %v766_v27 = vld [vmem:[%s10520_s6 + $0x11a8] sm:$0xff] }
  0x9d   : > { %v768_v28 = vld [vmem:[%s10520_s6 + $0x11c0] sm:$0xff]  ;;  %765 = vst [vmem:[%s10528_s7 + $0x8d0] sm:$0xff] %v764_v26  ;;  %767 = vst [vmem:[%s10528_s7 + $0x8d8] sm:$0xff] %v766_v27  ;;  %v770_v29 = vld [vmem:[%s10520_s6 + $0x11c8] sm:$0xff] }
  0x9e   : > { %769 = vst [vmem:[%s10528_s7 + $0x8e0] sm:$0xff] %v768_v28  ;;  %v772_v30 = vld [vmem:[%s10520_s6 + $0x11e0] sm:$0xff]  ;;  %v774_v31 = vld [vmem:[%s10520_s6 + $0x11e8] sm:$0xff]  ;;  %771 = vst [vmem:[%s10528_s7 + $0x8e8] sm:$0xff] %v770_v29 }
  0x9f   : > { %773 = vst [vmem:[%s10528_s7 + $0x8f0] sm:$0xff] %v772_v30  ;;  %775 = vst [vmem:[%s10528_s7 + $0x8f8] sm:$0xff] %v774_v31  ;;  %v776_v32 = vld [vmem:[%s10520_s6 + $0x1200] sm:$0xff]  ;;  %v778_v33 = vld [vmem:[%s10520_s6 + $0x1208] sm:$0xff] }
  0xa0   : > { %v780_v34 = vld [vmem:[%s10520_s6 + $0x1220] sm:$0xff]  ;;  %777 = vst [vmem:[%s10528_s7 + $0x900] sm:$0xff] %v776_v32  ;;  %779 = vst [vmem:[%s10528_s7 + $0x908] sm:$0xff] %v778_v33  ;;  %v782_v35 = vld [vmem:[%s10520_s6 + $0x1228] sm:$0xff] }
  0xa1   : > { %781 = vst [vmem:[%s10528_s7 + $0x910] sm:$0xff] %v780_v34  ;;  %v784_v36 = vld [vmem:[%s10520_s6 + $0x1240] sm:$0xff]  ;;  %v786_v37 = vld [vmem:[%s10520_s6 + $0x1248] sm:$0xff]  ;;  %783 = vst [vmem:[%s10528_s7 + $0x918] sm:$0xff] %v782_v35 }
  0xa2   : > { %785 = vst [vmem:[%s10528_s7 + $0x920] sm:$0xff] %v784_v36  ;;  %787 = vst [vmem:[%s10528_s7 + $0x928] sm:$0xff] %v786_v37  ;;  %v788_v38 = vld [vmem:[%s10520_s6 + $0x1260] sm:$0xff]  ;;  %v790_v39 = vld [vmem:[%s10520_s6 + $0x1268] sm:$0xff] }
  0xa3   : > { %v792_v40 = vld [vmem:[%s10520_s6 + $0x1280] sm:$0xff]  ;;  %789 = vst [vmem:[%s10528_s7 + $0x930] sm:$0xff] %v788_v38  ;;  %791 = vst [vmem:[%s10528_s7 + $0x938] sm:$0xff] %v790_v39  ;;  %v794_v41 = vld [vmem:[%s10520_s6 + $0x1288] sm:$0xff] }
  0xa4   : > { %793 = vst [vmem:[%s10528_s7 + $0x940] sm:$0xff] %v792_v40  ;;  %v796_v42 = vld [vmem:[%s10520_s6 + $0x12a0] sm:$0xff]  ;;  %v798_v43 = vld [vmem:[%s10520_s6 + $0x12a8] sm:$0xff]  ;;  %795 = vst [vmem:[%s10528_s7 + $0x948] sm:$0xff] %v794_v41 }
  0xa5   : > { %797 = vst [vmem:[%s10528_s7 + $0x950] sm:$0xff] %v796_v42  ;;  %799 = vst [vmem:[%s10528_s7 + $0x958] sm:$0xff] %v798_v43  ;;  %v800_v44 = vld [vmem:[%s10520_s6 + $0x12c0] sm:$0xff]  ;;  %v802_v45 = vld [vmem:[%s10520_s6 + $0x12c8] sm:$0xff] }
  0xa6   : > { %v804_v46 = vld [vmem:[%s10520_s6 + $0x12e0] sm:$0xff]  ;;  %801 = vst [vmem:[%s10528_s7 + $0x960] sm:$0xff] %v800_v44  ;;  %803 = vst [vmem:[%s10528_s7 + $0x968] sm:$0xff] %v802_v45  ;;  %v806_v47 = vld [vmem:[%s10520_s6 + $0x12e8] sm:$0xff] }
  0xa7   : > { %805 = vst [vmem:[%s10528_s7 + $0x970] sm:$0xff] %v804_v46  ;;  %v808_v48 = vld [vmem:[%s10520_s6 + $0x1300] sm:$0xff]  ;;  %v810_v49 = vld [vmem:[%s10520_s6 + $0x1308] sm:$0xff]  ;;  %807 = vst [vmem:[%s10528_s7 + $0x978] sm:$0xff] %v806_v47 }
  0xa8   : > { %809 = vst [vmem:[%s10528_s7 + $0x980] sm:$0xff] %v808_v48  ;;  %811 = vst [vmem:[%s10528_s7 + $0x988] sm:$0xff] %v810_v49  ;;  %v812_v50 = vld [vmem:[%s10520_s6 + $0x1320] sm:$0xff]  ;;  %v814_v51 = vld [vmem:[%s10520_s6 + $0x1328] sm:$0xff] }
  0xa9   : > { %v816_v52 = vld [vmem:[%s10520_s6 + $0x1340] sm:$0xff]  ;;  %813 = vst [vmem:[%s10528_s7 + $0x990] sm:$0xff] %v812_v50  ;;  %815 = vst [vmem:[%s10528_s7 + $0x998] sm:$0xff] %v814_v51  ;;  %v818_v53 = vld [vmem:[%s10520_s6 + $0x1348] sm:$0xff] }
  0xaa   : > { %817 = vst [vmem:[%s10528_s7 + $0x9a0] sm:$0xff] %v816_v52  ;;  %v820_v54 = vld [vmem:[%s10520_s6 + $0x1360] sm:$0xff]  ;;  %v822_v55 = vld [vmem:[%s10520_s6 + $0x1368] sm:$0xff]  ;;  %819 = vst [vmem:[%s10528_s7 + $0x9a8] sm:$0xff] %v818_v53 }
  0xab   : > { %821 = vst [vmem:[%s10528_s7 + $0x9b0] sm:$0xff] %v820_v54  ;;  %823 = vst [vmem:[%s10528_s7 + $0x9b8] sm:$0xff] %v822_v55  ;;  %v824_v56 = vld [vmem:[%s10520_s6 + $0x1380] sm:$0xff]  ;;  %v826_v57 = vld [vmem:[%s10520_s6 + $0x1388] sm:$0xff] }
  0xac   : > { %v828_v58 = vld [vmem:[%s10520_s6 + $0x13a0] sm:$0xff]  ;;  %825 = vst [vmem:[%s10528_s7 + $0x9c0] sm:$0xff] %v824_v56  ;;  %827 = vst [vmem:[%s10528_s7 + $0x9c8] sm:$0xff] %v826_v57  ;;  %v830_v59 = vld [vmem:[%s10520_s6 + $0x13a8] sm:$0xff] }
  0xad   : > { %829 = vst [vmem:[%s10528_s7 + $0x9d0] sm:$0xff] %v828_v58  ;;  %v832_v60 = vld [vmem:[%s10520_s6 + $0x13c0] sm:$0xff]  ;;  %v834_v61 = vld [vmem:[%s10520_s6 + $0x13c8] sm:$0xff]  ;;  %831 = vst [vmem:[%s10528_s7 + $0x9d8] sm:$0xff] %v830_v59 }
  0xae   : > { %833 = vst [vmem:[%s10528_s7 + $0x9e0] sm:$0xff] %v832_v60  ;;  %835 = vst [vmem:[%s10528_s7 + $0x9e8] sm:$0xff] %v834_v61  ;;  %v836_v62 = vld [vmem:[%s10520_s6 + $0x13e0] sm:$0xff]  ;;  %v838_v63 = vld [vmem:[%s10520_s6 + $0x13e8] sm:$0xff] }
  0xaf   : > { %v840_v0 = vld [vmem:[%s10520_s6 + $0x1400] sm:$0xff]  ;;  %837 = vst [vmem:[%s10528_s7 + $0x9f0] sm:$0xff] %v836_v62  ;;  %839 = vst [vmem:[%s10528_s7 + $0x9f8] sm:$0xff] %v838_v63  ;;  %v842_v1 = vld [vmem:[%s10520_s6 + $0x1408] sm:$0xff] }
  0xb0   : > { %841 = vst [vmem:[%s10528_s7 + $0xa00] sm:$0xff] %v840_v0  ;;  %v844_v2 = vld [vmem:[%s10520_s6 + $0x1420] sm:$0xff]  ;;  %v846_v3 = vld [vmem:[%s10520_s6 + $0x1428] sm:$0xff]  ;;  %843 = vst [vmem:[%s10528_s7 + $0xa08] sm:$0xff] %v842_v1 }
  0xb1   : > { %845 = vst [vmem:[%s10528_s7 + $0xa10] sm:$0xff] %v844_v2  ;;  %847 = vst [vmem:[%s10528_s7 + $0xa18] sm:$0xff] %v846_v3  ;;  %v848_v4 = vld [vmem:[%s10520_s6 + $0x1440] sm:$0xff]  ;;  %v850_v5 = vld [vmem:[%s10520_s6 + $0x1448] sm:$0xff] }
  0xb2   : > { %v852_v6 = vld [vmem:[%s10520_s6 + $0x1460] sm:$0xff]  ;;  %849 = vst [vmem:[%s10528_s7 + $0xa20] sm:$0xff] %v848_v4  ;;  %851 = vst [vmem:[%s10528_s7 + $0xa28] sm:$0xff] %v850_v5  ;;  %v854_v7 = vld [vmem:[%s10520_s6 + $0x1468] sm:$0xff] }
  0xb3   : > { %853 = vst [vmem:[%s10528_s7 + $0xa30] sm:$0xff] %v852_v6  ;;  %v856_v8 = vld [vmem:[%s10520_s6 + $0x1480] sm:$0xff]  ;;  %v858_v9 = vld [vmem:[%s10520_s6 + $0x1488] sm:$0xff]  ;;  %855 = vst [vmem:[%s10528_s7 + $0xa38] sm:$0xff] %v854_v7 }
  0xb4   : > { %857 = vst [vmem:[%s10528_s7 + $0xa40] sm:$0xff] %v856_v8  ;;  %859 = vst [vmem:[%s10528_s7 + $0xa48] sm:$0xff] %v858_v9  ;;  %v860_v10 = vld [vmem:[%s10520_s6 + $0x14a0] sm:$0xff]  ;;  %v862_v11 = vld [vmem:[%s10520_s6 + $0x14a8] sm:$0xff] }
  0xb5   : > { %v864_v12 = vld [vmem:[%s10520_s6 + $0x14c0] sm:$0xff]  ;;  %861 = vst [vmem:[%s10528_s7 + $0xa50] sm:$0xff] %v860_v10  ;;  %863 = vst [vmem:[%s10528_s7 + $0xa58] sm:$0xff] %v862_v11  ;;  %v866_v13 = vld [vmem:[%s10520_s6 + $0x14c8] sm:$0xff] }
  0xb6   : > { %865 = vst [vmem:[%s10528_s7 + $0xa60] sm:$0xff] %v864_v12  ;;  %v868_v14 = vld [vmem:[%s10520_s6 + $0x14e0] sm:$0xff]  ;;  %v870_v15 = vld [vmem:[%s10520_s6 + $0x14e8] sm:$0xff]  ;;  %867 = vst [vmem:[%s10528_s7 + $0xa68] sm:$0xff] %v866_v13 }
  0xb7   : > { %869 = vst [vmem:[%s10528_s7 + $0xa70] sm:$0xff] %v868_v14  ;;  %871 = vst [vmem:[%s10528_s7 + $0xa78] sm:$0xff] %v870_v15  ;;  %v872_v16 = vld [vmem:[%s10520_s6 + $0x1500] sm:$0xff]  ;;  %v874_v17 = vld [vmem:[%s10520_s6 + $0x1508] sm:$0xff] }
  0xb8   : > { %v876_v18 = vld [vmem:[%s10520_s6 + $0x1520] sm:$0xff]  ;;  %873 = vst [vmem:[%s10528_s7 + $0xa80] sm:$0xff] %v872_v16  ;;  %875 = vst [vmem:[%s10528_s7 + $0xa88] sm:$0xff] %v874_v17  ;;  %v878_v19 = vld [vmem:[%s10520_s6 + $0x1528] sm:$0xff] }
  0xb9   : > { %877 = vst [vmem:[%s10528_s7 + $0xa90] sm:$0xff] %v876_v18  ;;  %v880_v20 = vld [vmem:[%s10520_s6 + $0x1540] sm:$0xff]  ;;  %v882_v21 = vld [vmem:[%s10520_s6 + $0x1548] sm:$0xff]  ;;  %879 = vst [vmem:[%s10528_s7 + $0xa98] sm:$0xff] %v878_v19 }
  0xba   : > { %881 = vst [vmem:[%s10528_s7 + $0xaa0] sm:$0xff] %v880_v20  ;;  %883 = vst [vmem:[%s10528_s7 + $0xaa8] sm:$0xff] %v882_v21  ;;  %v884_v22 = vld [vmem:[%s10520_s6 + $0x1560] sm:$0xff]  ;;  %v886_v23 = vld [vmem:[%s10520_s6 + $0x1568] sm:$0xff] }
  0xbb   : > { %v888_v24 = vld [vmem:[%s10520_s6 + $0x1580] sm:$0xff]  ;;  %885 = vst [vmem:[%s10528_s7 + $0xab0] sm:$0xff] %v884_v22  ;;  %887 = vst [vmem:[%s10528_s7 + $0xab8] sm:$0xff] %v886_v23  ;;  %v890_v25 = vld [vmem:[%s10520_s6 + $0x1588] sm:$0xff] }
  0xbc   : > { %889 = vst [vmem:[%s10528_s7 + $0xac0] sm:$0xff] %v888_v24  ;;  %v892_v26 = vld [vmem:[%s10520_s6 + $0x15a0] sm:$0xff]  ;;  %v894_v27 = vld [vmem:[%s10520_s6 + $0x15a8] sm:$0xff]  ;;  %891 = vst [vmem:[%s10528_s7 + $0xac8] sm:$0xff] %v890_v25 }
  0xbd   : > { %893 = vst [vmem:[%s10528_s7 + $0xad0] sm:$0xff] %v892_v26  ;;  %895 = vst [vmem:[%s10528_s7 + $0xad8] sm:$0xff] %v894_v27  ;;  %v896_v28 = vld [vmem:[%s10520_s6 + $0x15c0] sm:$0xff]  ;;  %v898_v29 = vld [vmem:[%s10520_s6 + $0x15c8] sm:$0xff] }
  0xbe   : > { %v900_v30 = vld [vmem:[%s10520_s6 + $0x15e0] sm:$0xff]  ;;  %897 = vst [vmem:[%s10528_s7 + $0xae0] sm:$0xff] %v896_v28  ;;  %899 = vst [vmem:[%s10528_s7 + $0xae8] sm:$0xff] %v898_v29  ;;  %v902_v31 = vld [vmem:[%s10520_s6 + $0x15e8] sm:$0xff] }
  0xbf   : > { %901 = vst [vmem:[%s10528_s7 + $0xaf0] sm:$0xff] %v900_v30  ;;  %v904_v32 = vld [vmem:[%s10520_s6 + $0x1600] sm:$0xff]  ;;  %v906_v33 = vld [vmem:[%s10520_s6 + $0x1608] sm:$0xff]  ;;  %903 = vst [vmem:[%s10528_s7 + $0xaf8] sm:$0xff] %v902_v31 }
  0xc0   : > { %905 = vst [vmem:[%s10528_s7 + $0xb00] sm:$0xff] %v904_v32  ;;  %907 = vst [vmem:[%s10528_s7 + $0xb08] sm:$0xff] %v906_v33  ;;  %v908_v34 = vld [vmem:[%s10520_s6 + $0x1620] sm:$0xff]  ;;  %v910_v35 = vld [vmem:[%s10520_s6 + $0x1628] sm:$0xff] }
  0xc1   : > { %v912_v36 = vld [vmem:[%s10520_s6 + $0x1640] sm:$0xff]  ;;  %909 = vst [vmem:[%s10528_s7 + $0xb10] sm:$0xff] %v908_v34  ;;  %911 = vst [vmem:[%s10528_s7 + $0xb18] sm:$0xff] %v910_v35  ;;  %v914_v37 = vld [vmem:[%s10520_s6 + $0x1648] sm:$0xff] }
  0xc2   : > { %913 = vst [vmem:[%s10528_s7 + $0xb20] sm:$0xff] %v912_v36  ;;  %v916_v38 = vld [vmem:[%s10520_s6 + $0x1660] sm:$0xff]  ;;  %v918_v39 = vld [vmem:[%s10520_s6 + $0x1668] sm:$0xff]  ;;  %915 = vst [vmem:[%s10528_s7 + $0xb28] sm:$0xff] %v914_v37 }
  0xc3   : > { %917 = vst [vmem:[%s10528_s7 + $0xb30] sm:$0xff] %v916_v38  ;;  %919 = vst [vmem:[%s10528_s7 + $0xb38] sm:$0xff] %v918_v39  ;;  %v920_v40 = vld [vmem:[%s10520_s6 + $0x1680] sm:$0xff]  ;;  %v922_v41 = vld [vmem:[%s10520_s6 + $0x1688] sm:$0xff] }
  0xc4   : > { %v924_v42 = vld [vmem:[%s10520_s6 + $0x16a0] sm:$0xff]  ;;  %921 = vst [vmem:[%s10528_s7 + $0xb40] sm:$0xff] %v920_v40  ;;  %923 = vst [vmem:[%s10528_s7 + $0xb48] sm:$0xff] %v922_v41  ;;  %v926_v43 = vld [vmem:[%s10520_s6 + $0x16a8] sm:$0xff] }
  0xc5   : > { %925 = vst [vmem:[%s10528_s7 + $0xb50] sm:$0xff] %v924_v42  ;;  %v928_v44 = vld [vmem:[%s10520_s6 + $0x16c0] sm:$0xff]  ;;  %v930_v45 = vld [vmem:[%s10520_s6 + $0x16c8] sm:$0xff]  ;;  %927 = vst [vmem:[%s10528_s7 + $0xb58] sm:$0xff] %v926_v43 }
  0xc6   : > { %929 = vst [vmem:[%s10528_s7 + $0xb60] sm:$0xff] %v928_v44  ;;  %931 = vst [vmem:[%s10528_s7 + $0xb68] sm:$0xff] %v930_v45  ;;  %v932_v46 = vld [vmem:[%s10520_s6 + $0x16e0] sm:$0xff]  ;;  %v934_v47 = vld [vmem:[%s10520_s6 + $0x16e8] sm:$0xff] }
  0xc7   : > { %v936_v48 = vld [vmem:[%s10520_s6 + $0x1700] sm:$0xff]  ;;  %933 = vst [vmem:[%s10528_s7 + $0xb70] sm:$0xff] %v932_v46  ;;  %935 = vst [vmem:[%s10528_s7 + $0xb78] sm:$0xff] %v934_v47  ;;  %v938_v49 = vld [vmem:[%s10520_s6 + $0x1708] sm:$0xff] }
  0xc8   : > { %937 = vst [vmem:[%s10528_s7 + $0xb80] sm:$0xff] %v936_v48  ;;  %v940_v50 = vld [vmem:[%s10520_s6 + $0x1720] sm:$0xff]  ;;  %v942_v51 = vld [vmem:[%s10520_s6 + $0x1728] sm:$0xff]  ;;  %939 = vst [vmem:[%s10528_s7 + $0xb88] sm:$0xff] %v938_v49 }
  0xc9   : > { %941 = vst [vmem:[%s10528_s7 + $0xb90] sm:$0xff] %v940_v50  ;;  %943 = vst [vmem:[%s10528_s7 + $0xb98] sm:$0xff] %v942_v51  ;;  %v944_v52 = vld [vmem:[%s10520_s6 + $0x1740] sm:$0xff]  ;;  %v946_v53 = vld [vmem:[%s10520_s6 + $0x1748] sm:$0xff] }
  0xca   : > { %v948_v54 = vld [vmem:[%s10520_s6 + $0x1760] sm:$0xff]  ;;  %945 = vst [vmem:[%s10528_s7 + $0xba0] sm:$0xff] %v944_v52  ;;  %947 = vst [vmem:[%s10528_s7 + $0xba8] sm:$0xff] %v946_v53  ;;  %v950_v55 = vld [vmem:[%s10520_s6 + $0x1768] sm:$0xff] }
  0xcb   : > { %949 = vst [vmem:[%s10528_s7 + $0xbb0] sm:$0xff] %v948_v54  ;;  %v952_v56 = vld [vmem:[%s10520_s6 + $0x1780] sm:$0xff]  ;;  %v954_v57 = vld [vmem:[%s10520_s6 + $0x1788] sm:$0xff]  ;;  %951 = vst [vmem:[%s10528_s7 + $0xbb8] sm:$0xff] %v950_v55 }
  0xcc   : > { %953 = vst [vmem:[%s10528_s7 + $0xbc0] sm:$0xff] %v952_v56  ;;  %955 = vst [vmem:[%s10528_s7 + $0xbc8] sm:$0xff] %v954_v57  ;;  %v956_v58 = vld [vmem:[%s10520_s6 + $0x17a0] sm:$0xff]  ;;  %v958_v59 = vld [vmem:[%s10520_s6 + $0x17a8] sm:$0xff] }
  0xcd   : > { %v960_v60 = vld [vmem:[%s10520_s6 + $0x17c0] sm:$0xff]  ;;  %957 = vst [vmem:[%s10528_s7 + $0xbd0] sm:$0xff] %v956_v58  ;;  %959 = vst [vmem:[%s10528_s7 + $0xbd8] sm:$0xff] %v958_v59  ;;  %v962_v61 = vld [vmem:[%s10520_s6 + $0x17c8] sm:$0xff] }
  0xce   : > { %961 = vst [vmem:[%s10528_s7 + $0xbe0] sm:$0xff] %v960_v60  ;;  %v964_v62 = vld [vmem:[%s10520_s6 + $0x17e0] sm:$0xff]  ;;  %v966_v63 = vld [vmem:[%s10520_s6 + $0x17e8] sm:$0xff]  ;;  %963 = vst [vmem:[%s10528_s7 + $0xbe8] sm:$0xff] %v962_v61 }
  0xcf   : > { %965 = vst [vmem:[%s10528_s7 + $0xbf0] sm:$0xff] %v964_v62  ;;  %967 = vst [vmem:[%s10528_s7 + $0xbf8] sm:$0xff] %v966_v63  ;;  %v968_v0 = vld [vmem:[%s10520_s6 + $0x1800] sm:$0xff]  ;;  %v970_v1 = vld [vmem:[%s10520_s6 + $0x1808] sm:$0xff] }
  0xd0   : > { %v972_v2 = vld [vmem:[%s10520_s6 + $0x1820] sm:$0xff]  ;;  %969 = vst [vmem:[%s10528_s7 + $0xc00] sm:$0xff] %v968_v0  ;;  %971 = vst [vmem:[%s10528_s7 + $0xc08] sm:$0xff] %v970_v1  ;;  %v974_v3 = vld [vmem:[%s10520_s6 + $0x1828] sm:$0xff] }
  0xd1   : > { %973 = vst [vmem:[%s10528_s7 + $0xc10] sm:$0xff] %v972_v2  ;;  %v976_v4 = vld [vmem:[%s10520_s6 + $0x1840] sm:$0xff]  ;;  %v978_v5 = vld [vmem:[%s10520_s6 + $0x1848] sm:$0xff]  ;;  %975 = vst [vmem:[%s10528_s7 + $0xc18] sm:$0xff] %v974_v3 }
  0xd2   : > { %977 = vst [vmem:[%s10528_s7 + $0xc20] sm:$0xff] %v976_v4  ;;  %979 = vst [vmem:[%s10528_s7 + $0xc28] sm:$0xff] %v978_v5  ;;  %v980_v6 = vld [vmem:[%s10520_s6 + $0x1860] sm:$0xff]  ;;  %v982_v7 = vld [vmem:[%s10520_s6 + $0x1868] sm:$0xff] }
  0xd3   : > { %v984_v8 = vld [vmem:[%s10520_s6 + $0x1880] sm:$0xff]  ;;  %981 = vst [vmem:[%s10528_s7 + $0xc30] sm:$0xff] %v980_v6  ;;  %983 = vst [vmem:[%s10528_s7 + $0xc38] sm:$0xff] %v982_v7  ;;  %v986_v9 = vld [vmem:[%s10520_s6 + $0x1888] sm:$0xff] }
  0xd4   : > { %985 = vst [vmem:[%s10528_s7 + $0xc40] sm:$0xff] %v984_v8  ;;  %v988_v10 = vld [vmem:[%s10520_s6 + $0x18a0] sm:$0xff]  ;;  %v990_v11 = vld [vmem:[%s10520_s6 + $0x18a8] sm:$0xff]  ;;  %987 = vst [vmem:[%s10528_s7 + $0xc48] sm:$0xff] %v986_v9 }
  0xd5   : > { %989 = vst [vmem:[%s10528_s7 + $0xc50] sm:$0xff] %v988_v10  ;;  %991 = vst [vmem:[%s10528_s7 + $0xc58] sm:$0xff] %v990_v11  ;;  %v992_v12 = vld [vmem:[%s10520_s6 + $0x18c0] sm:$0xff]  ;;  %v994_v13 = vld [vmem:[%s10520_s6 + $0x18c8] sm:$0xff] }
  0xd6   : > { %v996_v14 = vld [vmem:[%s10520_s6 + $0x18e0] sm:$0xff]  ;;  %993 = vst [vmem:[%s10528_s7 + $0xc60] sm:$0xff] %v992_v12  ;;  %995 = vst [vmem:[%s10528_s7 + $0xc68] sm:$0xff] %v994_v13  ;;  %v998_v15 = vld [vmem:[%s10520_s6 + $0x18e8] sm:$0xff] }
  0xd7   : > { %997 = vst [vmem:[%s10528_s7 + $0xc70] sm:$0xff] %v996_v14  ;;  %v1000_v16 = vld [vmem:[%s10520_s6 + $0x1900] sm:$0xff]  ;;  %v1002_v17 = vld [vmem:[%s10520_s6 + $0x1908] sm:$0xff]  ;;  %999 = vst [vmem:[%s10528_s7 + $0xc78] sm:$0xff] %v998_v15 }
  0xd8   : > { %1001 = vst [vmem:[%s10528_s7 + $0xc80] sm:$0xff] %v1000_v16  ;;  %1003 = vst [vmem:[%s10528_s7 + $0xc88] sm:$0xff] %v1002_v17  ;;  %v1004_v18 = vld [vmem:[%s10520_s6 + $0x1920] sm:$0xff]  ;;  %v1006_v19 = vld [vmem:[%s10520_s6 + $0x1928] sm:$0xff] }
  0xd9   : > { %v1008_v20 = vld [vmem:[%s10520_s6 + $0x1940] sm:$0xff]  ;;  %1005 = vst [vmem:[%s10528_s7 + $0xc90] sm:$0xff] %v1004_v18  ;;  %1007 = vst [vmem:[%s10528_s7 + $0xc98] sm:$0xff] %v1006_v19  ;;  %v1010_v21 = vld [vmem:[%s10520_s6 + $0x1948] sm:$0xff] }
  0xda   : > { %1009 = vst [vmem:[%s10528_s7 + $0xca0] sm:$0xff] %v1008_v20  ;;  %v1012_v22 = vld [vmem:[%s10520_s6 + $0x1960] sm:$0xff]  ;;  %v1014_v23 = vld [vmem:[%s10520_s6 + $0x1968] sm:$0xff]  ;;  %1011 = vst [vmem:[%s10528_s7 + $0xca8] sm:$0xff] %v1010_v21 }
  0xdb   : > { %1013 = vst [vmem:[%s10528_s7 + $0xcb0] sm:$0xff] %v1012_v22  ;;  %1015 = vst [vmem:[%s10528_s7 + $0xcb8] sm:$0xff] %v1014_v23  ;;  %v1016_v24 = vld [vmem:[%s10520_s6 + $0x1980] sm:$0xff]  ;;  %v1018_v25 = vld [vmem:[%s10520_s6 + $0x1988] sm:$0xff] }
  0xdc   : > { %v1020_v26 = vld [vmem:[%s10520_s6 + $0x19a0] sm:$0xff]  ;;  %1017 = vst [vmem:[%s10528_s7 + $0xcc0] sm:$0xff] %v1016_v24  ;;  %1019 = vst [vmem:[%s10528_s7 + $0xcc8] sm:$0xff] %v1018_v25  ;;  %v1022_v27 = vld [vmem:[%s10520_s6 + $0x19a8] sm:$0xff] }
  0xdd   : > { %1021 = vst [vmem:[%s10528_s7 + $0xcd0] sm:$0xff] %v1020_v26  ;;  %v1024_v28 = vld [vmem:[%s10520_s6 + $0x19c0] sm:$0xff]  ;;  %v1026_v29 = vld [vmem:[%s10520_s6 + $0x19c8] sm:$0xff]  ;;  %1023 = vst [vmem:[%s10528_s7 + $0xcd8] sm:$0xff] %v1022_v27 }
  0xde   : > { %1025 = vst [vmem:[%s10528_s7 + $0xce0] sm:$0xff] %v1024_v28  ;;  %1027 = vst [vmem:[%s10528_s7 + $0xce8] sm:$0xff] %v1026_v29  ;;  %v1028_v30 = vld [vmem:[%s10520_s6 + $0x19e0] sm:$0xff]  ;;  %v1030_v31 = vld [vmem:[%s10520_s6 + $0x19e8] sm:$0xff] }
  0xdf   : > { %v1032_v32 = vld [vmem:[%s10520_s6 + $0x1a00] sm:$0xff]  ;;  %1029 = vst [vmem:[%s10528_s7 + $0xcf0] sm:$0xff] %v1028_v30  ;;  %1031 = vst [vmem:[%s10528_s7 + $0xcf8] sm:$0xff] %v1030_v31  ;;  %v1034_v33 = vld [vmem:[%s10520_s6 + $0x1a08] sm:$0xff] }
  0xe0   : > { %1033 = vst [vmem:[%s10528_s7 + $0xd00] sm:$0xff] %v1032_v32  ;;  %v1036_v34 = vld [vmem:[%s10520_s6 + $0x1a20] sm:$0xff]  ;;  %v1038_v35 = vld [vmem:[%s10520_s6 + $0x1a28] sm:$0xff]  ;;  %1035 = vst [vmem:[%s10528_s7 + $0xd08] sm:$0xff] %v1034_v33 }
  0xe1   : > { %1037 = vst [vmem:[%s10528_s7 + $0xd10] sm:$0xff] %v1036_v34  ;;  %1039 = vst [vmem:[%s10528_s7 + $0xd18] sm:$0xff] %v1038_v35  ;;  %v1040_v36 = vld [vmem:[%s10520_s6 + $0x1a40] sm:$0xff]  ;;  %v1042_v37 = vld [vmem:[%s10520_s6 + $0x1a48] sm:$0xff] }
  0xe2   : > { %v1044_v38 = vld [vmem:[%s10520_s6 + $0x1a60] sm:$0xff]  ;;  %1041 = vst [vmem:[%s10528_s7 + $0xd20] sm:$0xff] %v1040_v36  ;;  %1043 = vst [vmem:[%s10528_s7 + $0xd28] sm:$0xff] %v1042_v37  ;;  %v1046_v39 = vld [vmem:[%s10520_s6 + $0x1a68] sm:$0xff] }
  0xe3   : > { %1045 = vst [vmem:[%s10528_s7 + $0xd30] sm:$0xff] %v1044_v38  ;;  %v1048_v40 = vld [vmem:[%s10520_s6 + $0x1a80] sm:$0xff]  ;;  %v1050_v41 = vld [vmem:[%s10520_s6 + $0x1a88] sm:$0xff]  ;;  %1047 = vst [vmem:[%s10528_s7 + $0xd38] sm:$0xff] %v1046_v39 }
  0xe4   : > { %1049 = vst [vmem:[%s10528_s7 + $0xd40] sm:$0xff] %v1048_v40  ;;  %1051 = vst [vmem:[%s10528_s7 + $0xd48] sm:$0xff] %v1050_v41  ;;  %v1052_v42 = vld [vmem:[%s10520_s6 + $0x1aa0] sm:$0xff]  ;;  %v1054_v43 = vld [vmem:[%s10520_s6 + $0x1aa8] sm:$0xff] }
  0xe5   : > { %v1056_v44 = vld [vmem:[%s10520_s6 + $0x1ac0] sm:$0xff]  ;;  %1053 = vst [vmem:[%s10528_s7 + $0xd50] sm:$0xff] %v1052_v42  ;;  %1055 = vst [vmem:[%s10528_s7 + $0xd58] sm:$0xff] %v1054_v43  ;;  %v1058_v45 = vld [vmem:[%s10520_s6 + $0x1ac8] sm:$0xff] }
  0xe6   : > { %1057 = vst [vmem:[%s10528_s7 + $0xd60] sm:$0xff] %v1056_v44  ;;  %v1060_v46 = vld [vmem:[%s10520_s6 + $0x1ae0] sm:$0xff]  ;;  %v1062_v47 = vld [vmem:[%s10520_s6 + $0x1ae8] sm:$0xff]  ;;  %1059 = vst [vmem:[%s10528_s7 + $0xd68] sm:$0xff] %v1058_v45 }
  0xe7   : > { %1061 = vst [vmem:[%s10528_s7 + $0xd70] sm:$0xff] %v1060_v46  ;;  %1063 = vst [vmem:[%s10528_s7 + $0xd78] sm:$0xff] %v1062_v47  ;;  %v1064_v48 = vld [vmem:[%s10520_s6 + $0x1b00] sm:$0xff]  ;;  %v1066_v49 = vld [vmem:[%s10520_s6 + $0x1b08] sm:$0xff] }
  0xe8   : > { %v1068_v50 = vld [vmem:[%s10520_s6 + $0x1b20] sm:$0xff]  ;;  %1065 = vst [vmem:[%s10528_s7 + $0xd80] sm:$0xff] %v1064_v48  ;;  %1067 = vst [vmem:[%s10528_s7 + $0xd88] sm:$0xff] %v1066_v49  ;;  %v1070_v51 = vld [vmem:[%s10520_s6 + $0x1b28] sm:$0xff] }
  0xe9   : > { %1069 = vst [vmem:[%s10528_s7 + $0xd90] sm:$0xff] %v1068_v50  ;;  %v1072_v52 = vld [vmem:[%s10520_s6 + $0x1b40] sm:$0xff]  ;;  %v1074_v53 = vld [vmem:[%s10520_s6 + $0x1b48] sm:$0xff]  ;;  %1071 = vst [vmem:[%s10528_s7 + $0xd98] sm:$0xff] %v1070_v51 }
  0xea   : > { %1073 = vst [vmem:[%s10528_s7 + $0xda0] sm:$0xff] %v1072_v52  ;;  %1075 = vst [vmem:[%s10528_s7 + $0xda8] sm:$0xff] %v1074_v53  ;;  %v1076_v54 = vld [vmem:[%s10520_s6 + $0x1b60] sm:$0xff]  ;;  %v1078_v55 = vld [vmem:[%s10520_s6 + $0x1b68] sm:$0xff] }
  0xeb   : > { %v1080_v56 = vld [vmem:[%s10520_s6 + $0x1b80] sm:$0xff]  ;;  %1077 = vst [vmem:[%s10528_s7 + $0xdb0] sm:$0xff] %v1076_v54  ;;  %1079 = vst [vmem:[%s10528_s7 + $0xdb8] sm:$0xff] %v1078_v55  ;;  %v1082_v57 = vld [vmem:[%s10520_s6 + $0x1b88] sm:$0xff] }
  0xec   : > { %1081 = vst [vmem:[%s10528_s7 + $0xdc0] sm:$0xff] %v1080_v56  ;;  %v1084_v58 = vld [vmem:[%s10520_s6 + $0x1ba0] sm:$0xff]  ;;  %v1086_v59 = vld [vmem:[%s10520_s6 + $0x1ba8] sm:$0xff]  ;;  %1083 = vst [vmem:[%s10528_s7 + $0xdc8] sm:$0xff] %v1082_v57 }
  0xed   : > { %1085 = vst [vmem:[%s10528_s7 + $0xdd0] sm:$0xff] %v1084_v58  ;;  %1087 = vst [vmem:[%s10528_s7 + $0xdd8] sm:$0xff] %v1086_v59  ;;  %v1088_v60 = vld [vmem:[%s10520_s6 + $0x1bc0] sm:$0xff]  ;;  %v1090_v61 = vld [vmem:[%s10520_s6 + $0x1bc8] sm:$0xff] }
  0xee   : > { %v1092_v62 = vld [vmem:[%s10520_s6 + $0x1be0] sm:$0xff]  ;;  %1089 = vst [vmem:[%s10528_s7 + $0xde0] sm:$0xff] %v1088_v60  ;;  %1091 = vst [vmem:[%s10528_s7 + $0xde8] sm:$0xff] %v1090_v61  ;;  %v1094_v63 = vld [vmem:[%s10520_s6 + $0x1be8] sm:$0xff] }
  0xef   : > { %1093 = vst [vmem:[%s10528_s7 + $0xdf0] sm:$0xff] %v1092_v62  ;;  %v1096_v0 = vld [vmem:[%s10520_s6 + $0x1c00] sm:$0xff]  ;;  %v1098_v1 = vld [vmem:[%s10520_s6 + $0x1c08] sm:$0xff]  ;;  %1095 = vst [vmem:[%s10528_s7 + $0xdf8] sm:$0xff] %v1094_v63 }
  0xf0   : > { %1097 = vst [vmem:[%s10528_s7 + $0xe00] sm:$0xff] %v1096_v0  ;;  %1099 = vst [vmem:[%s10528_s7 + $0xe08] sm:$0xff] %v1098_v1  ;;  %v1100_v2 = vld [vmem:[%s10520_s6 + $0x1c20] sm:$0xff]  ;;  %v1102_v3 = vld [vmem:[%s10520_s6 + $0x1c28] sm:$0xff] }
  0xf1   : > { %v1104_v4 = vld [vmem:[%s10520_s6 + $0x1c40] sm:$0xff]  ;;  %1101 = vst [vmem:[%s10528_s7 + $0xe10] sm:$0xff] %v1100_v2  ;;  %1103 = vst [vmem:[%s10528_s7 + $0xe18] sm:$0xff] %v1102_v3  ;;  %v1106_v5 = vld [vmem:[%s10520_s6 + $0x1c48] sm:$0xff] }
  0xf2   : > { %1105 = vst [vmem:[%s10528_s7 + $0xe20] sm:$0xff] %v1104_v4  ;;  %v1108_v6 = vld [vmem:[%s10520_s6 + $0x1c60] sm:$0xff]  ;;  %v1110_v7 = vld [vmem:[%s10520_s6 + $0x1c68] sm:$0xff]  ;;  %1107 = vst [vmem:[%s10528_s7 + $0xe28] sm:$0xff] %v1106_v5 }
  0xf3   : > { %1109 = vst [vmem:[%s10528_s7 + $0xe30] sm:$0xff] %v1108_v6  ;;  %1111 = vst [vmem:[%s10528_s7 + $0xe38] sm:$0xff] %v1110_v7  ;;  %v1112_v8 = vld [vmem:[%s10520_s6 + $0x1c80] sm:$0xff]  ;;  %v1114_v9 = vld [vmem:[%s10520_s6 + $0x1c88] sm:$0xff] }
  0xf4   : > { %v1116_v10 = vld [vmem:[%s10520_s6 + $0x1ca0] sm:$0xff]  ;;  %1113 = vst [vmem:[%s10528_s7 + $0xe40] sm:$0xff] %v1112_v8  ;;  %1115 = vst [vmem:[%s10528_s7 + $0xe48] sm:$0xff] %v1114_v9  ;;  %v1118_v11 = vld [vmem:[%s10520_s6 + $0x1ca8] sm:$0xff] }
  0xf5   : > { %1117 = vst [vmem:[%s10528_s7 + $0xe50] sm:$0xff] %v1116_v10  ;;  %v1120_v12 = vld [vmem:[%s10520_s6 + $0x1cc0] sm:$0xff]  ;;  %v1122_v13 = vld [vmem:[%s10520_s6 + $0x1cc8] sm:$0xff]  ;;  %1119 = vst [vmem:[%s10528_s7 + $0xe58] sm:$0xff] %v1118_v11 }
  0xf6   : > { %1121 = vst [vmem:[%s10528_s7 + $0xe60] sm:$0xff] %v1120_v12  ;;  %1123 = vst [vmem:[%s10528_s7 + $0xe68] sm:$0xff] %v1122_v13  ;;  %v1124_v14 = vld [vmem:[%s10520_s6 + $0x1ce0] sm:$0xff]  ;;  %v1126_v15 = vld [vmem:[%s10520_s6 + $0x1ce8] sm:$0xff] }
  0xf7   : > { %v1128_v16 = vld [vmem:[%s10520_s6 + $0x1d00] sm:$0xff]  ;;  %1125 = vst [vmem:[%s10528_s7 + $0xe70] sm:$0xff] %v1124_v14  ;;  %1127 = vst [vmem:[%s10528_s7 + $0xe78] sm:$0xff] %v1126_v15  ;;  %v1130_v17 = vld [vmem:[%s10520_s6 + $0x1d08] sm:$0xff] }
  0xf8   : > { %1129 = vst [vmem:[%s10528_s7 + $0xe80] sm:$0xff] %v1128_v16  ;;  %v1132_v18 = vld [vmem:[%s10520_s6 + $0x1d20] sm:$0xff]  ;;  %v1134_v19 = vld [vmem:[%s10520_s6 + $0x1d28] sm:$0xff]  ;;  %1131 = vst [vmem:[%s10528_s7 + $0xe88] sm:$0xff] %v1130_v17 }
  0xf9   : > { %1133 = vst [vmem:[%s10528_s7 + $0xe90] sm:$0xff] %v1132_v18  ;;  %1135 = vst [vmem:[%s10528_s7 + $0xe98] sm:$0xff] %v1134_v19  ;;  %v1136_v20 = vld [vmem:[%s10520_s6 + $0x1d40] sm:$0xff]  ;;  %v1138_v21 = vld [vmem:[%s10520_s6 + $0x1d48] sm:$0xff] }
  0xfa   : > { %v1140_v22 = vld [vmem:[%s10520_s6 + $0x1d60] sm:$0xff]  ;;  %1137 = vst [vmem:[%s10528_s7 + $0xea0] sm:$0xff] %v1136_v20  ;;  %1139 = vst [vmem:[%s10528_s7 + $0xea8] sm:$0xff] %v1138_v21  ;;  %v1142_v23 = vld [vmem:[%s10520_s6 + $0x1d68] sm:$0xff] }
  0xfb   : > { %1141 = vst [vmem:[%s10528_s7 + $0xeb0] sm:$0xff] %v1140_v22  ;;  %v1144_v24 = vld [vmem:[%s10520_s6 + $0x1d80] sm:$0xff]  ;;  %v1146_v25 = vld [vmem:[%s10520_s6 + $0x1d88] sm:$0xff]  ;;  %1143 = vst [vmem:[%s10528_s7 + $0xeb8] sm:$0xff] %v1142_v23 }
  0xfc   : > { %1145 = vst [vmem:[%s10528_s7 + $0xec0] sm:$0xff] %v1144_v24  ;;  %1147 = vst [vmem:[%s10528_s7 + $0xec8] sm:$0xff] %v1146_v25  ;;  %v1148_v26 = vld [vmem:[%s10520_s6 + $0x1da0] sm:$0xff]  ;;  %v1150_v27 = vld [vmem:[%s10520_s6 + $0x1da8] sm:$0xff] }
  0xfd   : > { %v1152_v28 = vld [vmem:[%s10520_s6 + $0x1dc0] sm:$0xff]  ;;  %1149 = vst [vmem:[%s10528_s7 + $0xed0] sm:$0xff] %v1148_v26  ;;  %1151 = vst [vmem:[%s10528_s7 + $0xed8] sm:$0xff] %v1150_v27  ;;  %v1154_v29 = vld [vmem:[%s10520_s6 + $0x1dc8] sm:$0xff] }
  0xfe   : > { %1153 = vst [vmem:[%s10528_s7 + $0xee0] sm:$0xff] %v1152_v28  ;;  %v1156_v30 = vld [vmem:[%s10520_s6 + $0x1de0] sm:$0xff]  ;;  %v1158_v31 = vld [vmem:[%s10520_s6 + $0x1de8] sm:$0xff]  ;;  %1155 = vst [vmem:[%s10528_s7 + $0xee8] sm:$0xff] %v1154_v29 }
  0xff   : > { %1157 = vst [vmem:[%s10528_s7 + $0xef0] sm:$0xff] %v1156_v30  ;;  %1159 = vst [vmem:[%s10528_s7 + $0xef8] sm:$0xff] %v1158_v31  ;;  %v1160_v32 = vld [vmem:[%s10520_s6 + $0x1e00] sm:$0xff]  ;;  %v1162_v33 = vld [vmem:[%s10520_s6 + $0x1e08] sm:$0xff] }
 0x100   : > { %v1164_v34 = vld [vmem:[%s10520_s6 + $0x1e20] sm:$0xff]  ;;  %1161 = vst [vmem:[%s10528_s7 + $0xf00] sm:$0xff] %v1160_v32  ;;  %1163 = vst [vmem:[%s10528_s7 + $0xf08] sm:$0xff] %v1162_v33  ;;  %v1166_v35 = vld [vmem:[%s10520_s6 + $0x1e28] sm:$0xff] }
 0x101   : > { %1165 = vst [vmem:[%s10528_s7 + $0xf10] sm:$0xff] %v1164_v34  ;;  %v1168_v36 = vld [vmem:[%s10520_s6 + $0x1e40] sm:$0xff]  ;;  %v1170_v37 = vld [vmem:[%s10520_s6 + $0x1e48] sm:$0xff]  ;;  %1167 = vst [vmem:[%s10528_s7 + $0xf18] sm:$0xff] %v1166_v35 }
 0x102   : > { %1169 = vst [vmem:[%s10528_s7 + $0xf20] sm:$0xff] %v1168_v36  ;;  %1171 = vst [vmem:[%s10528_s7 + $0xf28] sm:$0xff] %v1170_v37  ;;  %v1172_v38 = vld [vmem:[%s10520_s6 + $0x1e60] sm:$0xff]  ;;  %v1174_v39 = vld [vmem:[%s10520_s6 + $0x1e68] sm:$0xff] }
 0x103   : > { %v1176_v40 = vld [vmem:[%s10520_s6 + $0x1e80] sm:$0xff]  ;;  %1173 = vst [vmem:[%s10528_s7 + $0xf30] sm:$0xff] %v1172_v38  ;;  %1175 = vst [vmem:[%s10528_s7 + $0xf38] sm:$0xff] %v1174_v39  ;;  %v1178_v41 = vld [vmem:[%s10520_s6 + $0x1e88] sm:$0xff] }
 0x104   : > { %1177 = vst [vmem:[%s10528_s7 + $0xf40] sm:$0xff] %v1176_v40  ;;  %v1180_v42 = vld [vmem:[%s10520_s6 + $0x1ea0] sm:$0xff]  ;;  %v1182_v43 = vld [vmem:[%s10520_s6 + $0x1ea8] sm:$0xff]  ;;  %1179 = vst [vmem:[%s10528_s7 + $0xf48] sm:$0xff] %v1178_v41 }
 0x105   : > { %1181 = vst [vmem:[%s10528_s7 + $0xf50] sm:$0xff] %v1180_v42  ;;  %1183 = vst [vmem:[%s10528_s7 + $0xf58] sm:$0xff] %v1182_v43  ;;  %v1184_v44 = vld [vmem:[%s10520_s6 + $0x1ec0] sm:$0xff]  ;;  %v1186_v45 = vld [vmem:[%s10520_s6 + $0x1ec8] sm:$0xff] }
 0x106   : > { %v1188_v46 = vld [vmem:[%s10520_s6 + $0x1ee0] sm:$0xff]  ;;  %1185 = vst [vmem:[%s10528_s7 + $0xf60] sm:$0xff] %v1184_v44  ;;  %1187 = vst [vmem:[%s10528_s7 + $0xf68] sm:$0xff] %v1186_v45  ;;  %v1190_v47 = vld [vmem:[%s10520_s6 + $0x1ee8] sm:$0xff] }
 0x107   : > { %1189 = vst [vmem:[%s10528_s7 + $0xf70] sm:$0xff] %v1188_v46  ;;  %v1192_v48 = vld [vmem:[%s10520_s6 + $0x1f00] sm:$0xff]  ;;  %v1194_v49 = vld [vmem:[%s10520_s6 + $0x1f08] sm:$0xff]  ;;  %1191 = vst [vmem:[%s10528_s7 + $0xf78] sm:$0xff] %v1190_v47 }
 0x108   : > { %1193 = vst [vmem:[%s10528_s7 + $0xf80] sm:$0xff] %v1192_v48  ;;  %1195 = vst [vmem:[%s10528_s7 + $0xf88] sm:$0xff] %v1194_v49  ;;  %v1196_v50 = vld [vmem:[%s10520_s6 + $0x1f20] sm:$0xff]  ;;  %v1198_v51 = vld [vmem:[%s10520_s6 + $0x1f28] sm:$0xff] }
 0x109   : > { %v1200_v52 = vld [vmem:[%s10520_s6 + $0x1f40] sm:$0xff]  ;;  %1197 = vst [vmem:[%s10528_s7 + $0xf90] sm:$0xff] %v1196_v50  ;;  %1199 = vst [vmem:[%s10528_s7 + $0xf98] sm:$0xff] %v1198_v51  ;;  %v1202_v53 = vld [vmem:[%s10520_s6 + $0x1f48] sm:$0xff] }
 0x10a   : > { %1201 = vst [vmem:[%s10528_s7 + $0xfa0] sm:$0xff] %v1200_v52  ;;  %v1204_v54 = vld [vmem:[%s10520_s6 + $0x1f60] sm:$0xff]  ;;  %v1206_v55 = vld [vmem:[%s10520_s6 + $0x1f68] sm:$0xff]  ;;  %1203 = vst [vmem:[%s10528_s7 + $0xfa8] sm:$0xff] %v1202_v53 }
 0x10b   : > { %1205 = vst [vmem:[%s10528_s7 + $0xfb0] sm:$0xff] %v1204_v54  ;;  %1207 = vst [vmem:[%s10528_s7 + $0xfb8] sm:$0xff] %v1206_v55  ;;  %v1208_v56 = vld [vmem:[%s10520_s6 + $0x1f80] sm:$0xff]  ;;  %v1210_v57 = vld [vmem:[%s10520_s6 + $0x1f88] sm:$0xff] }
 0x10c   : > { %v1212_v58 = vld [vmem:[%s10520_s6 + $0x1fa0] sm:$0xff]  ;;  %1209 = vst [vmem:[%s10528_s7 + $0xfc0] sm:$0xff] %v1208_v56  ;;  %1211 = vst [vmem:[%s10528_s7 + $0xfc8] sm:$0xff] %v1210_v57  ;;  %v1214_v59 = vld [vmem:[%s10520_s6 + $0x1fa8] sm:$0xff] }
 0x10d   : > { %1213 = vst [vmem:[%s10528_s7 + $0xfd0] sm:$0xff] %v1212_v58  ;;  %v1216_v60 = vld [vmem:[%s10520_s6 + $0x1fc0] sm:$0xff]  ;;  %v1218_v61 = vld [vmem:[%s10520_s6 + $0x1fc8] sm:$0xff]  ;;  %1215 = vst [vmem:[%s10528_s7 + $0xfd8] sm:$0xff] %v1214_v59 }
 0x10e   : > { %1217 = vst [vmem:[%s10528_s7 + $0xfe0] sm:$0xff] %v1216_v60  ;;  %1219 = vst [vmem:[%s10528_s7 + $0xfe8] sm:$0xff] %v1218_v61  ;;  %v1220_v62 = vld [vmem:[%s10520_s6 + $0x1fe0] sm:$0xff]  ;;  %v1222_v63 = vld [vmem:[%s10520_s6 + $0x1fe8] sm:$0xff] }
 0x10f   : > { %v1224_v0 = vld [vmem:[%s10520_s6 + $0x2000] sm:$0xff]  ;;  %1221 = vst [vmem:[%s10528_s7 + $0xff0] sm:$0xff] %v1220_v62  ;;  %1223 = vst [vmem:[%s10528_s7 + $0xff8] sm:$0xff] %v1222_v63  ;;  %v1226_v1 = vld [vmem:[%s10520_s6 + $0x2008] sm:$0xff] }
 0x110   : > { %1225 = vst [vmem:[%s10528_s7 + $0x1000] sm:$0xff] %v1224_v0  ;;  %v1228_v2 = vld [vmem:[%s10520_s6 + $0x2020] sm:$0xff]  ;;  %v1230_v3 = vld [vmem:[%s10520_s6 + $0x2028] sm:$0xff]  ;;  %1227 = vst [vmem:[%s10528_s7 + $0x1008] sm:$0xff] %v1226_v1 }
 0x111   : > { %1229 = vst [vmem:[%s10528_s7 + $0x1010] sm:$0xff] %v1228_v2  ;;  %1231 = vst [vmem:[%s10528_s7 + $0x1018] sm:$0xff] %v1230_v3  ;;  %v1232_v4 = vld [vmem:[%s10520_s6 + $0x2040] sm:$0xff]  ;;  %v1234_v5 = vld [vmem:[%s10520_s6 + $0x2048] sm:$0xff] }
 0x112   : > { %v1236_v6 = vld [vmem:[%s10520_s6 + $0x2060] sm:$0xff]  ;;  %1233 = vst [vmem:[%s10528_s7 + $0x1020] sm:$0xff] %v1232_v4  ;;  %1235 = vst [vmem:[%s10528_s7 + $0x1028] sm:$0xff] %v1234_v5  ;;  %v1238_v7 = vld [vmem:[%s10520_s6 + $0x2068] sm:$0xff] }
 0x113   : > { %1237 = vst [vmem:[%s10528_s7 + $0x1030] sm:$0xff] %v1236_v6  ;;  %v1240_v8 = vld [vmem:[%s10520_s6 + $0x2080] sm:$0xff]  ;;  %v1242_v9 = vld [vmem:[%s10520_s6 + $0x2088] sm:$0xff]  ;;  %1239 = vst [vmem:[%s10528_s7 + $0x1038] sm:$0xff] %v1238_v7 }
 0x114   : > { %1241 = vst [vmem:[%s10528_s7 + $0x1040] sm:$0xff] %v1240_v8  ;;  %1243 = vst [vmem:[%s10528_s7 + $0x1048] sm:$0xff] %v1242_v9  ;;  %v1244_v10 = vld [vmem:[%s10520_s6 + $0x20a0] sm:$0xff]  ;;  %v1246_v11 = vld [vmem:[%s10520_s6 + $0x20a8] sm:$0xff] }
 0x115   : > { %v1248_v12 = vld [vmem:[%s10520_s6 + $0x20c0] sm:$0xff]  ;;  %1245 = vst [vmem:[%s10528_s7 + $0x1050] sm:$0xff] %v1244_v10  ;;  %1247 = vst [vmem:[%s10528_s7 + $0x1058] sm:$0xff] %v1246_v11  ;;  %v1250_v13 = vld [vmem:[%s10520_s6 + $0x20c8] sm:$0xff] }
 0x116   : > { %1249 = vst [vmem:[%s10528_s7 + $0x1060] sm:$0xff] %v1248_v12  ;;  %v1252_v14 = vld [vmem:[%s10520_s6 + $0x20e0] sm:$0xff]  ;;  %v1254_v15 = vld [vmem:[%s10520_s6 + $0x20e8] sm:$0xff]  ;;  %1251 = vst [vmem:[%s10528_s7 + $0x1068] sm:$0xff] %v1250_v13 }
 0x117   : > { %1253 = vst [vmem:[%s10528_s7 + $0x1070] sm:$0xff] %v1252_v14  ;;  %1255 = vst [vmem:[%s10528_s7 + $0x1078] sm:$0xff] %v1254_v15  ;;  %v1256_v16 = vld [vmem:[%s10520_s6 + $0x2100] sm:$0xff]  ;;  %v1258_v17 = vld [vmem:[%s10520_s6 + $0x2108] sm:$0xff] }
 0x118   : > { %v1260_v18 = vld [vmem:[%s10520_s6 + $0x2120] sm:$0xff]  ;;  %1257 = vst [vmem:[%s10528_s7 + $0x1080] sm:$0xff] %v1256_v16  ;;  %1259 = vst [vmem:[%s10528_s7 + $0x1088] sm:$0xff] %v1258_v17  ;;  %v1262_v19 = vld [vmem:[%s10520_s6 + $0x2128] sm:$0xff] }
 0x119   : > { %1261 = vst [vmem:[%s10528_s7 + $0x1090] sm:$0xff] %v1260_v18  ;;  %v1264_v20 = vld [vmem:[%s10520_s6 + $0x2140] sm:$0xff]  ;;  %v1266_v21 = vld [vmem:[%s10520_s6 + $0x2148] sm:$0xff]  ;;  %1263 = vst [vmem:[%s10528_s7 + $0x1098] sm:$0xff] %v1262_v19 }
 0x11a   : > { %1265 = vst [vmem:[%s10528_s7 + $0x10a0] sm:$0xff] %v1264_v20  ;;  %1267 = vst [vmem:[%s10528_s7 + $0x10a8] sm:$0xff] %v1266_v21  ;;  %v1268_v22 = vld [vmem:[%s10520_s6 + $0x2160] sm:$0xff]  ;;  %v1270_v23 = vld [vmem:[%s10520_s6 + $0x2168] sm:$0xff] }
 0x11b   : > { %v1272_v24 = vld [vmem:[%s10520_s6 + $0x2180] sm:$0xff]  ;;  %1269 = vst [vmem:[%s10528_s7 + $0x10b0] sm:$0xff] %v1268_v22  ;;  %1271 = vst [vmem:[%s10528_s7 + $0x10b8] sm:$0xff] %v1270_v23  ;;  %v1274_v25 = vld [vmem:[%s10520_s6 + $0x2188] sm:$0xff] }
 0x11c   : > { %1273 = vst [vmem:[%s10528_s7 + $0x10c0] sm:$0xff] %v1272_v24  ;;  %v1276_v26 = vld [vmem:[%s10520_s6 + $0x21a0] sm:$0xff]  ;;  %v1278_v27 = vld [vmem:[%s10520_s6 + $0x21a8] sm:$0xff]  ;;  %1275 = vst [vmem:[%s10528_s7 + $0x10c8] sm:$0xff] %v1274_v25 }
 0x11d   : > { %1277 = vst [vmem:[%s10528_s7 + $0x10d0] sm:$0xff] %v1276_v26  ;;  %1279 = vst [vmem:[%s10528_s7 + $0x10d8] sm:$0xff] %v1278_v27  ;;  %v1280_v28 = vld [vmem:[%s10520_s6 + $0x21c0] sm:$0xff]  ;;  %v1282_v29 = vld [vmem:[%s10520_s6 + $0x21c8] sm:$0xff] }
 0x11e   : > { %v1284_v30 = vld [vmem:[%s10520_s6 + $0x21e0] sm:$0xff]  ;;  %1281 = vst [vmem:[%s10528_s7 + $0x10e0] sm:$0xff] %v1280_v28  ;;  %1283 = vst [vmem:[%s10528_s7 + $0x10e8] sm:$0xff] %v1282_v29  ;;  %v1286_v31 = vld [vmem:[%s10520_s6 + $0x21e8] sm:$0xff] }
 0x11f   : > { %1285 = vst [vmem:[%s10528_s7 + $0x10f0] sm:$0xff] %v1284_v30  ;;  %v1288_v32 = vld [vmem:[%s10520_s6 + $0x2200] sm:$0xff]  ;;  %v1290_v33 = vld [vmem:[%s10520_s6 + $0x2208] sm:$0xff]  ;;  %1287 = vst [vmem:[%s10528_s7 + $0x10f8] sm:$0xff] %v1286_v31 }
 0x120   : > { %1289 = vst [vmem:[%s10528_s7 + $0x1100] sm:$0xff] %v1288_v32  ;;  %1291 = vst [vmem:[%s10528_s7 + $0x1108] sm:$0xff] %v1290_v33  ;;  %v1292_v34 = vld [vmem:[%s10520_s6 + $0x2220] sm:$0xff]  ;;  %v1294_v35 = vld [vmem:[%s10520_s6 + $0x2228] sm:$0xff] }
 0x121   : > { %v1296_v36 = vld [vmem:[%s10520_s6 + $0x2240] sm:$0xff]  ;;  %1293 = vst [vmem:[%s10528_s7 + $0x1110] sm:$0xff] %v1292_v34  ;;  %1295 = vst [vmem:[%s10528_s7 + $0x1118] sm:$0xff] %v1294_v35  ;;  %v1298_v37 = vld [vmem:[%s10520_s6 + $0x2248] sm:$0xff] }
 0x122   : > { %1297 = vst [vmem:[%s10528_s7 + $0x1120] sm:$0xff] %v1296_v36  ;;  %v1300_v38 = vld [vmem:[%s10520_s6 + $0x2260] sm:$0xff]  ;;  %v1302_v39 = vld [vmem:[%s10520_s6 + $0x2268] sm:$0xff]  ;;  %1299 = vst [vmem:[%s10528_s7 + $0x1128] sm:$0xff] %v1298_v37 }
 0x123   : > { %1301 = vst [vmem:[%s10528_s7 + $0x1130] sm:$0xff] %v1300_v38  ;;  %1303 = vst [vmem:[%s10528_s7 + $0x1138] sm:$0xff] %v1302_v39  ;;  %v1304_v40 = vld [vmem:[%s10520_s6 + $0x2280] sm:$0xff]  ;;  %v1306_v41 = vld [vmem:[%s10520_s6 + $0x2288] sm:$0xff] }
 0x124   : > { %v1308_v42 = vld [vmem:[%s10520_s6 + $0x22a0] sm:$0xff]  ;;  %1305 = vst [vmem:[%s10528_s7 + $0x1140] sm:$0xff] %v1304_v40  ;;  %1307 = vst [vmem:[%s10528_s7 + $0x1148] sm:$0xff] %v1306_v41  ;;  %v1310_v43 = vld [vmem:[%s10520_s6 + $0x22a8] sm:$0xff] }
 0x125   : > { %1309 = vst [vmem:[%s10528_s7 + $0x1150] sm:$0xff] %v1308_v42  ;;  %v1312_v44 = vld [vmem:[%s10520_s6 + $0x22c0] sm:$0xff]  ;;  %v1314_v45 = vld [vmem:[%s10520_s6 + $0x22c8] sm:$0xff]  ;;  %1311 = vst [vmem:[%s10528_s7 + $0x1158] sm:$0xff] %v1310_v43 }
 0x126   : > { %1313 = vst [vmem:[%s10528_s7 + $0x1160] sm:$0xff] %v1312_v44  ;;  %1315 = vst [vmem:[%s10528_s7 + $0x1168] sm:$0xff] %v1314_v45  ;;  %v1316_v46 = vld [vmem:[%s10520_s6 + $0x22e0] sm:$0xff]  ;;  %v1318_v47 = vld [vmem:[%s10520_s6 + $0x22e8] sm:$0xff] }
 0x127   : > { %v1320_v48 = vld [vmem:[%s10520_s6 + $0x2300] sm:$0xff]  ;;  %1317 = vst [vmem:[%s10528_s7 + $0x1170] sm:$0xff] %v1316_v46  ;;  %1319 = vst [vmem:[%s10528_s7 + $0x1178] sm:$0xff] %v1318_v47  ;;  %v1322_v49 = vld [vmem:[%s10520_s6 + $0x2308] sm:$0xff] }
 0x128   : > { %1321 = vst [vmem:[%s10528_s7 + $0x1180] sm:$0xff] %v1320_v48  ;;  %v1324_v50 = vld [vmem:[%s10520_s6 + $0x2320] sm:$0xff]  ;;  %v1326_v51 = vld [vmem:[%s10520_s6 + $0x2328] sm:$0xff]  ;;  %1323 = vst [vmem:[%s10528_s7 + $0x1188] sm:$0xff] %v1322_v49 }
 0x129   : > { %1325 = vst [vmem:[%s10528_s7 + $0x1190] sm:$0xff] %v1324_v50  ;;  %1327 = vst [vmem:[%s10528_s7 + $0x1198] sm:$0xff] %v1326_v51  ;;  %v1328_v52 = vld [vmem:[%s10520_s6 + $0x2340] sm:$0xff]  ;;  %v1330_v53 = vld [vmem:[%s10520_s6 + $0x2348] sm:$0xff] }
 0x12a   : > { %v1332_v54 = vld [vmem:[%s10520_s6 + $0x2360] sm:$0xff]  ;;  %1329 = vst [vmem:[%s10528_s7 + $0x11a0] sm:$0xff] %v1328_v52  ;;  %1331 = vst [vmem:[%s10528_s7 + $0x11a8] sm:$0xff] %v1330_v53  ;;  %v1334_v55 = vld [vmem:[%s10520_s6 + $0x2368] sm:$0xff] }
 0x12b   : > { %1333 = vst [vmem:[%s10528_s7 + $0x11b0] sm:$0xff] %v1332_v54  ;;  %v1336_v56 = vld [vmem:[%s10520_s6 + $0x2380] sm:$0xff]  ;;  %v1338_v57 = vld [vmem:[%s10520_s6 + $0x2388] sm:$0xff]  ;;  %1335 = vst [vmem:[%s10528_s7 + $0x11b8] sm:$0xff] %v1334_v55 }
 0x12c   : > { %1337 = vst [vmem:[%s10528_s7 + $0x11c0] sm:$0xff] %v1336_v56  ;;  %1339 = vst [vmem:[%s10528_s7 + $0x11c8] sm:$0xff] %v1338_v57  ;;  %v1340_v58 = vld [vmem:[%s10520_s6 + $0x23a0] sm:$0xff]  ;;  %v1342_v59 = vld [vmem:[%s10520_s6 + $0x23a8] sm:$0xff] }
 0x12d   : > { %v1344_v60 = vld [vmem:[%s10520_s6 + $0x23c0] sm:$0xff]  ;;  %1341 = vst [vmem:[%s10528_s7 + $0x11d0] sm:$0xff] %v1340_v58  ;;  %1343 = vst [vmem:[%s10528_s7 + $0x11d8] sm:$0xff] %v1342_v59  ;;  %v1346_v61 = vld [vmem:[%s10520_s6 + $0x23c8] sm:$0xff] }
 0x12e   : > { %1345 = vst [vmem:[%s10528_s7 + $0x11e0] sm:$0xff] %v1344_v60  ;;  %v1348_v62 = vld [vmem:[%s10520_s6 + $0x23e0] sm:$0xff]  ;;  %v1350_v63 = vld [vmem:[%s10520_s6 + $0x23e8] sm:$0xff]  ;;  %1347 = vst [vmem:[%s10528_s7 + $0x11e8] sm:$0xff] %v1346_v61 }
 0x12f   : > { %1349 = vst [vmem:[%s10528_s7 + $0x11f0] sm:$0xff] %v1348_v62  ;;  %1351 = vst [vmem:[%s10528_s7 + $0x11f8] sm:$0xff] %v1350_v63  ;;  %v1352_v0 = vld [vmem:[%s10520_s6 + $0x2400] sm:$0xff]  ;;  %v1354_v1 = vld [vmem:[%s10520_s6 + $0x2408] sm:$0xff] }
 0x130   : > { %v1356_v2 = vld [vmem:[%s10520_s6 + $0x2420] sm:$0xff]  ;;  %1353 = vst [vmem:[%s10528_s7 + $0x1200] sm:$0xff] %v1352_v0  ;;  %1355 = vst [vmem:[%s10528_s7 + $0x1208] sm:$0xff] %v1354_v1  ;;  %v1358_v3 = vld [vmem:[%s10520_s6 + $0x2428] sm:$0xff] }
 0x131   : > { %1357 = vst [vmem:[%s10528_s7 + $0x1210] sm:$0xff] %v1356_v2  ;;  %v1360_v4 = vld [vmem:[%s10520_s6 + $0x2440] sm:$0xff]  ;;  %v1362_v5 = vld [vmem:[%s10520_s6 + $0x2448] sm:$0xff]  ;;  %1359 = vst [vmem:[%s10528_s7 + $0x1218] sm:$0xff] %v1358_v3 }
 0x132   : > { %1361 = vst [vmem:[%s10528_s7 + $0x1220] sm:$0xff] %v1360_v4  ;;  %1363 = vst [vmem:[%s10528_s7 + $0x1228] sm:$0xff] %v1362_v5  ;;  %v1364_v6 = vld [vmem:[%s10520_s6 + $0x2460] sm:$0xff]  ;;  %v1366_v7 = vld [vmem:[%s10520_s6 + $0x2468] sm:$0xff] }
 0x133   : > { %v1368_v8 = vld [vmem:[%s10520_s6 + $0x2480] sm:$0xff]  ;;  %1365 = vst [vmem:[%s10528_s7 + $0x1230] sm:$0xff] %v1364_v6  ;;  %1367 = vst [vmem:[%s10528_s7 + $0x1238] sm:$0xff] %v1366_v7  ;;  %v1370_v9 = vld [vmem:[%s10520_s6 + $0x2488] sm:$0xff] }
 0x134   : > { %1369 = vst [vmem:[%s10528_s7 + $0x1240] sm:$0xff] %v1368_v8  ;;  %v1372_v10 = vld [vmem:[%s10520_s6 + $0x24a0] sm:$0xff]  ;;  %v1374_v11 = vld [vmem:[%s10520_s6 + $0x24a8] sm:$0xff]  ;;  %1371 = vst [vmem:[%s10528_s7 + $0x1248] sm:$0xff] %v1370_v9 }
 0x135   : > { %1373 = vst [vmem:[%s10528_s7 + $0x1250] sm:$0xff] %v1372_v10  ;;  %1375 = vst [vmem:[%s10528_s7 + $0x1258] sm:$0xff] %v1374_v11  ;;  %v1376_v12 = vld [vmem:[%s10520_s6 + $0x24c0] sm:$0xff]  ;;  %v1378_v13 = vld [vmem:[%s10520_s6 + $0x24c8] sm:$0xff] }
 0x136   : > { %v1380_v14 = vld [vmem:[%s10520_s6 + $0x24e0] sm:$0xff]  ;;  %1377 = vst [vmem:[%s10528_s7 + $0x1260] sm:$0xff] %v1376_v12  ;;  %1379 = vst [vmem:[%s10528_s7 + $0x1268] sm:$0xff] %v1378_v13  ;;  %v1382_v15 = vld [vmem:[%s10520_s6 + $0x24e8] sm:$0xff] }
 0x137   : > { %1381 = vst [vmem:[%s10528_s7 + $0x1270] sm:$0xff] %v1380_v14  ;;  %v1384_v16 = vld [vmem:[%s10520_s6 + $0x2500] sm:$0xff]  ;;  %v1386_v17 = vld [vmem:[%s10520_s6 + $0x2508] sm:$0xff]  ;;  %1383 = vst [vmem:[%s10528_s7 + $0x1278] sm:$0xff] %v1382_v15 }
 0x138   : > { %1385 = vst [vmem:[%s10528_s7 + $0x1280] sm:$0xff] %v1384_v16  ;;  %1387 = vst [vmem:[%s10528_s7 + $0x1288] sm:$0xff] %v1386_v17  ;;  %v1388_v18 = vld [vmem:[%s10520_s6 + $0x2520] sm:$0xff]  ;;  %v1390_v19 = vld [vmem:[%s10520_s6 + $0x2528] sm:$0xff] }
 0x139   : > { %v1392_v20 = vld [vmem:[%s10520_s6 + $0x2540] sm:$0xff]  ;;  %1389 = vst [vmem:[%s10528_s7 + $0x1290] sm:$0xff] %v1388_v18  ;;  %1391 = vst [vmem:[%s10528_s7 + $0x1298] sm:$0xff] %v1390_v19  ;;  %v1394_v21 = vld [vmem:[%s10520_s6 + $0x2548] sm:$0xff] }
 0x13a   : > { %1393 = vst [vmem:[%s10528_s7 + $0x12a0] sm:$0xff] %v1392_v20  ;;  %v1396_v22 = vld [vmem:[%s10520_s6 + $0x2560] sm:$0xff]  ;;  %v1398_v23 = vld [vmem:[%s10520_s6 + $0x2568] sm:$0xff]  ;;  %1395 = vst [vmem:[%s10528_s7 + $0x12a8] sm:$0xff] %v1394_v21 }
 0x13b   : > { %1397 = vst [vmem:[%s10528_s7 + $0x12b0] sm:$0xff] %v1396_v22  ;;  %1399 = vst [vmem:[%s10528_s7 + $0x12b8] sm:$0xff] %v1398_v23  ;;  %v1400_v24 = vld [vmem:[%s10520_s6 + $0x2580] sm:$0xff]  ;;  %v1402_v25 = vld [vmem:[%s10520_s6 + $0x2588] sm:$0xff] }
 0x13c   : > { %v1404_v26 = vld [vmem:[%s10520_s6 + $0x25a0] sm:$0xff]  ;;  %1401 = vst [vmem:[%s10528_s7 + $0x12c0] sm:$0xff] %v1400_v24  ;;  %1403 = vst [vmem:[%s10528_s7 + $0x12c8] sm:$0xff] %v1402_v25  ;;  %v1406_v27 = vld [vmem:[%s10520_s6 + $0x25a8] sm:$0xff] }
 0x13d   : > { %1405 = vst [vmem:[%s10528_s7 + $0x12d0] sm:$0xff] %v1404_v26  ;;  %v1408_v28 = vld [vmem:[%s10520_s6 + $0x25c0] sm:$0xff]  ;;  %v1410_v29 = vld [vmem:[%s10520_s6 + $0x25c8] sm:$0xff]  ;;  %1407 = vst [vmem:[%s10528_s7 + $0x12d8] sm:$0xff] %v1406_v27 }
 0x13e   : > { %1409 = vst [vmem:[%s10528_s7 + $0x12e0] sm:$0xff] %v1408_v28  ;;  %1411 = vst [vmem:[%s10528_s7 + $0x12e8] sm:$0xff] %v1410_v29  ;;  %v1412_v30 = vld [vmem:[%s10520_s6 + $0x25e0] sm:$0xff]  ;;  %v1414_v31 = vld [vmem:[%s10520_s6 + $0x25e8] sm:$0xff] }
 0x13f   : > { %v1416_v32 = vld [vmem:[%s10520_s6 + $0x2600] sm:$0xff]  ;;  %1413 = vst [vmem:[%s10528_s7 + $0x12f0] sm:$0xff] %v1412_v30  ;;  %1415 = vst [vmem:[%s10528_s7 + $0x12f8] sm:$0xff] %v1414_v31  ;;  %v1418_v33 = vld [vmem:[%s10520_s6 + $0x2608] sm:$0xff] }
 0x140   : > { %1417 = vst [vmem:[%s10528_s7 + $0x1300] sm:$0xff] %v1416_v32  ;;  %v1420_v34 = vld [vmem:[%s10520_s6 + $0x2620] sm:$0xff]  ;;  %v1422_v35 = vld [vmem:[%s10520_s6 + $0x2628] sm:$0xff]  ;;  %1419 = vst [vmem:[%s10528_s7 + $0x1308] sm:$0xff] %v1418_v33 }
 0x141   : > { %1421 = vst [vmem:[%s10528_s7 + $0x1310] sm:$0xff] %v1420_v34  ;;  %1423 = vst [vmem:[%s10528_s7 + $0x1318] sm:$0xff] %v1422_v35  ;;  %v1424_v36 = vld [vmem:[%s10520_s6 + $0x2640] sm:$0xff]  ;;  %v1426_v37 = vld [vmem:[%s10520_s6 + $0x2648] sm:$0xff] }
 0x142   : > { %v1428_v38 = vld [vmem:[%s10520_s6 + $0x2660] sm:$0xff]  ;;  %1425 = vst [vmem:[%s10528_s7 + $0x1320] sm:$0xff] %v1424_v36  ;;  %1427 = vst [vmem:[%s10528_s7 + $0x1328] sm:$0xff] %v1426_v37  ;;  %v1430_v39 = vld [vmem:[%s10520_s6 + $0x2668] sm:$0xff] }
 0x143   : > { %1429 = vst [vmem:[%s10528_s7 + $0x1330] sm:$0xff] %v1428_v38  ;;  %v1432_v40 = vld [vmem:[%s10520_s6 + $0x2680] sm:$0xff]  ;;  %v1434_v41 = vld [vmem:[%s10520_s6 + $0x2688] sm:$0xff]  ;;  %1431 = vst [vmem:[%s10528_s7 + $0x1338] sm:$0xff] %v1430_v39 }
 0x144   : > { %1433 = vst [vmem:[%s10528_s7 + $0x1340] sm:$0xff] %v1432_v40  ;;  %1435 = vst [vmem:[%s10528_s7 + $0x1348] sm:$0xff] %v1434_v41  ;;  %v1436_v42 = vld [vmem:[%s10520_s6 + $0x26a0] sm:$0xff]  ;;  %v1438_v43 = vld [vmem:[%s10520_s6 + $0x26a8] sm:$0xff] }
 0x145   : > { %v1440_v44 = vld [vmem:[%s10520_s6 + $0x26c0] sm:$0xff]  ;;  %1437 = vst [vmem:[%s10528_s7 + $0x1350] sm:$0xff] %v1436_v42  ;;  %1439 = vst [vmem:[%s10528_s7 + $0x1358] sm:$0xff] %v1438_v43  ;;  %v1442_v45 = vld [vmem:[%s10520_s6 + $0x26c8] sm:$0xff] }
 0x146   : > { %1441 = vst [vmem:[%s10528_s7 + $0x1360] sm:$0xff] %v1440_v44  ;;  %v1444_v46 = vld [vmem:[%s10520_s6 + $0x26e0] sm:$0xff]  ;;  %v1446_v47 = vld [vmem:[%s10520_s6 + $0x26e8] sm:$0xff]  ;;  %1443 = vst [vmem:[%s10528_s7 + $0x1368] sm:$0xff] %v1442_v45 }
 0x147   : > { %1445 = vst [vmem:[%s10528_s7 + $0x1370] sm:$0xff] %v1444_v46  ;;  %1447 = vst [vmem:[%s10528_s7 + $0x1378] sm:$0xff] %v1446_v47  ;;  %v1448_v48 = vld [vmem:[%s10520_s6 + $0x2700] sm:$0xff]  ;;  %v1450_v49 = vld [vmem:[%s10520_s6 + $0x2708] sm:$0xff] }
 0x148   : > { %v1452_v50 = vld [vmem:[%s10520_s6 + $0x2720] sm:$0xff]  ;;  %1449 = vst [vmem:[%s10528_s7 + $0x1380] sm:$0xff] %v1448_v48  ;;  %1451 = vst [vmem:[%s10528_s7 + $0x1388] sm:$0xff] %v1450_v49  ;;  %v1454_v51 = vld [vmem:[%s10520_s6 + $0x2728] sm:$0xff] }
 0x149   : > { %1453 = vst [vmem:[%s10528_s7 + $0x1390] sm:$0xff] %v1452_v50  ;;  %v1456_v52 = vld [vmem:[%s10520_s6 + $0x2740] sm:$0xff]  ;;  %v1458_v53 = vld [vmem:[%s10520_s6 + $0x2748] sm:$0xff]  ;;  %1455 = vst [vmem:[%s10528_s7 + $0x1398] sm:$0xff] %v1454_v51 }
 0x14a   : > { %1457 = vst [vmem:[%s10528_s7 + $0x13a0] sm:$0xff] %v1456_v52  ;;  %1459 = vst [vmem:[%s10528_s7 + $0x13a8] sm:$0xff] %v1458_v53  ;;  %v1460_v54 = vld [vmem:[%s10520_s6 + $0x2760] sm:$0xff]  ;;  %v1462_v55 = vld [vmem:[%s10520_s6 + $0x2768] sm:$0xff] }
 0x14b   : > { %v1464_v56 = vld [vmem:[%s10520_s6 + $0x2780] sm:$0xff]  ;;  %1461 = vst [vmem:[%s10528_s7 + $0x13b0] sm:$0xff] %v1460_v54  ;;  %1463 = vst [vmem:[%s10528_s7 + $0x13b8] sm:$0xff] %v1462_v55  ;;  %v1466_v57 = vld [vmem:[%s10520_s6 + $0x2788] sm:$0xff] }
 0x14c   : > { %1465 = vst [vmem:[%s10528_s7 + $0x13c0] sm:$0xff] %v1464_v56  ;;  %v1468_v58 = vld [vmem:[%s10520_s6 + $0x27a0] sm:$0xff]  ;;  %v1470_v59 = vld [vmem:[%s10520_s6 + $0x27a8] sm:$0xff]  ;;  %1467 = vst [vmem:[%s10528_s7 + $0x13c8] sm:$0xff] %v1466_v57 }
 0x14d   : > { %1469 = vst [vmem:[%s10528_s7 + $0x13d0] sm:$0xff] %v1468_v58  ;;  %1471 = vst [vmem:[%s10528_s7 + $0x13d8] sm:$0xff] %v1470_v59  ;;  %v1472_v60 = vld [vmem:[%s10520_s6 + $0x27c0] sm:$0xff]  ;;  %v1474_v61 = vld [vmem:[%s10520_s6 + $0x27c8] sm:$0xff] }
 0x14e   : > { %v1476_v62 = vld [vmem:[%s10520_s6 + $0x27e0] sm:$0xff]  ;;  %1473 = vst [vmem:[%s10528_s7 + $0x13e0] sm:$0xff] %v1472_v60  ;;  %1475 = vst [vmem:[%s10528_s7 + $0x13e8] sm:$0xff] %v1474_v61  ;;  %v1478_v63 = vld [vmem:[%s10520_s6 + $0x27e8] sm:$0xff] }
 0x14f   : > { %1477 = vst [vmem:[%s10528_s7 + $0x13f0] sm:$0xff] %v1476_v62  ;;  %v1480_v0 = vld [vmem:[%s10520_s6 + $0x2800] sm:$0xff]  ;;  %v1482_v1 = vld [vmem:[%s10520_s6 + $0x2808] sm:$0xff]  ;;  %1479 = vst [vmem:[%s10528_s7 + $0x13f8] sm:$0xff] %v1478_v63 }
 0x150   : > { %1481 = vst [vmem:[%s10528_s7 + $0x1400] sm:$0xff] %v1480_v0  ;;  %1483 = vst [vmem:[%s10528_s7 + $0x1408] sm:$0xff] %v1482_v1  ;;  %v1484_v2 = vld [vmem:[%s10520_s6 + $0x2820] sm:$0xff]  ;;  %v1486_v3 = vld [vmem:[%s10520_s6 + $0x2828] sm:$0xff] }
 0x151   : > { %v1488_v4 = vld [vmem:[%s10520_s6 + $0x2840] sm:$0xff]  ;;  %1485 = vst [vmem:[%s10528_s7 + $0x1410] sm:$0xff] %v1484_v2  ;;  %1487 = vst [vmem:[%s10528_s7 + $0x1418] sm:$0xff] %v1486_v3  ;;  %v1490_v5 = vld [vmem:[%s10520_s6 + $0x2848] sm:$0xff] }
 0x152   : > { %1489 = vst [vmem:[%s10528_s7 + $0x1420] sm:$0xff] %v1488_v4  ;;  %v1492_v6 = vld [vmem:[%s10520_s6 + $0x2860] sm:$0xff]  ;;  %v1494_v7 = vld [vmem:[%s10520_s6 + $0x2868] sm:$0xff]  ;;  %1491 = vst [vmem:[%s10528_s7 + $0x1428] sm:$0xff] %v1490_v5 }
 0x153   : > { %1493 = vst [vmem:[%s10528_s7 + $0x1430] sm:$0xff] %v1492_v6  ;;  %1495 = vst [vmem:[%s10528_s7 + $0x1438] sm:$0xff] %v1494_v7  ;;  %v1496_v8 = vld [vmem:[%s10520_s6 + $0x2880] sm:$0xff]  ;;  %v1498_v9 = vld [vmem:[%s10520_s6 + $0x2888] sm:$0xff] }
 0x154   : > { %v1500_v10 = vld [vmem:[%s10520_s6 + $0x28a0] sm:$0xff]  ;;  %1497 = vst [vmem:[%s10528_s7 + $0x1440] sm:$0xff] %v1496_v8  ;;  %1499 = vst [vmem:[%s10528_s7 + $0x1448] sm:$0xff] %v1498_v9  ;;  %v1502_v11 = vld [vmem:[%s10520_s6 + $0x28a8] sm:$0xff] }
 0x155   : > { %1501 = vst [vmem:[%s10528_s7 + $0x1450] sm:$0xff] %v1500_v10  ;;  %v1504_v12 = vld [vmem:[%s10520_s6 + $0x28c0] sm:$0xff]  ;;  %v1506_v13 = vld [vmem:[%s10520_s6 + $0x28c8] sm:$0xff]  ;;  %1503 = vst [vmem:[%s10528_s7 + $0x1458] sm:$0xff] %v1502_v11 }
 0x156   : > { %1505 = vst [vmem:[%s10528_s7 + $0x1460] sm:$0xff] %v1504_v12  ;;  %1507 = vst [vmem:[%s10528_s7 + $0x1468] sm:$0xff] %v1506_v13  ;;  %v1508_v14 = vld [vmem:[%s10520_s6 + $0x28e0] sm:$0xff]  ;;  %v1510_v15 = vld [vmem:[%s10520_s6 + $0x28e8] sm:$0xff] }
 0x157   : > { %v1512_v16 = vld [vmem:[%s10520_s6 + $0x2900] sm:$0xff]  ;;  %1509 = vst [vmem:[%s10528_s7 + $0x1470] sm:$0xff] %v1508_v14  ;;  %1511 = vst [vmem:[%s10528_s7 + $0x1478] sm:$0xff] %v1510_v15  ;;  %v1514_v17 = vld [vmem:[%s10520_s6 + $0x2908] sm:$0xff] }
 0x158   : > { %1513 = vst [vmem:[%s10528_s7 + $0x1480] sm:$0xff] %v1512_v16  ;;  %v1516_v18 = vld [vmem:[%s10520_s6 + $0x2920] sm:$0xff]  ;;  %v1518_v19 = vld [vmem:[%s10520_s6 + $0x2928] sm:$0xff]  ;;  %1515 = vst [vmem:[%s10528_s7 + $0x1488] sm:$0xff] %v1514_v17 }
 0x159   : > { %1517 = vst [vmem:[%s10528_s7 + $0x1490] sm:$0xff] %v1516_v18  ;;  %1519 = vst [vmem:[%s10528_s7 + $0x1498] sm:$0xff] %v1518_v19  ;;  %v1520_v20 = vld [vmem:[%s10520_s6 + $0x2940] sm:$0xff]  ;;  %v1522_v21 = vld [vmem:[%s10520_s6 + $0x2948] sm:$0xff] }
 0x15a   : > { %v1524_v22 = vld [vmem:[%s10520_s6 + $0x2960] sm:$0xff]  ;;  %1521 = vst [vmem:[%s10528_s7 + $0x14a0] sm:$0xff] %v1520_v20  ;;  %1523 = vst [vmem:[%s10528_s7 + $0x14a8] sm:$0xff] %v1522_v21  ;;  %v1526_v23 = vld [vmem:[%s10520_s6 + $0x2968] sm:$0xff] }
 0x15b   : > { %1525 = vst [vmem:[%s10528_s7 + $0x14b0] sm:$0xff] %v1524_v22  ;;  %v1528_v24 = vld [vmem:[%s10520_s6 + $0x2980] sm:$0xff]  ;;  %v1530_v25 = vld [vmem:[%s10520_s6 + $0x2988] sm:$0xff]  ;;  %1527 = vst [vmem:[%s10528_s7 + $0x14b8] sm:$0xff] %v1526_v23 }
 0x15c   : > { %1529 = vst [vmem:[%s10528_s7 + $0x14c0] sm:$0xff] %v1528_v24  ;;  %1531 = vst [vmem:[%s10528_s7 + $0x14c8] sm:$0xff] %v1530_v25  ;;  %v1532_v26 = vld [vmem:[%s10520_s6 + $0x29a0] sm:$0xff]  ;;  %v1534_v27 = vld [vmem:[%s10520_s6 + $0x29a8] sm:$0xff] }
 0x15d   : > { %v1536_v28 = vld [vmem:[%s10520_s6 + $0x29c0] sm:$0xff]  ;;  %1533 = vst [vmem:[%s10528_s7 + $0x14d0] sm:$0xff] %v1532_v26  ;;  %1535 = vst [vmem:[%s10528_s7 + $0x14d8] sm:$0xff] %v1534_v27  ;;  %v1538_v29 = vld [vmem:[%s10520_s6 + $0x29c8] sm:$0xff] }
 0x15e   : > { %1537 = vst [vmem:[%s10528_s7 + $0x14e0] sm:$0xff] %v1536_v28  ;;  %v1540_v30 = vld [vmem:[%s10520_s6 + $0x29e0] sm:$0xff]  ;;  %v1542_v31 = vld [vmem:[%s10520_s6 + $0x29e8] sm:$0xff]  ;;  %1539 = vst [vmem:[%s10528_s7 + $0x14e8] sm:$0xff] %v1538_v29 }
 0x15f   : > { %1541 = vst [vmem:[%s10528_s7 + $0x14f0] sm:$0xff] %v1540_v30  ;;  %1543 = vst [vmem:[%s10528_s7 + $0x14f8] sm:$0xff] %v1542_v31  ;;  %v1544_v32 = vld [vmem:[%s10520_s6 + $0x2a00] sm:$0xff]  ;;  %v1546_v33 = vld [vmem:[%s10520_s6 + $0x2a08] sm:$0xff] }
 0x160   : > { %v1548_v34 = vld [vmem:[%s10520_s6 + $0x2a20] sm:$0xff]  ;;  %1545 = vst [vmem:[%s10528_s7 + $0x1500] sm:$0xff] %v1544_v32  ;;  %1547 = vst [vmem:[%s10528_s7 + $0x1508] sm:$0xff] %v1546_v33  ;;  %v1550_v35 = vld [vmem:[%s10520_s6 + $0x2a28] sm:$0xff] }
 0x161   : > { %1549 = vst [vmem:[%s10528_s7 + $0x1510] sm:$0xff] %v1548_v34  ;;  %v1552_v36 = vld [vmem:[%s10520_s6 + $0x2a40] sm:$0xff]  ;;  %v1554_v37 = vld [vmem:[%s10520_s6 + $0x2a48] sm:$0xff]  ;;  %1551 = vst [vmem:[%s10528_s7 + $0x1518] sm:$0xff] %v1550_v35 }
 0x162   : > { %1553 = vst [vmem:[%s10528_s7 + $0x1520] sm:$0xff] %v1552_v36  ;;  %1555 = vst [vmem:[%s10528_s7 + $0x1528] sm:$0xff] %v1554_v37  ;;  %v1556_v38 = vld [vmem:[%s10520_s6 + $0x2a60] sm:$0xff]  ;;  %v1558_v39 = vld [vmem:[%s10520_s6 + $0x2a68] sm:$0xff] }
 0x163   : > { %v1560_v40 = vld [vmem:[%s10520_s6 + $0x2a80] sm:$0xff]  ;;  %1557 = vst [vmem:[%s10528_s7 + $0x1530] sm:$0xff] %v1556_v38  ;;  %1559 = vst [vmem:[%s10528_s7 + $0x1538] sm:$0xff] %v1558_v39  ;;  %v1562_v41 = vld [vmem:[%s10520_s6 + $0x2a88] sm:$0xff] }
 0x164   : > { %1561 = vst [vmem:[%s10528_s7 + $0x1540] sm:$0xff] %v1560_v40  ;;  %v1564_v42 = vld [vmem:[%s10520_s6 + $0x2aa0] sm:$0xff]  ;;  %v1566_v43 = vld [vmem:[%s10520_s6 + $0x2aa8] sm:$0xff]  ;;  %1563 = vst [vmem:[%s10528_s7 + $0x1548] sm:$0xff] %v1562_v41 }
 0x165   : > { %1565 = vst [vmem:[%s10528_s7 + $0x1550] sm:$0xff] %v1564_v42  ;;  %1567 = vst [vmem:[%s10528_s7 + $0x1558] sm:$0xff] %v1566_v43  ;;  %v1568_v44 = vld [vmem:[%s10520_s6 + $0x2ac0] sm:$0xff]  ;;  %v1570_v45 = vld [vmem:[%s10520_s6 + $0x2ac8] sm:$0xff] }
 0x166   : > { %v1572_v46 = vld [vmem:[%s10520_s6 + $0x2ae0] sm:$0xff]  ;;  %1569 = vst [vmem:[%s10528_s7 + $0x1560] sm:$0xff] %v1568_v44  ;;  %1571 = vst [vmem:[%s10528_s7 + $0x1568] sm:$0xff] %v1570_v45  ;;  %v1574_v47 = vld [vmem:[%s10520_s6 + $0x2ae8] sm:$0xff] }
 0x167   : > { %1573 = vst [vmem:[%s10528_s7 + $0x1570] sm:$0xff] %v1572_v46  ;;  %v1576_v48 = vld [vmem:[%s10520_s6 + $0x2b00] sm:$0xff]  ;;  %v1578_v49 = vld [vmem:[%s10520_s6 + $0x2b08] sm:$0xff]  ;;  %1575 = vst [vmem:[%s10528_s7 + $0x1578] sm:$0xff] %v1574_v47 }
 0x168   : > { %1577 = vst [vmem:[%s10528_s7 + $0x1580] sm:$0xff] %v1576_v48  ;;  %1579 = vst [vmem:[%s10528_s7 + $0x1588] sm:$0xff] %v1578_v49  ;;  %v1580_v50 = vld [vmem:[%s10520_s6 + $0x2b20] sm:$0xff]  ;;  %v1582_v51 = vld [vmem:[%s10520_s6 + $0x2b28] sm:$0xff] }
 0x169   : > { %v1584_v52 = vld [vmem:[%s10520_s6 + $0x2b40] sm:$0xff]  ;;  %1581 = vst [vmem:[%s10528_s7 + $0x1590] sm:$0xff] %v1580_v50  ;;  %1583 = vst [vmem:[%s10528_s7 + $0x1598] sm:$0xff] %v1582_v51  ;;  %v1586_v53 = vld [vmem:[%s10520_s6 + $0x2b48] sm:$0xff] }
 0x16a   : > { %1585 = vst [vmem:[%s10528_s7 + $0x15a0] sm:$0xff] %v1584_v52  ;;  %v1588_v54 = vld [vmem:[%s10520_s6 + $0x2b60] sm:$0xff]  ;;  %v1590_v55 = vld [vmem:[%s10520_s6 + $0x2b68] sm:$0xff]  ;;  %1587 = vst [vmem:[%s10528_s7 + $0x15a8] sm:$0xff] %v1586_v53 }
 0x16b   : > { %1589 = vst [vmem:[%s10528_s7 + $0x15b0] sm:$0xff] %v1588_v54  ;;  %1591 = vst [vmem:[%s10528_s7 + $0x15b8] sm:$0xff] %v1590_v55  ;;  %v1592_v56 = vld [vmem:[%s10520_s6 + $0x2b80] sm:$0xff]  ;;  %v1594_v57 = vld [vmem:[%s10520_s6 + $0x2b88] sm:$0xff] }
 0x16c   : > { %v1596_v58 = vld [vmem:[%s10520_s6 + $0x2ba0] sm:$0xff]  ;;  %1593 = vst [vmem:[%s10528_s7 + $0x15c0] sm:$0xff] %v1592_v56  ;;  %1595 = vst [vmem:[%s10528_s7 + $0x15c8] sm:$0xff] %v1594_v57  ;;  %v1598_v59 = vld [vmem:[%s10520_s6 + $0x2ba8] sm:$0xff] }
 0x16d   : > { %1597 = vst [vmem:[%s10528_s7 + $0x15d0] sm:$0xff] %v1596_v58  ;;  %v1600_v60 = vld [vmem:[%s10520_s6 + $0x2bc0] sm:$0xff]  ;;  %v1602_v61 = vld [vmem:[%s10520_s6 + $0x2bc8] sm:$0xff]  ;;  %1599 = vst [vmem:[%s10528_s7 + $0x15d8] sm:$0xff] %v1598_v59 }
 0x16e   : > { %1601 = vst [vmem:[%s10528_s7 + $0x15e0] sm:$0xff] %v1600_v60  ;;  %1603 = vst [vmem:[%s10528_s7 + $0x15e8] sm:$0xff] %v1602_v61  ;;  %v1604_v62 = vld [vmem:[%s10520_s6 + $0x2be0] sm:$0xff]  ;;  %v1606_v63 = vld [vmem:[%s10520_s6 + $0x2be8] sm:$0xff] }
 0x16f   : > { %v1608_v0 = vld [vmem:[%s10520_s6 + $0x2c00] sm:$0xff]  ;;  %1605 = vst [vmem:[%s10528_s7 + $0x15f0] sm:$0xff] %v1604_v62  ;;  %1607 = vst [vmem:[%s10528_s7 + $0x15f8] sm:$0xff] %v1606_v63  ;;  %v1610_v1 = vld [vmem:[%s10520_s6 + $0x2c08] sm:$0xff] }
 0x170   : > { %1609 = vst [vmem:[%s10528_s7 + $0x1600] sm:$0xff] %v1608_v0  ;;  %v1612_v2 = vld [vmem:[%s10520_s6 + $0x2c20] sm:$0xff]  ;;  %v1614_v3 = vld [vmem:[%s10520_s6 + $0x2c28] sm:$0xff]  ;;  %1611 = vst [vmem:[%s10528_s7 + $0x1608] sm:$0xff] %v1610_v1 }
 0x171   : > { %1613 = vst [vmem:[%s10528_s7 + $0x1610] sm:$0xff] %v1612_v2  ;;  %1615 = vst [vmem:[%s10528_s7 + $0x1618] sm:$0xff] %v1614_v3  ;;  %v1616_v4 = vld [vmem:[%s10520_s6 + $0x2c40] sm:$0xff]  ;;  %v1618_v5 = vld [vmem:[%s10520_s6 + $0x2c48] sm:$0xff] }
 0x172   : > { %v1620_v6 = vld [vmem:[%s10520_s6 + $0x2c60] sm:$0xff]  ;;  %1617 = vst [vmem:[%s10528_s7 + $0x1620] sm:$0xff] %v1616_v4  ;;  %1619 = vst [vmem:[%s10528_s7 + $0x1628] sm:$0xff] %v1618_v5  ;;  %v1622_v7 = vld [vmem:[%s10520_s6 + $0x2c68] sm:$0xff] }
 0x173   : > { %1621 = vst [vmem:[%s10528_s7 + $0x1630] sm:$0xff] %v1620_v6  ;;  %v1624_v8 = vld [vmem:[%s10520_s6 + $0x2c80] sm:$0xff]  ;;  %v1626_v9 = vld [vmem:[%s10520_s6 + $0x2c88] sm:$0xff]  ;;  %1623 = vst [vmem:[%s10528_s7 + $0x1638] sm:$0xff] %v1622_v7 }
 0x174   : > { %1625 = vst [vmem:[%s10528_s7 + $0x1640] sm:$0xff] %v1624_v8  ;;  %1627 = vst [vmem:[%s10528_s7 + $0x1648] sm:$0xff] %v1626_v9  ;;  %v1628_v10 = vld [vmem:[%s10520_s6 + $0x2ca0] sm:$0xff]  ;;  %v1630_v11 = vld [vmem:[%s10520_s6 + $0x2ca8] sm:$0xff] }
 0x175   : > { %v1632_v12 = vld [vmem:[%s10520_s6 + $0x2cc0] sm:$0xff]  ;;  %1629 = vst [vmem:[%s10528_s7 + $0x1650] sm:$0xff] %v1628_v10  ;;  %1631 = vst [vmem:[%s10528_s7 + $0x1658] sm:$0xff] %v1630_v11  ;;  %v1634_v13 = vld [vmem:[%s10520_s6 + $0x2cc8] sm:$0xff] }
 0x176   : > { %1633 = vst [vmem:[%s10528_s7 + $0x1660] sm:$0xff] %v1632_v12  ;;  %v1636_v14 = vld [vmem:[%s10520_s6 + $0x2ce0] sm:$0xff]  ;;  %v1638_v15 = vld [vmem:[%s10520_s6 + $0x2ce8] sm:$0xff]  ;;  %1635 = vst [vmem:[%s10528_s7 + $0x1668] sm:$0xff] %v1634_v13 }
 0x177   : > { %1637 = vst [vmem:[%s10528_s7 + $0x1670] sm:$0xff] %v1636_v14  ;;  %1639 = vst [vmem:[%s10528_s7 + $0x1678] sm:$0xff] %v1638_v15  ;;  %v1640_v16 = vld [vmem:[%s10520_s6 + $0x2d00] sm:$0xff]  ;;  %v1642_v17 = vld [vmem:[%s10520_s6 + $0x2d08] sm:$0xff] }
 0x178   : > { %v1644_v18 = vld [vmem:[%s10520_s6 + $0x2d20] sm:$0xff]  ;;  %1641 = vst [vmem:[%s10528_s7 + $0x1680] sm:$0xff] %v1640_v16  ;;  %1643 = vst [vmem:[%s10528_s7 + $0x1688] sm:$0xff] %v1642_v17  ;;  %v1646_v19 = vld [vmem:[%s10520_s6 + $0x2d28] sm:$0xff] }
 0x179   : > { %1645 = vst [vmem:[%s10528_s7 + $0x1690] sm:$0xff] %v1644_v18  ;;  %v1648_v20 = vld [vmem:[%s10520_s6 + $0x2d40] sm:$0xff]  ;;  %v1650_v21 = vld [vmem:[%s10520_s6 + $0x2d48] sm:$0xff]  ;;  %1647 = vst [vmem:[%s10528_s7 + $0x1698] sm:$0xff] %v1646_v19 }
 0x17a   : > { %1649 = vst [vmem:[%s10528_s7 + $0x16a0] sm:$0xff] %v1648_v20  ;;  %1651 = vst [vmem:[%s10528_s7 + $0x16a8] sm:$0xff] %v1650_v21  ;;  %v1652_v22 = vld [vmem:[%s10520_s6 + $0x2d60] sm:$0xff]  ;;  %v1654_v23 = vld [vmem:[%s10520_s6 + $0x2d68] sm:$0xff] }
 0x17b   : > { %v1656_v24 = vld [vmem:[%s10520_s6 + $0x2d80] sm:$0xff]  ;;  %1653 = vst [vmem:[%s10528_s7 + $0x16b0] sm:$0xff] %v1652_v22  ;;  %1655 = vst [vmem:[%s10528_s7 + $0x16b8] sm:$0xff] %v1654_v23  ;;  %v1658_v25 = vld [vmem:[%s10520_s6 + $0x2d88] sm:$0xff] }
 0x17c   : > { %1657 = vst [vmem:[%s10528_s7 + $0x16c0] sm:$0xff] %v1656_v24  ;;  %v1660_v26 = vld [vmem:[%s10520_s6 + $0x2da0] sm:$0xff]  ;;  %v1662_v27 = vld [vmem:[%s10520_s6 + $0x2da8] sm:$0xff]  ;;  %1659 = vst [vmem:[%s10528_s7 + $0x16c8] sm:$0xff] %v1658_v25 }
 0x17d   : > { %1661 = vst [vmem:[%s10528_s7 + $0x16d0] sm:$0xff] %v1660_v26  ;;  %1663 = vst [vmem:[%s10528_s7 + $0x16d8] sm:$0xff] %v1662_v27  ;;  %v1664_v28 = vld [vmem:[%s10520_s6 + $0x2dc0] sm:$0xff]  ;;  %v1666_v29 = vld [vmem:[%s10520_s6 + $0x2dc8] sm:$0xff] }
 0x17e   : > { %v1668_v30 = vld [vmem:[%s10520_s6 + $0x2de0] sm:$0xff]  ;;  %1665 = vst [vmem:[%s10528_s7 + $0x16e0] sm:$0xff] %v1664_v28  ;;  %1667 = vst [vmem:[%s10528_s7 + $0x16e8] sm:$0xff] %v1666_v29  ;;  %v1670_v31 = vld [vmem:[%s10520_s6 + $0x2de8] sm:$0xff] }
 0x17f   : > { %1669 = vst [vmem:[%s10528_s7 + $0x16f0] sm:$0xff] %v1668_v30  ;;  %v1672_v32 = vld [vmem:[%s10520_s6 + $0x2e00] sm:$0xff]  ;;  %v1674_v33 = vld [vmem:[%s10520_s6 + $0x2e08] sm:$0xff]  ;;  %1671 = vst [vmem:[%s10528_s7 + $0x16f8] sm:$0xff] %v1670_v31 }
 0x180   : > { %1673 = vst [vmem:[%s10528_s7 + $0x1700] sm:$0xff] %v1672_v32  ;;  %1675 = vst [vmem:[%s10528_s7 + $0x1708] sm:$0xff] %v1674_v33  ;;  %v1676_v34 = vld [vmem:[%s10520_s6 + $0x2e20] sm:$0xff]  ;;  %v1678_v35 = vld [vmem:[%s10520_s6 + $0x2e28] sm:$0xff] }
 0x181   : > { %v1680_v36 = vld [vmem:[%s10520_s6 + $0x2e40] sm:$0xff]  ;;  %1677 = vst [vmem:[%s10528_s7 + $0x1710] sm:$0xff] %v1676_v34  ;;  %1679 = vst [vmem:[%s10528_s7 + $0x1718] sm:$0xff] %v1678_v35  ;;  %v1682_v37 = vld [vmem:[%s10520_s6 + $0x2e48] sm:$0xff] }
 0x182   : > { %1681 = vst [vmem:[%s10528_s7 + $0x1720] sm:$0xff] %v1680_v36  ;;  %v1684_v38 = vld [vmem:[%s10520_s6 + $0x2e60] sm:$0xff]  ;;  %v1686_v39 = vld [vmem:[%s10520_s6 + $0x2e68] sm:$0xff]  ;;  %1683 = vst [vmem:[%s10528_s7 + $0x1728] sm:$0xff] %v1682_v37 }
 0x183   : > { %1685 = vst [vmem:[%s10528_s7 + $0x1730] sm:$0xff] %v1684_v38  ;;  %1687 = vst [vmem:[%s10528_s7 + $0x1738] sm:$0xff] %v1686_v39  ;;  %v1688_v40 = vld [vmem:[%s10520_s6 + $0x2e80] sm:$0xff]  ;;  %v1690_v41 = vld [vmem:[%s10520_s6 + $0x2e88] sm:$0xff] }
 0x184   : > { %v1692_v42 = vld [vmem:[%s10520_s6 + $0x2ea0] sm:$0xff]  ;;  %1689 = vst [vmem:[%s10528_s7 + $0x1740] sm:$0xff] %v1688_v40  ;;  %1691 = vst [vmem:[%s10528_s7 + $0x1748] sm:$0xff] %v1690_v41  ;;  %v1694_v43 = vld [vmem:[%s10520_s6 + $0x2ea8] sm:$0xff] }
 0x185   : > { %1693 = vst [vmem:[%s10528_s7 + $0x1750] sm:$0xff] %v1692_v42  ;;  %v1696_v44 = vld [vmem:[%s10520_s6 + $0x2ec0] sm:$0xff]  ;;  %v1698_v45 = vld [vmem:[%s10520_s6 + $0x2ec8] sm:$0xff]  ;;  %1695 = vst [vmem:[%s10528_s7 + $0x1758] sm:$0xff] %v1694_v43 }
 0x186   : > { %1697 = vst [vmem:[%s10528_s7 + $0x1760] sm:$0xff] %v1696_v44  ;;  %1699 = vst [vmem:[%s10528_s7 + $0x1768] sm:$0xff] %v1698_v45  ;;  %v1700_v46 = vld [vmem:[%s10520_s6 + $0x2ee0] sm:$0xff]  ;;  %v1702_v47 = vld [vmem:[%s10520_s6 + $0x2ee8] sm:$0xff] }
 0x187   : > { %v1704_v48 = vld [vmem:[%s10520_s6 + $0x2f00] sm:$0xff]  ;;  %1701 = vst [vmem:[%s10528_s7 + $0x1770] sm:$0xff] %v1700_v46  ;;  %1703 = vst [vmem:[%s10528_s7 + $0x1778] sm:$0xff] %v1702_v47  ;;  %v1706_v49 = vld [vmem:[%s10520_s6 + $0x2f08] sm:$0xff] }
 0x188   : > { %1705 = vst [vmem:[%s10528_s7 + $0x1780] sm:$0xff] %v1704_v48  ;;  %v1708_v50 = vld [vmem:[%s10520_s6 + $0x2f20] sm:$0xff]  ;;  %v1710_v51 = vld [vmem:[%s10520_s6 + $0x2f28] sm:$0xff]  ;;  %1707 = vst [vmem:[%s10528_s7 + $0x1788] sm:$0xff] %v1706_v49 }
 0x189   : > { %1709 = vst [vmem:[%s10528_s7 + $0x1790] sm:$0xff] %v1708_v50  ;;  %1711 = vst [vmem:[%s10528_s7 + $0x1798] sm:$0xff] %v1710_v51  ;;  %v1712_v52 = vld [vmem:[%s10520_s6 + $0x2f40] sm:$0xff]  ;;  %v1714_v53 = vld [vmem:[%s10520_s6 + $0x2f48] sm:$0xff] }
 0x18a   : > { %v1716_v54 = vld [vmem:[%s10520_s6 + $0x2f60] sm:$0xff]  ;;  %1713 = vst [vmem:[%s10528_s7 + $0x17a0] sm:$0xff] %v1712_v52  ;;  %1715 = vst [vmem:[%s10528_s7 + $0x17a8] sm:$0xff] %v1714_v53  ;;  %v1718_v55 = vld [vmem:[%s10520_s6 + $0x2f68] sm:$0xff] }
 0x18b   : > { %1717 = vst [vmem:[%s10528_s7 + $0x17b0] sm:$0xff] %v1716_v54  ;;  %v1720_v56 = vld [vmem:[%s10520_s6 + $0x2f80] sm:$0xff]  ;;  %v1722_v57 = vld [vmem:[%s10520_s6 + $0x2f88] sm:$0xff]  ;;  %1719 = vst [vmem:[%s10528_s7 + $0x17b8] sm:$0xff] %v1718_v55 }
 0x18c   : > { %1721 = vst [vmem:[%s10528_s7 + $0x17c0] sm:$0xff] %v1720_v56  ;;  %1723 = vst [vmem:[%s10528_s7 + $0x17c8] sm:$0xff] %v1722_v57  ;;  %v1724_v58 = vld [vmem:[%s10520_s6 + $0x2fa0] sm:$0xff]  ;;  %v1726_v59 = vld [vmem:[%s10520_s6 + $0x2fa8] sm:$0xff] }
 0x18d   : > { %v1728_v60 = vld [vmem:[%s10520_s6 + $0x2fc0] sm:$0xff]  ;;  %1725 = vst [vmem:[%s10528_s7 + $0x17d0] sm:$0xff] %v1724_v58  ;;  %1727 = vst [vmem:[%s10528_s7 + $0x17d8] sm:$0xff] %v1726_v59  ;;  %v1730_v61 = vld [vmem:[%s10520_s6 + $0x2fc8] sm:$0xff] }
 0x18e   : > { %1729 = vst [vmem:[%s10528_s7 + $0x17e0] sm:$0xff] %v1728_v60  ;;  %v1732_v62 = vld [vmem:[%s10520_s6 + $0x2fe0] sm:$0xff]  ;;  %v1734_v63 = vld [vmem:[%s10520_s6 + $0x2fe8] sm:$0xff]  ;;  %1731 = vst [vmem:[%s10528_s7 + $0x17e8] sm:$0xff] %v1730_v61 }
 0x18f   : > { %1733 = vst [vmem:[%s10528_s7 + $0x17f0] sm:$0xff] %v1732_v62  ;;  %1735 = vst [vmem:[%s10528_s7 + $0x17f8] sm:$0xff] %v1734_v63  ;;  %v1736_v0 = vld [vmem:[%s10520_s6 + $0x3000] sm:$0xff]  ;;  %v1738_v1 = vld [vmem:[%s10520_s6 + $0x3008] sm:$0xff] }
 0x190   : > { %v1740_v2 = vld [vmem:[%s10520_s6 + $0x3020] sm:$0xff]  ;;  %1737 = vst [vmem:[%s10528_s7 + $0x1800] sm:$0xff] %v1736_v0  ;;  %1739 = vst [vmem:[%s10528_s7 + $0x1808] sm:$0xff] %v1738_v1  ;;  %v1742_v3 = vld [vmem:[%s10520_s6 + $0x3028] sm:$0xff] }
 0x191   : > { %1741 = vst [vmem:[%s10528_s7 + $0x1810] sm:$0xff] %v1740_v2  ;;  %v1744_v4 = vld [vmem:[%s10520_s6 + $0x3040] sm:$0xff]  ;;  %v1746_v5 = vld [vmem:[%s10520_s6 + $0x3048] sm:$0xff]  ;;  %1743 = vst [vmem:[%s10528_s7 + $0x1818] sm:$0xff] %v1742_v3 }
 0x192   : > { %1745 = vst [vmem:[%s10528_s7 + $0x1820] sm:$0xff] %v1744_v4  ;;  %1747 = vst [vmem:[%s10528_s7 + $0x1828] sm:$0xff] %v1746_v5  ;;  %v1748_v6 = vld [vmem:[%s10520_s6 + $0x3060] sm:$0xff]  ;;  %v1750_v7 = vld [vmem:[%s10520_s6 + $0x3068] sm:$0xff] }
 0x193   : > { %v1752_v8 = vld [vmem:[%s10520_s6 + $0x3080] sm:$0xff]  ;;  %1749 = vst [vmem:[%s10528_s7 + $0x1830] sm:$0xff] %v1748_v6  ;;  %1751 = vst [vmem:[%s10528_s7 + $0x1838] sm:$0xff] %v1750_v7  ;;  %v1754_v9 = vld [vmem:[%s10520_s6 + $0x3088] sm:$0xff] }
 0x194   : > { %1753 = vst [vmem:[%s10528_s7 + $0x1840] sm:$0xff] %v1752_v8  ;;  %v1756_v10 = vld [vmem:[%s10520_s6 + $0x30a0] sm:$0xff]  ;;  %v1758_v11 = vld [vmem:[%s10520_s6 + $0x30a8] sm:$0xff]  ;;  %1755 = vst [vmem:[%s10528_s7 + $0x1848] sm:$0xff] %v1754_v9 }
 0x195   : > { %1757 = vst [vmem:[%s10528_s7 + $0x1850] sm:$0xff] %v1756_v10  ;;  %1759 = vst [vmem:[%s10528_s7 + $0x1858] sm:$0xff] %v1758_v11  ;;  %v1760_v12 = vld [vmem:[%s10520_s6 + $0x30c0] sm:$0xff]  ;;  %v1762_v13 = vld [vmem:[%s10520_s6 + $0x30c8] sm:$0xff] }
 0x196   : > { %v1764_v14 = vld [vmem:[%s10520_s6 + $0x30e0] sm:$0xff]  ;;  %1761 = vst [vmem:[%s10528_s7 + $0x1860] sm:$0xff] %v1760_v12  ;;  %1763 = vst [vmem:[%s10528_s7 + $0x1868] sm:$0xff] %v1762_v13  ;;  %v1766_v15 = vld [vmem:[%s10520_s6 + $0x30e8] sm:$0xff] }
 0x197   : > { %1765 = vst [vmem:[%s10528_s7 + $0x1870] sm:$0xff] %v1764_v14  ;;  %1767 = vst [vmem:[%s10528_s7 + $0x1878] sm:$0xff] %v1766_v15 }
 0x198 PF: > { %p8275_p5 = scmp.ge.s32.totalorder %s10448_s20, 1  ;;  %p1789_p6 = scmp.lt.s32.totalorder %s10448_s20, 3 }
 0x19a   : > { %p1790_p7 = pnand %p8275_p5, %p1789_p6 }
 0x19b   : > { %s1796_s8 = sand.u32 (!%p1790_p7), 1, %s10440_s18   ;;  %s8276_s9 = sshll.u32 (!%p1790_p7), %s10500_s21, 2 }
 0x19c   : > { %1793 = sbr.rel (%p1790_p7) target bundleno = 1642 (0x66a), region = 59  ;;  %p1829_p8 = scmp.lt.s32.totalorder (!%p1790_p7), %s8276_s9, 7 }
 0x19d   : > { %s9151_s10 = smul.u32 (!%p1790_p7), 6272, %s1796_s8  ;;  %s8277_s11 = sshll.u32 (!%p1790_p7), %s10500_s21, 6 }
 0x19e   : > { %p1834_p9 = scmp.lt.s32.totalorder (!%p1790_p7), %s8277_s11, 127  ;;  %p8279_p10 = scmp.ne.s32.totalorder (!%p1790_p7), %s10500_s21, 0 }
 0x19f   : > { %s12107_s23 = scalar_lea.vmem (!%p1790_p7), [#allocation3], %s9151_s10 }
 0x1a1   : > { %s13215_s9 = smov (!%p1829_p8, %s8276_s9), 7  ;;  %s13217_s11 = smov (!%p1834_p9, %s8277_s11), 127 }
 0x1a2   : > { %s12100_s14 = scalar_lea.vmem %s13207_s2, %s13215_s9  ;;  %s8278_s15 = sshll.u32 %s13217_s11, 2 }
 0x1a3   : > { %s12105_s20 = scalar_lea.vmem %s13208_s3, %s8278_s15  ;;  %1843 = sbr.rel (%p8279_p10) target bundleno = 426 (0x1aa), region = 67 }
 0x1a8   : > { %vm1844_vm0 = vcmask 41984   ;;  %v10450_v16 = vmov 0.0  }
 0x1a9   : > { %1845 = vst.msk [vmem:[#allocation2] sm:$0x3] %vm1844_vm0, %v10450_v16 }
 0x1aa PF: > { %v9186_v17 = vld [vmem:[%s12107_s23 + $0xe4] ss:$16 sps:$4 sm:$0xff]   ;;  %v9190_v19 = vld [vmem:[%s12107_s23 + $0xe0] ss:$16 sps:$4 sm:$0xff]   ;;  %v2636_v53 = vlaneseq  ;;  %v10451_v54 = vmov 1966171168  }
 0x1ab   : > { %v9188_v18 = vld [vmem:[%s12107_s23 + $0x2e4] ss:$16 sps:$4 sm:$0xff]   ;;  %6769 = vmatprep.subr.bf16.mxu0 %v9186_v17  ;;  %v9191_v20 = vld [vmem:[%s12107_s23 + $0x2e0] ss:$16 sps:$4 sm:$0xff]   ;;  %v2662_v55 = vunpack.c.l.s4 %v10451_v54  ;;  %vm6765_vm1 = vcmask 523264   ;;  %vm8181_vm2 = vcmask 41984  }
 0x1ac   : > { %6810 = vmatprep.subr.bf16.mxu1 %v9188_v18  ;;  %v9192_v21 = vld [vmem:[%s12107_s23 + $0xc4] ss:$16 sps:$4 sm:$0xff]   ;;  %6770 = vmatpush1.bf16.msra.mxu0 %v9190_v19  ;;  %v9196_v23 = vld [vmem:[%s12107_s23 + $0xc0] ss:$16 sps:$4 sm:$0xff]   ;;  %v12149_v59 = vshrl.u32 %v2636_v53, 7  ;;  %p9099_p11 = scmp.ne.s32.totalorder %s10500_s21, 1 }
 0x1ad   : > { %6811 = vmatpush1.bf16.msra.mxu1 %v9191_v20  ;;  %v9194_v22 = vld [vmem:[%s12107_s23 + $0x2c4] ss:$16 sps:$4 sm:$0xff]   ;;  %6771 = vmatprep.subr.bf16.mxu0 %v9192_v21  ;;  %v9197_v24 = vld [vmem:[%s12107_s23 + $0x2c0] ss:$16 sps:$4 sm:$0xff]   ;;  %v2663_v60 = vunpack.c.0.s8 %v2662_v55 }
 0x1ae   : > { %6812 = vmatprep.subr.bf16.mxu1 %v9194_v22  ;;  %v9198_v25 = vld [vmem:[%s12107_s23 + $0xa4] ss:$16 sps:$4 sm:$0xff]   ;;  %v9202_v27 = vld [vmem:[%s12107_s23 + $0xa0] ss:$16 sps:$4 sm:$0xff]  }
 0x1af   : > { %v9200_v26 = vld [vmem:[%s12107_s23 + $0x2a4] ss:$16 sps:$4 sm:$0xff]   ;;  %v9203_v28 = vld [vmem:[%s12107_s23 + $0x2a0] ss:$16 sps:$4 sm:$0xff]   ;;  %v12157_v2 = vsub.s32 %v2663_v60, %v12149_v59 }
 0x1b0   : > { %6772 = vmatpush1.bf16.msra.mxu0 %v9196_v23  ;;  %v9204_v29 = vld [vmem:[%s12107_s23 + $0x84] ss:$16 sps:$4 sm:$0xff]   ;;  %v9208_v31 = vld [vmem:[%s12107_s23 + $0x80] ss:$16 sps:$4 sm:$0xff]  }
 0x1b1   : > { %6813 = vmatpush1.bf16.msra.mxu1 %v9197_v24  ;;  %6773 = vmatprep.subr.bf16.mxu0 %v9198_v25  ;;  %v9206_v30 = vld [vmem:[%s12107_s23 + $0x284] ss:$16 sps:$4 sm:$0xff]   ;;  %v9209_v32 = vld [vmem:[%s12107_s23 + $0x280] ss:$16 sps:$4 sm:$0xff]  }
 0x1b2   : > { %6814 = vmatprep.subr.bf16.mxu1 %v9200_v26  ;;  %v9210_v33 = vld [vmem:[%s12107_s23 + $0x64] ss:$16 sps:$4 sm:$0xff]   ;;  %v9214_v35 = vld [vmem:[%s12107_s23 + $0x60] ss:$16 sps:$4 sm:$0xff]  }
 0x1b3   : > { %v9212_v34 = vld [vmem:[%s12107_s23 + $0x264] ss:$16 sps:$4 sm:$0xff]   ;;  %v9215_v36 = vld [vmem:[%s12107_s23 + $0x260] ss:$16 sps:$4 sm:$0xff]  }
 0x1b4   : > { %6774 = vmatpush1.bf16.msra.mxu0 %v9202_v27  ;;  %v9216_v37 = vld [vmem:[%s12107_s23 + $0x44] ss:$16 sps:$4 sm:$0xff]   ;;  %v9220_v39 = vld [vmem:[%s12107_s23 + $0x40] ss:$16 sps:$4 sm:$0xff]  }
 0x1b5   : > { %6815 = vmatpush1.bf16.msra.mxu1 %v9203_v28  ;;  %6775 = vmatprep.subr.bf16.mxu0 %v9204_v29  ;;  %v9218_v38 = vld [vmem:[%s12107_s23 + $0x244] ss:$16 sps:$4 sm:$0xff]   ;;  %v9221_v40 = vld [vmem:[%s12107_s23 + $0x240] ss:$16 sps:$4 sm:$0xff]  }
 0x1b6   : > { %6816 = vmatprep.subr.bf16.mxu1 %v9206_v30  ;;  %v9222_v41 = vld [vmem:[%s12107_s23 + $0x24] ss:$16 sps:$4 sm:$0xff]   ;;  %v9226_v43 = vld [vmem:[%s12107_s23 + $0x20] ss:$16 sps:$4 sm:$0xff]  }
 0x1b7   : > { %v9224_v42 = vld [vmem:[%s12107_s23 + $0x224] ss:$16 sps:$4 sm:$0xff]   ;;  %v9227_v44 = vld [vmem:[%s12107_s23 + $0x220] ss:$16 sps:$4 sm:$0xff]  }
 0x1b8   : > { %6776 = vmatpush1.bf16.msra.mxu0 %v9208_v31  ;;  %v9228_v45 = vld [vmem:[%s12107_s23 + $0x4] ss:$16 sps:$4 sm:$0xff]   ;;  %v9232_v47 = vld [vmem:[%s12107_s23] ss:$16 sps:$4 sm:$0xff]  }
 0x1b9   : > { %6817 = vmatpush1.bf16.msra.mxu1 %v9209_v32  ;;  %6777 = vmatprep.subr.bf16.mxu0 %v9210_v33  ;;  %v9230_v46 = vld [vmem:[%s12107_s23 + $0x204] ss:$16 sps:$4 sm:$0xff]   ;;  %v9233_v48 = vld [vmem:[%s12107_s23 + $0x200] ss:$16 sps:$4 sm:$0xff]  }
 0x1ba   : > { %6818 = vmatprep.subr.bf16.mxu1 %v9212_v34  ;;  %v9234_v49 = vld [vmem:[%s12107_s23 + $0x1e4] ss:$16 sps:$4 sm:$0xff]   ;;  %v9238_v51 = vld [vmem:[%s12107_s23 + $0x1e0] ss:$16 sps:$4 sm:$0xff]  }
 0x1bb   : > { %v9236_v50 = vld [vmem:[%s12107_s23 + $0x3e4] ss:$16 sps:$4 sm:$0xff]   ;;  %v9239_v52 = vld [vmem:[%s12107_s23 + $0x3e0] ss:$16 sps:$4 sm:$0xff]  }
 0x1bc   : > { %6778 = vmatpush1.bf16.msra.mxu0 %v9214_v35  ;;  %v9240_v56 = vld [vmem:[%s12107_s23 + $0x1c4] ss:$16 sps:$4 sm:$0xff]   ;;  %v9244_v58 = vld [vmem:[%s12107_s23 + $0x1c0] ss:$16 sps:$4 sm:$0xff]  }
 0x1bd   : > { %6819 = vmatpush1.bf16.msra.mxu1 %v9215_v36  ;;  %6779 = vmatprep.subr.bf16.mxu0 %v9216_v37  ;;  %v9242_v57 = vld [vmem:[%s12107_s23 + $0x3c4] ss:$16 sps:$4 sm:$0xff]   ;;  %v9245_v61 = vld [vmem:[%s12107_s23 + $0x3c0] ss:$16 sps:$4 sm:$0xff]  }
 0x1be   : > { %6820 = vmatprep.subr.bf16.mxu1 %v9218_v38  ;;  %v9246_v62 = vld [vmem:[%s12107_s23 + $0x1a4] ss:$16 sps:$4 sm:$0xff]   ;;  %v9250_v0 = vld [vmem:[%s12107_s23 + $0x1a0] ss:$16 sps:$4 sm:$0xff]  }
 0x1bf   : > { %v9248_v63 = vld [vmem:[%s12107_s23 + $0x3a4] ss:$16 sps:$4 sm:$0xff]   ;;  %v9251_v1 = vld [vmem:[%s12107_s23 + $0x3a0] ss:$16 sps:$4 sm:$0xff]  }
 0x1c0   : > { %6780 = vmatpush1.bf16.msra.mxu0 %v9220_v39  ;;  %v9252_v3 = vld [vmem:[%s12107_s23 + $0x184] ss:$16 sps:$4 sm:$0xff]   ;;  %v9256_v6 = vld [vmem:[%s12107_s23 + $0x180] ss:$16 sps:$4 sm:$0xff]  }
 0x1c1   : > { %6821 = vmatpush1.bf16.msra.mxu1 %v9221_v40  ;;  %6781 = vmatprep.subr.bf16.mxu0 %v9222_v41  ;;  %v9254_v4 = vld [vmem:[%s12107_s23 + $0x384] ss:$16 sps:$4 sm:$0xff]   ;;  %v9257_v8 = vld [vmem:[%s12107_s23 + $0x380] ss:$16 sps:$4 sm:$0xff]  }
 0x1c2   : > { %6822 = vmatprep.subr.bf16.mxu1 %v9224_v42  ;;  %v1846_v5 = vld [vmem:[%s13205_s0] sm:$0xff] }
 0x1c3   : > { %v2667_v7 = vrot.slane %v1846_v5, %v12157_v2  ;;  %v9258_v9 = vld [vmem:[%s12107_s23 + $0x164] ss:$16 sps:$4 sm:$0xff]   ;;  %v9262_v12 = vld [vmem:[%s12107_s23 + $0x160] ss:$16 sps:$4 sm:$0xff]   ;;  %v2660_v18 = vcombine.high %v1846_v5, %v1846_v5 }
 0x1c4   : > { %6782 = vmatpush1.bf16.msra.mxu0 %v9226_v43  ;;  %v9260_v10 = vld [vmem:[%s12107_s23 + $0x364] ss:$16 sps:$4 sm:$0xff]   ;;  %v9263_v14 = vld [vmem:[%s12107_s23 + $0x360] ss:$16 sps:$4 sm:$0xff]  }
 0x1c5   : > { %6823 = vmatpush1.bf16.msra.mxu1 %v9227_v44  ;;  %6783 = vmatprep.subr.bf16.mxu0 %v9228_v45  ;;  %v2675_v11 = vcombine.high %v2667_v7, %v2667_v7  ;;  %v9264_v15 = vld [vmem:[%s12107_s23 + $0x144] ss:$16 sps:$4 sm:$0xff]   ;;  %v9268_v19 = vld [vmem:[%s12107_s23 + $0x140] ss:$16 sps:$4 sm:$0xff]   ;;  %v12187_v23 = vrot.slane %v2660_v18, %v12157_v2  ;;  %v12197_v30 = vrot.slane %v2667_v7, %v12157_v2 }
 0x1c6   : > { %6824 = vmatprep.subr.bf16.mxu1 %v9230_v46  ;;  %v9266_v16 = vld [vmem:[%s12107_s23 + $0x344] ss:$16 sps:$4 sm:$0xff]   ;;  %v9269_v20 = vld [vmem:[%s12107_s23 + $0x340] ss:$16 sps:$4 sm:$0xff]  }
 0x1c7   : > { %v12171_v13 = vrot.slane %v2675_v11, %v12157_v2  ;;  %v9270_v21 = vld [vmem:[%s12107_s23 + $0x124] ss:$16 sps:$4 sm:$0xff]   ;;  %v9274_v24 = vld [vmem:[%s12107_s23 + $0x120] ss:$16 sps:$4 sm:$0xff]   ;;  %v2676_v28 = vcombine.high %v12187_v23, %v12187_v23  ;;  %v12207_v35 = vcombine.high %v12197_v30, %v12197_v30 }
 0x1c8   : > { %6784 = vmatpush1.bf16.msra.mxu0 %v9232_v47  ;;  %v9272_v22 = vld [vmem:[%s12107_s23 + $0x324] ss:$16 sps:$4 sm:$0xff]   ;;  %v9275_v25 = vld [vmem:[%s12107_s23 + $0x320] ss:$16 sps:$4 sm:$0xff]  }
 0x1c9   : > { %6825 = vmatpush1.bf16.msra.mxu1 %v9233_v48  ;;  %6785 = vmatprep.subr.bf16.mxu0 %v9234_v49  ;;  %v12178_v17 = vcombine.high %v12171_v13, %v12171_v13  ;;  %v9276_v26 = vld [vmem:[%s12107_s23 + $0x104] ss:$16 sps:$4 sm:$0xff]   ;;  %v9280_v29 = vld [vmem:[%s12107_s23 + $0x100] ss:$16 sps:$4 sm:$0xff]   ;;  %v12203_v34 = vrot.slane %v2676_v28, %v12157_v2 }
 0x1ca   : > { %6826 = vmatprep.subr.bf16.mxu1 %v9236_v50  ;;  %6801 = vmatprep.mubr.bf16.mxu0 %v12171_v13  ;;  %v9278_v27 = vld [vmem:[%s12107_s23 + $0x304] ss:$16 sps:$4 sm:$0xff]   ;;  %v9281_v31 = vld [vmem:[%s12107_s23 + $0x300] ss:$16 sps:$4 sm:$0xff]  }
 0x1cb   : > { %6842 = vmatprep.mubr.bf16.mxu1 %v12178_v17  ;;  %v9284_v32 = vld [vmem:[%s12107_s23 + $0x4e4] ss:$16 sps:$4 sm:$0xff]   ;;  %v9282_v36 = vld [vmem:[%s12107_s23 + $0x4e0] ss:$16 sps:$4 sm:$0xff]   ;;  %v12215_v40 = vcombine.high %v12203_v34, %v12203_v34 }
 0x1cc   : > { %6786 = vmatpush2.bf16.msra.mxu0 %v9238_v51  ;;  %v9287_v33 = vld [vmem:[%s12107_s23 + $0x6e4] ss:$16 sps:$4 sm:$0xff]   ;;  %v9285_v37 = vld [vmem:[%s12107_s23 + $0x6e0] ss:$16 sps:$4 sm:$0xff]  }
 0x1cd   : > { %6827 = vmatpush2.bf16.msra.mxu1 %v9239_v52  ;;  %6787 = vmatprep.subr.bf16.mxu0 %v9240_v56  ;;  %v9290_v38 = vld [vmem:[%s12107_s23 + $0x4c4] ss:$16 sps:$4 sm:$0xff]   ;;  %v9288_v41 = vld [vmem:[%s12107_s23 + $0x4c0] ss:$16 sps:$4 sm:$0xff]  }
 0x1ce   : > { %6828 = vmatprep.subr.bf16.mxu1 %v9242_v57  ;;  %v9293_v39 = vld [vmem:[%s12107_s23 + $0x6c4] ss:$16 sps:$4 sm:$0xff]   ;;  %v9291_v42 = vld [vmem:[%s12107_s23 + $0x6c0] ss:$16 sps:$4 sm:$0xff]  }
 0x1cf   : > { %v9296_v43 = vld [vmem:[%s12107_s23 + $0x4a4] ss:$16 sps:$4 sm:$0xff]   ;;  %v9294_v45 = vld [vmem:[%s12107_s23 + $0x4a0] ss:$16 sps:$4 sm:$0xff]  }
 0x1d0   : > { %6788 = vmatpush2.bf16.msra.mxu0 %v9244_v58  ;;  %v9299_v44 = vld [vmem:[%s12107_s23 + $0x6a4] ss:$16 sps:$4 sm:$0xff]   ;;  %v9297_v46 = vld [vmem:[%s12107_s23 + $0x6a0] ss:$16 sps:$4 sm:$0xff]  }
 0x1d1   : > { %6829 = vmatpush2.bf16.msra.mxu1 %v9245_v61  ;;  %6789 = vmatprep.subr.bf16.mxu0 %v9246_v62  ;;  %v9302_v47 = vld [vmem:[%s12107_s23 + $0x484] ss:$16 sps:$4 sm:$0xff]   ;;  %v9300_v49 = vld [vmem:[%s12107_s23 + $0x480] ss:$16 sps:$4 sm:$0xff]  }
 0x1d2   : > { %6830 = vmatprep.subr.bf16.mxu1 %v9248_v63  ;;  %v9305_v48 = vld [vmem:[%s12107_s23 + $0x684] ss:$16 sps:$4 sm:$0xff]   ;;  %v9303_v50 = vld [vmem:[%s12107_s23 + $0x680] ss:$16 sps:$4 sm:$0xff]  }
 0x1d3   : > { %v9308_v51 = vld [vmem:[%s12107_s23 + $0x464] ss:$16 sps:$4 sm:$0xff]   ;;  %v9306_v53 = vld [vmem:[%s12107_s23 + $0x460] ss:$16 sps:$4 sm:$0xff]  }
 0x1d4   : > { %6790 = vmatpush2.bf16.msra.mxu0 %v9250_v0  ;;  %v9311_v52 = vld [vmem:[%s12107_s23 + $0x664] ss:$16 sps:$4 sm:$0xff]   ;;  %v9309_v54 = vld [vmem:[%s12107_s23 + $0x660] ss:$16 sps:$4 sm:$0xff]  }
 0x1d5   : > { %6831 = vmatpush2.bf16.msra.mxu1 %v9251_v1  ;;  %6791 = vmatprep.subr.bf16.mxu0 %v9252_v3  ;;  %v9314_v55 = vld [vmem:[%s12107_s23 + $0x444] ss:$16 sps:$4 sm:$0xff]   ;;  %v9312_v57 = vld [vmem:[%s12107_s23 + $0x440] ss:$16 sps:$4 sm:$0xff]  }
 0x1d6   : > { %6832 = vmatprep.subr.bf16.mxu1 %v9254_v4  ;;  %v9317_v56 = vld [vmem:[%s12107_s23 + $0x644] ss:$16 sps:$4 sm:$0xff]   ;;  %v9315_v58 = vld [vmem:[%s12107_s23 + $0x640] ss:$16 sps:$4 sm:$0xff]  }
 0x1d7   : > { %v9320_v60 = vld [vmem:[%s12107_s23 + $0x424] ss:$16 sps:$4 sm:$0xff]   ;;  %v9318_v62 = vld [vmem:[%s12107_s23 + $0x420] ss:$16 sps:$4 sm:$0xff]  }
 0x1d8   : > { %6792 = vmatpush2.bf16.msra.mxu0 %v9256_v6  ;;  %v9323_v61 = vld [vmem:[%s12107_s23 + $0x624] ss:$16 sps:$4 sm:$0xff]   ;;  %v9321_v63 = vld [vmem:[%s12107_s23 + $0x620] ss:$16 sps:$4 sm:$0xff]  }
 0x1d9   : > { %6833 = vmatpush2.bf16.msra.mxu1 %v9257_v8  ;;  %6793 = vmatprep.subr.bf16.mxu0 %v9258_v9  ;;  %v9326_v0 = vld [vmem:[%s12107_s23 + $0x404] ss:$16 sps:$4 sm:$0xff]   ;;  %v9324_v3 = vld [vmem:[%s12107_s23 + $0x400] ss:$16 sps:$4 sm:$0xff]  }
 0x1da   : > { %6834 = vmatprep.subr.bf16.mxu1 %v9260_v10  ;;  %v9329_v1 = vld [vmem:[%s12107_s23 + $0x604] ss:$16 sps:$4 sm:$0xff]   ;;  %v9327_v4 = vld [vmem:[%s12107_s23 + $0x600] ss:$16 sps:$4 sm:$0xff]  }
 0x1db   : > { %v9332_v5 = vld [vmem:[%s12107_s23 + $0x5e4] ss:$16 sps:$4 sm:$0xff]   ;;  %v9330_v7 = vld [vmem:[%s12107_s23 + $0x5e0] ss:$16 sps:$4 sm:$0xff]  }
 0x1dc   : > { %6794 = vmatpush2.bf16.msra.mxu0 %v9262_v12  ;;  %v9335_v6 = vld [vmem:[%s12107_s23 + $0x7e4] ss:$16 sps:$4 sm:$0xff]   ;;  %v9333_v8 = vld [vmem:[%s12107_s23 + $0x7e0] ss:$16 sps:$4 sm:$0xff]  }
 0x1dd   : > { %6835 = vmatpush2.bf16.msra.mxu1 %v9263_v14  ;;  %6795 = vmatprep.subr.bf16.mxu0 %v9264_v15  ;;  %v9338_v9 = vld [vmem:[%s12107_s23 + $0x5c4] ss:$16 sps:$4 sm:$0xff]   ;;  %v9336_v11 = vld [vmem:[%s12107_s23 + $0x5c0] ss:$16 sps:$4 sm:$0xff]  }
 0x1de   : > { %6836 = vmatprep.subr.bf16.mxu1 %v9266_v16  ;;  %v9341_v10 = vld [vmem:[%s12107_s23 + $0x7c4] ss:$16 sps:$4 sm:$0xff]   ;;  %v9339_v12 = vld [vmem:[%s12107_s23 + $0x7c0] ss:$16 sps:$4 sm:$0xff]  }
 0x1df   : > { %v9344_v14 = vld [vmem:[%s12107_s23 + $0x5a4] ss:$16 sps:$4 sm:$0xff]   ;;  %v9342_v16 = vld [vmem:[%s12107_s23 + $0x5a0] ss:$16 sps:$4 sm:$0xff]  }
 0x1e0   : > { %6796 = vmatpush2.bf16.msra.mxu0 %v9268_v19  ;;  %v9347_v15 = vld [vmem:[%s12107_s23 + $0x7a4] ss:$16 sps:$4 sm:$0xff]   ;;  %v9345_v18 = vld [vmem:[%s12107_s23 + $0x7a0] ss:$16 sps:$4 sm:$0xff]  }
 0x1e1   : > { %6837 = vmatpush2.bf16.msra.mxu1 %v9269_v20  ;;  %6797 = vmatprep.subr.bf16.mxu0 %v9270_v21  ;;  %v9350_v19 = vld [vmem:[%s12107_s23 + $0x584] ss:$16 sps:$4 sm:$0xff]   ;;  %v9348_v21 = vld [vmem:[%s12107_s23 + $0x580] ss:$16 sps:$4 sm:$0xff]  }
 0x1e2   : > { %6838 = vmatprep.subr.bf16.mxu1 %v9272_v22  ;;  %v9353_v20 = vld [vmem:[%s12107_s23 + $0x784] ss:$16 sps:$4 sm:$0xff]   ;;  %v9351_v22 = vld [vmem:[%s12107_s23 + $0x780] ss:$16 sps:$4 sm:$0xff]  }
 0x1e3   : > { %v9362_v28 = vld [vmem:[%s12107_s23 + $0x544] ss:$16 sps:$4 sm:$0xff]  }
 0x1e4   : > { %6798 = vmatpush2.bf16.msra.mxu0 %v9274_v24  ;;  %v9356_v24 = vld [vmem:[%s12107_s23 + $0x564] ss:$16 sps:$4 sm:$0xff]  }
 0x1e5   : > { %6839 = vmatpush2.bf16.msra.mxu1 %v9275_v25  ;;  %6799 = vmatprep.subr.bf16.mxu0 %v9276_v26  ;;  %v9359_v25 = vld [vmem:[%s12107_s23 + $0x764] ss:$16 sps:$4 sm:$0xff]   ;;  %v9354_v26 = vld [vmem:[%s12107_s23 + $0x560] ss:$16 sps:$4 sm:$0xff]  }
 0x1e6   : > { %6840 = vmatprep.subr.bf16.mxu1 %v9278_v27  ;;  %v9357_v27 = vld [vmem:[%s12107_s23 + $0x760] ss:$16 sps:$4 sm:$0xff]  }
 0x1e8   : > { %6800 = vmatpush2.bf16.msra.mxu0 %v9280_v29  ;;  %v9365_v29 = vld [vmem:[%s12107_s23 + $0x744] ss:$16 sps:$4 sm:$0xff]  }
 0x1e9   : > { %6841 = vmatpush2.bf16.msra.mxu1 %v9281_v31  ;;  %6851 = vmatprep.subr.bf16.mxu0 %v9284_v32  ;;  %v9360_v31 = vld [vmem:[%s12107_s23 + $0x540] ss:$16 sps:$4 sm:$0xff]  }
 0x1ea   : > { %6892 = vmatprep.subr.bf16.mxu1 %v9287_v33  ;;  %v9363_v32 = vld [vmem:[%s12107_s23 + $0x740] ss:$16 sps:$4 sm:$0xff]   ;;  %v9368_v33 = vld [vmem:[%s12107_s23 + $0x524] ss:$16 sps:$4 sm:$0xff]  }
 0x1eb   : > { %6802 = vmatmul.mubr.bf16.vlgmr.msra.gmra.mxu0 %v12197_v30 }
 0x1ec   : > { %6843 = vmatmul.mubr.bf16.vlgmr.msra.gmra.mxu1 %v12207_v35  ;;  %6852 = vmatpush1.bf16.msra.mxu0 %v9282_v36  ;;  %v9371_v36 = vld [vmem:[%s12107_s23 + $0x724] ss:$16 sps:$4 sm:$0xff]  }
 0x1ed   : > { %6893 = vmatpush1.bf16.msra.mxu1 %v9285_v37  ;;  %6853 = vmatprep.subr.bf16.mxu0 %v9290_v38  ;;  %v9366_v37 = vld [vmem:[%s12107_s23 + $0x520] ss:$16 sps:$4 sm:$0xff]  }
 0x1ee   : > { %6894 = vmatprep.subr.bf16.mxu1 %v9293_v39  ;;  %6883 = vmatprep.mubr.bf16.mxu0 %v12203_v34  ;;  %v9369_v38 = vld [vmem:[%s12107_s23 + $0x720] ss:$16 sps:$4 sm:$0xff]   ;;  %v9374_v39 = vld [vmem:[%s12107_s23 + $0x504] ss:$16 sps:$4 sm:$0xff]  }
 0x1ef   : > { %6924 = vmatprep.mubr.bf16.mxu1 %v12215_v40 }
 0x1f0   : > { %6854 = vmatpush1.bf16.msra.mxu0 %v9288_v41  ;;  %v9377_v41 = vld [vmem:[%s12107_s23 + $0x704] ss:$16 sps:$4 sm:$0xff]  }
 0x1f1   : > { %6895 = vmatpush1.bf16.msra.mxu1 %v9291_v42  ;;  %6855 = vmatprep.subr.bf16.mxu0 %v9296_v43  ;;  %v9372_v42 = vld [vmem:[%s12107_s23 + $0x500] ss:$16 sps:$4 sm:$0xff]   ;;  %v12280_v43 = vrot.slane %v12187_v23, %v12157_v2 }
 0x1f2   : > { %6896 = vmatprep.subr.bf16.mxu1 %v9299_v44  ;;  %v9375_v44 = vld [vmem:[%s12107_s23 + $0x700] ss:$16 sps:$4 sm:$0xff]  }
 0x1f3   : > { %v9382_v23 = vld [vmem:[%s12107_s23 + $0xae0] ss:$16 sps:$4 sm:$0xff]  }
 0x1f4   : > { %6856 = vmatpush1.bf16.msra.mxu0 %v9294_v45  ;;  %v9381_v45 = vld [vmem:[%s12107_s23 + $0x8e4] ss:$16 sps:$4 sm:$0xff]  }
 0x1f5   : > { %6897 = vmatpush1.bf16.msra.mxu1 %v9297_v46  ;;  %6857 = vmatprep.subr.bf16.mxu0 %v9302_v47  ;;  %v9384_v46 = vld [vmem:[%s12107_s23 + $0xae4] ss:$16 sps:$4 sm:$0xff]   ;;  %v12287_v47 = vcombine.high %v12280_v43, %v12280_v43 }
 0x1f6   : > { %6898 = vmatprep.subr.bf16.mxu1 %v9305_v48  ;;  %v9379_v48 = vld [vmem:[%s12107_s23 + $0x8e0] ss:$16 sps:$4 sm:$0xff]  }
 0x1f8   : > { %6858 = vmatpush1.bf16.msra.mxu0 %v9300_v49  ;;  %v12294_v49 = vld [vmem:[%s13205_s0 + $0x8] sm:$0xff] }
 0x1f9   : > { %6899 = vmatpush1.bf16.msra.mxu1 %v9303_v50  ;;  %6859 = vmatprep.subr.bf16.mxu0 %v9308_v51  ;;  %v9387_v50 = vld [vmem:[%s12107_s23 + $0x8c4] ss:$16 sps:$4 sm:$0xff]  }
 0x1fa   : > { %6900 = vmatprep.subr.bf16.mxu1 %v9311_v52  ;;  %v9390_v51 = vld [vmem:[%s12107_s23 + $0xac4] ss:$16 sps:$4 sm:$0xff]   ;;  %v12300_v52 = vrot.slane %v12294_v49, %v12157_v2 }
 0x1fc   : > { %6860 = vmatpush1.bf16.msra.mxu0 %v9306_v53  ;;  %v2724_v53 = vcombine.high %v12300_v52, %v12300_v52 }
 0x1fd   : > { %6901 = vmatpush1.bf16.msra.mxu1 %v9309_v54  ;;  %6861 = vmatprep.subr.bf16.mxu0 %v9314_v55  ;;  %v9385_v54 = vld [vmem:[%s12107_s23 + $0x8c0] ss:$16 sps:$4 sm:$0xff]  }
 0x1fe   : > { %6902 = vmatprep.subr.bf16.mxu1 %v9317_v56  ;;  %v9388_v55 = vld [vmem:[%s12107_s23 + $0xac0] ss:$16 sps:$4 sm:$0xff]   ;;  %v9393_v56 = vld [vmem:[%s12107_s23 + $0x8a4] ss:$16 sps:$4 sm:$0xff]  }
 0x200   : > { %6862 = vmatpush1.bf16.msra.mxu0 %v9312_v57  ;;  %v9396_v57 = vld [vmem:[%s12107_s23 + $0xaa4] ss:$16 sps:$4 sm:$0xff]  }
 0x201   : > { %6903 = vmatpush1.bf16.msra.mxu1 %v9315_v58  ;;  %6863 = vmatprep.subr.bf16.mxu0 %v9320_v60  ;;  %v12311_v58 = vrot.slane %v2724_v53, %v12157_v2  ;;  %v9457_v53 = vld [vmem:[%s12107_s23 + $0x940] ss:$16 sps:$4 sm:$0xff]  }
 0x202   : > { %6904 = vmatprep.subr.bf16.mxu1 %v9323_v61  ;;  %v9391_v61 = vld [vmem:[%s12107_s23 + $0x8a0] ss:$16 sps:$4 sm:$0xff]  }
 0x203   : > { %v12316_v60 = vcombine.high %v12311_v58, %v12311_v58 }
 0x204   : > { %6864 = vmatpush1.bf16.msra.mxu0 %v9318_v62  ;;  %v9394_v62 = vld [vmem:[%s12107_s23 + $0xaa0] ss:$16 sps:$4 sm:$0xff]  }
 0x205   : > { %6905 = vmatpush1.bf16.msra.mxu1 %v9321_v63  ;;  %6865 = vmatprep.subr.bf16.mxu0 %v9326_v0  ;;  %v9399_v63 = vld [vmem:[%s12107_s23 + $0x884] ss:$16 sps:$4 sm:$0xff]  }
 0x206   : > { %6906 = vmatprep.subr.bf16.mxu1 %v9329_v1  ;;  %v9402_v0 = vld [vmem:[%s12107_s23 + $0xa84] ss:$16 sps:$4 sm:$0xff]   ;;  %v9397_v1 = vld [vmem:[%s12107_s23 + $0x880] ss:$16 sps:$4 sm:$0xff]  }
 0x208   : > { %6866 = vmatpush1.bf16.msra.mxu0 %v9324_v3  ;;  %v9400_v3 = vld [vmem:[%s12107_s23 + $0xa80] ss:$16 sps:$4 sm:$0xff]  }
 0x209   : > { %6907 = vmatpush1.bf16.msra.mxu1 %v9327_v4  ;;  %6867 = vmatprep.subr.bf16.mxu0 %v9332_v5  ;;  %v9405_v4 = vld [vmem:[%s12107_s23 + $0x864] ss:$16 sps:$4 sm:$0xff]  }
 0x20a   : > { %6908 = vmatprep.subr.bf16.mxu1 %v9335_v6  ;;  %v9408_v5 = vld [vmem:[%s12107_s23 + $0xa64] ss:$16 sps:$4 sm:$0xff]   ;;  %v9403_v6 = vld [vmem:[%s12107_s23 + $0x860] ss:$16 sps:$4 sm:$0xff]  }
 0x20c   : > { %6868 = vmatpush2.bf16.msra.mxu0 %v9330_v7  ;;  %v9406_v7 = vld [vmem:[%s12107_s23 + $0xa60] ss:$16 sps:$4 sm:$0xff]  }
 0x20d   : > { %6909 = vmatpush2.bf16.msra.mxu1 %v9333_v8  ;;  %6869 = vmatprep.subr.bf16.mxu0 %v9338_v9  ;;  %v9411_v8 = vld [vmem:[%s12107_s23 + $0x844] ss:$16 sps:$4 sm:$0xff]  }
 0x20e   : > { %6910 = vmatprep.subr.bf16.mxu1 %v9341_v10  ;;  %v9414_v9 = vld [vmem:[%s12107_s23 + $0xa44] ss:$16 sps:$4 sm:$0xff]   ;;  %v9409_v10 = vld [vmem:[%s12107_s23 + $0x840] ss:$16 sps:$4 sm:$0xff]  }
 0x210   : > { %6870 = vmatpush2.bf16.msra.mxu0 %v9336_v11  ;;  %v9412_v11 = vld [vmem:[%s12107_s23 + $0xa40] ss:$16 sps:$4 sm:$0xff]  }
 0x211   : > { %6911 = vmatpush2.bf16.msra.mxu1 %v9339_v12  ;;  %6871 = vmatprep.subr.bf16.mxu0 %v9344_v14  ;;  %v9417_v12 = vld [vmem:[%s12107_s23 + $0x824] ss:$16 sps:$4 sm:$0xff]  }
 0x212   : > { %6912 = vmatprep.subr.bf16.mxu1 %v9347_v15  ;;  %v9420_v14 = vld [vmem:[%s12107_s23 + $0xa24] ss:$16 sps:$4 sm:$0xff]   ;;  %v9415_v15 = vld [vmem:[%s12107_s23 + $0x820] ss:$16 sps:$4 sm:$0xff]  }
 0x214   : > { %6872 = vmatpush2.bf16.msra.mxu0 %v9342_v16  ;;  %v9418_v16 = vld [vmem:[%s12107_s23 + $0xa20] ss:$16 sps:$4 sm:$0xff]  }
 0x215   : > { %6913 = vmatpush2.bf16.msra.mxu1 %v9345_v18  ;;  %6873 = vmatprep.subr.bf16.mxu0 %v9350_v19  ;;  %v9423_v18 = vld [vmem:[%s12107_s23 + $0x804] ss:$16 sps:$4 sm:$0xff]  }
 0x216   : > { %6914 = vmatprep.subr.bf16.mxu1 %v9353_v20  ;;  %v9426_v19 = vld [vmem:[%s12107_s23 + $0xa04] ss:$16 sps:$4 sm:$0xff]   ;;  %v9421_v20 = vld [vmem:[%s12107_s23 + $0x800] ss:$16 sps:$4 sm:$0xff]  }
 0x218   : > { %6874 = vmatpush2.bf16.msra.mxu0 %v9348_v21  ;;  %v9424_v21 = vld [vmem:[%s12107_s23 + $0xa00] ss:$16 sps:$4 sm:$0xff]  }
 0x219   : > { %6915 = vmatpush2.bf16.msra.mxu1 %v9351_v22  ;;  %6875 = vmatprep.subr.bf16.mxu0 %v9356_v24  ;;  %v9429_v22 = vld [vmem:[%s12107_s23 + $0x9e4] ss:$16 sps:$4 sm:$0xff]  }
 0x21a   : > { %6916 = vmatprep.subr.bf16.mxu1 %v9359_v25  ;;  %v9432_v24 = vld [vmem:[%s12107_s23 + $0xbe4] ss:$16 sps:$4 sm:$0xff]   ;;  %v9427_v25 = vld [vmem:[%s12107_s23 + $0x9e0] ss:$16 sps:$4 sm:$0xff]  }
 0x21c   : > { %6876 = vmatpush2.bf16.msra.mxu0 %v9354_v26  ;;  %v9430_v26 = vld [vmem:[%s12107_s23 + $0xbe0] ss:$16 sps:$4 sm:$0xff]  }
 0x21d   : > { %6917 = vmatpush2.bf16.msra.mxu1 %v9357_v27  ;;  %6877 = vmatprep.subr.bf16.mxu0 %v9362_v28  ;;  %v9435_v27 = vld [vmem:[%s12107_s23 + $0x9c4] ss:$16 sps:$4 sm:$0xff]  }
 0x21e   : > { %6918 = vmatprep.subr.bf16.mxu1 %v9365_v29  ;;  %v9438_v28 = vld [vmem:[%s12107_s23 + $0xbc4] ss:$16 sps:$4 sm:$0xff]   ;;  %v9433_v29 = vld [vmem:[%s12107_s23 + $0x9c0] ss:$16 sps:$4 sm:$0xff]  }
 0x220   : > { %6878 = vmatpush2.bf16.msra.mxu0 %v9360_v31  ;;  %v9436_v31 = vld [vmem:[%s12107_s23 + $0xbc0] ss:$16 sps:$4 sm:$0xff]  }
 0x221   : > { %6919 = vmatpush2.bf16.msra.mxu1 %v9363_v32  ;;  %6879 = vmatprep.subr.bf16.mxu0 %v9368_v33  ;;  %v9441_v32 = vld [vmem:[%s12107_s23 + $0x9a4] ss:$16 sps:$4 sm:$0xff]  }
 0x222   : > { %6920 = vmatprep.subr.bf16.mxu1 %v9371_v36  ;;  %v9444_v33 = vld [vmem:[%s12107_s23 + $0xba4] ss:$16 sps:$4 sm:$0xff]   ;;  %v9439_v36 = vld [vmem:[%s12107_s23 + $0x9a0] ss:$16 sps:$4 sm:$0xff]  }
 0x224   : > { %6880 = vmatpush2.bf16.msra.mxu0 %v9366_v37  ;;  %v9442_v37 = vld [vmem:[%s12107_s23 + $0xba0] ss:$16 sps:$4 sm:$0xff]  }
 0x225   : > { %6921 = vmatpush2.bf16.msra.mxu1 %v9369_v38  ;;  %6881 = vmatprep.subr.bf16.mxu0 %v9374_v39  ;;  %v9447_v38 = vld [vmem:[%s12107_s23 + $0x984] ss:$16 sps:$4 sm:$0xff]  }
 0x226   : > { %6922 = vmatprep.subr.bf16.mxu1 %v9377_v41  ;;  %v9450_v39 = vld [vmem:[%s12107_s23 + $0xb84] ss:$16 sps:$4 sm:$0xff]   ;;  %v9445_v41 = vld [vmem:[%s12107_s23 + $0x980] ss:$16 sps:$4 sm:$0xff]  }
 0x228   : > { %6882 = vmatpush2.bf16.msra.mxu0 %v9372_v42  ;;  %v9448_v42 = vld [vmem:[%s12107_s23 + $0xb80] ss:$16 sps:$4 sm:$0xff]  }
 0x229   : > { %6923 = vmatpush2.bf16.msra.mxu1 %v9375_v44  ;;  %6933 = vmatprep.subr.bf16.mxu0 %v9381_v45  ;;  %v9453_v44 = vld [vmem:[%s12107_s23 + $0x964] ss:$16 sps:$4 sm:$0xff]  }
 0x22a   : > { %6974 = vmatprep.subr.bf16.mxu1 %v9384_v46  ;;  %v9456_v45 = vld [vmem:[%s12107_s23 + $0xb64] ss:$16 sps:$4 sm:$0xff]   ;;  %v9451_v46 = vld [vmem:[%s12107_s23 + $0x960] ss:$16 sps:$4 sm:$0xff]  }
 0x22b   : > { %6884 = vmatmul.mubr.bf16.vlgmr.msra.gmra.mxu0 %v12280_v43 }
 0x22c   : > { %6925 = vmatmul.mubr.bf16.vlgmr.msra.gmra.mxu1 %v12287_v47  ;;  %6934 = vmatpush1.bf16.msra.mxu0 %v9379_v48  ;;  %v9454_v48 = vld [vmem:[%s12107_s23 + $0xb60] ss:$16 sps:$4 sm:$0xff]  }
 0x22d   : > { %6975 = vmatpush1.bf16.msra.mxu1 %v9382_v23  ;;  %6935 = vmatprep.subr.bf16.mxu0 %v9387_v50  ;;  %v9459_v23 = vld [vmem:[%s12107_s23 + $0x944] ss:$16 sps:$4 sm:$0xff]  }
 0x22e   : > { %6976 = vmatprep.subr.bf16.mxu1 %v9390_v51  ;;  %6965 = vmatprep.mubr.bf16.mxu0 %v12311_v58  ;;  %v9462_v50 = vld [vmem:[%s12107_s23 + $0xb44] ss:$16 sps:$4 sm:$0xff]   ;;  %v2709_v51 = vcombine.high %v12294_v49, %v12294_v49  ;;  %v9466_v49 = vld [vmem:[%s12107_s23 + $0xb20] ss:$16 sps:$4 sm:$0xff]  }
 0x22f   : > { %7006 = vmatprep.mubr.bf16.mxu1 %v12316_v60 }
 0x230   : > { %6936 = vmatpush1.bf16.msra.mxu0 %v9385_v54  ;;  %v9460_v54 = vld [vmem:[%s12107_s23 + $0xb40] ss:$16 sps:$4 sm:$0xff]  }
 0x231   : > { %6977 = vmatpush1.bf16.msra.mxu1 %v9388_v55  ;;  %6937 = vmatprep.subr.bf16.mxu0 %v9393_v56  ;;  %v9465_v55 = vld [vmem:[%s12107_s23 + $0x924] ss:$16 sps:$4 sm:$0xff]  }
 0x232   : > { %6978 = vmatprep.subr.bf16.mxu1 %v9396_v57  ;;  %v9468_v56 = vld [vmem:[%s12107_s23 + $0xb24] ss:$16 sps:$4 sm:$0xff]   ;;  %v12370_v57 = vrot.slane %v2709_v51, %v12157_v2  ;;  %v9526_v51 = vld [vmem:[%s12107_s23 + $0xfe0] ss:$16 sps:$4 sm:$0xff]  }
 0x234   : > { %6938 = vmatpush1.bf16.msra.mxu0 %v9391_v61  ;;  %v9463_v61 = vld [vmem:[%s12107_s23 + $0x920] ss:$16 sps:$4 sm:$0xff]  }
 0x235   : > { %6979 = vmatpush1.bf16.msra.mxu1 %v9394_v62  ;;  %6939 = vmatprep.subr.bf16.mxu0 %v9399_v63  ;;  %v9471_v62 = vld [vmem:[%s12107_s23 + $0x904] ss:$16 sps:$4 sm:$0xff]  }
 0x236   : > { %6980 = vmatprep.subr.bf16.mxu1 %v9402_v0  ;;  %v9474_v63 = vld [vmem:[%s12107_s23 + $0xb04] ss:$16 sps:$4 sm:$0xff]   ;;  %v2725_v0 = vcombine.high %v12370_v57, %v12370_v57 }
 0x238   : > { %6940 = vmatpush1.bf16.msra.mxu0 %v9397_v1  ;;  %v9469_v1 = vld [vmem:[%s12107_s23 + $0x900] ss:$16 sps:$4 sm:$0xff]  }
 0x239   : > { %6981 = vmatpush1.bf16.msra.mxu1 %v9400_v3  ;;  %6941 = vmatprep.subr.bf16.mxu0 %v9405_v4  ;;  %v12381_v3 = vrot.slane %v12300_v52, %v12157_v2  ;;  %v9472_v4 = vld [vmem:[%s12107_s23 + $0xb00] ss:$16 sps:$4 sm:$0xff]  }
 0x23a   : > { %6982 = vmatprep.subr.bf16.mxu1 %v9408_v5  ;;  %v9477_v5 = vld [vmem:[%s12107_s23 + $0xce4] ss:$16 sps:$4 sm:$0xff]   ;;  %v9475_v52 = vld [vmem:[%s12107_s23 + $0xce0] ss:$16 sps:$4 sm:$0xff]  }
 0x23c   : > { %6942 = vmatpush1.bf16.msra.mxu0 %v9403_v6  ;;  %v9480_v6 = vld [vmem:[%s12107_s23 + $0xee4] ss:$16 sps:$4 sm:$0xff]  }
 0x23d   : > { %6983 = vmatpush1.bf16.msra.mxu1 %v9406_v7  ;;  %6943 = vmatprep.subr.bf16.mxu0 %v9411_v8  ;;  %v12387_v7 = vrot.slane %v2725_v0, %v12157_v2  ;;  %v12391_v8 = vcombine.high %v12381_v3, %v12381_v3  ;;  %v9543_v0 = vld [vmem:[%s12107_s23 + $0xd84] ss:$16 sps:$4 sm:$0xff]  }
 0x23e   : > { %6984 = vmatprep.subr.bf16.mxu1 %v9414_v9  ;;  %v9478_v9 = vld [vmem:[%s12107_s23 + $0xee0] ss:$16 sps:$4 sm:$0xff]  }
 0x240   : > { %6944 = vmatpush1.bf16.msra.mxu0 %v9409_v10  ;;  %v9483_v10 = vld [vmem:[%s12107_s23 + $0xcc4] ss:$16 sps:$4 sm:$0xff]  }
 0x241   : > { %6985 = vmatpush1.bf16.msra.mxu1 %v9412_v11  ;;  %6945 = vmatprep.subr.bf16.mxu0 %v9417_v12  ;;  %v9486_v11 = vld [vmem:[%s12107_s23 + $0xec4] ss:$16 sps:$4 sm:$0xff]   ;;  %v12399_v12 = vcombine.high %v12387_v7, %v12387_v7 }
 0x242   : > { %6986 = vmatprep.subr.bf16.mxu1 %v9420_v14  ;;  %v9481_v14 = vld [vmem:[%s12107_s23 + $0xcc0] ss:$16 sps:$4 sm:$0xff]  }
 0x244   : > { %6946 = vmatpush1.bf16.msra.mxu0 %v9415_v15  ;;  %v9484_v15 = vld [vmem:[%s12107_s23 + $0xec0] ss:$16 sps:$4 sm:$0xff]  }
 0x245   : > { %6987 = vmatpush1.bf16.msra.mxu1 %v9418_v16  ;;  %6947 = vmatprep.subr.bf16.mxu0 %v9423_v18  ;;  %v9489_v16 = vld [vmem:[%s12107_s23 + $0xca4] ss:$16 sps:$4 sm:$0xff]  }
 0x246   : > { %6988 = vmatprep.subr.bf16.mxu1 %v9426_v19  ;;  %v9492_v18 = vld [vmem:[%s12107_s23 + $0xea4] ss:$16 sps:$4 sm:$0xff]   ;;  %v9487_v19 = vld [vmem:[%s12107_s23 + $0xca0] ss:$16 sps:$4 sm:$0xff]  }
 0x248   : > { %6948 = vmatpush1.bf16.msra.mxu0 %v9421_v20  ;;  %v9490_v20 = vld [vmem:[%s12107_s23 + $0xea0] ss:$16 sps:$4 sm:$0xff]  }
 0x249   : > { %6989 = vmatpush1.bf16.msra.mxu1 %v9424_v21  ;;  %6949 = vmatprep.subr.bf16.mxu0 %v9429_v22  ;;  %v9495_v21 = vld [vmem:[%s12107_s23 + $0xc84] ss:$16 sps:$4 sm:$0xff]  }
 0x24a   : > { %6990 = vmatprep.subr.bf16.mxu1 %v9432_v24  ;;  %v9498_v22 = vld [vmem:[%s12107_s23 + $0xe84] ss:$16 sps:$4 sm:$0xff]   ;;  %v9493_v24 = vld [vmem:[%s12107_s23 + $0xc80] ss:$16 sps:$4 sm:$0xff]  }
 0x24c   : > { %6950 = vmatpush2.bf16.msra.mxu0 %v9427_v25  ;;  %v9496_v25 = vld [vmem:[%s12107_s23 + $0xe80] ss:$16 sps:$4 sm:$0xff]  }
 0x24d   : > { %6991 = vmatpush2.bf16.msra.mxu1 %v9430_v26  ;;  %6951 = vmatprep.subr.bf16.mxu0 %v9435_v27  ;;  %v9501_v26 = vld [vmem:[%s12107_s23 + $0xc64] ss:$16 sps:$4 sm:$0xff]  }
 0x24e   : > { %6992 = vmatprep.subr.bf16.mxu1 %v9438_v28  ;;  %v9504_v27 = vld [vmem:[%s12107_s23 + $0xe64] ss:$16 sps:$4 sm:$0xff]   ;;  %v9499_v28 = vld [vmem:[%s12107_s23 + $0xc60] ss:$16 sps:$4 sm:$0xff]  }
 0x250   : > { %6952 = vmatpush2.bf16.msra.mxu0 %v9433_v29  ;;  %v9502_v29 = vld [vmem:[%s12107_s23 + $0xe60] ss:$16 sps:$4 sm:$0xff]  }
 0x251   : > { %6993 = vmatpush2.bf16.msra.mxu1 %v9436_v31  ;;  %6953 = vmatprep.subr.bf16.mxu0 %v9441_v32  ;;  %v9507_v31 = vld [vmem:[%s12107_s23 + $0xc44] ss:$16 sps:$4 sm:$0xff]  }
 0x252   : > { %6994 = vmatprep.subr.bf16.mxu1 %v9444_v33  ;;  %v9510_v32 = vld [vmem:[%s12107_s23 + $0xe44] ss:$16 sps:$4 sm:$0xff]   ;;  %v9505_v33 = vld [vmem:[%s12107_s23 + $0xc40] ss:$16 sps:$4 sm:$0xff]  }
 0x254   : > { %6954 = vmatpush2.bf16.msra.mxu0 %v9439_v36  ;;  %v9508_v36 = vld [vmem:[%s12107_s23 + $0xe40] ss:$16 sps:$4 sm:$0xff]  }
 0x255   : > { %6995 = vmatpush2.bf16.msra.mxu1 %v9442_v37  ;;  %6955 = vmatprep.subr.bf16.mxu0 %v9447_v38  ;;  %v9513_v37 = vld [vmem:[%s12107_s23 + $0xc24] ss:$16 sps:$4 sm:$0xff]  }
 0x256   : > { %6996 = vmatprep.subr.bf16.mxu1 %v9450_v39  ;;  %v9516_v38 = vld [vmem:[%s12107_s23 + $0xe24] ss:$16 sps:$4 sm:$0xff]   ;;  %v9511_v39 = vld [vmem:[%s12107_s23 + $0xc20] ss:$16 sps:$4 sm:$0xff]  }
 0x258   : > { %6956 = vmatpush2.bf16.msra.mxu0 %v9445_v41  ;;  %v9514_v41 = vld [vmem:[%s12107_s23 + $0xe20] ss:$16 sps:$4 sm:$0xff]  }
 0x259   : > { %6997 = vmatpush2.bf16.msra.mxu1 %v9448_v42  ;;  %6957 = vmatprep.subr.bf16.mxu0 %v9453_v44  ;;  %v9519_v42 = vld [vmem:[%s12107_s23 + $0xc04] ss:$16 sps:$4 sm:$0xff]  }
 0x25a   : > { %6998 = vmatprep.subr.bf16.mxu1 %v9456_v45  ;;  %v9522_v44 = vld [vmem:[%s12107_s23 + $0xe04] ss:$16 sps:$4 sm:$0xff]   ;;  %v9517_v45 = vld [vmem:[%s12107_s23 + $0xc00] ss:$16 sps:$4 sm:$0xff]  }
 0x25c   : > { %6958 = vmatpush2.bf16.msra.mxu0 %v9451_v46  ;;  %v9520_v46 = vld [vmem:[%s12107_s23 + $0xe00] ss:$16 sps:$4 sm:$0xff]  }
 0x25d   : > { %6999 = vmatpush2.bf16.msra.mxu1 %v9454_v48  ;;  %6959 = vmatprep.subr.bf16.mxu0 %v9459_v23  ;;  %v9525_v48 = vld [vmem:[%s12107_s23 + $0xde4] ss:$16 sps:$4 sm:$0xff]  }
 0x25e   : > { %7000 = vmatprep.subr.bf16.mxu1 %v9462_v50  ;;  %v9528_v23 = vld [vmem:[%s12107_s23 + $0xfe4] ss:$16 sps:$4 sm:$0xff]   ;;  %v9523_v50 = vld [vmem:[%s12107_s23 + $0xde0] ss:$16 sps:$4 sm:$0xff]  }
 0x260   : > { %6960 = vmatpush2.bf16.msra.mxu0 %v9457_v53  ;;  %v9531_v53 = vld [vmem:[%s12107_s23 + $0xdc4] ss:$16 sps:$4 sm:$0xff]  }
 0x261   : > { %7001 = vmatpush2.bf16.msra.mxu1 %v9460_v54  ;;  %6961 = vmatprep.subr.bf16.mxu0 %v9465_v55  ;;  %v9534_v54 = vld [vmem:[%s12107_s23 + $0xfc4] ss:$16 sps:$4 sm:$0xff]   ;;  %v9529_v55 = vld [vmem:[%s12107_s23 + $0xdc0] ss:$16 sps:$4 sm:$0xff]  }
 0x262   : > { %7002 = vmatprep.subr.bf16.mxu1 %v9468_v56  ;;  %v9532_v56 = vld [vmem:[%s12107_s23 + $0xfc0] ss:$16 sps:$4 sm:$0xff]  }
 0x264   : > { %6962 = vmatpush2.bf16.msra.mxu0 %v9463_v61  ;;  %v9537_v61 = vld [vmem:[%s12107_s23 + $0xda4] ss:$16 sps:$4 sm:$0xff]  }
 0x265   : > { %7003 = vmatpush2.bf16.msra.mxu1 %v9466_v49  ;;  %6963 = vmatprep.subr.bf16.mxu0 %v9471_v62  ;;  %v9540_v49 = vld [vmem:[%s12107_s23 + $0xfa4] ss:$16 sps:$4 sm:$0xff]   ;;  %v9535_v62 = vld [vmem:[%s12107_s23 + $0xda0] ss:$16 sps:$4 sm:$0xff]  }
 0x266   : > { %7004 = vmatprep.subr.bf16.mxu1 %v9474_v63  ;;  %v9538_v63 = vld [vmem:[%s12107_s23 + $0xfa0] ss:$16 sps:$4 sm:$0xff]  }
 0x268   : > { %6964 = vmatpush2.bf16.msra.mxu0 %v9469_v1  ;;  %v9546_v1 = vld [vmem:[%s12107_s23 + $0xf84] ss:$16 sps:$4 sm:$0xff]  }
 0x269   : > { %7005 = vmatpush2.bf16.msra.mxu1 %v9472_v4  ;;  %7015 = vmatprep.subr.bf16.mxu0 %v9477_v5  ;;  %v9541_v4 = vld [vmem:[%s12107_s23 + $0xd80] ss:$16 sps:$4 sm:$0xff]  }
 0x26a   : > { %7056 = vmatprep.subr.bf16.mxu1 %v9480_v6  ;;  %v9544_v5 = vld [vmem:[%s12107_s23 + $0xf80] ss:$16 sps:$4 sm:$0xff]   ;;  %v9549_v6 = vld [vmem:[%s12107_s23 + $0xd64] ss:$16 sps:$4 sm:$0xff]  }
 0x26b   : > { %6966 = vmatmul.mubr.bf16.vlgmr.msra.gmra.mxu0 %v12381_v3 }
 0x26c   : > { %7007 = vmatmul.mubr.bf16.vlgmr.msra.gmra.mxu1 %v12391_v8  ;;  %7016 = vmatpush1.bf16.msra.mxu0 %v9475_v52  ;;  %v9552_v52 = vld [vmem:[%s12107_s23 + $0xf64] ss:$16 sps:$4 sm:$0xff]  }
 0x26d   : > { %7057 = vmatpush1.bf16.msra.mxu1 %v9478_v9  ;;  %7017 = vmatprep.subr.bf16.mxu0 %v9483_v10  ;;  %v9547_v9 = vld [vmem:[%s12107_s23 + $0xd60] ss:$16 sps:$4 sm:$0xff]  }
 0x26e   : > { %7058 = vmatprep.subr.bf16.mxu1 %v9486_v11  ;;  %7047 = vmatprep.mubr.bf16.mxu0 %v12387_v7  ;;  %v9550_v10 = vld [vmem:[%s12107_s23 + $0xf60] ss:$16 sps:$4 sm:$0xff]   ;;  %v9555_v11 = vld [vmem:[%s12107_s23 + $0xd44] ss:$16 sps:$4 sm:$0xff]  }
 0x26f   : > { %7088 = vmatprep.mubr.bf16.mxu1 %v12399_v12 }
 0x270   : > { %7018 = vmatpush1.bf16.msra.mxu0 %v9481_v14  ;;  %v9558_v14 = vld [vmem:[%s12107_s23 + $0xf44] ss:$16 sps:$4 sm:$0xff]  }
 0x271   : > { %7059 = vmatpush1.bf16.msra.mxu1 %v9484_v15  ;;  %7019 = vmatprep.subr.bf16.mxu0 %v9489_v16  ;;  %v9553_v15 = vld [vmem:[%s12107_s23 + $0xd40] ss:$16 sps:$4 sm:$0xff]  }
 0x272   : > { %7060 = vmatprep.subr.bf16.mxu1 %v9492_v18  ;;  %v9556_v16 = vld [vmem:[%s12107_s23 + $0xf40] ss:$16 sps:$4 sm:$0xff]  }
 0x273   : > { %v12458_v18 = vld [vmem:[%s13205_s0 + $0x10] sm:$0xff] }
 0x274   : > { %7020 = vmatpush1.bf16.msra.mxu0 %v9487_v19  ;;  %v9561_v19 = vld [vmem:[%s12107_s23 + $0xd24] ss:$16 sps:$4 sm:$0xff]  }
 0x275   : > { %7061 = vmatpush1.bf16.msra.mxu1 %v9490_v20  ;;  %7021 = vmatprep.subr.bf16.mxu0 %v9495_v21  ;;  %v9564_v20 = vld [vmem:[%s12107_s23 + $0xf24] ss:$16 sps:$4 sm:$0xff]   ;;  %v12464_v21 = vrot.slane %v12458_v18, %v12157_v2 }
 0x276   : > { %7062 = vmatprep.subr.bf16.mxu1 %v9498_v22  ;;  %v9559_v22 = vld [vmem:[%s12107_s23 + $0xd20] ss:$16 sps:$4 sm:$0xff]  }
 0x278   : > { %7022 = vmatpush1.bf16.msra.mxu0 %v9493_v24  ;;  %v9562_v24 = vld [vmem:[%s12107_s23 + $0xf20] ss:$16 sps:$4 sm:$0xff]  }
 0x279   : > { %7063 = vmatpush1.bf16.msra.mxu1 %v9496_v25  ;;  %7023 = vmatprep.subr.bf16.mxu0 %v9501_v26  ;;  %v9567_v25 = vld [vmem:[%s12107_s23 + $0xd04] ss:$16 sps:$4 sm:$0xff]  }
 0x27a   : > { %7064 = vmatprep.subr.bf16.mxu1 %v9504_v27  ;;  %v9570_v26 = vld [vmem:[%s12107_s23 + $0xf04] ss:$16 sps:$4 sm:$0xff]   ;;  %v9565_v27 = vld [vmem:[%s12107_s23 + $0xd00] ss:$16 sps:$4 sm:$0xff]  }
 0x27c   : > { %7024 = vmatpush1.bf16.msra.mxu0 %v9499_v28  ;;  %v2773_v28 = vcombine.high %v12464_v21, %v12464_v21 }
 0x27d   : > { %7065 = vmatpush1.bf16.msra.mxu1 %v9502_v29  ;;  %7025 = vmatprep.subr.bf16.mxu0 %v9507_v31  ;;  %v9568_v29 = vld [vmem:[%s12107_s23 + $0xf00] ss:$16 sps:$4 sm:$0xff]  }
 0x27e   : > { %7066 = vmatprep.subr.bf16.mxu1 %v9510_v32  ;;  %v2634_v31 = vld [vmem:[%s12100_s14] sm:$0xf]  ;;  %v12477_v32 = vrot.slane %v12370_v57, %v12157_v2 }
 0x27f   : > { %v9572_v57 = vld [vmem:[%s12107_s23 + $0x10e0] ss:$16 sps:$4 sm:$0xff]  }
 0x280   : > { %7026 = vmatpush1.bf16.msra.mxu0 %v9505_v33  ;;  %v2638_v33 = vsub.s32 0, %v12149_v59 }
 0x281   : > { %7067 = vmatpush1.bf16.msra.mxu1 %v9508_v36  ;;  %7027 = vmatprep.subr.bf16.mxu0 %v9513_v37  ;;  %v9574_v36 = vld [vmem:[%s12107_s23 + $0x10e4] ss:$16 sps:$4 sm:$0xff]  }
 0x282   : > { %7068 = vmatprep.subr.bf16.mxu1 %v9516_v38  ;;  %v9577_v37 = vld [vmem:[%s12107_s23 + $0x12e4] ss:$16 sps:$4 sm:$0xff]   ;;  %v2642_v38 = vsub.s32 1, %v12149_v59 }
 0x284   : > { %7028 = vmatpush1.bf16.msra.mxu0 %v9511_v39  ;;  %v12484_v39 = vrot.slane %v2773_v28, %v12157_v2  ;;  %v9605_v28 = vld [vmem:[%s12107_s23 + $0x1240] ss:$16 sps:$4 sm:$0xff]  }
 0x285   : > { %7069 = vmatpush1.bf16.msra.mxu1 %v9514_v41  ;;  %7029 = vmatprep.subr.bf16.mxu0 %v9519_v42  ;;  %v12488_v41 = vcombine.high %v12477_v32, %v12477_v32  ;;  %v9575_v42 = vld [vmem:[%s12107_s23 + $0x12e0] ss:$16 sps:$4 sm:$0xff]  }
 0x286   : > { %7070 = vmatprep.subr.bf16.mxu1 %v9522_v44  ;;  %v2639_v44 = vrot.slane %v2634_v31, %v2638_v33  ;;  %v9608_v33 = vld [vmem:[%s12107_s23 + $0x1020] ss:$16 sps:$4 sm:$0xff]  }
 0x288   : > { %7030 = vmatpush1.bf16.msra.mxu0 %v9517_v45  ;;  %v9580_v45 = vld [vmem:[%s12107_s23 + $0x10c4] ss:$16 sps:$4 sm:$0xff]  }
 0x289   : > { %7071 = vmatpush1.bf16.msra.mxu1 %v9520_v46  ;;  %7031 = vmatprep.subr.bf16.mxu0 %v9525_v48  ;;  %v9583_v46 = vld [vmem:[%s12107_s23 + $0x12c4] ss:$16 sps:$4 sm:$0xff]   ;;  %v2643_v48 = vrot.slane %v2634_v31, %v2642_v38 }
 0x28a   : > { %7072 = vmatprep.subr.bf16.mxu1 %v9528_v23  ;;  %v12496_v23 = vcombine.high %v12484_v39, %v12484_v39  ;;  %v9613_v31 = vld [vmem:[%s12107_s23 + $0x1224] ss:$16 sps:$4 sm:$0xff]  }
 0x28b   : > { %v9619_v38 = vld [vmem:[%s12107_s23 + $0x1204] ss:$16 sps:$4 sm:$0xff]  }
 0x28c   : > { %7032 = vmatpush2.bf16.msra.mxu0 %v9523_v50 }
 0x28d   : > { %7073 = vmatpush2.bf16.msra.mxu1 %v9526_v51  ;;  %7033 = vmatprep.subr.bf16.mxu0 %v9531_v53  ;;  %v9578_v53 = vld [vmem:[%s12107_s23 + $0x10c0] ss:$16 sps:$4 sm:$0xff]  }
 0x28e   : > { %7074 = vmatprep.subr.bf16.mxu1 %v9534_v54  ;;  %v9581_v54 = vld [vmem:[%s12107_s23 + $0x12c0] ss:$16 sps:$4 sm:$0xff]  }
 0x290   : > { %7034 = vmatpush2.bf16.msra.mxu0 %v9529_v55 }
 0x291   : > { %7075 = vmatpush2.bf16.msra.mxu1 %v9532_v56  ;;  %7035 = vmatprep.subr.bf16.mxu0 %v9537_v61 }
 0x292   : > { %7076 = vmatprep.subr.bf16.mxu1 %v9540_v49  ;;  %v9586_v49 = vld [vmem:[%s12107_s23 + $0x10a4] ss:$16 sps:$4 sm:$0xff]  }
 0x294   : > { %7036 = vmatpush2.bf16.msra.mxu0 %v9535_v62  ;;  %v9589_v62 = vld [vmem:[%s12107_s23 + $0x12a4] ss:$16 sps:$4 sm:$0xff]  }
 0x295   : > { %7077 = vmatpush2.bf16.msra.mxu1 %v9538_v63  ;;  %7037 = vmatprep.subr.bf16.mxu0 %v9543_v0 }
 0x296   : > { %7078 = vmatprep.subr.bf16.mxu1 %v9546_v1  ;;  %v9584_v1 = vld [vmem:[%s12107_s23 + $0x10a0] ss:$16 sps:$4 sm:$0xff]  }
 0x298   : > { %7038 = vmatpush2.bf16.msra.mxu0 %v9541_v4  ;;  %v9587_v4 = vld [vmem:[%s12107_s23 + $0x12a0] ss:$16 sps:$4 sm:$0xff]  }
 0x299   : > { %7079 = vmatpush2.bf16.msra.mxu1 %v9544_v5  ;;  %7039 = vmatprep.subr.bf16.mxu0 %v9549_v6 }
 0x29a   : > { %7080 = vmatprep.subr.bf16.mxu1 %v9552_v52 }
 0x29c   : > { %7040 = vmatpush2.bf16.msra.mxu0 %v9547_v9 }
 0x29d   : > { %7081 = vmatpush2.bf16.msra.mxu1 %v9550_v10  ;;  %7041 = vmatprep.subr.bf16.mxu0 %v9555_v11  ;;  %v9592_v11 = vld [vmem:[%s12107_s23 + $0x1084] ss:$16 sps:$4 sm:$0xff]  }
 0x29e   : > { %7082 = vmatprep.subr.bf16.mxu1 %v9558_v14  ;;  %v9595_v14 = vld [vmem:[%s12107_s23 + $0x1284] ss:$16 sps:$4 sm:$0xff]  }
 0x2a0   : > { %7042 = vmatpush2.bf16.msra.mxu0 %v9553_v15  ;;  %v9590_v15 = vld [vmem:[%s12107_s23 + $0x1080] ss:$16 sps:$4 sm:$0xff]  }
 0x2a1   : > { %7083 = vmatpush2.bf16.msra.mxu1 %v9556_v16  ;;  %7043 = vmatprep.subr.bf16.mxu0 %v9561_v19  ;;  %v9593_v16 = vld [vmem:[%s12107_s23 + $0x1280] ss:$16 sps:$4 sm:$0xff]   ;;  %v9598_v19 = vld [vmem:[%s12107_s23 + $0x1064] ss:$16 sps:$4 sm:$0xff]  }
 0x2a2   : > { %7084 = vmatprep.subr.bf16.mxu1 %v9564_v20  ;;  %v9601_v20 = vld [vmem:[%s12107_s23 + $0x1264] ss:$16 sps:$4 sm:$0xff]  }
 0x2a4   : > { %7044 = vmatpush2.bf16.msra.mxu0 %v9559_v22  ;;  %v9596_v22 = vld [vmem:[%s12107_s23 + $0x1060] ss:$16 sps:$4 sm:$0xff]  }
 0x2a5   : > { %7085 = vmatpush2.bf16.msra.mxu1 %v9562_v24  ;;  %7045 = vmatprep.subr.bf16.mxu0 %v9567_v25  ;;  %v9599_v24 = vld [vmem:[%s12107_s23 + $0x1260] ss:$16 sps:$4 sm:$0xff]   ;;  %v9604_v25 = vld [vmem:[%s12107_s23 + $0x1044] ss:$16 sps:$4 sm:$0xff]  }
 0x2a6   : > { %7086 = vmatprep.subr.bf16.mxu1 %v9570_v26  ;;  %v9607_v26 = vld [vmem:[%s12107_s23 + $0x1244] ss:$16 sps:$4 sm:$0xff]  }
 0x2a8   : > { %7046 = vmatpush2.bf16.msra.mxu0 %v9565_v27  ;;  %v9602_v27 = vld [vmem:[%s12107_s23 + $0x1040] ss:$16 sps:$4 sm:$0xff]  }
 0x2a9   : > { %7087 = vmatpush2.bf16.msra.mxu1 %v9568_v29  ;;  %7097 = vmatprep.subr.bf16.mxu0 %v9574_v36  ;;  %v9610_v29 = vld [vmem:[%s12107_s23 + $0x1024] ss:$16 sps:$4 sm:$0xff]   ;;  %v9611_v36 = vld [vmem:[%s12107_s23 + $0x1220] ss:$16 sps:$4 sm:$0xff]  }
 0x2aa   : > { %7138 = vmatprep.subr.bf16.mxu1 %v9577_v37  ;;  %v9616_v37 = vld [vmem:[%s12107_s23 + $0x1004] ss:$16 sps:$4 sm:$0xff]  }
 0x2ab   : > { %v6803_v50 = vpop.f32.mrf.mxu0  ;;  %7048 = vmatmul.mubr.bf16.vlgmr.msra.gmra.mxu0 %v12477_v32 }
 0x2ac   : > { %v6844_v51 = vpop.f32.mrf.mxu1  ;;  %7089 = vmatmul.mubr.bf16.vlgmr.msra.gmra.mxu1 %v12488_v41  ;;  %v6804_v55 = vadd.f32 %v6803_v50, %v2639_v44  ;;  %7098 = vmatpush1.bf16.msra.mxu0 %v9572_v57  ;;  %v9614_v57 = vld [vmem:[%s12107_s23 + $0x1000] ss:$16 sps:$4 sm:$0xff]   ;;  %v9622_v44 = vld [vmem:[%s12107_s23 + $0x11e4] ss:$16 sps:$4 sm:$0xff]  }
 0x2ad   : > { %7139 = vmatpush1.bf16.msra.mxu1 %v9575_v42  ;;  %v6805_v56 = vpop.f32.mrf.mxu0  ;;  %7099 = vmatprep.subr.bf16.mxu0 %v9580_v45  ;;  %v9617_v42 = vld [vmem:[%s12107_s23 + $0x1200] ss:$16 sps:$4 sm:$0xff]   ;;  %v9625_v45 = vld [vmem:[%s12107_s23 + $0x13e4] ss:$16 sps:$4 sm:$0xff]  }
 0x2ae   : > { %v6846_v61 = vpop.f32.mrf.mxu1  ;;  %7140 = vmatprep.subr.bf16.mxu1 %v9583_v46  ;;  %v12504_v63 = vadd.f32 %v6844_v51, %v6804_v55  ;;  %v6806_v0 = vadd.f32 %v6805_v56, %v2643_v48  ;;  %7129 = vmatprep.mubr.bf16.mxu0 %v12484_v39  ;;  %v9620_v46 = vld [vmem:[%s12107_s23 + $0x11e0] ss:$16 sps:$4 sm:$0xff]   ;;  %v9628_v50 = vld [vmem:[%s12107_s23 + $0x11c4] ss:$16 sps:$4 sm:$0xff]  }
 0x2af   : > { %7170 = vmatprep.mubr.bf16.mxu1 %v12496_v23  ;;  %v6807_v5 = vpop.f32.mrf.mxu0  ;;  %v9623_v48 = vld [vmem:[%s12107_s23 + $0x13e0] ss:$16 sps:$4 sm:$0xff]   ;;  %v9631_v51 = vld [vmem:[%s12107_s23 + $0x13c4] ss:$16 sps:$4 sm:$0xff]  }
 0x2b0   : > { %v6848_v6 = vpop.f32.mrf.mxu1  ;;  %v12510_v52 = vadd.f32 %v6846_v61, %v6806_v0  ;;  %7100 = vmatpush1.bf16.msra.mxu0 %v9578_v53  ;;  %v9626_v53 = vld [vmem:[%s12107_s23 + $0x11c0] ss:$16 sps:$4 sm:$0xff]   ;;  %v9634_v55 = vld [vmem:[%s12107_s23 + $0x11a4] ss:$16 sps:$4 sm:$0xff]  }
 0x2b1   : > { %7141 = vmatpush1.bf16.msra.mxu1 %v9581_v54  ;;  %v6808_v9 = vpop.f32.mrf.mxu0  ;;  %7101 = vmatprep.subr.bf16.mxu0 %v9586_v49  ;;  %v9629_v54 = vld [vmem:[%s12107_s23 + $0x13c0] ss:$16 sps:$4 sm:$0xff]   ;;  %v9637_v56 = vld [vmem:[%s12107_s23 + $0x13a4] ss:$16 sps:$4 sm:$0xff]  }
 0x2b2   : > { %v6849_v10 = vpop.f32.mrf.mxu1  ;;  %7142 = vmatprep.subr.bf16.mxu1 %v9589_v62  ;;  %v9632_v61 = vld [vmem:[%s12107_s23 + $0x11a0] ss:$16 sps:$4 sm:$0xff]   ;;  %v9640_v62 = vld [vmem:[%s12107_s23 + $0x1184] ss:$16 sps:$4 sm:$0xff]  }
 0x2b3   : > { %v9635_v49 = vld [vmem:[%s12107_s23 + $0x13a0] ss:$16 sps:$4 sm:$0xff]   ;;  %v9643_v0 = vld [vmem:[%s12107_s23 + $0x1384] ss:$16 sps:$4 sm:$0xff]  }
 0x2b4   : > { %7102 = vmatpush1.bf16.msra.mxu0 %v9584_v1  ;;  %v9638_v1 = vld [vmem:[%s12107_s23 + $0x1180] ss:$16 sps:$4 sm:$0xff]   ;;  %v9646_v5 = vld [vmem:[%s12107_s23 + $0x1164] ss:$16 sps:$4 sm:$0xff]  }
 0x2b5   : > { %7143 = vmatpush1.bf16.msra.mxu1 %v9587_v4  ;;  %7103 = vmatprep.subr.bf16.mxu0 %v9592_v11  ;;  %v9641_v4 = vld [vmem:[%s12107_s23 + $0x1380] ss:$16 sps:$4 sm:$0xff]   ;;  %v9649_v6 = vld [vmem:[%s12107_s23 + $0x1364] ss:$16 sps:$4 sm:$0xff]  }
 0x2b6   : > { %7144 = vmatprep.subr.bf16.mxu1 %v9595_v14  ;;  %v9644_v9 = vld [vmem:[%s12107_s23 + $0x1160] ss:$16 sps:$4 sm:$0xff]   ;;  %v9652_v11 = vld [vmem:[%s12107_s23 + $0x1144] ss:$16 sps:$4 sm:$0xff]  }
 0x2b7   : > { %v9647_v10 = vld [vmem:[%s12107_s23 + $0x1360] ss:$16 sps:$4 sm:$0xff]   ;;  %v9655_v14 = vld [vmem:[%s12107_s23 + $0x1344] ss:$16 sps:$4 sm:$0xff]  }
 0x2b8   : > { %7104 = vmatpush1.bf16.msra.mxu0 %v9590_v15  ;;  %v2758_v15 = vcombine.high %v12458_v18, %v12458_v18  ;;  %v9656_v18 = vld [vmem:[%s12107_s23 + $0x1120] ss:$16 sps:$4 sm:$0xff]  }
 0x2b9   : > { %7145 = vmatpush1.bf16.msra.mxu1 %v9593_v16  ;;  %7105 = vmatprep.subr.bf16.mxu0 %v9598_v19  ;;  %v9650_v16 = vld [vmem:[%s12107_s23 + $0x1140] ss:$16 sps:$4 sm:$0xff]  }
 0x2ba   : > { %7146 = vmatprep.subr.bf16.mxu1 %v9601_v20  ;;  %v9653_v19 = vld [vmem:[%s12107_s23 + $0x1340] ss:$16 sps:$4 sm:$0xff]   ;;  %v9658_v20 = vld [vmem:[%s12107_s23 + $0x1124] ss:$16 sps:$4 sm:$0xff]  }
 0x2bc   : > { %7106 = vmatpush1.bf16.msra.mxu0 %v9596_v22  ;;  %v9661_v22 = vld [vmem:[%s12107_s23 + $0x1324] ss:$16 sps:$4 sm:$0xff]  }
 0x2bd   : > { %7147 = vmatpush1.bf16.msra.mxu1 %v9599_v24  ;;  %7107 = vmatprep.subr.bf16.mxu0 %v9604_v25  ;;  %v12561_v24 = vrot.slane %v2758_v15, %v12157_v2  ;;  %v9659_v25 = vld [vmem:[%s12107_s23 + $0x1320] ss:$16 sps:$4 sm:$0xff]  }
 0x2be   : > { %7148 = vmatprep.subr.bf16.mxu1 %v9607_v26  ;;  %v9664_v26 = vld [vmem:[%s12107_s23 + $0x1104] ss:$16 sps:$4 sm:$0xff]   ;;  %v9689_v15 = vld [vmem:[%s12107_s23 + $0x1680] ss:$16 sps:$4 sm:$0xff]  }
 0x2c0   : > { %7108 = vmatpush1.bf16.msra.mxu0 %v9602_v27  ;;  %v9667_v27 = vld [vmem:[%s12107_s23 + $0x1304] ss:$16 sps:$4 sm:$0xff]  }
 0x2c1   : > { %7149 = vmatpush1.bf16.msra.mxu1 %v9605_v28  ;;  %7109 = vmatprep.subr.bf16.mxu0 %v9610_v29  ;;  %v2774_v28 = vcombine.high %v12561_v24, %v12561_v24  ;;  %v12571_v29 = vrot.slane %v12464_v21, %v12157_v2 }
 0x2c2   : > { %7150 = vmatprep.subr.bf16.mxu1 %v9613_v31  ;;  %v9662_v31 = vld [vmem:[%s12107_s23 + $0x1100] ss:$16 sps:$4 sm:$0xff]  }
 0x2c3   : > { %v12584_v21 = vcombine.high %v12571_v29, %v12571_v29 }
 0x2c4   : > { %7110 = vmatpush1.bf16.msra.mxu0 %v9608_v33  ;;  %v9665_v33 = vld [vmem:[%s12107_s23 + $0x1300] ss:$16 sps:$4 sm:$0xff]  }
 0x2c5   : > { %7151 = vmatpush1.bf16.msra.mxu1 %v9611_v36  ;;  %7111 = vmatprep.subr.bf16.mxu0 %v9616_v37  ;;  %v9670_v36 = vld [vmem:[%s12107_s23 + $0x14e4] ss:$16 sps:$4 sm:$0xff]  }
 0x2c6   : > { %7152 = vmatprep.subr.bf16.mxu1 %v9619_v38  ;;  %v9673_v37 = vld [vmem:[%s12107_s23 + $0x16e4] ss:$16 sps:$4 sm:$0xff]   ;;  %v9668_v38 = vld [vmem:[%s12107_s23 + $0x14e0] ss:$16 sps:$4 sm:$0xff]  }
 0x2c8   : > { %7112 = vmatpush1.bf16.msra.mxu0 %v9614_v57  ;;  %v9671_v57 = vld [vmem:[%s12107_s23 + $0x16e0] ss:$16 sps:$4 sm:$0xff]  }
 0x2c9   : > { %7153 = vmatpush1.bf16.msra.mxu1 %v9617_v42  ;;  %7113 = vmatprep.subr.bf16.mxu0 %v9622_v44  ;;  %v12580_v42 = vrot.slane %v2774_v28, %v12157_v2  ;;  %v9676_v44 = vld [vmem:[%s12107_s23 + $0x14c4] ss:$16 sps:$4 sm:$0xff]  }
 0x2ca   : > { %7154 = vmatprep.subr.bf16.mxu1 %v9625_v45  ;;  %v9679_v45 = vld [vmem:[%s12107_s23 + $0x16c4] ss:$16 sps:$4 sm:$0xff]  }
 0x2cb   : > { %v9706_v28 = vld [vmem:[%s12107_s23 + $0x1424] ss:$16 sps:$4 sm:$0xff]  }
 0x2cc   : > { %7114 = vmatpush2.bf16.msra.mxu0 %v9620_v46  ;;  %v9674_v46 = vld [vmem:[%s12107_s23 + $0x14c0] ss:$16 sps:$4 sm:$0xff]  }
 0x2cd   : > { %7155 = vmatpush2.bf16.msra.mxu1 %v9623_v48  ;;  %7115 = vmatprep.subr.bf16.mxu0 %v9628_v50  ;;  %v9677_v48 = vld [vmem:[%s12107_s23 + $0x16c0] ss:$16 sps:$4 sm:$0xff]   ;;  %v12592_v50 = vcombine.high %v12580_v42, %v12580_v42 }
 0x2ce   : > { %7156 = vmatprep.subr.bf16.mxu1 %v9631_v51 }
 0x2d0   : > { %7116 = vmatpush2.bf16.msra.mxu0 %v9626_v53 }
 0x2d1   : > { %7157 = vmatpush2.bf16.msra.mxu1 %v9629_v54  ;;  %7117 = vmatprep.subr.bf16.mxu0 %v9634_v55 }
 0x2d2   : > { %7158 = vmatprep.subr.bf16.mxu1 %v9637_v56 }
 0x2d4   : > { %7118 = vmatpush2.bf16.msra.mxu0 %v9632_v61  ;;  %v9682_v61 = vld [vmem:[%s12107_s23 + $0x14a4] ss:$16 sps:$4 sm:$0xff]  }
 0x2d5   : > { %7159 = vmatpush2.bf16.msra.mxu1 %v9635_v49  ;;  %7119 = vmatprep.subr.bf16.mxu0 %v9640_v62  ;;  %v9685_v49 = vld [vmem:[%s12107_s23 + $0x16a4] ss:$16 sps:$4 sm:$0xff]  }
 0x2d6   : > { %7160 = vmatprep.subr.bf16.mxu1 %v9643_v0 }
 0x2d8   : > { %7120 = vmatpush2.bf16.msra.mxu0 %v9638_v1  ;;  %v9680_v1 = vld [vmem:[%s12107_s23 + $0x14a0] ss:$16 sps:$4 sm:$0xff]  }
 0x2d9   : > { %7161 = vmatpush2.bf16.msra.mxu1 %v9641_v4  ;;  %7121 = vmatprep.subr.bf16.mxu0 %v9646_v5  ;;  %v9683_v4 = vld [vmem:[%s12107_s23 + $0x16a0] ss:$16 sps:$4 sm:$0xff]  }
 0x2da   : > { %7162 = vmatprep.subr.bf16.mxu1 %v9649_v6 }
 0x2dc   : > { %7122 = vmatpush2.bf16.msra.mxu0 %v9644_v9 }
 0x2dd   : > { %7163 = vmatpush2.bf16.msra.mxu1 %v9647_v10  ;;  %7123 = vmatprep.subr.bf16.mxu0 %v9652_v11  ;;  %v9688_v10 = vld [vmem:[%s12107_s23 + $0x1484] ss:$16 sps:$4 sm:$0xff]  }
 0x2de   : > { %7164 = vmatprep.subr.bf16.mxu1 %v9655_v14  ;;  %v9691_v11 = vld [vmem:[%s12107_s23 + $0x1684] ss:$16 sps:$4 sm:$0xff]   ;;  %v9686_v14 = vld [vmem:[%s12107_s23 + $0x1480] ss:$16 sps:$4 sm:$0xff]  }
 0x2e0   : > { %7124 = vmatpush2.bf16.msra.mxu0 %v9650_v16  ;;  %v9694_v16 = vld [vmem:[%s12107_s23 + $0x1464] ss:$16 sps:$4 sm:$0xff]  }
 0x2e1   : > { %7165 = vmatpush2.bf16.msra.mxu1 %v9653_v19  ;;  %7125 = vmatprep.subr.bf16.mxu0 %v9658_v20  ;;  %v9697_v19 = vld [vmem:[%s12107_s23 + $0x1664] ss:$16 sps:$4 sm:$0xff]   ;;  %v9692_v20 = vld [vmem:[%s12107_s23 + $0x1460] ss:$16 sps:$4 sm:$0xff]  }
 0x2e2   : > { %7166 = vmatprep.subr.bf16.mxu1 %v9661_v22  ;;  %v9695_v22 = vld [vmem:[%s12107_s23 + $0x1660] ss:$16 sps:$4 sm:$0xff]  }
 0x2e4   : > { %7126 = vmatpush2.bf16.msra.mxu0 %v9656_v18  ;;  %v9700_v18 = vld [vmem:[%s12107_s23 + $0x1444] ss:$16 sps:$4 sm:$0xff]  }
 0x2e5   : > { %7167 = vmatpush2.bf16.msra.mxu1 %v9659_v25  ;;  %7127 = vmatprep.subr.bf16.mxu0 %v9664_v26  ;;  %v9703_v25 = vld [vmem:[%s12107_s23 + $0x1644] ss:$16 sps:$4 sm:$0xff]   ;;  %v9698_v26 = vld [vmem:[%s12107_s23 + $0x1440] ss:$16 sps:$4 sm:$0xff]  }
 0x2e6   : > { %7168 = vmatprep.subr.bf16.mxu1 %v9667_v27  ;;  %v9701_v27 = vld [vmem:[%s12107_s23 + $0x1640] ss:$16 sps:$4 sm:$0xff]  }
 0x2e8   : > { %7128 = vmatpush2.bf16.msra.mxu0 %v9662_v31  ;;  %v9709_v31 = vld [vmem:[%s12107_s23 + $0x1624] ss:$16 sps:$4 sm:$0xff]  }
 0x2e9   : > { %7169 = vmatpush2.bf16.msra.mxu1 %v9665_v33  ;;  %7179 = vmatprep.subr.bf16.mxu0 %v9670_v36  ;;  %v9704_v33 = vld [vmem:[%s12107_s23 + $0x1420] ss:$16 sps:$4 sm:$0xff]  }
 0x2ea   : > { %7220 = vmatprep.subr.bf16.mxu1 %v9673_v37  ;;  %v9707_v36 = vld [vmem:[%s12107_s23 + $0x1620] ss:$16 sps:$4 sm:$0xff]   ;;  %v9712_v37 = vld [vmem:[%s12107_s23 + $0x1404] ss:$16 sps:$4 sm:$0xff]  }
 0x2eb   : > { %v6885_v51 = vpop.f32.mrf.mxu0  ;;  %7130 = vmatmul.mubr.bf16.vlgmr.msra.gmra.mxu0 %v12571_v29 }
 0x2ec   : > { %v6926_v53 = vpop.f32.mrf.mxu1  ;;  %7171 = vmatmul.mubr.bf16.vlgmr.msra.gmra.mxu1 %v12584_v21  ;;  %v6886_v54 = vadd.f32 %v6885_v51, %v12504_v63  ;;  %7180 = vmatpush1.bf16.msra.mxu0 %v9668_v38  ;;  %v9715_v38 = vld [vmem:[%s12107_s23 + $0x1604] ss:$16 sps:$4 sm:$0xff]   ;;  %v9719_v51 = vld [vmem:[%s12107_s23 + $0x17e0] ss:$16 sps:$4 sm:$0xff]  }
 0x2ed   : > { %7221 = vmatpush1.bf16.msra.mxu1 %v9671_v57  ;;  %v6887_v55 = vpop.f32.mrf.mxu0  ;;  %7181 = vmatprep.subr.bf16.mxu0 %v9676_v44  ;;  %v9710_v57 = vld [vmem:[%s12107_s23 + $0x1400] ss:$16 sps:$4 sm:$0xff]  }
 0x2ee   : > { %v6928_v56 = vpop.f32.mrf.mxu1  ;;  %7222 = vmatprep.subr.bf16.mxu1 %v9679_v45  ;;  %v12599_v62 = vadd.f32 %v6926_v53, %v6886_v54  ;;  %v6888_v0 = vadd.f32 %v6887_v55, %v12510_v52  ;;  %7211 = vmatprep.mubr.bf16.mxu0 %v12580_v42  ;;  %v9713_v44 = vld [vmem:[%s12107_s23 + $0x1600] ss:$16 sps:$4 sm:$0xff]   ;;  %v9718_v45 = vld [vmem:[%s12107_s23 + $0x15e4] ss:$16 sps:$4 sm:$0xff]  }
 0x2ef   : > { %7252 = vmatprep.mubr.bf16.mxu1 %v12592_v50  ;;  %v6889_v63 = vpop.f32.mrf.mxu0  ;;  %v9724_v53 = vld [vmem:[%s12107_s23 + $0x15c4] ss:$16 sps:$4 sm:$0xff]   ;;  %v9722_v55 = vld [vmem:[%s12107_s23 + $0x15c0] ss:$16 sps:$4 sm:$0xff]  }
 0x2f0   : > { %v6930_v5 = vpop.f32.mrf.mxu1  ;;  %v12606_v6 = vadd.f32 %v6928_v56, %v6888_v0  ;;  %7182 = vmatpush1.bf16.msra.mxu0 %v9674_v46  ;;  %v9721_v46 = vld [vmem:[%s12107_s23 + $0x17e4] ss:$16 sps:$4 sm:$0xff]   ;;  %v9725_v56 = vld [vmem:[%s12107_s23 + $0x17c0] ss:$16 sps:$4 sm:$0xff]  }
 0x2f1   : > { %7223 = vmatpush1.bf16.msra.mxu1 %v9677_v48  ;;  %v6890_v9 = vpop.f32.mrf.mxu0  ;;  %7183 = vmatprep.subr.bf16.mxu0 %v9682_v61  ;;  %v9716_v48 = vld [vmem:[%s12107_s23 + $0x15e0] ss:$16 sps:$4 sm:$0xff]   ;;  %v9727_v54 = vld [vmem:[%s12107_s23 + $0x17c4] ss:$16 sps:$4 sm:$0xff]  }
 0x2f2   : > { %v6931_v52 = vpop.f32.mrf.mxu1  ;;  %7224 = vmatprep.subr.bf16.mxu1 %v9685_v49  ;;  %v9730_v61 = vld [vmem:[%s12107_s23 + $0x15a4] ss:$16 sps:$4 sm:$0xff]   ;;  %v9728_v0 = vld [vmem:[%s12107_s23 + $0x15a0] ss:$16 sps:$4 sm:$0xff]  }
 0x2f3   : > { %v9733_v49 = vld [vmem:[%s12107_s23 + $0x17a4] ss:$16 sps:$4 sm:$0xff]   ;;  %v9734_v5 = vld [vmem:[%s12107_s23 + $0x1580] ss:$16 sps:$4 sm:$0xff]  }
 0x2f4   : > { %7184 = vmatpush1.bf16.msra.mxu0 %v9680_v1  ;;  %v9731_v1 = vld [vmem:[%s12107_s23 + $0x17a0] ss:$16 sps:$4 sm:$0xff]   ;;  %v9739_v63 = vld [vmem:[%s12107_s23 + $0x1784] ss:$16 sps:$4 sm:$0xff]  }
 0x2f5   : > { %7225 = vmatpush1.bf16.msra.mxu1 %v9683_v4  ;;  %7185 = vmatprep.subr.bf16.mxu0 %v9688_v10  ;;  %v9736_v4 = vld [vmem:[%s12107_s23 + $0x1584] ss:$16 sps:$4 sm:$0xff]   ;;  %v9737_v9 = vld [vmem:[%s12107_s23 + $0x1780] ss:$16 sps:$4 sm:$0xff]  }
 0x2f6   : > { %7226 = vmatprep.subr.bf16.mxu1 %v9691_v11  ;;  %v9742_v52 = vld [vmem:[%s12107_s23 + $0x1564] ss:$16 sps:$4 sm:$0xff]   ;;  %v9740_v11 = vld [vmem:[%s12107_s23 + $0x1560] ss:$16 sps:$4 sm:$0xff]  }
 0x2f7   : > { %v9745_v10 = vld [vmem:[%s12107_s23 + $0x1764] ss:$16 sps:$4 sm:$0xff]  }
 0x2f8   : > { %7186 = vmatpush1.bf16.msra.mxu0 %v9686_v14  ;;  %v9743_v14 = vld [vmem:[%s12107_s23 + $0x1760] ss:$16 sps:$4 sm:$0xff]  }
 0x2f9   : > { %7227 = vmatpush1.bf16.msra.mxu1 %v9689_v15  ;;  %7187 = vmatprep.subr.bf16.mxu0 %v9694_v16  ;;  %v9748_v15 = vld [vmem:[%s12107_s23 + $0x1544] ss:$16 sps:$4 sm:$0xff]  }
 0x2fa   : > { %7228 = vmatprep.subr.bf16.mxu1 %v9697_v19  ;;  %v9751_v16 = vld [vmem:[%s12107_s23 + $0x1744] ss:$16 sps:$4 sm:$0xff]   ;;  %v9746_v19 = vld [vmem:[%s12107_s23 + $0x1540] ss:$16 sps:$4 sm:$0xff]  }
 0x2fc   : > { %7188 = vmatpush1.bf16.msra.mxu0 %v9692_v20  ;;  %v9749_v20 = vld [vmem:[%s12107_s23 + $0x1740] ss:$16 sps:$4 sm:$0xff]  }
 0x2fd   : > { %7229 = vmatpush1.bf16.msra.mxu1 %v9695_v22  ;;  %7189 = vmatprep.subr.bf16.mxu0 %v9700_v18  ;;  %v9754_v22 = vld [vmem:[%s12107_s23 + $0x1524] ss:$16 sps:$4 sm:$0xff]  }
 0x2fe   : > { %7230 = vmatprep.subr.bf16.mxu1 %v9703_v25  ;;  %v9757_v18 = vld [vmem:[%s12107_s23 + $0x1724] ss:$16 sps:$4 sm:$0xff]   ;;  %v9752_v25 = vld [vmem:[%s12107_s23 + $0x1520] ss:$16 sps:$4 sm:$0xff]  }
 0x300   : > { %7190 = vmatpush1.bf16.msra.mxu0 %v9698_v26  ;;  %v9755_v26 = vld [vmem:[%s12107_s23 + $0x1720] ss:$16 sps:$4 sm:$0xff]  }
 0x301   : > { %7231 = vmatpush1.bf16.msra.mxu1 %v9701_v27  ;;  %7191 = vmatprep.subr.bf16.mxu0 %v9706_v28  ;;  %v9760_v27 = vld [vmem:[%s12107_s23 + $0x1504] ss:$16 sps:$4 sm:$0xff]  }
 0x302   : > { %7232 = vmatprep.subr.bf16.mxu1 %v9709_v31  ;;  %v9763_v28 = vld [vmem:[%s12107_s23 + $0x1704] ss:$16 sps:$4 sm:$0xff]   ;;  %v12660_v31 = vrot.slane %v12561_v24, %v12157_v2 }
 0x303   : > { %v9773_v24 = vld [vmem:[%s12107_s23 + $0x1844] ss:$16 sps:$4 sm:$0xff]  }
 0x304   : > { %7192 = vmatpush1.bf16.msra.mxu0 %v9704_v33  ;;  %v9758_v33 = vld [vmem:[%s12107_s23 + $0x1500] ss:$16 sps:$4 sm:$0xff]  }
 0x305   : > { %7233 = vmatpush1.bf16.msra.mxu1 %v9707_v36  ;;  %7193 = vmatprep.subr.bf16.mxu0 %v9712_v37  ;;  %v9761_v36 = vld [vmem:[%s12107_s23 + $0x1700] ss:$16 sps:$4 sm:$0xff]   ;;  %v9767_v37 = vld [vmem:[%s12107_s23 + $0x1864] ss:$16 sps:$4 sm:$0xff]  }
 0x306   : > { %7234 = vmatprep.subr.bf16.mxu1 %v9715_v38  ;;  %v9770_v38 = vld [vmem:[%s12107_s23 + $0xec] ss:$16 sps:$4 sm:$0xff]  }
 0x308   : > { %7194 = vmatpush1.bf16.msra.mxu0 %v9710_v57  ;;  %v9765_v57 = vld [vmem:[%s12107_s23 + $0x1860] ss:$16 sps:$4 sm:$0xff]  }
 0x309   : > { %7235 = vmatpush1.bf16.msra.mxu1 %v9713_v44  ;;  %7195 = vmatprep.subr.bf16.mxu0 %v9718_v45  ;;  %v9768_v44 = vld [vmem:[%s12107_s23 + $0xe8] ss:$16 sps:$4 sm:$0xff]   ;;  %v12670_v45 = vcombine.high %v12660_v31, %v12660_v31 }
 0x30a   : > { %7236 = vmatprep.subr.bf16.mxu1 %v9721_v46  ;;  %v9776_v46 = vld [vmem:[%s12107_s23 + $0xcc] ss:$16 sps:$4 sm:$0xff]  }
 0x30c   : > { %7196 = vmatpush2.bf16.msra.mxu0 %v9716_v48  ;;  %v9771_v48 = vld [vmem:[%s12107_s23 + $0x1840] ss:$16 sps:$4 sm:$0xff]  }
 0x30d   : > { %7237 = vmatpush2.bf16.msra.mxu1 %v9719_v51  ;;  %7197 = vmatprep.subr.bf16.mxu0 %v9724_v53  ;;  %v9774_v51 = vld [vmem:[%s12107_s23 + $0xc8] ss:$16 sps:$4 sm:$0xff]  }
 0x30e   : > { %7238 = vmatprep.subr.bf16.mxu1 %v9727_v54 }
 0x310   : > { %7198 = vmatpush2.bf16.msra.mxu0 %v9722_v55 }
 0x311   : > { %7239 = vmatpush2.bf16.msra.mxu1 %v9725_v56  ;;  %7199 = vmatprep.subr.bf16.mxu0 %v9730_v61 }
 0x312   : > { %7240 = vmatprep.subr.bf16.mxu1 %v9733_v49  ;;  %v9779_v49 = vld [vmem:[%s12107_s23 + $0x1824] ss:$16 sps:$4 sm:$0xff]  }
 0x314   : > { %7200 = vmatpush2.bf16.msra.mxu0 %v9728_v0  ;;  %v9782_v0 = vld [vmem:[%s12107_s23 + $0xac] ss:$16 sps:$4 sm:$0xff]  }
 0x315   : > { %7241 = vmatpush2.bf16.msra.mxu1 %v9731_v1  ;;  %7201 = vmatprep.subr.bf16.mxu0 %v9736_v4 }
 0x316   : > { %7242 = vmatprep.subr.bf16.mxu1 %v9739_v63  ;;  %v9777_v63 = vld [vmem:[%s12107_s23 + $0x1820] ss:$16 sps:$4 sm:$0xff]  }
 0x318   : > { %7202 = vmatpush2.bf16.msra.mxu0 %v9734_v5  ;;  %v9780_v5 = vld [vmem:[%s12107_s23 + $0xa8] ss:$16 sps:$4 sm:$0xff]  }
 0x319   : > { %7243 = vmatpush2.bf16.msra.mxu1 %v9737_v9  ;;  %7203 = vmatprep.subr.bf16.mxu0 %v9742_v52  ;;  %v10452_v9 = vmov 0  }
 0x31a   : > { %7244 = vmatprep.subr.bf16.mxu1 %v9745_v10 }
 0x31c   : > { %7204 = vmatpush2.bf16.msra.mxu0 %v9740_v11 }
 0x31d   : > { %7245 = vmatpush2.bf16.msra.mxu1 %v9743_v14  ;;  %7205 = vmatprep.subr.bf16.mxu0 %v9748_v15  ;;  %v9785_v14 = vld [vmem:[%s12107_s23 + $0x1804] ss:$16 sps:$4 sm:$0xff]   ;;  %v9788_v15 = vld [vmem:[%s12107_s23 + $0x8c] ss:$16 sps:$4 sm:$0xff]  }
 0x31e   : > { %7246 = vmatprep.subr.bf16.mxu1 %v9751_v16  ;;  %v9783_v16 = vld [vmem:[%s12107_s23 + $0x1800] ss:$16 sps:$4 sm:$0xff]  }
 0x320   : > { %7206 = vmatpush2.bf16.msra.mxu0 %v9746_v19  ;;  %v9786_v19 = vld [vmem:[%s12107_s23 + $0x88] ss:$16 sps:$4 sm:$0xff]  }
 0x321   : > { %7247 = vmatpush2.bf16.msra.mxu1 %v9749_v20  ;;  %7207 = vmatprep.subr.bf16.mxu0 %v9754_v22  ;;  %v9791_v20 = vld [vmem:[%s12107_s23 + $0x6c] ss:$16 sps:$4 sm:$0xff]  }
 0x322   : > { %7248 = vmatprep.subr.bf16.mxu1 %v9757_v18  ;;  %v9794_v22 = vld [vmem:[%s12107_s23 + $0x2ec] ss:$16 sps:$4 sm:$0xff]   ;;  %v9789_v18 = vld [vmem:[%s12107_s23 + $0x68] ss:$16 sps:$4 sm:$0xff]  }
 0x324   : > { %7208 = vmatpush2.bf16.msra.mxu0 %v9752_v25  ;;  %v9792_v25 = vld [vmem:[%s12107_s23 + $0x2e8] ss:$16 sps:$4 sm:$0xff]  }
 0x325   : > { %7249 = vmatpush2.bf16.msra.mxu1 %v9755_v26  ;;  %7209 = vmatprep.subr.bf16.mxu0 %v9760_v27  ;;  %v9797_v27 = vld [vmem:[%s12107_s23 + $0x4c] ss:$16 sps:$4 sm:$0xff]  }
 0x326   : > { %7250 = vmatprep.subr.bf16.mxu1 %v9763_v28  ;;  %v9800_v28 = vld [vmem:[%s12107_s23 + $0x2cc] ss:$16 sps:$4 sm:$0xff]  }
 0x328   : > { %7210 = vmatpush2.bf16.msra.mxu0 %v9758_v33  ;;  %v9795_v33 = vld [vmem:[%s12107_s23 + $0x48] ss:$16 sps:$4 sm:$0xff]  }
 0x329   : > { %7251 = vmatpush2.bf16.msra.mxu1 %v9761_v36  ;;  %7269 = vmatprep.subr.bf16.mxu0 %v9767_v37  ;;  %v9803_v36 = vld [vmem:[%s12107_s23 + $0x2c] ss:$16 sps:$4 sm:$0xff]  }
 0x32a   : > { %7302 = vmatprep.subr.bf16.mxu1 %v9770_v38  ;;  %v9806_v37 = vld [vmem:[%s12107_s23 + $0x2ac] ss:$16 sps:$4 sm:$0xff]   ;;  %v9801_v38 = vld [vmem:[%s12107_s23 + $0x28] ss:$16 sps:$4 sm:$0xff]  }
 0x32b   : > { %v6967_v53 = vpop.f32.mrf.mxu0  ;;  %7212 = vmatmul.mubr.bf16.vlgmr.msra.gmra.mxu0 %v12660_v31 }
 0x32c   : > { %v7008_v54 = vpop.f32.mrf.mxu1  ;;  %7253 = vmatmul.mubr.bf16.vlgmr.msra.gmra.mxu1 %v12670_v45  ;;  %v6968_v55 = vadd.f32 %v6967_v53, %v12599_v62  ;;  %7270 = vmatpush1.bf16.msra.mxu0 %v9765_v57  ;;  %v9804_v57 = vld [vmem:[%s12107_s23 + $0x2a8] ss:$16 sps:$4 sm:$0xff]  }
 0x32d   : > { %7303 = vmatpush1.bf16.msra.mxu1 %v9768_v44  ;;  %v6969_v56 = vpop.f32.mrf.mxu0  ;;  %7271 = vmatprep.subr.bf16.mxu0 %v9773_v24  ;;  %v9809_v44 = vld [vmem:[%s12107_s23 + $0xc] ss:$16 sps:$4 sm:$0xff]   ;;  %v9813_v53 = vld [vmem:[%s12107_s23 + $0x1e8] ss:$16 sps:$4 sm:$0xff]  }
 0x32e   : > { %v7010_v61 = vpop.f32.mrf.mxu1  ;;  %7304 = vmatprep.subr.bf16.mxu1 %v9776_v46  ;;  %v12681_v1 = vadd.f32 %v7008_v54, %v6968_v55  ;;  %v6970_v4 = vadd.f32 %v6969_v56, %v12606_v6  ;;  %7293 = vmatprep.mubr.bf16.mxu0 %v10452_v9  ;;  %v9812_v24 = vld [vmem:[%s12107_s23 + $0x28c] ss:$16 sps:$4 sm:$0xff]   ;;  %v9807_v46 = vld [vmem:[%s12107_s23 + $0x8] ss:$16 sps:$4 sm:$0xff]  }
 0x32f   : > { %7334 = vmatprep.mubr.bf16.mxu1 %v12171_v13  ;;  %v6971_v62 = vpop.f32.mrf.mxu0  ;;  %v8280_v13 = vld.sshfl [vmem:[%s13205_s0 + $0x18] sm:$0x1 pattern:$0x75316420]  ;;  %v9816_v54 = vld [vmem:[%s12107_s23 + $0x268] ss:$16 sps:$4 sm:$0xff]  }
 0x330   : > { %v7012_v52 = vpop.f32.mrf.mxu1  ;;  %v12688_v10 = vadd.f32 %v7010_v61, %v6970_v4  ;;  %7272 = vmatpush1.bf16.msra.mxu0 %v9771_v48  ;;  %v12702_v26 = vrot.slane %v8280_v13, %v12157_v2  ;;  %v9798_v2 = vld [vmem:[%s12107_s23 + $0x2c8] ss:$16 sps:$4 sm:$0xff]   ;;  %v9821_v55 = vld [vmem:[%s12107_s23 + $0x1cc] ss:$16 sps:$4 sm:$0xff]  }
 0x331   : > { %7305 = vmatpush1.bf16.msra.mxu1 %v9774_v51  ;;  %v6972_v6 = vpop.f32.mrf.mxu0  ;;  %7273 = vmatprep.subr.bf16.mxu0 %v9779_v49  ;;  %v9810_v48 = vld [vmem:[%s12107_s23 + $0x288] ss:$16 sps:$4 sm:$0xff]   ;;  %v9818_v51 = vld [vmem:[%s12107_s23 + $0x26c] ss:$16 sps:$4 sm:$0xff]  }
 0x332   : > { %v7013_v11 = vpop.f32.mrf.mxu1  ;;  %7306 = vmatprep.subr.bf16.mxu1 %v9782_v0  ;;  %v9824_v56 = vld [vmem:[%s12107_s23 + $0x24c] ss:$16 sps:$4 sm:$0xff]   ;;  %v9819_v61 = vld [vmem:[%s12107_s23 + $0x1c8] ss:$16 sps:$4 sm:$0xff]  }
 0x333   : > { %v9822_v49 = vld [vmem:[%s12107_s23 + $0x248] ss:$16 sps:$4 sm:$0xff]   ;;  %v9827_v0 = vld [vmem:[%s12107_s23 + $0x1ac] ss:$16 sps:$4 sm:$0xff]  }
 0x334   : > { %7274 = vmatpush1.bf16.msra.mxu0 %v9777_v63  ;;  %v9830_v4 = vld [vmem:[%s12107_s23 + $0x22c] ss:$16 sps:$4 sm:$0xff]   ;;  %v9825_v63 = vld [vmem:[%s12107_s23 + $0x1a8] ss:$16 sps:$4 sm:$0xff]  }
 0x335   : > { %7307 = vmatpush1.bf16.msra.mxu1 %v9780_v5  ;;  %7275 = vmatprep.subr.bf16.mxu0 %v9785_v14  ;;  %v9828_v5 = vld [vmem:[%s12107_s23 + $0x228] ss:$16 sps:$4 sm:$0xff]   ;;  %v9833_v62 = vld [vmem:[%s12107_s23 + $0x18c] ss:$16 sps:$4 sm:$0xff]  }
 0x336   : > { %7308 = vmatprep.subr.bf16.mxu1 %v9788_v15  ;;  %v9836_v52 = vld [vmem:[%s12107_s23 + $0x20c] ss:$16 sps:$4 sm:$0xff]   ;;  %v9831_v6 = vld [vmem:[%s12107_s23 + $0x188] ss:$16 sps:$4 sm:$0xff]  }
 0x337   : > { %v9834_v11 = vld [vmem:[%s12107_s23 + $0x208] ss:$16 sps:$4 sm:$0xff]   ;;  %v9839_v14 = vld [vmem:[%s12107_s23 + $0x16c] ss:$16 sps:$4 sm:$0xff]  }
 0x338   : > { %7276 = vmatpush1.bf16.msra.mxu0 %v9783_v16  ;;  %v9842_v15 = vld [vmem:[%s12107_s23 + $0x3ec] ss:$16 sps:$4 sm:$0xff]   ;;  %v9837_v16 = vld [vmem:[%s12107_s23 + $0x168] ss:$16 sps:$4 sm:$0xff]  }
 0x339   : > { %7309 = vmatpush1.bf16.msra.mxu1 %v9786_v19  ;;  %7343 = vmatprep.subr.bf16.mxu0 %v9794_v22  ;;  %v9840_v19 = vld [vmem:[%s12107_s23 + $0x3e8] ss:$16 sps:$4 sm:$0xff]   ;;  %v9845_v13 = vld [vmem:[%s12107_s23 + $0x14c] ss:$16 sps:$4 sm:$0xff]  }
 0x33a   : > { %7310 = vmatprep.subr.bf16.mxu1 %v9791_v20  ;;  %v9848_v20 = vld [vmem:[%s12107_s23 + $0x3cc] ss:$16 sps:$4 sm:$0xff]   ;;  %v9843_v22 = vld [vmem:[%s12107_s23 + $0x148] ss:$16 sps:$4 sm:$0xff]  }
 0x33b   : > { %9065 = vmatmul.mubr.msk.bf16.vlgmr.msra.gmra.mxu0 %vm6765_vm1, %v12702_v26 }
 0x33c   : > { %7344 = vmatpush1.bf16.msra.mxu0 %v9792_v25  ;;  %7375 = vmatprep.mubr.bf16.mxu0 %v12178_v17  ;;  %v9815_v17 = vld [vmem:[%s12107_s23 + $0x1ec] ss:$16 sps:$4 sm:$0xff]  }
 0x33d   : > { %7311 = vmatpush1.bf16.msra.mxu1 %v9789_v18  ;;  %7345 = vmatprep.subr.bf16.mxu0 %v9800_v28  ;;  %v9846_v18 = vld [vmem:[%s12107_s23 + $0x3c8] ss:$16 sps:$4 sm:$0xff]   ;;  %v9851_v25 = vld [vmem:[%s12107_s23 + $0x12c] ss:$16 sps:$4 sm:$0xff]  }
 0x33e   : > { %7312 = vmatprep.subr.bf16.mxu1 %v9797_v27  ;;  %v9854_v27 = vld [vmem:[%s12107_s23 + $0x3ac] ss:$16 sps:$4 sm:$0xff]   ;;  %v9849_v28 = vld [vmem:[%s12107_s23 + $0x128] ss:$16 sps:$4 sm:$0xff]  }
 0x340   : > { %7346 = vmatpush1.bf16.msra.mxu0 %v9798_v2  ;;  %v9857_v2 = vld [vmem:[%s12107_s23 + $0x10c] ss:$16 sps:$4 sm:$0xff]  }
 0x341   : > { %7313 = vmatpush1.bf16.msra.mxu1 %v9795_v33  ;;  %7347 = vmatprep.subr.bf16.mxu0 %v9806_v37  ;;  %v9852_v33 = vld [vmem:[%s12107_s23 + $0x3a8] ss:$16 sps:$4 sm:$0xff]  }
 0x342   : > { %7314 = vmatprep.subr.bf16.mxu1 %v9803_v36  ;;  %v9860_v36 = vld [vmem:[%s12107_s23 + $0x38c] ss:$16 sps:$4 sm:$0xff]   ;;  %v9855_v37 = vld [vmem:[%s12107_s23 + $0x108] ss:$16 sps:$4 sm:$0xff]  }
 0x344   : > { %7348 = vmatpush1.bf16.msra.mxu0 %v9804_v57  ;;  %v9863_v57 = vld [vmem:[%s12107_s23 + $0x36c] ss:$16 sps:$4 sm:$0xff]  }
 0x345   : > { %7315 = vmatpush1.bf16.msra.mxu1 %v9801_v38  ;;  %7349 = vmatprep.subr.bf16.mxu0 %v9812_v24  ;;  %v9858_v38 = vld [vmem:[%s12107_s23 + $0x388] ss:$16 sps:$4 sm:$0xff]  }
 0x346   : > { %7316 = vmatprep.subr.bf16.mxu1 %v9809_v44  ;;  %v9866_v44 = vld [vmem:[%s12107_s23 + $0x4ec] ss:$16 sps:$4 sm:$0xff]   ;;  %v9861_v24 = vld [vmem:[%s12107_s23 + $0x368] ss:$16 sps:$4 sm:$0xff]  }
 0x348   : > { %7350 = vmatpush1.bf16.msra.mxu0 %v9810_v48  ;;  %v9869_v48 = vld [vmem:[%s12107_s23 + $0x34c] ss:$16 sps:$4 sm:$0xff]  }
 0x349   : > { %7317 = vmatpush1.bf16.msra.mxu1 %v9807_v46  ;;  %7351 = vmatprep.subr.bf16.mxu0 %v9818_v51  ;;  %v9864_v46 = vld [vmem:[%s12107_s23 + $0x4e8] ss:$16 sps:$4 sm:$0xff]  }
 0x34a   : > { %7318 = vmatprep.subr.bf16.mxu1 %v9815_v17  ;;  %v9872_v17 = vld [vmem:[%s12107_s23 + $0x4cc] ss:$16 sps:$4 sm:$0xff]   ;;  %v9867_v51 = vld [vmem:[%s12107_s23 + $0x348] ss:$16 sps:$4 sm:$0xff]  }
 0x34c   : > { %7352 = vmatpush1.bf16.msra.mxu0 %v9816_v54 }
 0x34d   : > { %7319 = vmatpush2.bf16.msra.mxu1 %v9813_v53  ;;  %7353 = vmatprep.subr.bf16.mxu0 %v9824_v56  ;;  %v9870_v53 = vld [vmem:[%s12107_s23 + $0x4c8] ss:$16 sps:$4 sm:$0xff]  }
 0x34e   : > { %7320 = vmatprep.subr.bf16.mxu1 %v9821_v55 }
 0x350   : > { %7354 = vmatpush1.bf16.msra.mxu0 %v9822_v49 }
 0x351   : > { %7321 = vmatpush2.bf16.msra.mxu1 %v9819_v61  ;;  %7355 = vmatprep.subr.bf16.mxu0 %v9830_v4  ;;  %v9878_v4 = vld [vmem:[%s12107_s23 + $0x4ac] ss:$16 sps:$4 sm:$0xff]  }
 0x352   : > { %7322 = vmatprep.subr.bf16.mxu1 %v9827_v0  ;;  %v9875_v0 = vld [vmem:[%s12107_s23 + $0x32c] ss:$16 sps:$4 sm:$0xff]  }
 0x354   : > { %7356 = vmatpush1.bf16.msra.mxu0 %v9828_v5 }
 0x355   : > { %7323 = vmatpush2.bf16.msra.mxu1 %v9825_v63  ;;  %7357 = vmatprep.subr.bf16.mxu0 %v9836_v52  ;;  %v9876_v52 = vld [vmem:[%s12107_s23 + $0x4a8] ss:$16 sps:$4 sm:$0xff]  }
 0x356   : > { %7324 = vmatprep.subr.bf16.mxu1 %v9833_v62  ;;  %v9873_v62 = vld [vmem:[%s12107_s23 + $0x328] ss:$16 sps:$4 sm:$0xff]  }
 0x358   : > { %7358 = vmatpush1.bf16.msra.mxu0 %v9834_v11 }
 0x359   : > { %7325 = vmatpush2.bf16.msra.mxu1 %v9831_v6  ;;  %7359 = vmatprep.subr.bf16.mxu0 %v9842_v15  ;;  %v9884_v15 = vld [vmem:[%s12107_s23 + $0x48c] ss:$16 sps:$4 sm:$0xff]  }
 0x35a   : > { %7326 = vmatprep.subr.bf16.mxu1 %v9839_v14 }
 0x35c   : > { %7360 = vmatpush2.bf16.msra.mxu0 %v9840_v19  ;;  %v9887_v19 = vld [vmem:[%s12107_s23 + $0x46c] ss:$16 sps:$4 sm:$0xff]  }
 0x35d   : > { %7327 = vmatpush2.bf16.msra.mxu1 %v9837_v16  ;;  %7361 = vmatprep.subr.bf16.mxu0 %v9848_v20  ;;  %v9882_v16 = vld [vmem:[%s12107_s23 + $0x488] ss:$16 sps:$4 sm:$0xff]  }
 0x35e   : > { %7328 = vmatprep.subr.bf16.mxu1 %v9845_v13  ;;  %v9890_v13 = vld [vmem:[%s12107_s23 + $0x6ec] ss:$16 sps:$4 sm:$0xff]   ;;  %v9885_v20 = vld [vmem:[%s12107_s23 + $0x468] ss:$16 sps:$4 sm:$0xff]  }
 0x360   : > { %7362 = vmatpush2.bf16.msra.mxu0 %v9846_v18  ;;  %v9893_v18 = vld [vmem:[%s12107_s23 + $0x44c] ss:$16 sps:$4 sm:$0xff]  }
 0x361   : > { %7329 = vmatpush2.bf16.msra.mxu1 %v9843_v22  ;;  %7363 = vmatprep.subr.bf16.mxu0 %v9854_v27  ;;  %v9888_v22 = vld [vmem:[%s12107_s23 + $0x6e8] ss:$16 sps:$4 sm:$0xff]  }
 0x362   : > { %7330 = vmatprep.subr.bf16.mxu1 %v9851_v25  ;;  %v9896_v25 = vld [vmem:[%s12107_s23 + $0x6cc] ss:$16 sps:$4 sm:$0xff]   ;;  %v9891_v27 = vld [vmem:[%s12107_s23 + $0x448] ss:$16 sps:$4 sm:$0xff]  }
 0x364   : > { %7364 = vmatpush2.bf16.msra.mxu0 %v9852_v33  ;;  %v9899_v33 = vld [vmem:[%s12107_s23 + $0x42c] ss:$16 sps:$4 sm:$0xff]  }
 0x365   : > { %7331 = vmatpush2.bf16.msra.mxu1 %v9849_v28  ;;  %7365 = vmatprep.subr.bf16.mxu0 %v9860_v36  ;;  %v9894_v28 = vld [vmem:[%s12107_s23 + $0x6c8] ss:$16 sps:$4 sm:$0xff]  }
 0x366   : > { %7332 = vmatprep.subr.bf16.mxu1 %v9857_v2  ;;  %v9902_v2 = vld [vmem:[%s12107_s23 + $0x6ac] ss:$16 sps:$4 sm:$0xff]   ;;  %v9897_v36 = vld [vmem:[%s12107_s23 + $0x428] ss:$16 sps:$4 sm:$0xff]  }
 0x368   : > { %7366 = vmatpush2.bf16.msra.mxu0 %v9858_v38  ;;  %v9908_v38 = vld [vmem:[%s12107_s23 + $0x68c] ss:$16 sps:$4 sm:$0xff]  }
 0x369   : > { %7333 = vmatpush2.bf16.msra.mxu1 %v9855_v37  ;;  %7367 = vmatprep.subr.bf16.mxu0 %v9863_v57  ;;  %v9900_v37 = vld [vmem:[%s12107_s23 + $0x6a8] ss:$16 sps:$4 sm:$0xff]  }
 0x36a   : > { %7384 = vmatprep.subr.bf16.mxu1 %v9866_v44  ;;  %v9903_v57 = vld [vmem:[%s12107_s23 + $0x408] ss:$16 sps:$4 sm:$0xff]  }
 0x36b   : > { %v7049_v54 = vpop.f32.mrf.mxu0  ;;  %v9906_v44 = vld [vmem:[%s12107_s23 + $0x688] ss:$16 sps:$4 sm:$0xff]  }
 0x36c   : > { %v7090_v55 = vpop.f32.mrf.mxu1  ;;  %7335 = vmatmul.mubr.bf16.vlgmr.msra.gmra.mxu1 %v12197_v30  ;;  %v7050_v56 = vadd.f32 %v7049_v54, %v12681_v1  ;;  %7368 = vmatpush2.bf16.msra.mxu0 %v9861_v24  ;;  %v9911_v24 = vld [vmem:[%s12107_s23 + $0x5ec] ss:$16 sps:$4 sm:$0xff]   ;;  %v9918_v54 = vld [vmem:[%s12107_s23 + $0x648] ss:$16 sps:$4 sm:$0xff]  }
 0x36d   : > { %7385 = vmatpush1.bf16.msra.mxu1 %v9864_v46  ;;  %v7051_v61 = vpop.f32.mrf.mxu0  ;;  %7369 = vmatprep.subr.bf16.mxu0 %v9869_v48  ;;  %v9909_v46 = vld [vmem:[%s12107_s23 + $0x5e8] ss:$16 sps:$4 sm:$0xff]  }
 0x36e   : > { %v7092_v49 = vpop.f32.mrf.mxu1  ;;  %7386 = vmatprep.subr.bf16.mxu1 %v9872_v17  ;;  %v12763_v63 = vadd.f32 %v7090_v55, %v7050_v56  ;;  %v7052_v5 = vadd.f32 %v7051_v61, %v12688_v10  ;;  %7416 = vmatprep.mubr.bf16.mxu1 %v12203_v34  ;;  %v9881_v10 = vld [vmem:[%s12107_s23 + $0x30c] ss:$16 sps:$4 sm:$0xff]   ;;  %v9879_v34 = vld [vmem:[%s12107_s23 + $0x308] ss:$16 sps:$4 sm:$0xff]  }
 0x36f   : > { %v7053_v30 = vpop.f32.mrf.mxu0  ;;  %v9912_v48 = vld [vmem:[%s12107_s23 + $0x668] ss:$16 sps:$4 sm:$0xff]   ;;  %v9917_v17 = vld [vmem:[%s12107_s23 + $0x5cc] ss:$16 sps:$4 sm:$0xff]  }
 0x370   : > { %v7094_v1 = vpop.f32.mrf.mxu1  ;;  %v12769_v6 = vadd.f32 %v7092_v49, %v7052_v5  ;;  %7370 = vmatpush2.bf16.msra.mxu0 %v9867_v51  ;;  %v9920_v51 = vld [vmem:[%s12107_s23 + $0x64c] ss:$16 sps:$4 sm:$0xff]   ;;  %v9921_v61 = vld [vmem:[%s12107_s23 + $0x5a8] ss:$16 sps:$4 sm:$0xff]  }
 0x371   : > { %7387 = vmatpush1.bf16.msra.mxu1 %v9870_v53  ;;  %v7054_v11 = vpop.f32.mrf.mxu0  ;;  %7371 = vmatprep.subr.bf16.mxu0 %v9875_v0  ;;  %v9915_v53 = vld [vmem:[%s12107_s23 + $0x5c8] ss:$16 sps:$4 sm:$0xff]   ;;  %v9923_v55 = vld [vmem:[%s12107_s23 + $0x5ac] ss:$16 sps:$4 sm:$0xff]  }
 0x372   : > { %v7095_v14 = vpop.f32.mrf.mxu1  ;;  %7388 = vmatprep.subr.bf16.mxu1 %v9878_v4  ;;  %v9926_v56 = vld [vmem:[%s12107_s23 + $0x62c] ss:$16 sps:$4 sm:$0xff]   ;;  %v9924_v49 = vld [vmem:[%s12107_s23 + $0x628] ss:$16 sps:$4 sm:$0xff]  }
 0x373   : > { %v9929_v0 = vld [vmem:[%s12107_s23 + $0x58c] ss:$16 sps:$4 sm:$0xff]   ;;  %v9927_v5 = vld [vmem:[%s12107_s23 + $0x588] ss:$16 sps:$4 sm:$0xff]  }
 0x374   : > { %7372 = vmatpush2.bf16.msra.mxu0 %v9873_v62  ;;  %v9932_v4 = vld [vmem:[%s12107_s23 + $0x60c] ss:$16 sps:$4 sm:$0xff]   ;;  %v9930_v62 = vld [vmem:[%s12107_s23 + $0x608] ss:$16 sps:$4 sm:$0xff]  }
 0x375   : > { %7389 = vmatpush1.bf16.msra.mxu1 %v9876_v52  ;;  %7373 = vmatprep.subr.bf16.mxu0 %v9881_v10  ;;  %v9935_v52 = vld [vmem:[%s12107_s23 + $0x56c] ss:$16 sps:$4 sm:$0xff]   ;;  %v9933_v1 = vld [vmem:[%s12107_s23 + $0x568] ss:$16 sps:$4 sm:$0xff]  }
 0x376   : > { %7390 = vmatprep.subr.bf16.mxu1 %v9884_v15  ;;  %v9938_v30 = vld [vmem:[%s12107_s23 + $0x7ec] ss:$16 sps:$4 sm:$0xff]   ;;  %v9936_v11 = vld [vmem:[%s12107_s23 + $0x7e8] ss:$16 sps:$4 sm:$0xff]  }
 0x377   : > { %v9941_v14 = vld [vmem:[%s12107_s23 + $0x54c] ss:$16 sps:$4 sm:$0xff]   ;;  %v9939_v15 = vld [vmem:[%s12107_s23 + $0x548] ss:$16 sps:$4 sm:$0xff]  }
 0x378   : > { %7374 = vmatpush2.bf16.msra.mxu0 %v9879_v34  ;;  %v9944_v10 = vld [vmem:[%s12107_s23 + $0x7cc] ss:$16 sps:$4 sm:$0xff]   ;;  %v9942_v34 = vld [vmem:[%s12107_s23 + $0x7c8] ss:$16 sps:$4 sm:$0xff]  }
 0x379   : > { %7391 = vmatpush1.bf16.msra.mxu1 %v9882_v16  ;;  %7425 = vmatprep.subr.bf16.mxu0 %v9890_v13  ;;  %v9947_v16 = vld [vmem:[%s12107_s23 + $0x52c] ss:$16 sps:$4 sm:$0xff]   ;;  %v9945_v13 = vld [vmem:[%s12107_s23 + $0x528] ss:$16 sps:$4 sm:$0xff]  }
 0x37a   : > { %7392 = vmatprep.subr.bf16.mxu1 %v9887_v19  ;;  %v9950_v19 = vld [vmem:[%s12107_s23 + $0x7ac] ss:$16 sps:$4 sm:$0xff]  }
 0x37b   : > { %7376 = vmatmul.mubr.bf16.vlgmr.msra.gmra.mxu0 %v12207_v35  ;;  %v9905_v35 = vld [vmem:[%s12107_s23 + $0x40c] ss:$16 sps:$4 sm:$0xff]  }
 0x37c   : > { %7426 = vmatpush1.bf16.msra.mxu0 %v9888_v22  ;;  %7457 = vmatprep.mubr.bf16.mxu0 %v12215_v40  ;;  %v9914_v40 = vld [vmem:[%s12107_s23 + $0x66c] ss:$16 sps:$4 sm:$0xff]  }
 0x37d   : > { %7393 = vmatpush1.bf16.msra.mxu1 %v9885_v20  ;;  %7427 = vmatprep.subr.bf16.mxu0 %v9896_v25  ;;  %v9948_v20 = vld [vmem:[%s12107_s23 + $0x7a8] ss:$16 sps:$4 sm:$0xff]   ;;  %v9953_v22 = vld [vmem:[%s12107_s23 + $0x50c] ss:$16 sps:$4 sm:$0xff]  }
 0x37e   : > { %7394 = vmatprep.subr.bf16.mxu1 %v9893_v18  ;;  %v9956_v18 = vld [vmem:[%s12107_s23 + $0x78c] ss:$16 sps:$4 sm:$0xff]   ;;  %v9951_v25 = vld [vmem:[%s12107_s23 + $0x508] ss:$16 sps:$4 sm:$0xff]  }
 0x380   : > { %7428 = vmatpush1.bf16.msra.mxu0 %v9894_v28  ;;  %v9959_v28 = vld [vmem:[%s12107_s23 + $0x76c] ss:$16 sps:$4 sm:$0xff]  }
 0x381   : > { %7395 = vmatpush1.bf16.msra.mxu1 %v9891_v27  ;;  %7429 = vmatprep.subr.bf16.mxu0 %v9902_v2  ;;  %v9954_v27 = vld [vmem:[%s12107_s23 + $0x788] ss:$16 sps:$4 sm:$0xff]  }
 0x382   : > { %7396 = vmatprep.subr.bf16.mxu1 %v9899_v33  ;;  %v9962_v33 = vld [vmem:[%s12107_s23 + $0x8ec] ss:$16 sps:$4 sm:$0xff]   ;;  %v9957_v2 = vld [vmem:[%s12107_s23 + $0x768] ss:$16 sps:$4 sm:$0xff]  }
 0x384   : > { %7430 = vmatpush1.bf16.msra.mxu0 %v9900_v37  ;;  %v9965_v37 = vld [vmem:[%s12107_s23 + $0x74c] ss:$16 sps:$4 sm:$0xff]  }
 0x385   : > { %7397 = vmatpush1.bf16.msra.mxu1 %v9897_v36  ;;  %7431 = vmatprep.subr.bf16.mxu0 %v9908_v38  ;;  %v9960_v36 = vld [vmem:[%s12107_s23 + $0x8e8] ss:$16 sps:$4 sm:$0xff]  }
 0x386   : > { %7398 = vmatprep.subr.bf16.mxu1 %v9905_v35  ;;  %v9968_v35 = vld [vmem:[%s12107_s23 + $0x8cc] ss:$16 sps:$4 sm:$0xff]  }
 0x388   : > { %7432 = vmatpush1.bf16.msra.mxu0 %v9906_v44 }
 0x389   : > { %7399 = vmatpush1.bf16.msra.mxu1 %v9903_v57  ;;  %7433 = vmatprep.subr.bf16.mxu0 %v9914_v40  ;;  %v9966_v40 = vld [vmem:[%s12107_s23 + $0x8c8] ss:$16 sps:$4 sm:$0xff]  }
 0x38a   : > { %7400 = vmatprep.subr.bf16.mxu1 %v9911_v24  ;;  %v9963_v24 = vld [vmem:[%s12107_s23 + $0x748] ss:$16 sps:$4 sm:$0xff]  }
 0x38c   : > { %7434 = vmatpush1.bf16.msra.mxu0 %v9912_v48 }
 0x38d   : > { %7401 = vmatpush2.bf16.msra.mxu1 %v9909_v46  ;;  %7435 = vmatprep.subr.bf16.mxu0 %v9920_v51  ;;  %v9974_v51 = vld [vmem:[%s12107_s23 + $0x8ac] ss:$16 sps:$4 sm:$0xff]  }
 0x38e   : > { %7402 = vmatprep.subr.bf16.mxu1 %v9917_v17  ;;  %v9971_v17 = vld [vmem:[%s12107_s23 + $0x72c] ss:$16 sps:$4 sm:$0xff]  }
 0x390   : > { %7436 = vmatpush1.bf16.msra.mxu0 %v9918_v54 }
 0x391   : > { %7403 = vmatpush2.bf16.msra.mxu1 %v9915_v53  ;;  %7437 = vmatprep.subr.bf16.mxu0 %v9926_v56  ;;  %v9969_v56 = vld [vmem:[%s12107_s23 + $0x728] ss:$16 sps:$4 sm:$0xff]  }
 0x392   : > { %7404 = vmatprep.subr.bf16.mxu1 %v9923_v55 }
 0x394   : > { %7438 = vmatpush1.bf16.msra.mxu0 %v9924_v49 }
 0x395   : > { %7405 = vmatpush2.bf16.msra.mxu1 %v9921_v61  ;;  %7439 = vmatprep.subr.bf16.mxu0 %v9932_v4  ;;  %v9972_v61 = vld [vmem:[%s12107_s23 + $0x8a8] ss:$16 sps:$4 sm:$0xff]  }
 0x396   : > { %7406 = vmatprep.subr.bf16.mxu1 %v9929_v0  ;;  %v9975_v4 = vld [vmem:[%s12107_s23 + $0x708] ss:$16 sps:$4 sm:$0xff]  }
 0x398   : > { %7440 = vmatpush1.bf16.msra.mxu0 %v9930_v62  ;;  %v9983_v62 = vld [vmem:[%s12107_s23 + $0x86c] ss:$16 sps:$4 sm:$0xff]  }
 0x399   : > { %7407 = vmatpush2.bf16.msra.mxu1 %v9927_v5  ;;  %7441 = vmatprep.subr.bf16.mxu0 %v9938_v30  ;;  %v9978_v5 = vld [vmem:[%s12107_s23 + $0x888] ss:$16 sps:$4 sm:$0xff]  }
 0x39a   : > { %7408 = vmatprep.subr.bf16.mxu1 %v9935_v52  ;;  %v9986_v52 = vld [vmem:[%s12107_s23 + $0xaec] ss:$16 sps:$4 sm:$0xff]   ;;  %v9981_v30 = vld [vmem:[%s12107_s23 + $0x868] ss:$16 sps:$4 sm:$0xff]  }
 0x39c   : > { %7442 = vmatpush2.bf16.msra.mxu0 %v9936_v11  ;;  %v9989_v11 = vld [vmem:[%s12107_s23 + $0x84c] ss:$16 sps:$4 sm:$0xff]  }
 0x39d   : > { %7409 = vmatpush2.bf16.msra.mxu1 %v9933_v1  ;;  %7443 = vmatprep.subr.bf16.mxu0 %v9944_v10  ;;  %v9984_v1 = vld [vmem:[%s12107_s23 + $0xae8] ss:$16 sps:$4 sm:$0xff]  }
 0x39e   : > { %7410 = vmatprep.subr.bf16.mxu1 %v9941_v14  ;;  %v9992_v14 = vld [vmem:[%s12107_s23 + $0xacc] ss:$16 sps:$4 sm:$0xff]   ;;  %v9987_v10 = vld [vmem:[%s12107_s23 + $0x848] ss:$16 sps:$4 sm:$0xff]  }
 0x3a0   : > { %7444 = vmatpush2.bf16.msra.mxu0 %v9942_v34  ;;  %v9995_v34 = vld [vmem:[%s12107_s23 + $0x82c] ss:$16 sps:$4 sm:$0xff]  }
 0x3a1   : > { %7411 = vmatpush2.bf16.msra.mxu1 %v9939_v15  ;;  %7445 = vmatprep.subr.bf16.mxu0 %v9950_v19  ;;  %v9990_v15 = vld [vmem:[%s12107_s23 + $0xac8] ss:$16 sps:$4 sm:$0xff]  }
 0x3a2   : > { %7412 = vmatprep.subr.bf16.mxu1 %v9947_v16  ;;  %v9998_v16 = vld [vmem:[%s12107_s23 + $0xaac] ss:$16 sps:$4 sm:$0xff]   ;;  %v9993_v19 = vld [vmem:[%s12107_s23 + $0x828] ss:$16 sps:$4 sm:$0xff]  }
 0x3a4   : > { %7446 = vmatpush2.bf16.msra.mxu0 %v9948_v20  ;;  %v10004_v20 = vld [vmem:[%s12107_s23 + $0xa8c] ss:$16 sps:$4 sm:$0xff]  }
 0x3a5   : > { %7413 = vmatpush2.bf16.msra.mxu1 %v9945_v13  ;;  %7447 = vmatprep.subr.bf16.mxu0 %v9956_v18  ;;  %v10001_v13 = vld [vmem:[%s12107_s23 + $0x80c] ss:$16 sps:$4 sm:$0xff]   ;;  %v10002_v18 = vld [vmem:[%s12107_s23 + $0xa88] ss:$16 sps:$4 sm:$0xff]  }
 0x3a6   : > { %7414 = vmatprep.subr.bf16.mxu1 %v9953_v22  ;;  %v9999_v22 = vld [vmem:[%s12107_s23 + $0x808] ss:$16 sps:$4 sm:$0xff]  }
 0x3a8   : > { %7448 = vmatpush2.bf16.msra.mxu0 %v9954_v27  ;;  %v10005_v27 = vld [vmem:[%s12107_s23 + $0x9e8] ss:$16 sps:$4 sm:$0xff]  }
 0x3a9   : > { %7415 = vmatpush2.bf16.msra.mxu1 %v9951_v25  ;;  %7449 = vmatprep.subr.bf16.mxu0 %v9959_v28  ;;  %v10010_v25 = vld [vmem:[%s12107_s23 + $0xa6c] ss:$16 sps:$4 sm:$0xff]   ;;  %v10008_v28 = vld [vmem:[%s12107_s23 + $0xa68] ss:$16 sps:$4 sm:$0xff]  }
 0x3aa   : > { %7466 = vmatprep.subr.bf16.mxu1 %v9962_v33  ;;  %v10013_v33 = vld [vmem:[%s12107_s23 + $0x9cc] ss:$16 sps:$4 sm:$0xff]  }
 0x3ab   : > { %v7131_v38 = vpop.f32.mrf.mxu0 }
 0x3ac   : > { %v7172_v57 = vpop.f32.mrf.mxu1  ;;  %7417 = vmatmul.mubr.bf16.vlgmr.msra.gmra.mxu1 %v12280_v43  ;;  %v7132_v44 = vadd.f32 %v7131_v38, %v12763_v63  ;;  %7450 = vmatpush2.bf16.msra.mxu0 %v9957_v2  ;;  %v10016_v2 = vld [vmem:[%s12107_s23 + $0xa4c] ss:$16 sps:$4 sm:$0xff]  }
 0x3ad   : > { %7467 = vmatpush1.bf16.msra.mxu1 %v9960_v36  ;;  %v7133_v46 = vpop.f32.mrf.mxu0  ;;  %7451 = vmatprep.subr.bf16.mxu0 %v9965_v37  ;;  %v10011_v36 = vld [vmem:[%s12107_s23 + $0x9c8] ss:$16 sps:$4 sm:$0xff]   ;;  %v10022_v38 = vld [vmem:[%s12107_s23 + $0xa2c] ss:$16 sps:$4 sm:$0xff]  }
 0x3ae   : > { %v7174_v48 = vpop.f32.mrf.mxu1  ;;  %7468 = vmatprep.subr.bf16.mxu1 %v9968_v35  ;;  %v12837_v53 = vadd.f32 %v7172_v57, %v7132_v44  ;;  %v7134_v43 = vadd.f32 %v7133_v46, %v12769_v6  ;;  %7498 = vmatprep.mubr.bf16.mxu1 %v12311_v58  ;;  %v9977_v6 = vld [vmem:[%s12107_s23 + $0x70c] ss:$16 sps:$4 sm:$0xff]   ;;  %v10014_v37 = vld [vmem:[%s12107_s23 + $0xa48] ss:$16 sps:$4 sm:$0xff]  }
 0x3af   : > { %v7135_v63 = vpop.f32.mrf.mxu0  ;;  %v9980_v58 = vld [vmem:[%s12107_s23 + $0x88c] ss:$16 sps:$4 sm:$0xff]   ;;  %v10017_v57 = vld [vmem:[%s12107_s23 + $0x9a8] ss:$16 sps:$4 sm:$0xff]  }
 0x3b0   : > { %v7176_v54 = vpop.f32.mrf.mxu1  ;;  %v12841_v55 = vadd.f32 %v7174_v48, %v7134_v43  ;;  %7452 = vmatpush2.bf16.msra.mxu0 %v9963_v24  ;;  %v10019_v35 = vld [vmem:[%s12107_s23 + $0x9ac] ss:$16 sps:$4 sm:$0xff]   ;;  %v10020_v44 = vld [vmem:[%s12107_s23 + $0xa28] ss:$16 sps:$4 sm:$0xff]  }
 0x3b1   : > { %7469 = vmatpush1.bf16.msra.mxu1 %v9966_v40  ;;  %v7136_v49 = vpop.f32.mrf.mxu0  ;;  %7453 = vmatprep.subr.bf16.mxu0 %v9971_v17  ;;  %v10025_v24 = vld [vmem:[%s12107_s23 + $0x98c] ss:$16 sps:$4 sm:$0xff]   ;;  %v10023_v46 = vld [vmem:[%s12107_s23 + $0x988] ss:$16 sps:$4 sm:$0xff]  }
 0x3b2   : > { %v7177_v0 = vpop.f32.mrf.mxu1  ;;  %7470 = vmatprep.subr.bf16.mxu1 %v9974_v51  ;;  %v10028_v40 = vld [vmem:[%s12107_s23 + $0xa0c] ss:$16 sps:$4 sm:$0xff]   ;;  %v10026_v48 = vld [vmem:[%s12107_s23 + $0xa08] ss:$16 sps:$4 sm:$0xff]  }
 0x3b3   : > { %v10031_v17 = vld [vmem:[%s12107_s23 + $0x96c] ss:$16 sps:$4 sm:$0xff]   ;;  %v10029_v43 = vld [vmem:[%s12107_s23 + $0x968] ss:$16 sps:$4 sm:$0xff]  }
 0x3b4   : > { %7454 = vmatpush2.bf16.msra.mxu0 %v9969_v56  ;;  %v10034_v51 = vld [vmem:[%s12107_s23 + $0xbec] ss:$16 sps:$4 sm:$0xff]   ;;  %v10032_v63 = vld [vmem:[%s12107_s23 + $0xbe8] ss:$16 sps:$4 sm:$0xff]  }
 0x3b5   : > { %7471 = vmatpush1.bf16.msra.mxu1 %v9972_v61  ;;  %7455 = vmatprep.subr.bf16.mxu0 %v9977_v6  ;;  %v10037_v54 = vld [vmem:[%s12107_s23 + $0x94c] ss:$16 sps:$4 sm:$0xff]   ;;  %v10035_v61 = vld [vmem:[%s12107_s23 + $0x948] ss:$16 sps:$4 sm:$0xff]  }
 0x3b6   : > { %7472 = vmatprep.subr.bf16.mxu1 %v9980_v58  ;;  %v10040_v56 = vld [vmem:[%s12107_s23 + $0xbcc] ss:$16 sps:$4 sm:$0xff]   ;;  %v10038_v49 = vld [vmem:[%s12107_s23 + $0xbc8] ss:$16 sps:$4 sm:$0xff]  }
 0x3b7   : > { %v10043_v0 = vld [vmem:[%s12107_s23 + $0x92c] ss:$16 sps:$4 sm:$0xff]   ;;  %v10041_v58 = vld [vmem:[%s12107_s23 + $0x928] ss:$16 sps:$4 sm:$0xff]  }
 0x3b8   : > { %7456 = vmatpush2.bf16.msra.mxu0 %v9975_v4  ;;  %v10046_v6 = vld [vmem:[%s12107_s23 + $0xbac] ss:$16 sps:$4 sm:$0xff]   ;;  %v10044_v4 = vld [vmem:[%s12107_s23 + $0xba8] ss:$16 sps:$4 sm:$0xff]  }
 0x3b9   : > { %7473 = vmatpush1.bf16.msra.mxu1 %v9978_v5  ;;  %7507 = vmatprep.subr.bf16.mxu0 %v9986_v52  ;;  %v10049_v5 = vld [vmem:[%s12107_s23 + $0x90c] ss:$16 sps:$4 sm:$0xff]   ;;  %v10047_v52 = vld [vmem:[%s12107_s23 + $0x908] ss:$16 sps:$4 sm:$0xff]  }
 0x3ba   : > { %7474 = vmatprep.subr.bf16.mxu1 %v9983_v62  ;;  %v10052_v62 = vld [vmem:[%s12107_s23 + $0xb8c] ss:$16 sps:$4 sm:$0xff]  }
 0x3bb   : > { %7458 = vmatmul.mubr.bf16.vlgmr.msra.gmra.mxu0 %v12287_v47  ;;  %v9996_v47 = vld [vmem:[%s12107_s23 + $0xaa8] ss:$16 sps:$4 sm:$0xff]  }
 0x3bc   : > { %7508 = vmatpush1.bf16.msra.mxu0 %v9984_v1  ;;  %7539 = vmatprep.mubr.bf16.mxu0 %v12316_v60  ;;  %v10007_v60 = vld [vmem:[%s12107_s23 + $0x9ec] ss:$16 sps:$4 sm:$0xff]  }
 0x3bd   : > { %7475 = vmatpush1.bf16.msra.mxu1 %v9981_v30  ;;  %7509 = vmatprep.subr.bf16.mxu0 %v9992_v14  ;;  %v10050_v30 = vld [vmem:[%s12107_s23 + $0xb88] ss:$16 sps:$4 sm:$0xff]   ;;  %v10055_v1 = vld [vmem:[%s12107_s23 + $0xb6c] ss:$16 sps:$4 sm:$0xff]  }
 0x3be   : > { %7476 = vmatprep.subr.bf16.mxu1 %v9989_v11  ;;  %v10058_v11 = vld [vmem:[%s12107_s23 + $0xcec] ss:$16 sps:$4 sm:$0xff]   ;;  %v10053_v14 = vld [vmem:[%s12107_s23 + $0xb68] ss:$16 sps:$4 sm:$0xff]  }
 0x3c0   : > { %7510 = vmatpush1.bf16.msra.mxu0 %v9990_v15  ;;  %v10061_v15 = vld [vmem:[%s12107_s23 + $0xb4c] ss:$16 sps:$4 sm:$0xff]  }
 0x3c1   : > { %7477 = vmatpush1.bf16.msra.mxu1 %v9987_v10  ;;  %7511 = vmatprep.subr.bf16.mxu0 %v9998_v16  ;;  %v10056_v10 = vld [vmem:[%s12107_s23 + $0xce8] ss:$16 sps:$4 sm:$0xff]  }
 0x3c2   : > { %7478 = vmatprep.subr.bf16.mxu1 %v9995_v34  ;;  %v10064_v34 = vld [vmem:[%s12107_s23 + $0xccc] ss:$16 sps:$4 sm:$0xff]  }
 0x3c4   : > { %7512 = vmatpush1.bf16.msra.mxu0 %v9996_v47 }
 0x3c5   : > { %7479 = vmatpush1.bf16.msra.mxu1 %v9993_v19  ;;  %7513 = vmatprep.subr.bf16.mxu0 %v10004_v20  ;;  %v10062_v20 = vld [vmem:[%s12107_s23 + $0xcc8] ss:$16 sps:$4 sm:$0xff]  }
 0x3c6   : > { %7480 = vmatprep.subr.bf16.mxu1 %v10001_v13  ;;  %v10059_v13 = vld [vmem:[%s12107_s23 + $0xb48] ss:$16 sps:$4 sm:$0xff]  }
 0x3c8   : > { %7514 = vmatpush1.bf16.msra.mxu0 %v10002_v18 }
 0x3c9   : > { %7481 = vmatpush1.bf16.msra.mxu1 %v9999_v22  ;;  %7515 = vmatprep.subr.bf16.mxu0 %v10010_v25  ;;  %v10070_v25 = vld [vmem:[%s12107_s23 + $0xcac] ss:$16 sps:$4 sm:$0xff]  }
 0x3ca   : > { %7482 = vmatprep.subr.bf16.mxu1 %v10007_v60  ;;  %v10067_v60 = vld [vmem:[%s12107_s23 + $0xb2c] ss:$16 sps:$4 sm:$0xff]  }
 0x3cc   : > { %7516 = vmatpush1.bf16.msra.mxu0 %v10008_v28 }
 0x3cd   : > { %7483 = vmatpush2.bf16.msra.mxu1 %v10005_v27  ;;  %7517 = vmatprep.subr.bf16.mxu0 %v10016_v2  ;;  %v10065_v2 = vld [vmem:[%s12107_s23 + $0xb28] ss:$16 sps:$4 sm:$0xff]  }
 0x3ce   : > { %7484 = vmatprep.subr.bf16.mxu1 %v10013_v33 }
 0x3d0   : > { %7518 = vmatpush1.bf16.msra.mxu0 %v10014_v37 }
 0x3d1   : > { %7485 = vmatpush2.bf16.msra.mxu1 %v10011_v36  ;;  %7519 = vmatprep.subr.bf16.mxu0 %v10022_v38  ;;  %v10068_v36 = vld [vmem:[%s12107_s23 + $0xca8] ss:$16 sps:$4 sm:$0xff]  }
 0x3d2   : > { %7486 = vmatprep.subr.bf16.mxu1 %v10019_v35  ;;  %v10071_v38 = vld [vmem:[%s12107_s23 + $0xb08] ss:$16 sps:$4 sm:$0xff]  }
 0x3d4   : > { %7520 = vmatpush1.bf16.msra.mxu0 %v10020_v44  ;;  %v10079_v44 = vld [vmem:[%s12107_s23 + $0xc6c] ss:$16 sps:$4 sm:$0xff]  }
 0x3d5   : > { %7487 = vmatpush2.bf16.msra.mxu1 %v10017_v57  ;;  %7521 = vmatprep.subr.bf16.mxu0 %v10028_v40  ;;  %v10074_v57 = vld [vmem:[%s12107_s23 + $0xc88] ss:$16 sps:$4 sm:$0xff]  }
 0x3d6   : > { %7488 = vmatprep.subr.bf16.mxu1 %v10025_v24  ;;  %v10082_v24 = vld [vmem:[%s12107_s23 + $0xeec] ss:$16 sps:$4 sm:$0xff]   ;;  %v10077_v40 = vld [vmem:[%s12107_s23 + $0xc68] ss:$16 sps:$4 sm:$0xff]  }
 0x3d8   : > { %7522 = vmatpush1.bf16.msra.mxu0 %v10026_v48  ;;  %v10085_v48 = vld [vmem:[%s12107_s23 + $0xc4c] ss:$16 sps:$4 sm:$0xff]  }
 0x3d9   : > { %7489 = vmatpush2.bf16.msra.mxu1 %v10023_v46  ;;  %7523 = vmatprep.subr.bf16.mxu0 %v10034_v51  ;;  %v10080_v46 = vld [vmem:[%s12107_s23 + $0xee8] ss:$16 sps:$4 sm:$0xff]  }
 0x3da   : > { %7490 = vmatprep.subr.bf16.mxu1 %v10031_v17  ;;  %v10088_v17 = vld [vmem:[%s12107_s23 + $0xecc] ss:$16 sps:$4 sm:$0xff]  }
 0x3dc   : > { %7524 = vmatpush2.bf16.msra.mxu0 %v10032_v63  ;;  %v10083_v63 = vld [vmem:[%s12107_s23 + $0xc48] ss:$16 sps:$4 sm:$0xff]  }
 0x3dd   : > { %7491 = vmatpush2.bf16.msra.mxu1 %v10029_v43  ;;  %7525 = vmatprep.subr.bf16.mxu0 %v10040_v56 }
 0x3de   : > { %7492 = vmatprep.subr.bf16.mxu1 %v10037_v54  ;;  %v10086_v54 = vld [vmem:[%s12107_s23 + $0xec8] ss:$16 sps:$4 sm:$0xff]  }
 0x3e0   : > { %7526 = vmatpush2.bf16.msra.mxu0 %v10038_v49  ;;  %v10094_v49 = vld [vmem:[%s12107_s23 + $0xeac] ss:$16 sps:$4 sm:$0xff]  }
 0x3e1   : > { %7493 = vmatpush2.bf16.msra.mxu1 %v10035_v61  ;;  %7527 = vmatprep.subr.bf16.mxu0 %v10046_v6  ;;  %v10091_v61 = vld [vmem:[%s12107_s23 + $0xc2c] ss:$16 sps:$4 sm:$0xff]   ;;  %v10089_v6 = vld [vmem:[%s12107_s23 + $0xc28] ss:$16 sps:$4 sm:$0xff]  }
 0x3e2   : > { %7494 = vmatprep.subr.bf16.mxu1 %v10043_v0 }
 0x3e4   : > { %7528 = vmatpush2.bf16.msra.mxu0 %v10044_v4 }
 0x3e5   : > { %7495 = vmatpush2.bf16.msra.mxu1 %v10041_v58  ;;  %7529 = vmatprep.subr.bf16.mxu0 %v10052_v62  ;;  %v10092_v58 = vld [vmem:[%s12107_s23 + $0xea8] ss:$16 sps:$4 sm:$0xff]   ;;  %v10100_v62 = vld [vmem:[%s12107_s23 + $0xe8c] ss:$16 sps:$4 sm:$0xff]  }
 0x3e6   : > { %7496 = vmatprep.subr.bf16.mxu1 %v10049_v5  ;;  %v10097_v5 = vld [vmem:[%s12107_s23 + $0xc0c] ss:$16 sps:$4 sm:$0xff]  }
 0x3e8   : > { %7530 = vmatpush2.bf16.msra.mxu0 %v10050_v30  ;;  %v10103_v30 = vld [vmem:[%s12107_s23 + $0xdec] ss:$16 sps:$4 sm:$0xff]  }
 0x3e9   : > { %7497 = vmatpush2.bf16.msra.mxu1 %v10047_v52  ;;  %7531 = vmatprep.subr.bf16.mxu0 %v10055_v1  ;;  %v10095_v52 = vld [vmem:[%s12107_s23 + $0xc08] ss:$16 sps:$4 sm:$0xff]   ;;  %v10106_v1 = vld [vmem:[%s12107_s23 + $0xe6c] ss:$16 sps:$4 sm:$0xff]  }
 0x3ea   : > { %7548 = vmatprep.subr.bf16.mxu1 %v10058_v11  ;;  %v10101_v11 = vld [vmem:[%s12107_s23 + $0xde8] ss:$16 sps:$4 sm:$0xff]  }
 0x3eb   : > { %v7213_v16 = vpop.f32.mrf.mxu0 }
 0x3ec   : > { %v7254_v19 = vpop.f32.mrf.mxu1  ;;  %7499 = vmatmul.mubr.bf16.vlgmr.msra.gmra.mxu1 %v12381_v3  ;;  %v7214_v47 = vadd.f32 %v7213_v16, %v12837_v53  ;;  %7532 = vmatpush2.bf16.msra.mxu0 %v10053_v14  ;;  %v10104_v14 = vld [vmem:[%s12107_s23 + $0xe68] ss:$16 sps:$4 sm:$0xff]  }
 0x3ed   : > { %7549 = vmatpush1.bf16.msra.mxu1 %v10056_v10  ;;  %v7215_v22 = vpop.f32.mrf.mxu0  ;;  %7533 = vmatprep.subr.bf16.mxu0 %v10061_v15  ;;  %v10109_v10 = vld [vmem:[%s12107_s23 + $0xdcc] ss:$16 sps:$4 sm:$0xff]   ;;  %v10110_v16 = vld [vmem:[%s12107_s23 + $0xe48] ss:$16 sps:$4 sm:$0xff]  }
 0x3ee   : > { %v7256_v18 = vpop.f32.mrf.mxu1  ;;  %7550 = vmatprep.subr.bf16.mxu1 %v10064_v34  ;;  %v7255_v27 = vadd.f32 %v7254_v19, %v7214_v47  ;;  %v7216_v28 = vadd.f32 %v7215_v22, %v12841_v55  ;;  %7580 = vmatprep.mubr.bf16.mxu1 %v12387_v7  ;;  %v10073_v55 = vld [vmem:[%s12107_s23 + $0xb0c] ss:$16 sps:$4 sm:$0xff]   ;;  %v10107_v34 = vld [vmem:[%s12107_s23 + $0xdc8] ss:$16 sps:$4 sm:$0xff]  }
 0x3ef   : > { %v7217_v3 = vpop.f32.mrf.mxu0  ;;  %v10076_v7 = vld [vmem:[%s12107_s23 + $0xc8c] ss:$16 sps:$4 sm:$0xff]  }
 0x3f0   : > { %v7258_v53 = vpop.f32.mrf.mxu1  ;;  %v7257_v33 = vadd.f32 %v7256_v18, %v7216_v28  ;;  %7534 = vmatpush2.bf16.msra.mxu0 %v10059_v13  ;;  %v10112_v15 = vld [vmem:[%s12107_s23 + $0xe4c] ss:$16 sps:$4 sm:$0xff]   ;;  %v10113_v13 = vld [vmem:[%s12107_s23 + $0xda8] ss:$16 sps:$4 sm:$0xff]  }
 0x3f1   : > { %7551 = vmatpush1.bf16.msra.mxu1 %v10062_v20  ;;  %v7218_v37 = vpop.f32.mrf.mxu0  ;;  %7535 = vmatprep.subr.bf16.mxu0 %v10067_v60  ;;  %v10115_v19 = vld [vmem:[%s12107_s23 + $0xdac] ss:$16 sps:$4 sm:$0xff]   ;;  %v10116_v20 = vld [vmem:[%s12107_s23 + $0xe28] ss:$16 sps:$4 sm:$0xff]  }
 0x3f2   : > { %v7259_v35 = vpop.f32.mrf.mxu1  ;;  %7552 = vmatprep.subr.bf16.mxu1 %v10070_v25  ;;  %v10118_v47 = vld [vmem:[%s12107_s23 + $0xe2c] ss:$16 sps:$4 sm:$0xff]   ;;  %v10119_v60 = vld [vmem:[%s12107_s23 + $0xd88] ss:$16 sps:$4 sm:$0xff]  }
 0x3f3   : > { %v10121_v22 = vld [vmem:[%s12107_s23 + $0xd8c] ss:$16 sps:$4 sm:$0xff]   ;;  %v10122_v25 = vld [vmem:[%s12107_s23 + $0xe08] ss:$16 sps:$4 sm:$0xff]  }
 0x3f4   : > { %7536 = vmatpush2.bf16.msra.mxu0 %v10065_v2  ;;  %v10124_v18 = vld [vmem:[%s12107_s23 + $0xe0c] ss:$16 sps:$4 sm:$0xff]   ;;  %v10125_v3 = vld [vmem:[%s12107_s23 + $0xd68] ss:$16 sps:$4 sm:$0xff]  }
 0x3f5   : > { %7553 = vmatpush1.bf16.msra.mxu1 %v10068_v36  ;;  %7537 = vmatprep.subr.bf16.mxu0 %v10073_v55  ;;  %v10130_v28 = vld [vmem:[%s12107_s23 + $0xfec] ss:$16 sps:$4 sm:$0xff]   ;;  %v10128_v53 = vld [vmem:[%s12107_s23 + $0xfe8] ss:$16 sps:$4 sm:$0xff]  }
 0x3f6   : > { %7554 = vmatprep.subr.bf16.mxu1 %v10076_v7  ;;  %v10136_v2 = vld [vmem:[%s12107_s23 + $0xfcc] ss:$16 sps:$4 sm:$0xff]   ;;  %v10131_v36 = vld [vmem:[%s12107_s23 + $0xd48] ss:$16 sps:$4 sm:$0xff]  }
 0x3f7   : > { %v10134_v37 = vld [vmem:[%s12107_s23 + $0xfc8] ss:$16 sps:$4 sm:$0xff]   ;;  %v10139_v35 = vld [vmem:[%s12107_s23 + $0xd2c] ss:$16 sps:$4 sm:$0xff]  }
 0x3f8   : > { %7538 = vmatpush2.bf16.msra.mxu0 %v10071_v38  ;;  %v10142_v55 = vld [vmem:[%s12107_s23 + $0xfac] ss:$16 sps:$4 sm:$0xff]   ;;  %v10137_v7 = vld [vmem:[%s12107_s23 + $0xd28] ss:$16 sps:$4 sm:$0xff]  }
 0x3f9   : > { %7555 = vmatpush1.bf16.msra.mxu1 %v10074_v57  ;;  %7589 = vmatprep.subr.bf16.mxu0 %v10082_v24  ;;  %v10140_v38 = vld [vmem:[%s12107_s23 + $0xfa8] ss:$16 sps:$4 sm:$0xff]   ;;  %v10145_v57 = vld [vmem:[%s12107_s23 + $0xd0c] ss:$16 sps:$4 sm:$0xff]  }
 0x3fa   : > { %7556 = vmatprep.subr.bf16.mxu1 %v10079_v44  ;;  %v10148_v44 = vld [vmem:[%s12107_s23 + $0xf8c] ss:$16 sps:$4 sm:$0xff]   ;;  %v10143_v24 = vld [vmem:[%s12107_s23 + $0xd08] ss:$16 sps:$4 sm:$0xff]  }
 0x3fb   : > { %v7295_v51 = vpop.f32.mrf.mxu0  ;;  %7540 = vmatmul.mubr.bf16.vlgmr.msra.gmra.mxu0 %v12391_v8 }
 0x3fc   : > { %v12926_v43 = vadd.f32 %v7295_v51, %v7255_v27  ;;  %7590 = vmatpush1.bf16.msra.mxu0 %v10080_v46  ;;  %7621 = vmatprep.mubr.bf16.mxu0 %v12399_v12  ;;  %v10098_v12 = vld [vmem:[%s12107_s23 + $0xe88] ss:$16 sps:$4 sm:$0xff]   ;;  %v10127_v27 = vld [vmem:[%s12107_s23 + $0xd6c] ss:$16 sps:$4 sm:$0xff]  }
 0x3fd   : > { %7557 = vmatpush1.bf16.msra.mxu1 %v10077_v40  ;;  %v7297_v56 = vpop.f32.mrf.mxu0  ;;  %7591 = vmatprep.subr.bf16.mxu0 %v10088_v17  ;;  %v10146_v40 = vld [vmem:[%s12107_s23 + $0xf88] ss:$16 sps:$4 sm:$0xff]   ;;  %v10151_v46 = vld [vmem:[%s12107_s23 + $0xf6c] ss:$16 sps:$4 sm:$0xff]  }
 0x3fe   : > { %7558 = vmatprep.subr.bf16.mxu1 %v10085_v48  ;;  %v12932_v0 = vadd.f32 %v7297_v56, %v7257_v33  ;;  %v10133_v33 = vld [vmem:[%s12107_s23 + $0xd4c] ss:$16 sps:$4 sm:$0xff]   ;;  %v10149_v17 = vld [vmem:[%s12107_s23 + $0xf68] ss:$16 sps:$4 sm:$0xff]  }
 0x3ff   : > { %v7299_v8 = vpop.f32.mrf.mxu0  ;;  %v10154_v48 = vld [vmem:[%s12107_s23 + $0x10ec] ss:$16 sps:$4 sm:$0xff]   ;;  %v10152_v51 = vld [vmem:[%s12107_s23 + $0x10e8] ss:$16 sps:$4 sm:$0xff]  }
 0x400   : > { %7592 = vmatpush1.bf16.msra.mxu0 %v10086_v54  ;;  %v10160_v54 = vld [vmem:[%s12107_s23 + $0x10cc] ss:$16 sps:$4 sm:$0xff]  }
 0x401   : > { %7559 = vmatpush1.bf16.msra.mxu1 %v10083_v63  ;;  %v7300_v4 = vpop.f32.mrf.mxu0  ;;  %7593 = vmatprep.subr.bf16.mxu0 %v10094_v49  ;;  %v10157_v63 = vld [vmem:[%s12107_s23 + $0xf4c] ss:$16 sps:$4 sm:$0xff]   ;;  %v10158_v49 = vld [vmem:[%s12107_s23 + $0x10c8] ss:$16 sps:$4 sm:$0xff]  }
 0x402   : > { %7560 = vmatprep.subr.bf16.mxu1 %v10091_v61  ;;  %v10155_v61 = vld [vmem:[%s12107_s23 + $0xf48] ss:$16 sps:$4 sm:$0xff]  }
 0x404   : > { %7594 = vmatpush1.bf16.msra.mxu0 %v10092_v58  ;;  %v10166_v58 = vld [vmem:[%s12107_s23 + $0x10ac] ss:$16 sps:$4 sm:$0xff]  }
 0x405   : > { %7561 = vmatpush1.bf16.msra.mxu1 %v10089_v6  ;;  %7595 = vmatprep.subr.bf16.mxu0 %v10100_v62  ;;  %v10163_v6 = vld [vmem:[%s12107_s23 + $0xf2c] ss:$16 sps:$4 sm:$0xff]  }
 0x406   : > { %7562 = vmatprep.subr.bf16.mxu1 %v10097_v5  ;;  %v10164_v5 = vld [vmem:[%s12107_s23 + $0x10a8] ss:$16 sps:$4 sm:$0xff]  }
 0x408   : > { %7596 = vmatpush1.bf16.msra.mxu0 %v10098_v12  ;;  %v10172_v12 = vld [vmem:[%s12107_s23 + $0x108c] ss:$16 sps:$4 sm:$0xff]  }
 0x409   : > { %7563 = vmatpush1.bf16.msra.mxu1 %v10095_v52  ;;  %7597 = vmatprep.subr.bf16.mxu0 %v10106_v1  ;;  %v10169_v52 = vld [vmem:[%s12107_s23 + $0xf0c] ss:$16 sps:$4 sm:$0xff]   ;;  %v10167_v1 = vld [vmem:[%s12107_s23 + $0xf08] ss:$16 sps:$4 sm:$0xff]  }
 0x40a   : > { %7564 = vmatprep.subr.bf16.mxu1 %v10103_v30  ;;  %v2646_v30 = vsub.s32 2, %v12149_v59 }
 0x40c   : > { %7598 = vmatpush1.bf16.msra.mxu0 %v10104_v14  ;;  %v10175_v14 = vld [vmem:[%s12107_s23 + $0x106c] ss:$16 sps:$4 sm:$0xff]  }
 0x40d   : > { %7565 = vmatpush2.bf16.msra.mxu1 %v10101_v11  ;;  %7599 = vmatprep.subr.bf16.mxu0 %v10112_v15  ;;  %v10170_v11 = vld [vmem:[%s12107_s23 + $0x1088] ss:$16 sps:$4 sm:$0xff]   ;;  %v10397_v15 = vld [vmem:[%s12100_s14] sm:$0xf] }
 0x40e   : > { %7566 = vmatprep.subr.bf16.mxu1 %v10109_v10  ;;  %v10178_v10 = vld [vmem:[%s12107_s23 + $0x12ec] ss:$16 sps:$4 sm:$0xff]  }
 0x410   : > { %7600 = vmatpush1.bf16.msra.mxu0 %v10110_v16 }
 0x411   : > { %7567 = vmatpush2.bf16.msra.mxu1 %v10107_v34  ;;  %7601 = vmatprep.subr.bf16.mxu0 %v10118_v47  ;;  %v2647_v34 = vrot.slane %v10397_v15, %v2646_v30  ;;  %v10176_v47 = vld [vmem:[%s12107_s23 + $0x12e8] ss:$16 sps:$4 sm:$0xff]  }
 0x412   : > { %7568 = vmatprep.subr.bf16.mxu1 %v10115_v19  ;;  %v10173_v19 = vld [vmem:[%s12107_s23 + $0x1068] ss:$16 sps:$4 sm:$0xff]  }
 0x413   : > { %v10230_v30 = vld [vmem:[%s12107_s23 + $0x13c8] ss:$16 sps:$4 sm:$0xff]  }
 0x414   : > { %7602 = vmatpush1.bf16.msra.mxu0 %v10116_v20 }
 0x415   : > { %7569 = vmatpush2.bf16.msra.mxu1 %v10113_v13  ;;  %7603 = vmatprep.subr.bf16.mxu0 %v10124_v18  ;;  %v10184_v13 = vld [vmem:[%s12107_s23 + $0x12cc] ss:$16 sps:$4 sm:$0xff]  }
 0x416   : > { %7570 = vmatprep.subr.bf16.mxu1 %v10121_v22 }
 0x418   : > { %7604 = vmatpush1.bf16.msra.mxu0 %v10122_v25  ;;  %v10179_v25 = vld [vmem:[%s12107_s23 + $0x1048] ss:$16 sps:$4 sm:$0xff]  }
 0x419   : > { %7571 = vmatpush2.bf16.msra.mxu1 %v10119_v60  ;;  %7605 = vmatprep.subr.bf16.mxu0 %v10130_v28 }
 0x41a   : > { %7572 = vmatprep.subr.bf16.mxu1 %v10127_v27  ;;  %v10182_v27 = vld [vmem:[%s12107_s23 + $0x12c8] ss:$16 sps:$4 sm:$0xff]  }
 0x41c   : > { %7606 = vmatpush2.bf16.msra.mxu0 %v10128_v53  ;;  %v10190_v53 = vld [vmem:[%s12107_s23 + $0x12ac] ss:$16 sps:$4 sm:$0xff]  }
 0x41d   : > { %7573 = vmatpush2.bf16.msra.mxu1 %v10125_v3  ;;  %7607 = vmatprep.subr.bf16.mxu0 %v10136_v2  ;;  %v10187_v3 = vld [vmem:[%s12107_s23 + $0x102c] ss:$16 sps:$4 sm:$0xff]   ;;  %v10185_v2 = vld [vmem:[%s12107_s23 + $0x1028] ss:$16 sps:$4 sm:$0xff]  }
 0x41e   : > { %7574 = vmatprep.subr.bf16.mxu1 %v10133_v33 }
 0x420   : > { %7608 = vmatpush2.bf16.msra.mxu0 %v10134_v37 }
 0x421   : > { %7575 = vmatpush2.bf16.msra.mxu1 %v10131_v36  ;;  %7609 = vmatprep.subr.bf16.mxu0 %v10142_v55  ;;  %v10188_v36 = vld [vmem:[%s12107_s23 + $0x12a8] ss:$16 sps:$4 sm:$0xff]   ;;  %v10196_v55 = vld [vmem:[%s12107_s23 + $0x128c] ss:$16 sps:$4 sm:$0xff]  }
 0x422   : > { %7576 = vmatprep.subr.bf16.mxu1 %v10139_v35  ;;  %v10193_v35 = vld [vmem:[%s12107_s23 + $0x100c] ss:$16 sps:$4 sm:$0xff]  }
 0x424   : > { %7610 = vmatpush2.bf16.msra.mxu0 %v10140_v38  ;;  %v10199_v38 = vld [vmem:[%s12107_s23 + $0x11ec] ss:$16 sps:$4 sm:$0xff]  }
 0x425   : > { %7577 = vmatpush2.bf16.msra.mxu1 %v10137_v7  ;;  %7611 = vmatprep.subr.bf16.mxu0 %v10148_v44  ;;  %v10191_v7 = vld [vmem:[%s12107_s23 + $0x1008] ss:$16 sps:$4 sm:$0xff]  }
 0x426   : > { %7578 = vmatprep.subr.bf16.mxu1 %v10145_v57  ;;  %v10202_v57 = vld [vmem:[%s12107_s23 + $0x126c] ss:$16 sps:$4 sm:$0xff]   ;;  %v10197_v44 = vld [vmem:[%s12107_s23 + $0x11e8] ss:$16 sps:$4 sm:$0xff]  }
 0x428   : > { %7612 = vmatpush2.bf16.msra.mxu0 %v10146_v40  ;;  %v10205_v40 = vld [vmem:[%s12107_s23 + $0x11cc] ss:$16 sps:$4 sm:$0xff]  }
 0x429   : > { %7579 = vmatpush2.bf16.msra.mxu1 %v10143_v24  ;;  %7613 = vmatprep.subr.bf16.mxu0 %v10151_v46  ;;  %v10200_v24 = vld [vmem:[%s12107_s23 + $0x1268] ss:$16 sps:$4 sm:$0xff]   ;;  %v10208_v46 = vld [vmem:[%s12107_s23 + $0x124c] ss:$16 sps:$4 sm:$0xff]  }
 0x42a   : > { %7630 = vmatprep.subr.bf16.mxu1 %v10154_v48  ;;  %v10203_v48 = vld [vmem:[%s12107_s23 + $0x11c8] ss:$16 sps:$4 sm:$0xff]  }
 0x42c   : > { %v7336_v56 = vpop.f32.mrf.mxu1  ;;  %7581 = vmatmul.mubr.bf16.vlgmr.msra.gmra.mxu1 %v12477_v32  ;;  %7614 = vmatpush2.bf16.msra.mxu0 %v10149_v17  ;;  %v10161_v32 = vld [vmem:[%s12107_s23 + $0xf28] ss:$16 sps:$4 sm:$0xff]  }
 0x42d   : > { %7631 = vmatpush1.bf16.msra.mxu1 %v10152_v51  ;;  %7615 = vmatprep.subr.bf16.mxu0 %v10157_v63  ;;  %v7337_v20 = vadd.f32 %v7336_v56, %v2647_v34  ;;  %v10206_v17 = vld [vmem:[%s12107_s23 + $0x1248] ss:$16 sps:$4 sm:$0xff]   ;;  %v10211_v51 = vld [vmem:[%s12107_s23 + $0x11ac] ss:$16 sps:$4 sm:$0xff]  }
 0x42e   : > { %v7338_v8 = vpop.f32.mrf.mxu1  ;;  %7632 = vmatprep.subr.bf16.mxu1 %v10160_v54  ;;  %7662 = vmatprep.mubr.bf16.mxu1 %v12484_v39  ;;  %v2650_v39 = vsub.s32 3, %v12149_v59  ;;  %v10181_v59 = vld [vmem:[%s12107_s23 + $0x104c] ss:$16 sps:$4 sm:$0xff]   ;;  %v10209_v54 = vld [vmem:[%s12107_s23 + $0x11a8] ss:$16 sps:$4 sm:$0xff]  }
 0x42f   : > { %v10214_v63 = vld [vmem:[%s12107_s23 + $0x122c] ss:$16 sps:$4 sm:$0xff]   ;;  %v10212_v56 = vld [vmem:[%s12107_s23 + $0x1228] ss:$16 sps:$4 sm:$0xff]  }
 0x430   : > { %v7340_v4 = vpop.f32.mrf.mxu1  ;;  %7616 = vmatpush2.bf16.msra.mxu0 %v10155_v61  ;;  %v2651_v16 = vrot.slane %v10397_v15, %v2650_v39  ;;  %v10217_v61 = vld [vmem:[%s12107_s23 + $0x118c] ss:$16 sps:$4 sm:$0xff]   ;;  %v10239_v34 = vld [vmem:[%s12107_s23 + $0x1108] ss:$16 sps:$4 sm:$0xff]  }
 0x431   : > { %7633 = vmatpush1.bf16.msra.mxu1 %v10158_v49  ;;  %7617 = vmatprep.subr.bf16.mxu0 %v10163_v6  ;;  %v10220_v49 = vld [vmem:[%s12107_s23 + $0x120c] ss:$16 sps:$4 sm:$0xff]   ;;  %v10218_v6 = vld [vmem:[%s12107_s23 + $0x1208] ss:$16 sps:$4 sm:$0xff]  }
 0x432   : > { %v7341_v62 = vpop.f32.mrf.mxu1  ;;  %7634 = vmatprep.subr.bf16.mxu1 %v10166_v58  ;;  %v7339_v18 = vadd.f32 %v7338_v8, %v2651_v16  ;;  %v10215_v8 = vld [vmem:[%s12107_s23 + $0x1188] ss:$16 sps:$4 sm:$0xff]   ;;  %v10223_v58 = vld [vmem:[%s12107_s23 + $0x116c] ss:$16 sps:$4 sm:$0xff]  }
 0x433   : > { %v10226_v4 = vld [vmem:[%s12107_s23 + $0x13ec] ss:$16 sps:$4 sm:$0xff]   ;;  %v10242_v16 = vld [vmem:[%s12107_s23 + $0x1388] ss:$16 sps:$4 sm:$0xff]  }
 0x434   : > { %7618 = vmatpush2.bf16.msra.mxu0 %v10161_v32  ;;  %v10221_v32 = vld [vmem:[%s12107_s23 + $0x1168] ss:$16 sps:$4 sm:$0xff]   ;;  %v10229_v62 = vld [vmem:[%s12107_s23 + $0x114c] ss:$16 sps:$4 sm:$0xff]  }
 0x435   : > { %7635 = vmatpush1.bf16.msra.mxu1 %v10164_v5  ;;  %7619 = vmatprep.subr.bf16.mxu0 %v10169_v52  ;;  %v10224_v5 = vld [vmem:[%s12107_s23 + $0x13e8] ss:$16 sps:$4 sm:$0xff]   ;;  %v10232_v52 = vld [vmem:[%s12107_s23 + $0x13cc] ss:$16 sps:$4 sm:$0xff]  }
 0x436   : > { %7636 = vmatprep.subr.bf16.mxu1 %v10172_v12  ;;  %v10227_v12 = vld [vmem:[%s12107_s23 + $0x1148] ss:$16 sps:$4 sm:$0xff]   ;;  %v10235_v39 = vld [vmem:[%s12107_s23 + $0x112c] ss:$16 sps:$4 sm:$0xff]  }
 0x437   : > { %v10244_v15 = vld [vmem:[%s12107_s23 + $0x138c] ss:$16 sps:$4 sm:$0xff]  }
 0x438   : > { %7620 = vmatpush2.bf16.msra.mxu0 %v10167_v1  ;;  %v10238_v1 = vld [vmem:[%s12107_s23 + $0x13ac] ss:$16 sps:$4 sm:$0xff]  }
 0x439   : > { %7637 = vmatpush1.bf16.msra.mxu1 %v10170_v11  ;;  %7671 = vmatprep.subr.bf16.mxu0 %v10178_v10  ;;  %v10233_v11 = vld [vmem:[%s12107_s23 + $0x1128] ss:$16 sps:$4 sm:$0xff]   ;;  %v10241_v10 = vld [vmem:[%s12107_s23 + $0x110c] ss:$16 sps:$4 sm:$0xff]  }
 0x43a   : > { %7638 = vmatprep.subr.bf16.mxu1 %v10175_v14  ;;  %v10236_v14 = vld [vmem:[%s12107_s23 + $0x13a8] ss:$16 sps:$4 sm:$0xff]  }
 0x43b   : > { %v7377_v22 = vpop.f32.mrf.mxu0  ;;  %7622 = vmatmul.mubr.bf16.vlgmr.msra.gmra.mxu0 %v12488_v41 }
 0x43c   : > { %v13001_v60 = vadd.f32 %v7377_v22, %v7337_v20  ;;  %7672 = vmatpush1.bf16.msra.mxu0 %v10176_v47  ;;  %7703 = vmatprep.mubr.bf16.mxu0 %v12496_v23  ;;  %v10194_v23 = vld [vmem:[%s12107_s23 + $0x1288] ss:$16 sps:$4 sm:$0xff]   ;;  %v10250_v47 = vld [vmem:[%s12107_s23 + $0x14ec] ss:$16 sps:$4 sm:$0xff]  }
 0x43d   : > { %7639 = vmatpush1.bf16.msra.mxu1 %v10173_v19  ;;  %v7379_v28 = vpop.f32.mrf.mxu0  ;;  %7673 = vmatprep.subr.bf16.mxu0 %v10184_v13  ;;  %v10247_v19 = vld [vmem:[%s12107_s23 + $0x136c] ss:$16 sps:$4 sm:$0xff]   ;;  %v10248_v13 = vld [vmem:[%s12107_s23 + $0x14e8] ss:$16 sps:$4 sm:$0xff]  }
 0x43e   : > { %7640 = vmatprep.subr.bf16.mxu1 %v10181_v59  ;;  %v13007_v33 = vadd.f32 %v7379_v28, %v7339_v18  ;;  %v10245_v59 = vld [vmem:[%s12107_s23 + $0x1368] ss:$16 sps:$4 sm:$0xff]   ;;  %v10253_v20 = vld [vmem:[%s12107_s23 + $0x134c] ss:$16 sps:$4 sm:$0xff]  }
 0x43f   : > { %v7381_v41 = vpop.f32.mrf.mxu0  ;;  %v10256_v22 = vld [vmem:[%s12107_s23 + $0x14cc] ss:$16 sps:$4 sm:$0xff]   ;;  %v10254_v28 = vld [vmem:[%s12107_s23 + $0x14c8] ss:$16 sps:$4 sm:$0xff]  }
 0x440   : > { %7674 = vmatpush1.bf16.msra.mxu0 %v10182_v27  ;;  %v10251_v27 = vld [vmem:[%s12107_s23 + $0x1348] ss:$16 sps:$4 sm:$0xff]   ;;  %v10262_v41 = vld [vmem:[%s12107_s23 + $0x14ac] ss:$16 sps:$4 sm:$0xff]  }
 0x441   : > { %7641 = vmatpush1.bf16.msra.mxu1 %v10179_v25  ;;  %v7382_v37 = vpop.f32.mrf.mxu0  ;;  %7675 = vmatprep.subr.bf16.mxu0 %v10190_v53  ;;  %v10259_v53 = vld [vmem:[%s12107_s23 + $0x132c] ss:$16 sps:$4 sm:$0xff]  }
 0x442   : > { %7642 = vmatprep.subr.bf16.mxu1 %v10187_v3 }
 0x444   : > { %7676 = vmatpush1.bf16.msra.mxu0 %v10188_v36  ;;  %v10260_v36 = vld [vmem:[%s12107_s23 + $0x14a8] ss:$16 sps:$4 sm:$0xff]  }
 0x445   : > { %7643 = vmatpush1.bf16.msra.mxu1 %v10185_v2  ;;  %7677 = vmatprep.subr.bf16.mxu0 %v10196_v55  ;;  %v10268_v55 = vld [vmem:[%s12107_s23 + $0x148c] ss:$16 sps:$4 sm:$0xff]  }
 0x446   : > { %7644 = vmatprep.subr.bf16.mxu1 %v10193_v35  ;;  %v10265_v35 = vld [vmem:[%s12107_s23 + $0x130c] ss:$16 sps:$4 sm:$0xff]  }
 0x448   : > { %7678 = vmatpush1.bf16.msra.mxu0 %v10194_v23  ;;  %v10274_v23 = vld [vmem:[%s12107_s23 + $0x16ec] ss:$16 sps:$4 sm:$0xff]  }
 0x449   : > { %7645 = vmatpush1.bf16.msra.mxu1 %v10191_v7  ;;  %7679 = vmatprep.subr.bf16.mxu0 %v10202_v57  ;;  %v10271_v7 = vld [vmem:[%s12107_s23 + $0x146c] ss:$16 sps:$4 sm:$0xff]   ;;  %v10272_v57 = vld [vmem:[%s12107_s23 + $0x16e8] ss:$16 sps:$4 sm:$0xff]  }
 0x44a   : > { %7646 = vmatprep.subr.bf16.mxu1 %v10199_v38  ;;  %v10269_v38 = vld [vmem:[%s12107_s23 + $0x1468] ss:$16 sps:$4 sm:$0xff]  }
 0x44c   : > { %7680 = vmatpush1.bf16.msra.mxu0 %v10200_v24  ;;  %v10280_v24 = vld [vmem:[%s12107_s23 + $0x16cc] ss:$16 sps:$4 sm:$0xff]  }
 0x44d   : > { %7647 = vmatpush2.bf16.msra.mxu1 %v10197_v44  ;;  %7681 = vmatprep.subr.bf16.mxu0 %v10208_v46  ;;  %v10277_v44 = vld [vmem:[%s12107_s23 + $0x144c] ss:$16 sps:$4 sm:$0xff]  }
 0x44e   : > { %7648 = vmatprep.subr.bf16.mxu1 %v10205_v40 }
 0x450   : > { %7682 = vmatpush1.bf16.msra.mxu0 %v10206_v17  ;;  %v10278_v17 = vld [vmem:[%s12107_s23 + $0x16c8] ss:$16 sps:$4 sm:$0xff]  }
 0x451   : > { %7649 = vmatpush2.bf16.msra.mxu1 %v10203_v48  ;;  %7683 = vmatprep.subr.bf16.mxu0 %v10214_v63  ;;  %v10275_v48 = vld [vmem:[%s12107_s23 + $0x1448] ss:$16 sps:$4 sm:$0xff]   ;;  %v10283_v63 = vld [vmem:[%s12107_s23 + $0x142c] ss:$16 sps:$4 sm:$0xff]  }
 0x452   : > { %7650 = vmatprep.subr.bf16.mxu1 %v10211_v51 }
 0x454   : > { %7684 = vmatpush1.bf16.msra.mxu0 %v10212_v56 }
 0x455   : > { %7651 = vmatpush2.bf16.msra.mxu1 %v10209_v54  ;;  %7685 = vmatprep.subr.bf16.mxu0 %v10220_v49  ;;  %v10286_v54 = vld [vmem:[%s12107_s23 + $0x16ac] ss:$16 sps:$4 sm:$0xff]   ;;  %v10284_v49 = vld [vmem:[%s12107_s23 + $0x16a8] ss:$16 sps:$4 sm:$0xff]  }
 0x456   : > { %7652 = vmatprep.subr.bf16.mxu1 %v10217_v61  ;;  %v10281_v61 = vld [vmem:[%s12107_s23 + $0x1428] ss:$16 sps:$4 sm:$0xff]  }
 0x458   : > { %7686 = vmatpush1.bf16.msra.mxu0 %v10218_v6  ;;  %v10289_v6 = vld [vmem:[%s12107_s23 + $0x140c] ss:$16 sps:$4 sm:$0xff]  }
 0x459   : > { %7653 = vmatpush2.bf16.msra.mxu1 %v10215_v8  ;;  %7687 = vmatprep.subr.bf16.mxu0 %v10226_v4  ;;  %v10287_v4 = vld [vmem:[%s12107_s23 + $0x1408] ss:$16 sps:$4 sm:$0xff]  }
 0x45a   : > { %7654 = vmatprep.subr.bf16.mxu1 %v10223_v58  ;;  %v10292_v58 = vld [vmem:[%s12107_s23 + $0x168c] ss:$16 sps:$4 sm:$0xff]  }
 0x45c   : > { %7688 = vmatpush2.bf16.msra.mxu0 %v10224_v5  ;;  %v10298_v5 = vld [vmem:[%s12107_s23 + $0x166c] ss:$16 sps:$4 sm:$0xff]  }
 0x45d   : > { %7655 = vmatpush2.bf16.msra.mxu1 %v10221_v32  ;;  %7689 = vmatprep.subr.bf16.mxu0 %v10232_v52  ;;  %v10295_v32 = vld [vmem:[%s12107_s23 + $0x15ec] ss:$16 sps:$4 sm:$0xff]   ;;  %v10296_v52 = vld [vmem:[%s12107_s23 + $0x1668] ss:$16 sps:$4 sm:$0xff]  }
 0x45e   : > { %7656 = vmatprep.subr.bf16.mxu1 %v10229_v62  ;;  %v10293_v62 = vld [vmem:[%s12107_s23 + $0x15e8] ss:$16 sps:$4 sm:$0xff]  }
 0x460   : > { %7690 = vmatpush2.bf16.msra.mxu0 %v10230_v30  ;;  %v10304_v30 = vld [vmem:[%s12107_s23 + $0x164c] ss:$16 sps:$4 sm:$0xff]  }
 0x461   : > { %7657 = vmatpush2.bf16.msra.mxu1 %v10227_v12  ;;  %7691 = vmatprep.subr.bf16.mxu0 %v10238_v1  ;;  %v10301_v12 = vld [vmem:[%s12107_s23 + $0x15cc] ss:$16 sps:$4 sm:$0xff]   ;;  %v10302_v1 = vld [vmem:[%s12107_s23 + $0x1648] ss:$16 sps:$4 sm:$0xff]  }
 0x462   : > { %7658 = vmatprep.subr.bf16.mxu1 %v10235_v39  ;;  %v10299_v39 = vld [vmem:[%s12107_s23 + $0x15c8] ss:$16 sps:$4 sm:$0xff]  }
 0x464   : > { %7692 = vmatpush2.bf16.msra.mxu0 %v10236_v14  ;;  %v10310_v14 = vld [vmem:[%s12107_s23 + $0x162c] ss:$16 sps:$4 sm:$0xff]  }
 0x465   : > { %7659 = vmatpush2.bf16.msra.mxu1 %v10233_v11  ;;  %7693 = vmatprep.subr.bf16.mxu0 %v10244_v15  ;;  %v10307_v11 = vld [vmem:[%s12107_s23 + $0x15ac] ss:$16 sps:$4 sm:$0xff]   ;;  %v10308_v15 = vld [vmem:[%s12107_s23 + $0x1628] ss:$16 sps:$4 sm:$0xff]  }
 0x466   : > { %7660 = vmatprep.subr.bf16.mxu1 %v10241_v10  ;;  %v10305_v10 = vld [vmem:[%s12107_s23 + $0x15a8] ss:$16 sps:$4 sm:$0xff]  }
 0x468   : > { %7694 = vmatpush2.bf16.msra.mxu0 %v10242_v16  ;;  %v10316_v16 = vld [vmem:[%s12107_s23 + $0x160c] ss:$16 sps:$4 sm:$0xff]  }
 0x469   : > { %7661 = vmatpush2.bf16.msra.mxu1 %v10239_v34  ;;  %7695 = vmatprep.subr.bf16.mxu0 %v10247_v19  ;;  %v10313_v34 = vld [vmem:[%s12107_s23 + $0x158c] ss:$16 sps:$4 sm:$0xff]   ;;  %v10311_v19 = vld [vmem:[%s12107_s23 + $0x1588] ss:$16 sps:$4 sm:$0xff]  }
 0x46a   : > { %7712 = vmatprep.subr.bf16.mxu1 %v10250_v47  ;;  %v10314_v47 = vld [vmem:[%s12107_s23 + $0x1608] ss:$16 sps:$4 sm:$0xff]  }
 0x46c   : > { %v7418_v18 = vpop.f32.mrf.mxu1  ;;  %7663 = vmatmul.mubr.bf16.vlgmr.msra.gmra.mxu1 %v12571_v29  ;;  %7696 = vmatpush2.bf16.msra.mxu0 %v10245_v59  ;;  %v10319_v59 = vld [vmem:[%s12107_s23 + $0x156c] ss:$16 sps:$4 sm:$0xff]  }
 0x46d   : > { %v7419_v25 = vadd.f32 %v7418_v18, %v13001_v60  ;;  %7713 = vmatpush1.bf16.msra.mxu1 %v10248_v13  ;;  %7697 = vmatprep.subr.bf16.mxu0 %v10253_v20  ;;  %v10257_v60 = vld [vmem:[%s12107_s23 + $0x1328] ss:$16 sps:$4 sm:$0xff]   ;;  %v10322_v13 = vld [vmem:[%s12107_s23 + $0x17ec] ss:$16 sps:$4 sm:$0xff]  }
 0x46e   : > { %v7420_v3 = vpop.f32.mrf.mxu1  ;;  %7714 = vmatprep.subr.bf16.mxu1 %v10256_v22  ;;  %7744 = vmatprep.mubr.bf16.mxu1 %v12580_v42  ;;  %v10266_v42 = vld [vmem:[%s12107_s23 + $0x1488] ss:$16 sps:$4 sm:$0xff]   ;;  %v10325_v18 = vld [vmem:[%s12107_s23 + $0x154c] ss:$16 sps:$4 sm:$0xff]  }
 0x46f   : > { %v7421_v2 = vadd.f32 %v7420_v3, %v13007_v33  ;;  %v10263_v33 = vld [vmem:[%s12107_s23 + $0x1308] ss:$16 sps:$4 sm:$0xff]   ;;  %v10331_v3 = vld [vmem:[%s12107_s23 + $0x152c] ss:$16 sps:$4 sm:$0xff]  }
 0x470   : > { %v7422_v29 = vpop.f32.mrf.mxu1  ;;  %7698 = vmatpush2.bf16.msra.mxu0 %v10251_v27  ;;  %v10317_v20 = vld [vmem:[%s12107_s23 + $0x1568] ss:$16 sps:$4 sm:$0xff]  }
 0x471   : > { %7715 = vmatpush1.bf16.msra.mxu1 %v10254_v28  ;;  %7699 = vmatprep.subr.bf16.mxu0 %v10259_v53  ;;  %v10320_v22 = vld [vmem:[%s12107_s23 + $0x17e8] ss:$16 sps:$4 sm:$0xff]   ;;  %v10334_v53 = vld [vmem:[%s12107_s23 + $0x17ac] ss:$16 sps:$4 sm:$0xff]  }
 0x472   : > { %v7423_v37 = vpop.f32.mrf.mxu1  ;;  %7716 = vmatprep.subr.bf16.mxu1 %v10262_v41  ;;  %v10323_v27 = vld [vmem:[%s12107_s23 + $0x1548] ss:$16 sps:$4 sm:$0xff]   ;;  %v10337_v29 = vld [vmem:[%s12107_s23 + $0x150c] ss:$16 sps:$4 sm:$0xff]  }
 0x473   : > { %v10326_v28 = vld [vmem:[%s12107_s23 + $0x17c8] ss:$16 sps:$4 sm:$0xff]  }
 0x474   : > { %7700 = vmatpush2.bf16.msra.mxu0 %v10257_v60  ;;  %v10329_v41 = vld [vmem:[%s12107_s23 + $0x1528] ss:$16 sps:$4 sm:$0xff]   ;;  %v10340_v60 = vld [vmem:[%s12107_s23 + $0x178c] ss:$16 sps:$4 sm:$0xff]  }
 0x475   : > { %7717 = vmatpush1.bf16.msra.mxu1 %v10260_v36  ;;  %7701 = vmatprep.subr.bf16.mxu0 %v10265_v35  ;;  %v10335_v36 = vld [vmem:[%s12107_s23 + $0x1508] ss:$16 sps:$4 sm:$0xff]   ;;  %v10343_v35 = vld [vmem:[%s12107_s23 + $0x176c] ss:$16 sps:$4 sm:$0xff]  }
 0x476   : > { %7718 = vmatprep.subr.bf16.mxu1 %v10268_v55  ;;  %v10338_v37 = vld [vmem:[%s12107_s23 + $0x1788] ss:$16 sps:$4 sm:$0xff]   ;;  %v10346_v55 = vld [vmem:[%s12107_s23 + $0x186c] ss:$16 sps:$4 sm:$0xff]  }
 0x478   : > { %7702 = vmatpush2.bf16.msra.mxu0 %v10263_v33  ;;  %v10341_v33 = vld [vmem:[%s12107_s23 + $0x1768] ss:$16 sps:$4 sm:$0xff]  }
 0x479   : > { %7719 = vmatpush1.bf16.msra.mxu1 %v10266_v42  ;;  %7753 = vmatprep.subr.bf16.mxu0 %v10274_v23  ;;  %v10344_v42 = vld [vmem:[%s12107_s23 + $0x1868] ss:$16 sps:$4 sm:$0xff]   ;;  %v10352_v23 = vld [vmem:[%s12107_s23 + $0x184c] ss:$16 sps:$4 sm:$0xff]  }
 0x47a   : > { %7720 = vmatprep.subr.bf16.mxu1 %v10271_v7  ;;  %v10349_v7 = vld [vmem:[%s12107_s23 + $0x174c] ss:$16 sps:$4 sm:$0xff]  }
 0x47b   : > { %v7459_v40 = vpop.f32.mrf.mxu0  ;;  %7704 = vmatmul.mubr.bf16.vlgmr.msra.gmra.mxu0 %v12584_v21 }
 0x47c   : > { %v13075_v46 = vadd.f32 %v7459_v40, %v7419_v25  ;;  %7754 = vmatpush1.bf16.msra.mxu0 %v10272_v57  ;;  %7785 = vmatprep.mubr.bf16.mxu0 %v12592_v50  ;;  %v10290_v50 = vld [vmem:[%s12107_s23 + $0x1688] ss:$16 sps:$4 sm:$0xff]   ;;  %v10328_v25 = vld [vmem:[%s12107_s23 + $0x17cc] ss:$16 sps:$4 sm:$0xff]  }
 0x47d   : > { %7721 = vmatpush1.bf16.msra.mxu1 %v10269_v38  ;;  %v7461_v51 = vpop.f32.mrf.mxu0  ;;  %7755 = vmatprep.subr.bf16.mxu0 %v10280_v24  ;;  %v10350_v24 = vld [vmem:[%s12107_s23 + $0x1848] ss:$16 sps:$4 sm:$0xff]  }
 0x47e   : > { %7722 = vmatprep.subr.bf16.mxu1 %v10277_v44  ;;  %v13081_v56 = vadd.f32 %v7461_v51, %v7421_v2  ;;  %v10332_v2 = vld [vmem:[%s12107_s23 + $0x17a8] ss:$16 sps:$4 sm:$0xff]  }
 0x47f   : > { %v7463_v21 = vpop.f32.mrf.mxu0  ;;  %v10347_v44 = vld [vmem:[%s12107_s23 + $0x1748] ss:$16 sps:$4 sm:$0xff]  }
 0x480   : > { %7756 = vmatpush1.bf16.msra.mxu0 %v10278_v17  ;;  %v10358_v17 = vld [vmem:[%s12107_s23 + $0x182c] ss:$16 sps:$4 sm:$0xff]  }
 0x481   : > { %7723 = vmatpush1.bf16.msra.mxu1 %v10275_v48  ;;  %v7464_v8 = vpop.f32.mrf.mxu0  ;;  %7757 = vmatprep.subr.bf16.mxu0 %v10286_v54  ;;  %v10355_v48 = vld [vmem:[%s12107_s23 + $0x172c] ss:$16 sps:$4 sm:$0xff]  }
 0x482   : > { %7724 = vmatprep.subr.bf16.mxu1 %v10283_v63  ;;  %v10356_v63 = vld [vmem:[%s12107_s23 + $0x1828] ss:$16 sps:$4 sm:$0xff]   ;;  %v10361_v21 = vld [vmem:[%s12107_s23 + $0x170c] ss:$16 sps:$4 sm:$0xff]  }
 0x483   : > { %v10362_v8 = vld [vmem:[%s12107_s23 + $0x1808] ss:$16 sps:$4 sm:$0xff]  }
 0x484   : > { %7758 = vmatpush1.bf16.msra.mxu0 %v10284_v49  ;;  %v10359_v49 = vld [vmem:[%s12107_s23 + $0x1708] ss:$16 sps:$4 sm:$0xff]  }
 0x485   : > { %7725 = vmatpush1.bf16.msra.mxu1 %v10281_v61  ;;  %7759 = vmatprep.subr.bf16.mxu0 %v10292_v58  ;;  %v10364_v61 = vld [vmem:[%s12107_s23 + $0x180c] ss:$16 sps:$4 sm:$0xff]  }
 0x486   : > { %7726 = vmatprep.subr.bf16.mxu1 %v10289_v6  ;;  %v10366_v6 = vld [vmem:[%s12105_s20 + $0x38] sm:$0xff]   ;;  %v10367_v58 = vld [vmem:[%s12105_s20 + $0x70] sm:$0xff]  }
 0x488   : > { %7760 = vmatpush1.bf16.msra.mxu0 %v10290_v50 }
 0x489   : > { %7727 = vmatpush1.bf16.msra.mxu1 %v10287_v4  ;;  %7761 = vmatprep.subr.bf16.mxu0 %v10298_v5 }
 0x48a   : > { %7728 = vmatprep.subr.bf16.mxu1 %v10295_v32 }
 0x48c   : > { %7762 = vmatpush1.bf16.msra.mxu0 %v10296_v52 }
 0x48d   : > { %7729 = vmatpush2.bf16.msra.mxu1 %v10293_v62  ;;  %7763 = vmatprep.subr.bf16.mxu0 %v10304_v30  ;;  %v10369_v62 = vld [vmem:[%s12105_s20 + $0x68] sm:$0xff]  }
 0x48e   : > { %7730 = vmatprep.subr.bf16.mxu1 %v10301_v12 }
 0x490   : > { %7764 = vmatpush1.bf16.msra.mxu0 %v10302_v1  ;;  %v10382_v1 = vld [vmem:[%s12105_s20 + $0xb8] sm:$0xff]  }
 0x491   : > { %7731 = vmatpush2.bf16.msra.mxu1 %v10299_v39  ;;  %7765 = vmatprep.subr.bf16.mxu0 %v10310_v14  ;;  %v10381_v39 = vld [vmem:[%s12105_s20 + $0xf8] sm:$0xff]  }
 0x492   : > { %7732 = vmatprep.subr.bf16.mxu1 %v10307_v11  ;;  %v10372_v11 = vld [vmem:[%s12105_s20 + $0x20] sm:$0xff]   ;;  %v10373_v14 = vld [vmem:[%s12105_s20 + $0x58] sm:$0xff]  }
 0x494   : > { %7766 = vmatpush1.bf16.msra.mxu0 %v10308_v15  ;;  %v10375_v15 = vld [vmem:[%s12105_s20 + $0x50] sm:$0xff]  }
 0x495   : > { %7733 = vmatpush2.bf16.msra.mxu1 %v10305_v10  ;;  %7767 = vmatprep.subr.bf16.mxu0 %v10316_v16  ;;  %v10374_v10 = vld [vmem:[%s12105_s20 + $0x18] sm:$0xff]   ;;  %v10377_v16 = vld [vmem:[%s12105_s20 + $0x48] sm:$0xff]  }
 0x496   : > { %7734 = vmatprep.subr.bf16.mxu1 %v10313_v34  ;;  %v10376_v34 = vld [vmem:[%s12105_s20 + $0x10] sm:$0xff]  }
 0x498   : > { %7768 = vmatpush1.bf16.msra.mxu0 %v10314_v47  ;;  %v10379_v47 = vld [vmem:[%s12105_s20 + $0x40] sm:$0xff]  }
 0x499   : > { %7735 = vmatpush2.bf16.msra.mxu1 %v10311_v19  ;;  %7769 = vmatprep.subr.bf16.mxu0 %v10322_v13  ;;  %v10378_v19 = vld [vmem:[%s12105_s20 + $0x8] sm:$0xff]   ;;  %v7835_v13 = vmax.f32 %v12926_v43, 0.0 }
 0x49a   : > { %7736 = vmatprep.subr.bf16.mxu1 %v10319_v59  ;;  %v10380_v59 = vld [vmem:[%s12105_s20] sm:$0xff]   ;;  %v10386_v43 = vld [vmem:[%s12105_s20 + $0xa8] sm:$0xff]  }
 0x49c   : > { %7770 = vmatpush2.bf16.msra.mxu0 %v10320_v22  ;;  %v10383_v22 = vld [vmem:[%s12105_s20 + $0xf0] sm:$0xff]  }
 0x49d   : > { %7737 = vmatpush2.bf16.msra.mxu1 %v10317_v20  ;;  %7771 = vmatprep.subr.bf16.mxu0 %v10328_v25  ;;  %v7840_v20 = vpack.c.bf16 %v7835_v13, %v7835_v13 }
 0x49e   : > { %7738 = vmatprep.subr.bf16.mxu1 %v10325_v18  ;;  %v10384_v18 = vld [vmem:[%s12105_s20 + $0xb0] sm:$0xff]  }
 0x4a0   : > { %7772 = vmatpush2.bf16.msra.mxu0 %v10326_v28 }
 0x4a1   : > { %7739 = vmatpush2.bf16.msra.mxu1 %v10323_v27  ;;  %7773 = vmatprep.subr.bf16.mxu0 %v10334_v53 }
 0x4a2   : > { %7740 = vmatprep.subr.bf16.mxu1 %v10331_v3  ;;  %v10385_v3 = vld [vmem:[%s12105_s20 + $0xe8] sm:$0xff]  }
 0x4a4   : > { %7774 = vmatpush2.bf16.msra.mxu0 %v10332_v2 }
 0x4a5   : > { %7741 = vmatpush2.bf16.msra.mxu1 %v10329_v41  ;;  %7775 = vmatprep.subr.bf16.mxu0 %v10340_v60  ;;  %v10388_v60 = vld [vmem:[%s12105_s20 + $0xa0] sm:$0xff]  }
 0x4a6   : > { %7742 = vmatprep.subr.bf16.mxu1 %v10337_v29  ;;  %v10387_v29 = vld [vmem:[%s12105_s20 + $0xe0] sm:$0xff]  }
 0x4a8   : > { %7776 = vmatpush2.bf16.msra.mxu0 %v10338_v37  ;;  %v10390_v37 = vld [vmem:[%s12105_s20 + $0x98] sm:$0xff]  }
 0x4a9   : > { %7743 = vmatpush2.bf16.msra.mxu1 %v10335_v36  ;;  %7777 = vmatprep.subr.bf16.mxu0 %v10343_v35  ;;  %v10389_v36 = vld [vmem:[%s12105_s20 + $0xd8] sm:$0xff]   ;;  %v10391_v35 = vld [vmem:[%s12105_s20 + $0xd0] sm:$0xff]  }
 0x4aa   : > { %7802 = vmatprep.subr.bf16.mxu1 %v10346_v55  ;;  %v10392_v55 = vld [vmem:[%s12105_s20 + $0x90] sm:$0xff]  }
 0x4ac   : > { %v7500_v38 = vpop.f32.mrf.mxu1  ;;  %7745 = vmatmul.mubr.bf16.vlgmr.msra.gmra.mxu1 %v12660_v31  ;;  %7778 = vmatpush2.bf16.msra.mxu0 %v10341_v33 }
 0x4ad   : > { %v7501_v57 = vadd.f32 %v7500_v38, %v13075_v46  ;;  %7803 = vmatpush1.bf16.msra.mxu1 %v10344_v42  ;;  %7779 = vmatprep.subr.bf16.mxu0 %v10349_v7  ;;  %v10353_v46 = vld [vmem:[%s12107_s23 + $0x1728] ss:$16 sps:$4 sm:$0xff]  }
 0x4ae   : > { %v7502_v40 = vpop.f32.mrf.mxu1  ;;  %7804 = vmatprep.subr.bf16.mxu1 %v10352_v23  ;;  %7826 = vmatprep.mubr.bf16.mxu1 %v10452_v9  ;;  %v10365_v9 = vld [vmem:[%s12105_s20 + $0x78] sm:$0xff]   ;;  %v10393_v23 = vld [vmem:[%s12105_s20 + $0xc8] sm:$0xff]  }
 0x4af   : > { %v7503_v51 = vadd.f32 %v7502_v40, %v13081_v56  ;;  %v7836_v56 = vmax.f32 %v12932_v0, 0.0  ;;  %v10368_v0 = vld [vmem:[%s12105_s20 + $0x30] sm:$0xff]   ;;  %v10395_v40 = vld [vmem:[%s12105_s20 + $0xc0] sm:$0xff]  }
 0x4b0   : > { %v7504_v31 = vpop.f32.mrf.mxu1  ;;  %7780 = vmatpush2.bf16.msra.mxu0 %v10347_v44 }
 0x4b1   : > { %7805 = vmatpush1.bf16.msra.mxu1 %v10350_v24  ;;  %7781 = vmatprep.subr.bf16.mxu0 %v10355_v48  ;;  %v7841_v4 = vpack.c.bf16 %v7836_v56, %v7836_v56  ;;  %v10396_v48 = vld [vmem:[%s12105_s20 + $0x80] sm:$0xff]  }
 0x4b2   : > { %v7505_v54 = vpop.f32.mrf.mxu1  ;;  %7806 = vmatprep.subr.bf16.mxu1 %v10358_v17 }
 0x4b4   : > { %7782 = vmatpush2.bf16.msra.mxu0 %v10353_v46 }
 0x4b5   : > { %7807 = vmatpush1.bf16.msra.mxu1 %v10356_v63  ;;  %7783 = vmatprep.subr.bf16.mxu0 %v10361_v21 }
 0x4b6   : > { %7808 = vmatprep.subr.bf16.mxu1 %v10364_v61 }
 0x4b8   : > { %7784 = vmatpush2.bf16.msra.mxu0 %v10359_v49 }
 0x4b9   : > { %7809 = vmatpush1.bf16.msra.mxu1 %v10362_v8  ;;  %9106 = vmatprep.subr.bf16.mxu0 %v10365_v9 }
 0x4ba   : > { %9128 = vmatprep.subr.bf16.mxu1 %v10381_v39 }
 0x4bb   : > { %v7541_v50 = vpop.f32.mrf.mxu0  ;;  %7786 = vmatmul.mubr.bf16.vlgmr.msra.gmra.mxu0 %v12670_v45  ;;  %v10370_v45 = vld [vmem:[%s12105_s20 + $0x28] sm:$0xff]  }
 0x4bc   : > { %9066 = vmatmul.mubr.msk.bf16.vlgmr.msra.gmra.mxu1 %vm6765_vm1, %v12702_v26  ;;  %v7542_v32 = vadd.f32 %v7541_v50, %v7501_v57  ;;  %9107 = vmatpush3.bf16.msra.mxu0 %v10366_v6  ;;  %v10371_v26 = vld [vmem:[%s12105_s20 + $0x60] sm:$0xff]   ;;  %v10394_v57 = vld [vmem:[%s12105_s20 + $0x88] sm:$0xff]  }
 0x4bd   : > { %8132 = vmatprep.mubr.bf16.mxu0 %v7841_v4  ;;  %v7543_v5 = vpop.f32.mrf.mxu0  ;;  %9108 = vmatprep.subr.bf16.mxu0 %v10367_v58 }
 0x4be   : > { %v7544_v52 = vadd.f32 %v7543_v5, %v7503_v51  ;;  %9129 = vmatpush3.bf16.msra.mxu1 %v10382_v1 }
 0x4bf   : > { %v7545_v12 = vpop.f32.mrf.mxu0  ;;  %9130 = vmatprep.subr.bf16.mxu1 %v10383_v22 }
 0x4c0   : > { %9109 = vmatpush3.bf16.msra.mxu0 %v10368_v0 }
 0x4c1   : > { %v7546_v30 = vpop.f32.mrf.mxu0  ;;  %9110 = vmatprep.subr.bf16.mxu0 %v10369_v62 }
 0x4c2   : > { %9131 = vmatpush3.bf16.msra.mxu1 %v10384_v18 }
 0x4c3   : > { %9132 = vmatprep.subr.bf16.mxu1 %v10385_v3 }
 0x4c4   : > { %9111 = vmatpush3.bf16.msra.mxu0 %v10370_v45 }
 0x4c5   : > { %9112 = vmatprep.subr.bf16.mxu0 %v10371_v26 }
 0x4c6   : > { %9133 = vmatpush3.bf16.msra.mxu1 %v10386_v43 }
 0x4c7   : > { %9134 = vmatprep.subr.bf16.mxu1 %v10387_v29 }
 0x4c8   : > { %9113 = vmatpush3.bf16.msra.mxu0 %v10372_v11 }
 0x4c9   : > { %9114 = vmatprep.subr.bf16.mxu0 %v10373_v14 }
 0x4ca   : > { %9135 = vmatpush3.bf16.msra.mxu1 %v10388_v60 }
 0x4cb   : > { %9136 = vmatprep.subr.bf16.mxu1 %v10389_v36 }
 0x4cc   : > { %9115 = vmatpush3.bf16.msra.mxu0 %v10374_v10 }
 0x4cd   : > { %9116 = vmatprep.subr.bf16.mxu0 %v10375_v15 }
 0x4ce   : > { %9137 = vmatpush3.bf16.msra.mxu1 %v10390_v37 }
 0x4cf   : > { %9138 = vmatprep.subr.bf16.mxu1 %v10391_v35 }
 0x4d0   : > { %9117 = vmatpush3.bf16.msra.mxu0 %v10376_v34 }
 0x4d1   : > { %9118 = vmatprep.subr.bf16.mxu0 %v10377_v16 }
 0x4d2   : > { %9139 = vmatpush3.bf16.msra.mxu1 %v10392_v55 }
 0x4d3   : > { %9140 = vmatprep.subr.bf16.mxu1 %v10393_v23 }
 0x4d4   : > { %9119 = vmatpush3.bf16.msra.mxu0 %v10378_v19 }
 0x4d5   : > { %9120 = vmatprep.subr.bf16.mxu0 %v10379_v47 }
 0x4d6   : > { %9141 = vmatpush3.bf16.msra.mxu1 %v10394_v57 }
 0x4d7   : > { %9142 = vmatprep.subr.bf16.mxu1 %v10395_v40 }
 0x4d8   : > { %9121 = vmatpush3.bf16.msra.mxu0 %v10380_v59 }
 0x4da   : > { %9143 = vmatpush3.bf16.msra.mxu1 %v10396_v48 }
 0x4db   : > { %8133 = vmatmul.mubr.bf16.vlgmr.msra.gmra.mxu0 %v7840_v20 }
 0x4ec   : > { %v7582_v25 = vpop.f32.mrf.mxu1 }
 0x4ed   : > { %v7583_v27 = vadd.f32 %v7582_v25, %v7542_v32 }
 0x4ee   : > { %v7584_v28 = vpop.f32.mrf.mxu1 }
 0x4ef   : > { %v7585_v53 = vadd.f32 %v7584_v28, %v7544_v52  ;;  %v7839_v28 = vld [vmem:[#allocation2] sm:$0x3] }
 0x4f0   : > { %v7586_v41 = vpop.f32.mrf.mxu1 }
 0x4f2   : > { %v7587_v2 = vpop.f32.mrf.mxu1 }
 0x4fb   : > { %v7623_v33 = vpop.f32.mrf.mxu0 }
 0x4fc   : > { %v7624_v42 = vadd.f32 %v7623_v33, %v7583_v27 }
 0x4fd   : > { %v7625_v7 = vpop.f32.mrf.mxu0 }
 0x4fe   : > { %v7626_v38 = vadd.f32 %v7625_v7, %v7585_v53 }
 0x4ff   : > { %v7627_v44 = vpop.f32.mrf.mxu0 }
 0x501   : > { %v7628_v24 = vpop.f32.mrf.mxu0 }
 0x52c   : > { %v7664_v17 = vpop.f32.mrf.mxu1 }
 0x52d   : > { %v7665_v51 = vadd.f32 %v7664_v17, %v7624_v42 }
 0x52e   : > { %v7666_v31 = vpop.f32.mrf.mxu1 }
 0x52f   : > { %v7667_v46 = vadd.f32 %v7666_v31, %v7626_v38 }
 0x530   : > { %v7668_v63 = vpop.f32.mrf.mxu1 }
 0x532   : > { %v7669_v54 = vpop.f32.mrf.mxu1 }
 0x53b   : > { %v7705_v21 = vpop.f32.mrf.mxu0 }
 0x53c   : > { %v7706_v4 = vadd.f32 %v7705_v21, %v7665_v51 }
 0x53d   : > { %v7707_v61 = vpop.f32.mrf.mxu0 }
 0x53e   : > { %v7708_v50 = vadd.f32 %v7707_v61, %v7667_v46 }
 0x53f   : > { %v7709_v49 = vpop.f32.mrf.mxu0 }
 0x541   : > { %v7710_v8 = vpop.f32.mrf.mxu0 }
 0x56c   : > { %v7746_v9 = vpop.f32.mrf.mxu1 }
 0x56d   : > { %v7747_v32 = vadd.f32 %v7746_v9, %v7706_v4 }
 0x56e   : > { %v7748_v56 = vpop.f32.mrf.mxu1 }
 0x56f   : > { %v7749_v62 = vadd.f32 %v7748_v56, %v7708_v50 }
 0x570   : > { %v7750_v6 = vpop.f32.mrf.mxu1 }
 0x572   : > { %v7751_v58 = vpop.f32.mrf.mxu1 }
 0x57b   : > { %v7787_v0 = vpop.f32.mrf.mxu0 }
 0x57c   : > { %v7828_v5 = vpop.f32.mrf.mxu1  ;;  %v7788_v52 = vadd.f32 %v7787_v0, %v7747_v32 }
 0x57d   : > { %v7789_v12 = vpop.f32.mrf.mxu0 }
 0x57e   : > { %v7830_v45 = vpop.f32.mrf.mxu1  ;;  %v7829_v30 = vadd.f32 %v7828_v5, %v7788_v52  ;;  %v7790_v26 = vadd.f32 %v7789_v12, %v7749_v62 }
 0x57f   : > { %v7791_v39 = vpop.f32.mrf.mxu0 }
 0x580   : > { %v7832_v1 = vpop.f32.mrf.mxu1  ;;  %v7831_v11 = vadd.f32 %v7830_v45, %v7790_v26  ;;  %v7837_v14 = vmax.f32 %v7829_v30, 0.0 }
 0x581   : > { %v7792_v10 = vpop.f32.mrf.mxu0 }
 0x582   : > { %v7833_v15 = vpop.f32.mrf.mxu1  ;;  %v7838_v34 = vmax.f32 %v7831_v11, 0.0  ;;  %v7842_v19 = vpack.c.bf16 %v7837_v14, %v7837_v14 }
 0x584   : > { %v7843_v16 = vpack.c.bf16 %v7838_v34, %v7838_v34 }
 0x586   : > { %8172 = vmatprep.mubr.bf16.mxu1 %v7843_v16 }
 0x587   : > { %8173 = vmatmul.mubr.bf16.vlgmr.msra.gmra.mxu1 %v7842_v19 }
 0x59b   : > { %v9122_v47 = vpop.f32.mrf.mxu0 }
 0x59d   : > { %v9123_v59 = vpop.f32.mrf.mxu0 }
 0x59e   : > { %v9124_v13 = vadd.f32 %v9123_v59, %v9122_v47 }
 0x59f   : > { %v9125_v20 = vpop.f32.mrf.mxu0 }
 0x5a1   : > { %v9126_v22 = vpop.f32.mrf.mxu0 }
 0x647   : > { %v9144_v18 = vpop.f32.mrf.mxu1 }
 0x649   : > { %v9145_v25 = vpop.f32.mrf.mxu1 }
 0x64a   : > { %v9146_v27 = vadd.f32 %v9145_v25, %v9144_v18 }
 0x64b   : > { %v9147_v3 = vpop.f32.mrf.mxu1 }
 0x64c   : > { %v8175_v53 = vadd.f32 %v9146_v27, %v9124_v13  ;;  %8186 = sbr.rel (%p9099_p11) target bundleno = 1627 (0x65b), region = 71 }
 0x64d   : > { %v9148_v43 = vpop.f32.mrf.mxu1 }
 0x64e   : > { %v8180_v41 = vadd.f32 %v8175_v53, %v7839_v28 }
 0x650   : > { %8182 = vst.msk [vmem:[#allocation2] sm:$0x3] %vm8181_vm2, %v8180_v41 }
 0x651   : > { %v9100_v29 = vld [vmem:[%s13209_s4] ss:$0 sm:$0xff] }
 0x657   : > { %v8187_v2 = vld [vmem:[#allocation2] sm:$0x3] }
 0x658   : > { %v8195_v60 = vadd.f32 %v9100_v29, %v8187_v2 }
 0x65a   : > { %8196 = vst.msk [vmem:[#allocation4] sm:$0x3] %vm8181_vm2, %v8195_v60 }
 0x65b PF: > { %p9156_p12 = scmp.eq.s32.totalorder %s10500_s21, 1  ;;  %s10453_s9 = smov [#allocation4]  }
 0x65c   : > { %s8204_s10 = sshll.u32 %s10453_s9, 4  ;;  %s8205_s10 = int_to_ptr.vmem [resolvable:$true] %s8204_s10 }
 0x65d   : > { %s10398_s11 = scalar_lea.vmem %s8205_s10, 32  ;;  %p10405_p2 = scmp.lt.s32.totalorder %s8205_s10, %s8205_s10 }
 0x65e   : > { %p10399_p13 = scmp.ne.s32.totalorder %s8205_s10, %s10398_s11  ;;  %p10406_p3 = scmp.lt.s32.totalorder %s10398_s11, %s10398_s11 }
 0x660   : > { %p10400_p0 = pnand %p10399_p13, %p9156_p12  ;;  %p10407_p4 = por %p10406_p3, %p10405_p2 }
 0x662   : > { %p10401_p1 = pneg %p10400_p0 }
 0x664   : > { %p10408_p5 = pnand %p10407_p4, %p10401_p1 }
 0x666   : > { %10411 = shalt.err (!%p10408_p5)
}
 0x667   : > { %9153 = dma.vmem_to_hbm [thread:$0]  (%p9156_p12), %s8205_s10, 32, %s13210_s5, [#allocation5]  }
 0x668   : > { %10435 = dma.done.wait (%p9156_p12), [#allocation5], 32  }
 0x669   : > { %10437 = vsyncadd (%p9156_p12), [#allocation5], 4294967264 }
 0x66a PF: > { %p13_p6 = scmp.ge.s32.totalorder %s10503_s22, 4   ;;  %s13211_s18 = smov %s10444_s19 }
 0x66b   : > { %s13212_s19 = smov %s10512_s25  ;;  %s13213_s20 = smov %s10503_s22 }
 0x66c   :  { %15 = sbr.rel (!%p13_p6) target bundleno = 2 (0x2), region = 109 }
 0x671   :  { %8217 = vsyncpa [#allocation5], 1 }
 0x672   :  { %8219 = vsyncpa [#allocation5 + $0x1], 1 }

</bundles_post_ra>
